<compile_context>
chip_gen: v5e
topology: v5e:2x2
jax: 0.10.0
libtpu: 0.0.40
codegen_flags: <defaults>
</compile_context>

<pallas_src>
import functools

import jax
import jax.numpy as jnp
from jax.experimental import pallas as pl
from jax.experimental.pallas import tpu as pltpu

EPS = 1e-5


def _layernorm(h, gamma, beta):
    mean = jnp.mean(h, axis=-1, keepdims=True)
    var = jnp.mean((h - mean) ** 2, axis=-1, keepdims=True)
    return (h - mean) * jax.lax.rsqrt(var + EPS) * gamma + beta


def fused_processor_kernel(
    # inputs
    src_ids_ref, dst_ids_ref,       # (T, TE) int32  — whole-array VMEM
    n_in_ref, e_in_ref,             # (N, D), (E, D) — raw HBM refs (pl.ANY)
    w_ref, b_ref,                   # (1, 9D, D), (1, 16, D) — current layer slabs
    # output
    n_out_ref,                      # (N, D) — resident output block
    # scratch
    n_state, e_state, agg_state,    # VMEM state persisting across the grid
    dma_sem,                        # (2,) DMA semaphores
    *, num_nodes: int, edge_tile: int, dim: int,
):
    l = pl.program_id(0)
    t = pl.program_id(1)
    num_layers = pl.num_programs(0)
    num_tiles = pl.num_programs(1)
    N, TE, D = num_nodes, edge_tile, dim

    # ---- one-time load of initial node/edge features into resident VMEM ----
    @pl.when(jnp.logical_and(l == 0, t == 0))
    def _load_initial_state():
        cp_n = pltpu.make_async_copy(n_in_ref, n_state, dma_sem.at[0])
        cp_e = pltpu.make_async_copy(e_in_ref, e_state, dma_sem.at[1])
        cp_n.start()
        cp_e.start()
        cp_n.wait()
        cp_e.wait()

    # ---- zero the scatter-sum accumulator at the start of every layer ------
    @pl.when(t == 0)
    def _zero_agg():
        agg_state[...] = jnp.zeros_like(agg_state)

    # ---- current layer's edge-MLP parameters (static slices of the slab) ---
    we0 = w_ref[0, 0 * D:3 * D, :]          # (3D, D)
    we1 = w_ref[0, 3 * D:4 * D, :]          # (D, D)
    weo = w_ref[0, 4 * D:5 * D, :]          # (D, D)
    b = b_ref[0]                            # (16, D)
    be0, be1, beo = b[0:1, :], b[1:2, :], b[2:3, :]
    ge, bel = b[3:4, :], b[4:5, :]

    # ---- current edge tile (edge features are resident across layers) ------
    row0 = pl.multiple_of(t * TE, TE)
    e_tile = e_state[pl.ds(row0, TE), :]            # (TE, D)
    n_cur = n_state[...]                            # (N, D) — previous layer's nodes

    # ---- gather via in-kernel one-hot (built from indices, no HBM traffic) -
    src_ids = src_ids_ref[t]                        # (TE,) int32
    dst_ids = dst_ids_ref[t]                        # (TE,) int32
    node_iota = jax.lax.broadcasted_iota(jnp.int32, (N, TE), 0)
    oh_src = (node_iota == src_ids[None, :]).astype(jnp.float32)   # (N, TE)
    oh_dst = (node_iota == dst_ids[None, :]).astype(jnp.float32)   # (N, TE)
    gdims = (((0,), (0,)), ((), ()))                # contract the node axis
    n_src = jax.lax.dot_general(oh_src, n_cur, gdims,
                                preferred_element_type=jnp.float32)  # (TE, D)
    n_dst = jax.lax.dot_general(oh_dst, n_cur, gdims,
                                preferred_element_type=jnp.float32)  # (TE, D)

    # ---- edge MLP: one fused K=3D matmul on concat([e, n_src, n_dst]) ------
    x_e = jnp.concatenate([e_tile, n_src, n_dst], axis=-1)           # (TE, 3D)
    h = jnp.maximum(jnp.dot(x_e, we0, preferred_element_type=jnp.float32) + be0, 0.0)
    h = jnp.maximum(jnp.dot(h, we1, preferred_element_type=jnp.float32) + be1, 0.0)
    h = jnp.dot(h, weo, preferred_element_type=jnp.float32) + beo
    e_new = _layernorm(h, ge, bel) + e_tile                          # residual
    e_state[pl.ds(row0, TE), :] = e_new

    # ---- scatter-sum updated edge features onto destination nodes ----------
    agg_state[...] += jnp.dot(oh_dst, e_new, preferred_element_type=jnp.float32)

    # ---- node MLP + residual, once per layer after the last edge tile ------
    @pl.when(t == num_tiles - 1)
    def _node_update():
        wn0 = w_ref[0, 5 * D:7 * D, :]      # (2D, D)
        wn1 = w_ref[0, 7 * D:8 * D, :]      # (D, D)
        wno = w_ref[0, 8 * D:9 * D, :]      # (D, D)
        bn0, bn1, bno = b[5:6, :], b[6:7, :], b[7:8, :]
        gn, bnl = b[8:9, :], b[9:10, :]
        x_n = jnp.concatenate([agg_state[...], n_cur], axis=-1)      # (N, 2D)
        hn = jnp.maximum(jnp.dot(x_n, wn0, preferred_element_type=jnp.float32) + bn0, 0.0)
        hn = jnp.maximum(jnp.dot(hn, wn1, preferred_element_type=jnp.float32) + bn1, 0.0)
        hn = jnp.dot(hn, wno, preferred_element_type=jnp.float32) + bno
        n_state[...] = _layernorm(hn, gn, bnl) + n_cur               # residual

    # ---- final writeback (the module returns node features only) -----------
    @pl.when(jnp.logical_and(l == num_layers - 1, t == num_tiles - 1))
    def _write_output():
        n_out_ref[...] = n_state[...]


def mesh_graphnet_processor(node_feat, edge_feat, src_idx, dst_idx,
                            w_slab, b_slab, dim, *, edge_tile=256):
    """Equivalent of MeshGraphNetProcessor.forward for a single graph."""
    N, D = node_feat.shape
    E = edge_feat.shape[0]
    L = w_slab.shape[0]
    assert D == dim and D % 128 == 0 and N % 8 == 0
    TE = min(edge_tile, E)
    assert TE % 128 == 0 and E % TE == 0, "edge count must be a multiple of the edge tile"
    T = E // TE

    src2d = src_idx.astype(jnp.int32).reshape(T, TE)
    dst2d = dst_idx.astype(jnp.int32).reshape(T, TE)

    wrows = w_slab.shape[1]   # 9 * D
    brows = b_slab.shape[1]   # 16

    flops = int(L * (6 * E * N * D + 10 * E * D * D + 8 * N * D * D))
    bytes_accessed = int(4 * (2 * N * D + E * D + L * (wrows + brows) * D) + 8 * E)
    cost = pl.CostEstimate(flops=flops, transcendentals=int(L * (E + N)),
                           bytes_accessed=bytes_accessed)

    grid_spec = pltpu.PrefetchScalarGridSpec(
        num_scalar_prefetch=0,
        grid=(L, T),
        in_specs=[
            pl.BlockSpec(memory_space=pltpu.MemorySpace.VMEM),   # src ids (T, TE)
            pl.BlockSpec(memory_space=pltpu.MemorySpace.VMEM),   # dst ids (T, TE)
            pl.BlockSpec(memory_space=pl.ANY),                   # node feats (HBM)
            pl.BlockSpec(memory_space=pl.ANY),                   # edge feats (HBM)
            pl.BlockSpec((1, wrows, D), lambda l, t: (l, 0, 0)), # weight slab
            pl.BlockSpec((1, brows, D), lambda l, t: (l, 0, 0)), # bias/LN slab
        ],
        out_specs=pl.BlockSpec((N, D), lambda l, t: (0, 0)),
        scratch_shapes=[
            pltpu.VMEM((N, D), jnp.float32),    # node state (resident)
            pltpu.VMEM((E, D), jnp.float32),    # edge state (resident)
            pltpu.VMEM((N, D), jnp.float32),    # scatter-sum accumulator
            pltpu.SemaphoreType.DMA((2,)),      # initial-load DMA sems
        ],
    )

    kernel = functools.partial(fused_processor_kernel,
                               num_nodes=N, edge_tile=TE, dim=D)
    return pl.pallas_call(
        kernel,
        out_shape=jax.ShapeDtypeStruct((N, D), jnp.float32),
        grid_spec=grid_spec,
        compiler_params=pltpu.CompilerParams(
            # Layer axis and edge-tile axis both carry sequential state
            # (resident node/edge/agg scratch), so they must be "arbitrary".
            dimension_semantics=("arbitrary", "arbitrary"),
            vmem_limit_bytes=64 * 1024 * 1024,
        ),
        cost_estimate=cost,
    )(src2d, dst2d, node_feat, edge_feat, w_slab, b_slab)


# ----------------------------- reference (pure JAX) --------------------------
def _mm(a, b):
    return jnp.dot(a, b, precision=jax.lax.Precision.HIGHEST)


def reference_processor(node_feat, edge_feat, src_idx, dst_idx, w_slab, b_slab, dim):
    n, e = node_feat, edge_feat
    N = n.shape[0]
    for l in range(w_slab.shape[0]):
        w, b = w_slab[l], b_slab[l]
        we0, we1, weo = w[0:3 * dim], w[3 * dim:4 * dim], w[4 * dim:5 * dim]
        wn0, wn1, wno = w[5 * dim:7 * dim], w[7 * dim:8 * dim], w[8 * dim:9 * dim]
        be0, be1, beo, ge, bel = b[0], b[1], b[2], b[3], b[4]
        bn0, bn1, bno, gn, bnl = b[5], b[6], b[7], b[8], b[9]
        x = jnp.concatenate([e, n[src_idx], n[dst_idx]], axis=-1)
        h = jax.nn.relu(_mm(x, we0) + be0)
        h = jax.nn.relu(_mm(h, we1) + be1)
        h = _mm(h, weo) + beo
        e = _layernorm(h, ge, bel) + e
        agg = jax.ops.segment_sum(e, dst_idx, num_segments=N)
        x = jnp.concatenate([agg, n], axis=-1)
        h = jax.nn.relu(_mm(x, wn0) + bn0)
        h = jax.nn.relu(_mm(h, wn1) + bn1)
        h = _mm(h, wno) + bno
        n = _layernorm(h, gn, bnl) + n
    return n


def init_params(key, processor_size, dim):
    """Deterministic synthetic weights matching the module shapes, packed as
    one (L, 9D, D) weight slab and one (L, 16, D) bias/LayerNorm slab."""
    def lin(k, fan_in, fan_out):
        return (jax.random.normal(k, (fan_in, fan_out), jnp.float32)
                / jnp.sqrt(jnp.float32(fan_in)))

    w_layers, b_layers = [], []
    for _ in range(processor_size):
        key, k0, k1, k2, k3, k4, k5, kb = jax.random.split(key, 8)
        w = jnp.concatenate([
            lin(k0, 3 * dim, dim),   # edge MLP layer 0 (input [e, n_src, n_dst])
            lin(k1, dim, dim),       # edge MLP layer 1
            lin(k2, dim, dim),       # edge MLP output
            lin(k3, 2 * dim, dim),   # node MLP layer 0 (input [agg, n])
            lin(k4, dim, dim),       # node MLP layer 1
            lin(k5, dim, dim),       # node MLP output
        ], axis=0)                   # (9*dim, dim)
        b = 0.1 * jax.random.normal(kb, (16, dim), jnp.float32)
        b = b.at[3].add(1.0).at[8].add(1.0)   # LayerNorm gammas ~ 1
        w_layers.append(w)
        b_layers.append(b)
    return jnp.stack(w_layers), jnp.stack(b_layers)


if __name__ == "__main__":
    # Small shapes consistent with the module (input_dim_node = input_dim_edge
    # = hidden_dim = 128 is the module default -> lane-dense vregs).
    PROCESSOR_SIZE = 3
    DIM = 128
    N_NODES = 256
    N_EDGES = 512
    EDGE_TILE = 256

    key = jax.random.PRNGKey(0)
    k_n, k_e, k_src, k_dst, k_w = jax.random.split(key, 5)

    node_features = jax.random.normal(k_n, (N_NODES, DIM), jnp.float32)
    edge_features = jax.random.normal(k_e, (N_EDGES, DIM), jnp.float32)
    src_idx = jax.random.randint(k_src, (N_EDGES,), 0, N_NODES, dtype=jnp.int32)
    dst_idx = jax.random.randint(k_dst, (N_EDGES,), 0, N_NODES, dtype=jnp.int32)

    w_slab, b_slab = init_params(k_w, PROCESSOR_SIZE, DIM)

    out = mesh_graphnet_processor(node_features, edge_features, src_idx, dst_idx,
                                  w_slab, b_slab, DIM, edge_tile=EDGE_TILE)
    out = jax.block_until_ready(out)

    ref = reference_processor(node_features, edge_features, src_idx, dst_idx,
                              w_slab, b_slab, DIM)

    assert out.shape == (N_NODES, DIM) and out.dtype == jnp.float32
    assert bool(jnp.all(jnp.isfinite(out)))
    max_err = float(jnp.max(jnp.abs(out - ref)))
    assert max_err < 1e-2, f"mismatch vs reference, max abs err = {max_err}"
    print("KERNEL_OK")
</pallas_src>

<mosaic_0001>
module attributes {stable_mosaic.version = 11 : i64} {
  func.func @fused_processor_kernel(%arg0: i32, %arg1: i32, %arg2: memref<2x256xi32, #tpu.memory_space<vmem>>, %arg3: memref<2x256xi32, #tpu.memory_space<vmem>>, %arg4: memref<256x128xf32, #tpu.memory_space<any>>, %arg5: memref<512x128xf32, #tpu.memory_space<any>>, %arg6: memref<1x1152x128xf32, #tpu.memory_space<vmem>>, %arg7: memref<1x16x128xf32, #tpu.memory_space<vmem>>, %arg8: memref<256x128xf32, #tpu.memory_space<vmem>>, %arg9: memref<256x128xf32, #tpu.memory_space<vmem>>, %arg10: memref<512x128xf32, #tpu.memory_space<vmem>>, %arg11: memref<256x128xf32, #tpu.memory_space<vmem>>, %arg12: memref<2x!tpu.dma_semaphore, #tpu.memory_space<semaphore_mem>>) attributes {dimension_semantics = [#tpu.dimension_semantics<arbitrary>, #tpu.dimension_semantics<arbitrary>], iteration_bounds = array<i64: 3, 2>, scalar_prefetch = 0 : i64, scratch_operands = 4 : i64, tpu.core_type = #tpu.core_type<tc>, window_params = [{pipeline_mode = #tpu.pipeline_mode<synchronous>, transform_indices = @transform_0, window_bounds = array<i64: 2, 256>}, {pipeline_mode = #tpu.pipeline_mode<synchronous>, transform_indices = @transform_1, window_bounds = array<i64: 2, 256>}, {}, {}, {transform_indices = @transform_4, window_bounds = array<i64: 1, 1152, 128>}, {transform_indices = @transform_5, window_bounds = array<i64: 1, 16, 128>}, {pipeline_mode = #tpu.pipeline_mode<synchronous>, transform_indices = @transform_6, window_bounds = array<i64: 256, 128>}]} {
    %c0_i32 = arith.constant 0 : i32
    %0 = arith.cmpi eq, %arg0, %c0_i32 : i32
    %c0_i32_0 = arith.constant 0 : i32
    %1 = arith.cmpi eq, %arg1, %c0_i32_0 : i32
    %2 = arith.andi %0, %1 : i1
    %3 = arith.extui %2 : i1 to i32
    %c0_i32_1 = arith.constant 0 : i32
    %4 = arith.cmpi ne, %3, %c0_i32_1 : i32
    scf.if %4 {
      %c0_i32_38 = arith.constant 0 : i32
      %96 = tpu.memref_slice %arg12[%c0_i32_38] : memref<2x!tpu.dma_semaphore, #tpu.memory_space<semaphore_mem>> -> memref<1x!tpu.dma_semaphore, #tpu.memory_space<semaphore_mem>>
      %97 = tpu.memref_squeeze %96 : memref<1x!tpu.dma_semaphore, #tpu.memory_space<semaphore_mem>> -> memref<!tpu.dma_semaphore, #tpu.memory_space<semaphore_mem>>
      tpu.enqueue_dma source(%arg4 : memref<256x128xf32, #tpu.memory_space<any>>) target(%arg9 : memref<256x128xf32, #tpu.memory_space<vmem>>) target_semaphore(%97 : memref<!tpu.dma_semaphore, #tpu.memory_space<semaphore_mem>>)
      %c1_i32_39 = arith.constant 1 : i32
      %98 = tpu.memref_slice %arg12[%c1_i32_39] : memref<2x!tpu.dma_semaphore, #tpu.memory_space<semaphore_mem>> -> memref<1x!tpu.dma_semaphore, #tpu.memory_space<semaphore_mem>>
      %99 = tpu.memref_squeeze %98 : memref<1x!tpu.dma_semaphore, #tpu.memory_space<semaphore_mem>> -> memref<!tpu.dma_semaphore, #tpu.memory_space<semaphore_mem>>
      tpu.enqueue_dma source(%arg5 : memref<512x128xf32, #tpu.memory_space<any>>) target(%arg10 : memref<512x128xf32, #tpu.memory_space<vmem>>) target_semaphore(%99 : memref<!tpu.dma_semaphore, #tpu.memory_space<semaphore_mem>>)
      %c0_i32_40 = arith.constant 0 : i32
      %100 = tpu.memref_slice %arg12[%c0_i32_40] : memref<2x!tpu.dma_semaphore, #tpu.memory_space<semaphore_mem>> -> memref<1x!tpu.dma_semaphore, #tpu.memory_space<semaphore_mem>>
      %101 = tpu.memref_squeeze %100 : memref<1x!tpu.dma_semaphore, #tpu.memory_space<semaphore_mem>> -> memref<!tpu.dma_semaphore, #tpu.memory_space<semaphore_mem>>
      tpu.wait_dma2 semaphore(%101 : memref<!tpu.dma_semaphore, #tpu.memory_space<semaphore_mem>>) src(%arg4 : memref<256x128xf32, #tpu.memory_space<any>>) dst(%arg9 : memref<256x128xf32, #tpu.memory_space<vmem>>)
      %c1_i32_41 = arith.constant 1 : i32
      %102 = tpu.memref_slice %arg12[%c1_i32_41] : memref<2x!tpu.dma_semaphore, #tpu.memory_space<semaphore_mem>> -> memref<1x!tpu.dma_semaphore, #tpu.memory_space<semaphore_mem>>
      %103 = tpu.memref_squeeze %102 : memref<1x!tpu.dma_semaphore, #tpu.memory_space<semaphore_mem>> -> memref<!tpu.dma_semaphore, #tpu.memory_space<semaphore_mem>>
      tpu.wait_dma2 semaphore(%103 : memref<!tpu.dma_semaphore, #tpu.memory_space<semaphore_mem>>) src(%arg5 : memref<512x128xf32, #tpu.memory_space<any>>) dst(%arg10 : memref<512x128xf32, #tpu.memory_space<vmem>>)
    } else {
    }
    %c0_i32_2 = arith.constant 0 : i32
    %5 = arith.cmpi eq, %arg1, %c0_i32_2 : i32
    %6 = arith.extui %5 : i1 to i32
    %c0_i32_3 = arith.constant 0 : i32
    %7 = arith.cmpi ne, %6, %c0_i32_3 : i32
    scf.if %7 {
      %cst_38 = arith.constant 0.000000e+00 : f32
      %96 = vector.broadcast %cst_38 : f32 to vector<256x128xf32>
      %c0_39 = arith.constant 0 : index
      %c0_40 = arith.constant 0 : index
      %97 = vector.load %arg11[%c0_39, %c0_40] : memref<256x128xf32, #tpu.memory_space<vmem>>, vector<256x128xf32>
      tpu.vector_store %arg11[%c0_39, %c0_40], %96 {strides = array<i32>} : memref<256x128xf32, #tpu.memory_space<vmem>>, vector<256x128xf32>,
    } else {
    }
    %c0 = arith.constant 0 : index
    %c0_4 = arith.constant 0 : index
    %c0_5 = arith.constant 0 : index
    %8 = vector.load %arg6[%c0, %c0_4, %c0_5] : memref<1x1152x128xf32, #tpu.memory_space<vmem>>, vector<1x384x128xf32>
    %9 = vector.shape_cast %8 : vector<1x384x128xf32> to vector<384x128xf32>
    %c0_6 = arith.constant 0 : index
    %c384 = arith.constant 384 : index
    %c0_7 = arith.constant 0 : index
    %10 = vector.load %arg6[%c0_6, %c384, %c0_7] : memref<1x1152x128xf32, #tpu.memory_space<vmem>>, vector<1x128x128xf32>
    %11 = vector.shape_cast %10 : vector<1x128x128xf32> to vector<128x128xf32>
    %c0_8 = arith.constant 0 : index
    %c512 = arith.constant 512 : index
    %c0_9 = arith.constant 0 : index
    %12 = vector.load %arg6[%c0_8, %c512, %c0_9] : memref<1x1152x128xf32, #tpu.memory_space<vmem>>, vector<1x128x128xf32>
    %13 = vector.shape_cast %12 : vector<1x128x128xf32> to vector<128x128xf32>
    %c0_10 = arith.constant 0 : index
    %c0_11 = arith.constant 0 : index
    %c0_12 = arith.constant 0 : index
    %14 = vector.load %arg7[%c0_10, %c0_11, %c0_12] : memref<1x16x128xf32, #tpu.memory_space<vmem>>, vector<1x16x128xf32>
    %15 = vector.shape_cast %14 : vector<1x16x128xf32> to vector<16x128xf32>
    %16 = vector.extract_strided_slice %15 {offsets = [0, 0], sizes = [1, 128], strides = [1, 1]} : vector<16x128xf32> to vector<1x128xf32>
    %17 = vector.extract_strided_slice %15 {offsets = [1, 0], sizes = [1, 128], strides = [1, 1]} : vector<16x128xf32> to vector<1x128xf32>
    %18 = vector.extract_strided_slice %15 {offsets = [2, 0], sizes = [1, 128], strides = [1, 1]} : vector<16x128xf32> to vector<1x128xf32>
    %19 = vector.extract_strided_slice %15 {offsets = [3, 0], sizes = [1, 128], strides = [1, 1]} : vector<16x128xf32> to vector<1x128xf32>
    %20 = vector.extract_strided_slice %15 {offsets = [4, 0], sizes = [1, 128], strides = [1, 1]} : vector<16x128xf32> to vector<1x128xf32>
    %c256_i32 = arith.constant 256 : i32
    %21 = arith.muli %arg1, %c256_i32 : i32
    %22 = tpu.assume_multiple %21, 256 : i32
    %23 = arith.index_cast %22 : i32 to index
    %c0_13 = arith.constant 0 : index
    %24 = vector.load %arg10[%23, %c0_13] : memref<512x128xf32, #tpu.memory_space<vmem>>, vector<256x128xf32>
    %c0_14 = arith.constant 0 : index
    %c0_15 = arith.constant 0 : index
    %25 = vector.load %arg9[%c0_14, %c0_15] : memref<256x128xf32, #tpu.memory_space<vmem>>, vector<256x128xf32>
    %26 = arith.index_cast %arg1 : i32 to index
    %c0_16 = arith.constant 0 : index
    %27 = vector.load %arg2[%26, %c0_16] : memref<2x256xi32, #tpu.memory_space<vmem>>, vector<1x256xi32>
    %28 = vector.shape_cast %27 : vector<1x256xi32> to vector<256xi32>
    %29 = arith.index_cast %arg1 : i32 to index
    %c0_17 = arith.constant 0 : index
    %30 = vector.load %arg3[%29, %c0_17] : memref<2x256xi32, #tpu.memory_space<vmem>>, vector<1x256xi32>
    %31 = vector.shape_cast %30 : vector<1x256xi32> to vector<256xi32>
    %32 = tpu.iota {dimensions = array<i32: 0>} : vector<256x256xi32>
    %33 = vector.shape_cast %28 : vector<256xi32> to vector<1x256xi32>
    %34 = vector.broadcast %33 : vector<1x256xi32> to vector<256x256xi32>
    %35 = arith.cmpi eq, %32, %34 : vector<256x256xi32>
    %36 = arith.extui %35 : vector<256x256xi1> to vector<256x256xi32>
    %37 = arith.sitofp %36 : vector<256x256xi32> to vector<256x256xf32>
    %38 = vector.shape_cast %31 : vector<256xi32> to vector<1x256xi32>
    %39 = vector.broadcast %38 : vector<1x256xi32> to vector<256x256xi32>
    %40 = arith.cmpi eq, %32, %39 : vector<256x256xi32>
    %41 = arith.extui %40 : vector<256x256xi1> to vector<256x256xi32>
    %42 = arith.sitofp %41 : vector<256x256xi32> to vector<256x256xf32>
    %cst = arith.constant dense<0.000000e+00> : vector<256x128xf32>
    %43 = tpu.matmul %37, %25, %cst {dimension_numbers = #tpu.dot_dimension_numbers<[0], [0], [1], [1], [0, 1, 1, 1], [], []>} : vector<256x256xf32>, vector<256x128xf32>, vector<256x128xf32> -> vector<256x128xf32>
    %cst_18 = arith.constant dense<0.000000e+00> : vector<256x128xf32>
    %44 = tpu.matmul %42, %25, %cst_18 {dimension_numbers = #tpu.dot_dimension_numbers<[0], [0], [1], [1], [0, 1, 1, 1], [], []>} : vector<256x256xf32>, vector<256x128xf32>, vector<256x128xf32> -> vector<256x128xf32>
    %45 = tpu.concatenate %24, %43, %44 in 1 : vector<256x128xf32>, vector<256x128xf32>, vector<256x128xf32> -> vector<256x384xf32>
    %cst_19 = arith.constant dense<0.000000e+00> : vector<256x128xf32>
    %46 = tpu.matmul %45, %9, %cst_19 {dimension_numbers = #tpu.dot_dimension_numbers<[1], [0], [0], [1], [0, 0, 1, 1], [], []>} : vector<256x384xf32>, vector<384x128xf32>, vector<256x128xf32> -> vector<256x128xf32>
    %47 = vector.broadcast %16 : vector<1x128xf32> to vector<256x128xf32>
    %48 = arith.addf %46, %47 : vector<256x128xf32>
    %cst_20 = arith.constant 0.000000e+00 : f32
    %49 = vector.broadcast %cst_20 : f32 to vector<256x128xf32>
    %50 = arith.maximumf %48, %49 : vector<256x128xf32>
    %cst_21 = arith.constant dense<0.000000e+00> : vector<256x128xf32>
    %51 = tpu.matmul %50, %11, %cst_21 {dimension_numbers = #tpu.dot_dimension_numbers<[1], [0], [0], [1], [0, 0, 1, 1], [], []>} : vector<256x128xf32>, vector<128x128xf32>, vector<256x128xf32> -> vector<256x128xf32>
    %52 = vector.broadcast %17 : vector<1x128xf32> to vector<256x128xf32>
    %53 = arith.addf %51, %52 : vector<256x128xf32>
    %cst_22 = arith.constant 0.000000e+00 : f32
    %54 = vector.broadcast %cst_22 : f32 to vector<256x128xf32>
    %55 = arith.maximumf %53, %54 : vector<256x128xf32>
    %cst_23 = arith.constant dense<0.000000e+00> : vector<256x128xf32>
    %56 = tpu.matmul %55, %13, %cst_23 {dimension_numbers = #tpu.dot_dimension_numbers<[1], [0], [0], [1], [0, 0, 1, 1], [], []>} : vector<256x128xf32>, vector<128x128xf32>, vector<256x128xf32> -> vector<256x128xf32>
    %57 = vector.broadcast %18 : vector<1x128xf32> to vector<256x128xf32>
    %58 = arith.addf %56, %57 : vector<256x128xf32>
    %cst_24 = arith.constant dense<0.000000e+00> : vector<256xf32>
    %59 = vector.multi_reduction <add>, %58, %cst_24 [1] : vector<256x128xf32> to vector<256xf32>
    %60 = vector.shape_cast %59 : vector<256xf32> to vector<256x1xf32>
    %cst_25 = arith.constant 1.280000e+02 : f32
    %61 = vector.broadcast %cst_25 : f32 to vector<256x1xf32>
    %62 = arith.divf %60, %61 : vector<256x1xf32>
    %63 = vector.broadcast %62 : vector<256x1xf32> to vector<256x128xf32>
    %64 = arith.subf %58, %63 : vector<256x128xf32>
    %65 = arith.mulf %64, %64 : vector<256x128xf32>
    %cst_26 = arith.constant dense<0.000000e+00> : vector<256xf32>
    %66 = vector.multi_reduction <add>, %65, %cst_26 [1] : vector<256x128xf32> to vector<256xf32>
    %67 = vector.shape_cast %66 : vector<256xf32> to vector<256x1xf32>
    %cst_27 = arith.constant 1.280000e+02 : f32
    %68 = vector.broadcast %cst_27 : f32 to vector<256x1xf32>
    %69 = arith.divf %67, %68 : vector<256x1xf32>
    %70 = vector.broadcast %62 : vector<256x1xf32> to vector<256x128xf32>
    %71 = arith.subf %58, %70 : vector<256x128xf32>
    %cst_28 = arith.constant 9.99999974E-6 : f32
    %72 = vector.broadcast %cst_28 : f32 to vector<256x1xf32>
    %73 = arith.addf %69, %72 : vector<256x1xf32>
    %74 = math.rsqrt %73 : vector<256x1xf32>
    %75 = vector.broadcast %74 : vector<256x1xf32> to vector<256x128xf32>
    %76 = arith.mulf %71, %75 : vector<256x128xf32>
    %77 = vector.broadcast %19 : vector<1x128xf32> to vector<256x128xf32>
    %78 = arith.mulf %76, %77 : vector<256x128xf32>
    %79 = vector.broadcast %20 : vector<1x128xf32> to vector<256x128xf32>
    %80 = arith.addf %78, %79 : vector<256x128xf32>
    %81 = arith.addf %80, %24 : vector<256x128xf32>
    %82 = arith.index_cast %22 : i32 to index
    %c0_29 = arith.constant 0 : index
    %83 = vector.load %arg10[%82, %c0_29] : memref<512x128xf32, #tpu.memory_space<vmem>>, vector<256x128xf32>
    tpu.vector_store %arg10[%82, %c0_29], %81 {strides = array<i32>} : memref<512x128xf32, #tpu.memory_space<vmem>>, vector<256x128xf32>,
    %c0_30 = arith.constant 0 : index
    %c0_31 = arith.constant 0 : index
    %84 = vector.load %arg11[%c0_30, %c0_31] : memref<256x128xf32, #tpu.memory_space<vmem>>, vector<256x128xf32>
    %cst_32 = arith.constant dense<0.000000e+00> : vector<256x128xf32>
    %85 = tpu.matmul %42, %81, %cst_32 {dimension_numbers = #tpu.dot_dimension_numbers<[1], [0], [0], [1], [0, 0, 1, 1], [], []>} : vector<256x256xf32>, vector<256x128xf32>, vector<256x128xf32> -> vector<256x128xf32>
    %86 = arith.addf %84, %85 : vector<256x128xf32>
    %c0_33 = arith.constant 0 : index
    %c0_34 = arith.constant 0 : index
    %87 = vector.load %arg11[%c0_33, %c0_34] : memref<256x128xf32, #tpu.memory_space<vmem>>, vector<256x128xf32>
    tpu.vector_store %arg11[%c0_33, %c0_34], %86 {strides = array<i32>} : memref<256x128xf32, #tpu.memory_space<vmem>>, vector<256x128xf32>,
    %c1_i32 = arith.constant 1 : i32
    %88 = arith.cmpi eq, %arg1, %c1_i32 : i32
    %89 = arith.extui %88 : i1 to i32
    %c0_i32_35 = arith.constant 0 : i32
    %90 = arith.cmpi ne, %89, %c0_i32_35 : i32
    scf.if %90 {
      %c0_38 = arith.constant 0 : index
      %c640 = arith.constant 640 : index
      %c0_39 = arith.constant 0 : index
      %96 = vector.load %arg6[%c0_38, %c640, %c0_39] : memref<1x1152x128xf32, #tpu.memory_space<vmem>>, vector<1x256x128xf32>
      %97 = vector.shape_cast %96 : vector<1x256x128xf32> to vector<256x128xf32>
      %c0_40 = arith.constant 0 : index
      %c896 = arith.constant 896 : index
      %c0_41 = arith.constant 0 : index
      %98 = vector.load %arg6[%c0_40, %c896, %c0_41] : memref<1x1152x128xf32, #tpu.memory_space<vmem>>, vector<1x128x128xf32>
      %99 = vector.shape_cast %98 : vector<1x128x128xf32> to vector<128x128xf32>
      %c0_42 = arith.constant 0 : index
      %c1024 = arith.constant 1024 : index
      %c0_43 = arith.constant 0 : index
      %100 = vector.load %arg6[%c0_42, %c1024, %c0_43] : memref<1x1152x128xf32, #tpu.memory_space<vmem>>, vector<1x128x128xf32>
      %101 = vector.shape_cast %100 : vector<1x128x128xf32> to vector<128x128xf32>
      %102 = vector.extract_strided_slice %15 {offsets = [5, 0], sizes = [1, 128], strides = [1, 1]} : vector<16x128xf32> to vector<1x128xf32>
      %103 = vector.extract_strided_slice %15 {offsets = [6, 0], sizes = [1, 128], strides = [1, 1]} : vector<16x128xf32> to vector<1x128xf32>
      %104 = vector.extract_strided_slice %15 {offsets = [7, 0], sizes = [1, 128], strides = [1, 1]} : vector<16x128xf32> to vector<1x128xf32>
      %105 = vector.extract_strided_slice %15 {offsets = [8, 0], sizes = [1, 128], strides = [1, 1]} : vector<16x128xf32> to vector<1x128xf32>
      %106 = vector.extract_strided_slice %15 {offsets = [9, 0], sizes = [1, 128], strides = [1, 1]} : vector<16x128xf32> to vector<1x128xf32>
      %c0_44 = arith.constant 0 : index
      %c0_45 = arith.constant 0 : index
      %107 = vector.load %arg11[%c0_44, %c0_45] : memref<256x128xf32, #tpu.memory_space<vmem>>, vector<256x128xf32>
      %108 = tpu.concatenate %107, %25 in 1 : vector<256x128xf32>, vector<256x128xf32> -> vector<256x256xf32>
      %cst_46 = arith.constant dense<0.000000e+00> : vector<256x128xf32>
      %109 = tpu.matmul %108, %97, %cst_46 {dimension_numbers = #tpu.dot_dimension_numbers<[1], [0], [0], [1], [0, 0, 1, 1], [], []>} : vector<256x256xf32>, vector<256x128xf32>, vector<256x128xf32> -> vector<256x128xf32>
      %110 = vector.broadcast %102 : vector<1x128xf32> to vector<256x128xf32>
      %111 = arith.addf %109, %110 : vector<256x128xf32>
      %cst_47 = arith.constant 0.000000e+00 : f32
      %112 = vector.broadcast %cst_47 : f32 to vector<256x128xf32>
      %113 = arith.maximumf %111, %112 : vector<256x128xf32>
      %cst_48 = arith.constant dense<0.000000e+00> : vector<256x128xf32>
      %114 = tpu.matmul %113, %99, %cst_48 {dimension_numbers = #tpu.dot_dimension_numbers<[1], [0], [0], [1], [0, 0, 1, 1], [], []>} : vector<256x128xf32>, vector<128x128xf32>, vector<256x128xf32> -> vector<256x128xf32>
      %115 = vector.broadcast %103 : vector<1x128xf32> to vector<256x128xf32>
      %116 = arith.addf %114, %115 : vector<256x128xf32>
      %cst_49 = arith.constant 0.000000e+00 : f32
      %117 = vector.broadcast %cst_49 : f32 to vector<256x128xf32>
      %118 = arith.maximumf %116, %117 : vector<256x128xf32>
      %cst_50 = arith.constant dense<0.000000e+00> : vector<256x128xf32>
      %119 = tpu.matmul %118, %101, %cst_50 {dimension_numbers = #tpu.dot_dimension_numbers<[1], [0], [0], [1], [0, 0, 1, 1], [], []>} : vector<256x128xf32>, vector<128x128xf32>, vector<256x128xf32> -> vector<256x128xf32>
      %120 = vector.broadcast %104 : vector<1x128xf32> to vector<256x128xf32>
      %121 = arith.addf %119, %120 : vector<256x128xf32>
      %cst_51 = arith.constant dense<0.000000e+00> : vector<256xf32>
      %122 = vector.multi_reduction <add>, %121, %cst_51 [1] : vector<256x128xf32> to vector<256xf32>
      %123 = vector.shape_cast %122 : vector<256xf32> to vector<256x1xf32>
      %cst_52 = arith.constant 1.280000e+02 : f32
      %124 = vector.broadcast %cst_52 : f32 to vector<256x1xf32>
      %125 = arith.divf %123, %124 : vector<256x1xf32>
      %126 = vector.broadcast %125 : vector<256x1xf32> to vector<256x128xf32>
      %127 = arith.subf %121, %126 : vector<256x128xf32>
      %128 = arith.mulf %127, %127 : vector<256x128xf32>
      %cst_53 = arith.constant dense<0.000000e+00> : vector<256xf32>
      %129 = vector.multi_reduction <add>, %128, %cst_53 [1] : vector<256x128xf32> to vector<256xf32>
      %130 = vector.shape_cast %129 : vector<256xf32> to vector<256x1xf32>
      %cst_54 = arith.constant 1.280000e+02 : f32
      %131 = vector.broadcast %cst_54 : f32 to vector<256x1xf32>
      %132 = arith.divf %130, %131 : vector<256x1xf32>
      %133 = vector.broadcast %125 : vector<256x1xf32> to vector<256x128xf32>
      %134 = arith.subf %121, %133 : vector<256x128xf32>
      %cst_55 = arith.constant 9.99999974E-6 : f32
      %135 = vector.broadcast %cst_55 : f32 to vector<256x1xf32>
      %136 = arith.addf %132, %135 : vector<256x1xf32>
      %137 = math.rsqrt %136 : vector<256x1xf32>
      %138 = vector.broadcast %137 : vector<256x1xf32> to vector<256x128xf32>
      %139 = arith.mulf %134, %138 : vector<256x128xf32>
      %140 = vector.broadcast %105 : vector<1x128xf32> to vector<256x128xf32>
      %141 = arith.mulf %139, %140 : vector<256x128xf32>
      %142 = vector.broadcast %106 : vector<1x128xf32> to vector<256x128xf32>
      %143 = arith.addf %141, %142 : vector<256x128xf32>
      %144 = arith.addf %143, %25 : vector<256x128xf32>
      %c0_56 = arith.constant 0 : index
      %c0_57 = arith.constant 0 : index
      %145 = vector.load %arg9[%c0_56, %c0_57] : memref<256x128xf32, #tpu.memory_space<vmem>>, vector<256x128xf32>
      tpu.vector_store %arg9[%c0_56, %c0_57], %144 {strides = array<i32>} : memref<256x128xf32, #tpu.memory_space<vmem>>, vector<256x128xf32>,
    } else {
    }
    %c2_i32 = arith.constant 2 : i32
    %91 = arith.cmpi eq, %arg0, %c2_i32 : i32
    %c1_i32_36 = arith.constant 1 : i32
    %92 = arith.cmpi eq, %arg1, %c1_i32_36 : i32
    %93 = arith.andi %91, %92 : i1
    %94 = arith.extui %93 : i1 to i32
    %c0_i32_37 = arith.constant 0 : i32
    %95 = arith.cmpi ne, %94, %c0_i32_37 : i32
    scf.if %95 {
      %c0_38 = arith.constant 0 : index
      %c0_39 = arith.constant 0 : index
      %96 = vector.load %arg9[%c0_38, %c0_39] : memref<256x128xf32, #tpu.memory_space<vmem>>, vector<256x128xf32>
      %c0_40 = arith.constant 0 : index
      %c0_41 = arith.constant 0 : index
      %97 = vector.load %arg8[%c0_40, %c0_41] : memref<256x128xf32, #tpu.memory_space<vmem>>, vector<256x128xf32>
      tpu.vector_store %arg8[%c0_40, %c0_41], %96 {strides = array<i32>} : memref<256x128xf32, #tpu.memory_space<vmem>>, vector<256x128xf32>,
    } else {
    }
    return
  }
  func.func @transform_0(%arg0: i32, %arg1: i32) -> (i32, i32) {
    %c0_i32 = arith.constant 0 : i32
    %c0_i32_0 = arith.constant 0 : i32
    %c0_i32_1 = arith.constant 0 : i32
    return %c0_i32, %c0_i32_0 : i32, i32
  }
  func.func @transform_1(%arg0: i32, %arg1: i32) -> (i32, i32) {
    %c0_i32 = arith.constant 0 : i32
    %c0_i32_0 = arith.constant 0 : i32
    %c0_i32_1 = arith.constant 0 : i32
    return %c0_i32, %c0_i32_0 : i32, i32
  }
  func.func @transform_4(%arg0: i32, %arg1: i32) -> (i32, i32, i32) {
    %c0_i32 = arith.constant 0 : i32
    %c0_i32_0 = arith.constant 0 : i32
    %c0_i32_1 = arith.constant 0 : i32
    return %arg0, %c0_i32, %c0_i32_0 : i32, i32, i32
  }
  func.func @transform_5(%arg0: i32, %arg1: i32) -> (i32, i32, i32) {
    %c0_i32 = arith.constant 0 : i32
    %c0_i32_0 = arith.constant 0 : i32
    %c0_i32_1 = arith.constant 0 : i32
    return %arg0, %c0_i32, %c0_i32_0 : i32, i32, i32
  }
  func.func @transform_6(%arg0: i32, %arg1: i32) -> (i32, i32) {
    %c0_i32 = arith.constant 0 : i32
    %c0_i32_0 = arith.constant 0 : i32
    %c0_i32_1 = arith.constant 0 : i32
    return %c0_i32, %c0_i32_0 : i32, i32
  }
}

</mosaic_0001>

<bundles_post_ra>
// kernel: tpu_custom_call.1
= control target key start
LH: loop header
LB: loop body
LE: loop exit
PB: predicated region body
PF: predicated region fallthrough
CT: control target
= control target key end

     0   :  { %s9710_s0 = inlined_call_operand.hbm [shape: s32[2,256], index: 0, kind: input, shape index: {}]   ;;  %s9711_s1 = inlined_call_operand.hbm [shape: s32[2,256], index: 1, kind: input, shape index: {}]   ;;  %s9712_s2 = inlined_call_operand.hbm [shape: f32[256,128], index: 2, kind: input, shape index: {}]   ;;  %s9713_s3 = inlined_call_operand.hbm [shape: f32[512,128], index: 3, kind: input, shape index: {}]   ;;  %s9714_s4 = inlined_call_operand.hbm [shape: f32[3,1152,128], index: 4, kind: input, shape index: {}]   ;;  %s9715_s5 = inlined_call_operand.hbm [shape: f32[3,16,128], index: 5, kind: input, shape index: {}]   ;;  %s9716_s6 = inlined_call_operand.hbm [shape: f32[256,128], index: 6, kind: output, shape index: {}]  }
   0x1   :  { %9930 = sst [smem:[#allocation100_spill]] %s9710_s0 }
   0x2   :  { %9931 = sst [smem:[#allocation101_spill]] %s9711_s1 }
   0x3   :  { %9932 = sst [smem:[#allocation102_spill]] %s9712_s2 }
   0x4   :  { %9933 = sst [smem:[#allocation103_spill]] %s9713_s3 }
   0x5   :  { %9934 = sst [smem:[#allocation104_spill]] %s9716_s6 }
   0x6   :  { %11 = vsyncpa [#allocation7], 0 }
   0x7   :  { %12 = vsyncpa [#allocation10], 0 }
   0x8   :  { %13 = vsyncpa [#allocation8], 0  ;;  %s6282_s21 = smov 0   ;;  %s6284_s22 = smov 0  }
   0x9   :  { %s6286_s23 = smov 0   ;;  %s6288_s24 = smov 0  }
   0xa   :  { %s6290_s25 = smov 0   ;;  %s6292_s26 = smov 0  }
   0xb   :  { %s6294_s27 = smov 0   ;;  %s6296_s28 = smov 0  }
   0xc LB: > { %9935 = sst [smem:[#allocation26_spill]] %s6223_s26  ;;  %s6321_s29 = sadd.s32 4294967295, %s6231_s28   ;;  %s6231_s28 = sphi %s6296_s28, %s19_s28   ;;  %s6227_s27 = sphi %s6294_s27, %s10196_s27   ;;  %s6223_s26 = sphi %s6292_s26, %s10191_s26   ;;  %s6219_s25 = sphi %s6290_s25, %s10195_s25   ;;  %s6215_s24 = sphi %s6288_s24, %s10190_s24   ;;  %s6211_s23 = sphi %s6286_s23, %s10194_s23   ;;  %s6207_s22 = sphi %s6284_s22, %s10193_s22   ;;  %s6203_s21 = sphi %s6282_s21, %s10192_s21  }
   0xd   : > { %9936 = sst [smem:[#allocation27_spill]] %s6231_s28  ;;  %p87_p0 = scmp.ne.s32.totalorder %s6211_s23, %s6207_s22 }
   0xe   : > { %p88_p1 = scmp.eq.s32.totalorder %s6231_s28, 0  ;;  %p93_p2 = scmp.ne.s32.totalorder %s6207_s22, %s6203_s21 }
   0xf   : > { %p94_p3 = scmp.eq.s32.totalorder %s6321_s29, 0  ;;  %p4971_p5 = scmp.ge.s32.totalorder %s6231_s28, 1 }
  0x10   : > { %p6329_p4 = por %p88_p1, %p87_p0  ;;  %p151_p7 = scmp.lt.s32.totalorder %s6231_s28, 7 }
  0x11   : > { %p6336_p6 = por %p94_p3, %p93_p2  ;;  %s9939_s0 = sld [smem:[#allocation100_spill]] }
  0x12   : > { %p6344_p8 = pnand %p4971_p5, %p151_p7  ;;  %s6233_s13 = smov [#allocation6]  }
  0x13   : > { %s165_s14 = sshll.u32 %s6233_s13, 4  ;;  %p5340_p10 = scmp.lt.s32.totalorder %s6231_s28, 6  ;;  %s166_s14 = int_to_ptr.vmem [resolvable:$true] %s165_s14 }
  0x14   : > { %p5324_p9 = pneg %p6344_p8  ;;  %s28_s17 = sadd.s32 1, %s6223_s26 }
  0x15   : > { %p6359_p12 = pnand %p5340_p10, %p6329_p4  ;;  %s31_s18 = sadd.s32 1, %s6227_s27 }
  0x16   : > { %p6353_p11 = pnand %p5324_p9, %p94_p3  ;;  %p29_p13 = scmp.ge.s32.totalorder %s28_s17, 2 }
  0x17   : > { %s163_s11 = sshll.u32 %s9939_s0, 4  ;;  %s188_s19 = sand.u32 1, %s6231_s28   ;;  %s164_s11 = int_to_ptr.hbm [resolvable:$true] %s163_s11 }
  0x18   : > { %5327 = dma.hbm_to_vmem [thread:$0]  (!%p6353_p11), %s164_s11, 64, %s166_s14, [#allocation7]  }
  0x19   : > { %s190_s20 = sand.u32 1, %s6211_s23   ;;  %s10198_s17 = smov (%p29_p13, %s28_s17), 0 }
  0x1a   : > { %9943 = sst [smem:[#allocation28_spill]] %s10198_s17  ;;  %s10200_s18 = smov (!%p29_p13, %s31_s18), %s6227_s27 }
  0x1b   : > { %s5300_s21 = smul.u32 1152, %s190_s20  ;;  %p33_p0 = scmp.ge.s32.totalorder %s10200_s18, 3 }
  0x1c   : > { %s5301_s7 = smul.u32 1152, %s6227_s27  ;;  %s9944_s1 = sld [smem:[#allocation101_spill]] }
  0x1d   : > { %s10202_s18 = smov (%p33_p0, %s10200_s18), 0  ;;  %s192_s13 = scalar_lea.vmem [#allocation11], %s5300_s21 }
  0x1e   : > { %s197_s11 = scalar_lea.hbm %s9714_s4, %s5301_s7  ;;  %s200_s14 = sshll.u32 %s192_s13, 4  ;;  %s201_s14 = int_to_ptr.vmem [resolvable:$true] %s200_s14 }
  0x1f   : > { %s77_s30 = ssub.s32 %s6227_s27, %s10202_s18  ;;  %s198_s0 = sshll.u32 %s197_s11, 4  ;;  %s199_s0 = int_to_ptr.hbm [resolvable:$true] %s198_s0 }
  0x20   : > { %p78_p1 = scmp.eq.s32.totalorder %s77_s30, 0  ;;  %s9945_s6 = sadd.s32 1, %s6211_s23 }
  0x21   : > { %s189_s2 = scalar_lea.sflag [#allocation7], %s188_s19  ;;  %s6234_s9 = smov 128  }
  0x22   : > { %s175_s28 = sshll.u32 %s9944_s1, 4  ;;  %s6235_s7 = smov 8   ;;  %s176_s28 = int_to_ptr.hbm [resolvable:$true] %s175_s28 }
  0x23   : > { %s6386_s3 = scalar_select %p78_p1, %s6211_s23, %s9945_s6  }
  0x24   : > { %5334 = dma.hbm_to_vmem [thread:$0]  (!%p6359_p12), %s199_s0, 18432, %s201_s14, %s189_s2, %s6234_s9, %s6234_s9, %s6235_s7  }
  0x25   : > { %s6236_s21 = smov [#allocation9]   ;;  %s4976_s11 = sshll.u32 %s190_s20, 4 }
  0x26   : > { %s177_s10 = sshll.u32 %s6236_s21, 4  ;;  %s5186_s30 = sshll.u32 %s6227_s27, 4  ;;  %s178_s10 = int_to_ptr.vmem [resolvable:$true] %s177_s10 }
  0x27   : > { %5330 = dma.hbm_to_vmem [thread:$0]  (!%p6353_p11), %s176_s28, 64, %s178_s10, [#allocation10]  }
  0x28   : > { %s214_s13 = scalar_lea.vmem [#allocation12], %s4976_s11  ;;  %s219_s6 = scalar_lea.hbm %s9715_s5, %s5186_s30 }
  0x29   : > { %s222_s26 = sshll.u32 %s214_s13, 4  ;;  %s220_s19 = sshll.u32 %s219_s6, 4  ;;  %s223_s26 = int_to_ptr.vmem [resolvable:$true] %s222_s26  ;;  %s221_s19 = int_to_ptr.hbm [resolvable:$true] %s220_s19 }
  0x2a   : > { %5337 = dma.hbm_to_vmem [thread:$0]  (!%p6359_p12), %s221_s19, 256, %s223_s26, %s189_s2, %s6234_s9, %s6234_s9, %s6235_s7  }
  0x2b   : > { %234 = sbr.rel (%p6344_p8) target bundleno = 3022 (0xbce), region = 36 }
  0x30   : > { %6178 = dma.done.wait (%p94_p3), [#allocation7], 64  }
  0x31   : > { %6180 = vsyncadd (%p94_p3), [#allocation7], 4294967232 }
  0x32   : > { %6182 = dma.done.wait (%p94_p3), [#allocation10], 64  }
  0x33   : > { %6184 = vsyncadd (%p94_p3), [#allocation10], 4294967232  ;;  %s246_s0 = sand.u32 1, %s6321_s29   ;;  %s248_s1 = sand.u32 1, %s6207_s22  }
  0x34   : > { %s5302_s2 = smul.u32 1152, %s248_s1  ;;  %s247_s28 = scalar_lea.sflag [#allocation7], %s246_s0 }
  0x36   : > { %s6410_s12 = scalar_lea.vmem [#allocation11], %s5302_s2 }
  0x37   : > { %6186 = dma.done.wait (%p6336_p6), %s247_s28, 18688  }
  0x38   : > { %6188 = vsyncadd (%p6336_p6), %s247_s28, 4294948608  ;;  %s4982_s15 = sshll.u32 %s248_s1, 4  ;;  %p286_p2 = scmp.eq.s32.totalorder %s6219_s25, 0 }
  0x39   : > { %p287_p4 = scmp.eq.s32.totalorder %s6215_s24, 0  ;;  %s9946_s14 = sld [smem:[#allocation102_spill]] }
  0x3a   : > { %s6237_s21 = smov [#allocation2]   ;;  %s9948_s30 = sld [smem:[#allocation103_spill]] }
  0x3b   : > { %p6421_p3 = pnand %p287_p4, %p286_p2  ;;  %s301_s8 = sshll.u32 %s6237_s21, 4  ;;  %s302_s8 = int_to_ptr.vmem [resolvable:$true] %s301_s8 }
  0x3c   : > { %s6238_s26 = smov [#allocation3]   ;;  %s6434_s6 = scalar_lea.vmem [#allocation12], %s4982_s15 }
  0x3d   : > { %p5315_p5 = pneg %p6421_p3  ;;  %s315_s17 = sshll.u32 %s6238_s26, 4  ;;  %s316_s17 = int_to_ptr.vmem [resolvable:$true] %s315_s17 }
  0x3f   : > { %s299_s9 = sshll.u32 %s9946_s14, 4  ;;  %s300_s9 = int_to_ptr.hbm [resolvable:$true] %s299_s9 }
  0x40   : > { %s313_s13 = sshll.u32 %s9948_s30, 4  ;;  %s314_s13 = int_to_ptr.hbm [resolvable:$true] %s313_s13 }
  0x41   : > { %5316 = dma.hbm_to_vmem [thread:$0]  (!%p6421_p3), %s300_s9, 4096, %s302_s8, [#allocation5] }
  0x42   : > { %5317 = dma.hbm_to_vmem [thread:$0]  (!%p6421_p3), %s314_s13, 8192, %s316_s17, [#allocation5 + $0x1] }
  0x43   : > { %6190 = dma.done.wait (%p5315_p5), [#allocation5], 4096 }
  0x44   : > { %6192 = vsyncadd (%p5315_p5), [#allocation5], 4294963200 }
  0x45   : > { %6194 = dma.done.wait (%p5315_p5), [#allocation5 + $0x1], 8192 }
  0x46   : > { %6196 = vsyncadd (%p5315_p5), [#allocation5 + $0x1], 4294959104  ;;  %p4983_p6 = scmp.ne.s32.totalorder %s6215_s24, 0 }
  0x48   : > { %327 = sbr.rel (%p4983_p6) target bundleno = 110 (0x6e), region = 68 }
  0x4d   : > { %v6239_v0 = vmov 0.0  }
  0x4e   : > { %328 = vst [vmem:[#allocation4 + $0xb0] sm:$0xff] %v6239_v0 }
  0x4f   : > { %329 = vst [vmem:[#allocation4] sm:$0xff] %v6239_v0 }
  0x50   : > { %330 = vst [vmem:[#allocation4 + $0xd8] sm:$0xff] %v6239_v0 }
  0x51   : > { %331 = vst [vmem:[#allocation4 + $0x18] sm:$0xff] %v6239_v0 }
  0x52   : > { %332 = vst [vmem:[#allocation4 + $0x50] sm:$0xff] %v6239_v0 }
  0x53   : > { %333 = vst [vmem:[#allocation4 + $0x68] sm:$0xff] %v6239_v0 }
  0x54   : > { %334 = vst [vmem:[#allocation4 + $0x30] sm:$0xff] %v6239_v0 }
  0x55   : > { %335 = vst [vmem:[#allocation4 + $0x48] sm:$0xff] %v6239_v0 }
  0x56   : > { %336 = vst [vmem:[#allocation4 + $0x80] sm:$0xff] %v6239_v0 }
  0x57   : > { %337 = vst [vmem:[#allocation4 + $0x88] sm:$0xff] %v6239_v0 }
  0x58   : > { %338 = vst [vmem:[#allocation4 + $0xe8] sm:$0xff] %v6239_v0 }
  0x59   : > { %339 = vst [vmem:[#allocation4 + $0xb8] sm:$0xff] %v6239_v0 }
  0x5a   : > { %340 = vst [vmem:[#allocation4 + $0x60] sm:$0xff] %v6239_v0 }
  0x5b   : > { %341 = vst [vmem:[#allocation4 + $0xf0] sm:$0xff] %v6239_v0 }
  0x5c   : > { %342 = vst [vmem:[#allocation4 + $0x8] sm:$0xff] %v6239_v0 }
  0x5d   : > { %343 = vst [vmem:[#allocation4 + $0x78] sm:$0xff] %v6239_v0 }
  0x5e   : > { %344 = vst [vmem:[#allocation4 + $0x38] sm:$0xff] %v6239_v0 }
  0x5f   : > { %345 = vst [vmem:[#allocation4 + $0x58] sm:$0xff] %v6239_v0 }
  0x60   : > { %346 = vst [vmem:[#allocation4 + $0x40] sm:$0xff] %v6239_v0 }
  0x61   : > { %347 = vst [vmem:[#allocation4 + $0xc8] sm:$0xff] %v6239_v0 }
  0x62   : > { %348 = vst [vmem:[#allocation4 + $0xe0] sm:$0xff] %v6239_v0 }
  0x63   : > { %349 = vst [vmem:[#allocation4 + $0x90] sm:$0xff] %v6239_v0 }
  0x64   : > { %350 = vst [vmem:[#allocation4 + $0x70] sm:$0xff] %v6239_v0 }
  0x65   : > { %351 = vst [vmem:[#allocation4 + $0xc0] sm:$0xff] %v6239_v0 }
  0x66   : > { %352 = vst [vmem:[#allocation4 + $0xa8] sm:$0xff] %v6239_v0 }
  0x67   : > { %353 = vst [vmem:[#allocation4 + $0xd0] sm:$0xff] %v6239_v0 }
  0x68   : > { %354 = vst [vmem:[#allocation4 + $0x10] sm:$0xff] %v6239_v0 }
  0x69   : > { %355 = vst [vmem:[#allocation4 + $0x28] sm:$0xff] %v6239_v0 }
  0x6a   : > { %356 = vst [vmem:[#allocation4 + $0xa0] sm:$0xff] %v6239_v0 }
  0x6b   : > { %357 = vst [vmem:[#allocation4 + $0xf8] sm:$0xff] %v6239_v0 }
  0x6c   : > { %358 = vst [vmem:[#allocation4 + $0x20] sm:$0xff] %v6239_v0 }
  0x6d   : > { %359 = vst [vmem:[#allocation4 + $0x98] sm:$0xff] %v6239_v0 }
  0x6e PF: > { %s508_s19 = sshra.s32 %s6215_s24, 1  ;;  %s511_s0 = sand.u32 1, %s6215_s24  ;;  %v519_v1 = vlaneseq  ;;  %v9744_v12 = vmov 0.0  }
  0x6f   : > { %s5187_s1 = sshll.u32 %s508_s19, 2  ;;  %s4984_s16 = sshll.u32 %s6215_s24, 8 }
  0x70   : > { %s514_s2 = sadd.s32 %s5187_s1, %s511_s0  ;;  %v6439_v2 = vshrl.u32 %v519_v1, 7  ;;  %s7350_s20 = scalar_lea.vmem [#allocation3], %s4984_s16 }
  0x71   : > { %s517_s28 = scalar_lea.vmem [#allocation9], %s514_s2  ;;  %s515_s15 = scalar_lea.vmem [#allocation6], %s514_s2 }
  0x72   : > { %9949 = vst [vmem:[#allocation29_spill] sm:$0xff] %v6439_v2  ;;  %v518_v3 = vld [vmem:[%s517_s28] ss:$2 sm:$0x3]  ;;  %v6446_v7 = vadd.s32 128, %v6439_v2  ;;  %v6453_v10 = vadd.s32 8, %v6439_v2 }
  0x73   : > { %v516_v4 = vld [vmem:[%s515_s15] ss:$2 sm:$0x3]  ;;  %v6441_v5 = vperm.slane %v518_v3, 0  ;;  %v6443_v6 = vperm.slane %v518_v3, 1  ;;  %v6456_v11 = vadd.s32 136, %v6439_v2 }
  0x74   : > { %9951 = vst [vmem:[#allocation31_spill] sm:$0xff] %v6446_v7  ;;  %v6448_v8 = vperm.slane %v516_v4, 1  ;;  %v6450_v9 = vperm.slane %v516_v4, 0  ;;  %v6493_v23 = vadd.s32 16, %v6439_v2  ;;  %v6510_v31 = vadd.s32 144, %v6439_v2  ;;  %p3379_p7 = scmp.eq.s32.totalorder %s6215_s24, 1 }
  0x75   : > { %9950 = vst [vmem:[#allocation30_spill] sm:$0xff] %v6443_v6  ;;  %vm748_vm0 = vcmp.eq.s32.totalorder %v6439_v2, %v6441_v5  ;;  %vm749_vm1 = vcmp.eq.s32.totalorder %v6439_v2, %v6443_v6  ;;  %vm750_vm6 = vcmp.eq.s32.totalorder %v6453_v10, %v6441_v5  ;;  %vm751_vm7 = vcmp.eq.s32.totalorder %v6453_v10, %v6443_v6  ;;  %p5179_p8 = scmp.ne.s32.totalorder %s6215_s24, 1 }
  0x76   : > { %9952 = vst [vmem:[#allocation32_spill] sm:$0xff] %v6453_v10  ;;  %vm555_vm2 = vcmp.eq.s32.totalorder %v6439_v2, %v6448_v8  ;;  %vm587_vm3 = vcmp.eq.s32.totalorder %v6446_v7, %v6448_v8  ;;  %v5051_v13 = vsel %vm748_vm0, 1.0, %v9744_v12  ;;  %v5052_v14 = vsel %vm749_vm1, 1.0, %v9744_v12 }
  0x77   : > { %9953 = vst [vmem:[#allocation33_spill] sm:$0xff] %v6456_v11  ;;  %v4988_v15 = vsel %vm555_vm2, 1.0, %v9744_v12  ;;  %v5020_v16 = vsel %vm587_vm3, 1.0, %v9744_v12  ;;  %v5534_v17 = vpack.i.bf16 %v5051_v13, %v5052_v14  ;;  %vm554_vm4 = vcmp.eq.s32.totalorder %v6439_v2, %v6450_v9 }
  0x78   : > { %v5422_v18 = vpack.i.bf16 %v5020_v16, %v4988_v15  ;;  %vm586_vm5 = vcmp.eq.s32.totalorder %v6446_v7, %v6450_v9  ;;  %v4987_v19 = vsel %vm554_vm4, 1.0, %v9744_v12  ;;  %v5053_v22 = vsel %vm750_vm6, 1.0, %v9744_v12  ;;  %9954 = vst [vmem:[#allocation34_spill] sm:$0xff] %v6493_v23 }
  0x79   : > { %v5019_v20 = vsel %vm586_vm5, 1.0, %v9744_v12  ;;  %5535 = vxpose.xlu1.b32.start [1/16] %v5534_v17, 128  ;;  %vm557_vm8 = vcmp.eq.s32.totalorder %v6453_v10, %v6448_v8  ;;  %v5054_v24 = vsel %vm751_vm7, 1.0, %v9744_v12  ;;  %vm589_vm9 = vcmp.eq.s32.totalorder %v6456_v11, %v6448_v8  ;;  %9955 = vst [vmem:[#allocation35_spill] sm:$0xff] %v6510_v31 }
  0x7a   : > { %5423 = vxpose.xlu0.b32.start [1/16] %v5422_v18, 128  ;;  %v5646_v21 = vpack.i.bf16 %v5019_v20, %v4987_v19  ;;  %v4990_v25 = vsel %vm557_vm8, 1.0, %v9744_v12  ;;  %vm556_vm10 = vcmp.eq.s32.totalorder %v6453_v10, %v6450_v9  ;;  %v5022_v26 = vsel %vm589_vm9, 1.0, %v9744_v12 }
  0x7b   : > { %vm588_vm11 = vcmp.eq.s32.totalorder %v6456_v11, %v6450_v9  ;;  %v4989_v27 = vsel %vm556_vm10, 1.0, %v9744_v12  ;;  %v5536_v29 = vpack.i.bf16 %v5053_v22, %v5054_v24  ;;  %v5424_v30 = vpack.i.bf16 %v5022_v26, %v4990_v25 }
  0x7c   : > { %5647 = vxpose.xlu2.b32.start [1/16] %v5646_v21, 128  ;;  %v5021_v28 = vsel %vm588_vm11, 1.0, %v9744_v12  ;;  %vm752_vm12 = vcmp.eq.s32.totalorder %v6493_v23, %v6441_v5  ;;  %vm753_vm13 = vcmp.eq.s32.totalorder %v6493_v23, %v6443_v6  ;;  %vm559_vm14 = vcmp.eq.s32.totalorder %v6493_v23, %v6448_v8 }
  0x7d   : > { %v5648_v32 = vpack.i.bf16 %v5021_v28, %v4989_v27  ;;  %vm591_vm15 = vcmp.eq.s32.totalorder %v6510_v31, %v6448_v8  ;;  %v5055_v33 = vsel %vm752_vm12, 1.0, %v9744_v12  ;;  %vm558_vm2 = vcmp.eq.s32.totalorder %v6493_v23, %v6450_v9 }
  0x7e   : > { %vm590_vm3 = vcmp.eq.s32.totalorder %v6510_v31, %v6450_v9  ;;  %v5056_v34 = vsel %vm753_vm13, 1.0, %v9744_v12  ;;  %v4992_v35 = vsel %vm559_vm14, 1.0, %v9744_v12  ;;  %v5024_v36 = vsel %vm591_vm15, 1.0, %v9744_v12 }
  0x7f   : > { %v6535_v37 = vadd.s32 24, %v6439_v2  ;;  %v6538_v38 = vadd.s32 152, %v6439_v2  ;;  %v4991_v39 = vsel %vm558_vm2, 1.0, %v9744_v12  ;;  %v5023_v40 = vsel %vm590_vm3, 1.0, %v9744_v12 }
  0x80   : > { %v5538_v41 = vpack.i.bf16 %v5055_v33, %v5056_v34  ;;  %v5426_v42 = vpack.i.bf16 %v5024_v36, %v4992_v35  ;;  %v5650_v43 = vpack.i.bf16 %v5023_v40, %v4991_v39  ;;  %v6567_v50 = vadd.s32 32, %v6439_v2 }
  0x81   : > { %5537 = vxpose.xlu1.b32.cont [2/16] %v5536_v29, 128  ;;  %9956 = vst [vmem:[#allocation36_spill] sm:$0xff] %v6535_v37  ;;  %vm9926_vm4 = vcmp.eq.s32.totalorder %v6535_v37, %v6441_v5  ;;  %vm755_vm5 = vcmp.eq.s32.totalorder %v6535_v37, %v6443_v6  ;;  %vm561_vm8 = vcmp.eq.s32.totalorder %v6535_v37, %v6448_v8  ;;  %v6570_v51 = vadd.s32 160, %v6439_v2 }
  0x82   : > { %5425 = vxpose.xlu0.b32.cont [2/16] %v5424_v30, 128  ;;  %9957 = vst [vmem:[#allocation37_spill] sm:$0xff] %v6538_v38  ;;  %vm593_vm9 = vcmp.eq.s32.totalorder %v6538_v38, %v6448_v8  ;;  %vm560_vm10 = vcmp.eq.s32.totalorder %v6535_v37, %v6450_v9  ;;  %vm592_vm11 = vcmp.eq.s32.totalorder %v6538_v38, %v6450_v9  ;;  %v5057_v44 = vsel %vm9926_vm4, 1.0, %v9744_v12 }
  0x83   : > { %v5058_v45 = vsel %vm755_vm5, 1.0, %v9744_v12  ;;  %v4994_v46 = vsel %vm561_vm8, 1.0, %v9744_v12  ;;  %v5026_v47 = vsel %vm593_vm9, 1.0, %v9744_v12  ;;  %v4993_v48 = vsel %vm560_vm10, 1.0, %v9744_v12  ;;  %9958 = vst [vmem:[#allocation38_spill] sm:$0xff] %v6567_v50 }
  0x84   : > { %5649 = vxpose.xlu2.b32.cont [2/16] %v5648_v32, 128  ;;  %v5025_v49 = vsel %vm592_vm11, 1.0, %v9744_v12  ;;  %9959 = vst [vmem:[#allocation39_spill] sm:$0xff] %v6570_v51  ;;  %v5540_v52 = vpack.i.bf16 %v5057_v44, %v5058_v45  ;;  %v5428_v53 = vpack.i.bf16 %v5026_v47, %v4994_v46  ;;  %vm9924_vm14 = vcmp.eq.s32.totalorder %v6567_v50, %v6441_v5 }
  0x85   : > { %v5652_v54 = vpack.i.bf16 %v5025_v49, %v4993_v48  ;;  %vm9925_vm15 = vcmp.eq.s32.totalorder %v6567_v50, %v6443_v6  ;;  %vm563_vm2 = vcmp.eq.s32.totalorder %v6567_v50, %v6448_v8  ;;  %vm595_vm3 = vcmp.eq.s32.totalorder %v6570_v51, %v6448_v8 }
  0x86   : > { %vm562_vm8 = vcmp.eq.s32.totalorder %v6567_v50, %v6450_v9  ;;  %vm594_vm9 = vcmp.eq.s32.totalorder %v6570_v51, %v6450_v9  ;;  %v6585_v55 = vadd.s32 40, %v6439_v2  ;;  %v5059_v56 = vsel %vm9924_vm14, 1.0, %v9744_v12 }
  0x87   : > { %v5060_v57 = vsel %vm9925_vm15, 1.0, %v9744_v12  ;;  %v4996_v58 = vsel %vm563_vm2, 1.0, %v9744_v12  ;;  %v5028_v59 = vsel %vm595_vm3, 1.0, %v9744_v12  ;;  %v6598_v60 = vadd.s32 168, %v6439_v2 }
  0x88   : > { %9960 = vst [vmem:[#allocation40_spill] sm:$0xff] %v6585_v55  ;;  %v4995_v61 = vsel %vm562_vm8, 1.0, %v9744_v12  ;;  %v5027_v62 = vsel %vm594_vm9, 1.0, %v9744_v12  ;;  %v5542_v63 = vpack.i.bf16 %v5059_v56, %v5060_v57  ;;  %v5430_v0 = vpack.i.bf16 %v5028_v59, %v4996_v58 }
  0x89   : > { %5539 = vxpose.xlu1.b32.cont [3/16] %v5538_v41, 128  ;;  %9961 = vst [vmem:[#allocation41_spill] sm:$0xff] %v6598_v60  ;;  %vm9719_vm10 = vcmp.eq.s32.totalorder %v6585_v55, %v6441_v5  ;;  %v5654_v1 = vpack.i.bf16 %v5027_v62, %v4995_v61  ;;  %vm9720_vm11 = vcmp.eq.s32.totalorder %v6585_v55, %v6443_v6  ;;  %v6615_v3 = vadd.s32 48, %v6439_v2 }
  0x8a   : > { %5427 = vxpose.xlu0.b32.cont [3/16] %v5426_v42, 128  ;;  %vm565_vm2 = vcmp.eq.s32.totalorder %v6585_v55, %v6448_v8  ;;  %vm597_vm3 = vcmp.eq.s32.totalorder %v6598_v60, %v6448_v8  ;;  %vm564_vm8 = vcmp.eq.s32.totalorder %v6585_v55, %v6450_v9  ;;  %vm596_vm9 = vcmp.eq.s32.totalorder %v6598_v60, %v6450_v9 }
  0x8b   : > { %9962 = vst [vmem:[#allocation42_spill] sm:$0xff] %v6615_v3  ;;  %v5061_v4 = vsel %vm9719_vm10, 1.0, %v9744_v12  ;;  %v5062_v13 = vsel %vm9720_vm11, 1.0, %v9744_v12  ;;  %v4998_v14 = vsel %vm565_vm2, 1.0, %v9744_v12  ;;  %v5030_v15 = vsel %vm597_vm3, 1.0, %v9744_v12 }
  0x8c   : > { %5651 = vxpose.xlu2.b32.cont [3/16] %v5650_v43, 128  ;;  %v6628_v16 = vadd.s32 176, %v6439_v2  ;;  %v4997_v17 = vsel %vm564_vm8, 1.0, %v9744_v12  ;;  %v5029_v18 = vsel %vm596_vm9, 1.0, %v9744_v12  ;;  %v5544_v19 = vpack.i.bf16 %v5061_v4, %v5062_v13 }
  0x8d   : > { %v5432_v20 = vpack.i.bf16 %v5030_v15, %v4998_v14  ;;  %vm9721_vm10 = vcmp.eq.s32.totalorder %v6615_v3, %v6441_v5  ;;  %v5656_v21 = vpack.i.bf16 %v5029_v18, %v4997_v17  ;;  %vm9722_vm11 = vcmp.eq.s32.totalorder %v6615_v3, %v6443_v6 }
  0x8e   : > { %9963 = vst [vmem:[#allocation43_spill] sm:$0xff] %v6628_v16  ;;  %vm567_vm2 = vcmp.eq.s32.totalorder %v6615_v3, %v6448_v8  ;;  %vm599_vm3 = vcmp.eq.s32.totalorder %v6628_v16, %v6448_v8  ;;  %v5063_v22 = vsel %vm9721_vm10, 1.0, %v9744_v12  ;;  %vm566_vm8 = vcmp.eq.s32.totalorder %v6615_v3, %v6450_v9 }
  0x8f   : > { %vm598_vm9 = vcmp.eq.s32.totalorder %v6628_v16, %v6450_v9  ;;  %v5064_v24 = vsel %vm9722_vm11, 1.0, %v9744_v12  ;;  %v5000_v25 = vsel %vm567_vm2, 1.0, %v9744_v12  ;;  %v5032_v26 = vsel %vm599_vm3, 1.0, %v9744_v12 }
  0x90   : > { %v6655_v27 = vadd.s32 56, %v6439_v2  ;;  %v6658_v28 = vadd.s32 184, %v6439_v2  ;;  %v4999_v29 = vsel %vm566_vm8, 1.0, %v9744_v12  ;;  %v5031_v30 = vsel %vm598_vm9, 1.0, %v9744_v12 }
  0x91   : > { %5541 = vxpose.xlu1.b32.cont [4/16] %v5540_v52, 128  ;;  %v5546_v32 = vpack.i.bf16 %v5063_v22, %v5064_v24  ;;  %v5434_v33 = vpack.i.bf16 %v5032_v26, %v5000_v25  ;;  %v5658_v34 = vpack.i.bf16 %v5031_v30, %v4999_v29  ;;  %v6685_v41 = vadd.s32 64, %v6439_v2 }
  0x92   : > { %5429 = vxpose.xlu0.b32.cont [4/16] %v5428_v53, 128  ;;  %9964 = vst [vmem:[#allocation44_spill] sm:$0xff] %v6655_v27  ;;  %vm9723_vm10 = vcmp.eq.s32.totalorder %v6655_v27, %v6441_v5  ;;  %vm9724_vm2 = vcmp.eq.s32.totalorder %v6655_v27, %v6443_v6  ;;  %vm569_vm3 = vcmp.eq.s32.totalorder %v6655_v27, %v6448_v8  ;;  %v6688_v42 = vadd.s32 192, %v6439_v2 }
  0x93   : > { %9965 = vst [vmem:[#allocation45_spill] sm:$0xff] %v6658_v28  ;;  %vm601_vm11 = vcmp.eq.s32.totalorder %v6658_v28, %v6448_v8  ;;  %v5065_v35 = vsel %vm9723_vm10, 1.0, %v9744_v12  ;;  %vm568_vm8 = vcmp.eq.s32.totalorder %v6655_v27, %v6450_v9  ;;  %vm600_vm9 = vcmp.eq.s32.totalorder %v6658_v28, %v6450_v9 }
  0x94   : > { %5653 = vxpose.xlu2.b32.cont [4/16] %v5652_v54, 128  ;;  %v5066_v36 = vsel %vm9724_vm2, 1.0, %v9744_v12  ;;  %v5002_v39 = vsel %vm569_vm3, 1.0, %v9744_v12  ;;  %v5034_v40 = vsel %vm601_vm11, 1.0, %v9744_v12  ;;  %9966 = vst [vmem:[#allocation46_spill] sm:$0xff] %v6685_v41  ;;  %v5001_v43 = vsel %vm568_vm8, 1.0, %v9744_v12 }
  0x95   : > { %9967 = vst [vmem:[#allocation47_spill] sm:$0xff] %v6688_v42  ;;  %v5033_v44 = vsel %vm600_vm9, 1.0, %v9744_v12  ;;  %v5548_v45 = vpack.i.bf16 %v5065_v35, %v5066_v36  ;;  %v5436_v46 = vpack.i.bf16 %v5034_v40, %v5002_v39  ;;  %vm9725_vm10 = vcmp.eq.s32.totalorder %v6685_v41, %v6441_v5 }
  0x96   : > { %v5660_v47 = vpack.i.bf16 %v5033_v44, %v5001_v43  ;;  %vm9726_vm11 = vcmp.eq.s32.totalorder %v6685_v41, %v6443_v6  ;;  %vm571_vm3 = vcmp.eq.s32.totalorder %v6685_v41, %v6448_v8  ;;  %vm603_vm2 = vcmp.eq.s32.totalorder %v6688_v42, %v6448_v8 }
  0x97   : > { %v5067_v48 = vsel %vm9725_vm10, 1.0, %v9744_v12  ;;  %vm570_vm8 = vcmp.eq.s32.totalorder %v6685_v41, %v6450_v9  ;;  %vm602_vm9 = vcmp.eq.s32.totalorder %v6688_v42, %v6450_v9  ;;  %v5068_v49 = vsel %vm9726_vm11, 1.0, %v9744_v12 }
  0x98   : > { %v5004_v52 = vsel %vm571_vm3, 1.0, %v9744_v12  ;;  %v5036_v53 = vsel %vm603_vm2, 1.0, %v9744_v12  ;;  %v6715_v54 = vadd.s32 72, %v6439_v2  ;;  %v6718_v56 = vadd.s32 200, %v6439_v2 }
  0x99   : > { %5543 = vxpose.xlu1.b32.cont [5/16] %v5542_v63, 128  ;;  %v5003_v57 = vsel %vm570_vm8, 1.0, %v9744_v12  ;;  %v5035_v58 = vsel %vm602_vm9, 1.0, %v9744_v12  ;;  %v5550_v59 = vpack.i.bf16 %v5067_v48, %v5068_v49  ;;  %v5438_v61 = vpack.i.bf16 %v5036_v53, %v5004_v52 }
  0x9a   : > { %5431 = vxpose.xlu0.b32.cont [5/16] %v5430_v0, 128  ;;  %9968 = vst [vmem:[#allocation48_spill] sm:$0xff] %v6715_v54  ;;  %vm9727_vm10 = vcmp.eq.s32.totalorder %v6715_v54, %v6441_v5  ;;  %v5662_v62 = vpack.i.bf16 %v5035_v58, %v5003_v57  ;;  %vm9728_vm2 = vcmp.eq.s32.totalorder %v6715_v54, %v6443_v6  ;;  %v6745_v13 = vadd.s32 80, %v6439_v2 }
  0x9b   : > { %9969 = vst [vmem:[#allocation49_spill] sm:$0xff] %v6718_v56  ;;  %vm573_vm3 = vcmp.eq.s32.totalorder %v6715_v54, %v6448_v8  ;;  %vm605_vm11 = vcmp.eq.s32.totalorder %v6718_v56, %v6448_v8  ;;  %v5069_v63 = vsel %vm9727_vm10, 1.0, %v9744_v12  ;;  %vm572_vm8 = vcmp.eq.s32.totalorder %v6715_v54, %v6450_v9 }
  0x9c   : > { %5655 = vxpose.xlu2.b32.cont [5/16] %v5654_v1, 128  ;;  %vm604_vm9 = vcmp.eq.s32.totalorder %v6718_v56, %v6450_v9  ;;  %v5070_v0 = vsel %vm9728_vm2, 1.0, %v9744_v12  ;;  %v5006_v1 = vsel %vm573_vm3, 1.0, %v9744_v12  ;;  %v5038_v4 = vsel %vm605_vm11, 1.0, %v9744_v12  ;;  %9970 = vst [vmem:[#allocation50_spill] sm:$0xff] %v6745_v13 }
  0x9d   : > { %v6748_v14 = vadd.s32 208, %v6439_v2  ;;  %v5005_v15 = vsel %vm572_vm8, 1.0, %v9744_v12  ;;  %v5037_v17 = vsel %vm604_vm9, 1.0, %v9744_v12  ;;  %v5552_v18 = vpack.i.bf16 %v5069_v63, %v5070_v0 }
  0x9e   : > { %vm9729_vm10 = vcmp.eq.s32.totalorder %v6745_v13, %v6441_v5  ;;  %vm9730_vm11 = vcmp.eq.s32.totalorder %v6745_v13, %v6443_v6  ;;  %vm575_vm3 = vcmp.eq.s32.totalorder %v6745_v13, %v6448_v8  ;;  %vm574_vm8 = vcmp.eq.s32.totalorder %v6745_v13, %v6450_v9  ;;  %v7049_v13 = vld [vmem:[#allocation2 + $0x90] sm:$0xff] }
  0x9f   : > { %9971 = vst [vmem:[#allocation51_spill] sm:$0xff] %v6748_v14  ;;  %vm607_vm2 = vcmp.eq.s32.totalorder %v6748_v14, %v6448_v8  ;;  %vm606_vm9 = vcmp.eq.s32.totalorder %v6748_v14, %v6450_v9  ;;  %v5072_v22 = vsel %vm9730_vm11, 1.0, %v9744_v12  ;;  %v5008_v24 = vsel %vm575_vm3, 1.0, %v9744_v12 }
  0xa0   : > { %v5040_v25 = vsel %vm607_vm2, 1.0, %v9744_v12  ;;  %v6775_v26 = vadd.s32 88, %v6439_v2  ;;  %v6778_v29 = vadd.s32 216, %v6439_v2  ;;  %v5007_v30 = vsel %vm574_vm8, 1.0, %v9744_v12  ;;  %10011 = vst [vmem:[#allocation90_spill] sm:$0xff] %v7049_v13 }
  0xa1   : > { %5545 = vxpose.xlu1.b32.cont [6/16] %v5544_v19, 128  ;;  %v5440_v19 = vpack.i.bf16 %v5038_v4, %v5006_v1  ;;  %v6805_v44 = vadd.s32 96, %v6439_v2  ;;  %v6840_v0 = vadd.s32 232, %v6439_v2  ;;  %v6843_v1 = vld [vmem:[%s6434_s6 + $0x8] sm:$0xff]  ;;  %v6845_v4 = vld [vmem:[#allocation2 + $0x78] sm:$0xff] }
  0xa2   : > { %5433 = vxpose.xlu0.b32.cont [6/16] %v5432_v20, 128  ;;  %v5664_v20 = vpack.i.bf16 %v5037_v17, %v5005_v15  ;;  %9972 = vst [vmem:[#allocation52_spill] sm:$0xff] %v6775_v26  ;;  %vm9732_vm2 = vcmp.eq.s32.totalorder %v6775_v26, %v6443_v6  ;;  %vm577_vm3 = vcmp.eq.s32.totalorder %v6775_v26, %v6448_v8  ;;  %v6847_v15 = vld [vmem:[#allocation2 + $0xf8] sm:$0xff]  ;;  %v6851_v17 = vld [vmem:[#allocation2 + $0x70] sm:$0xff] }
  0xa3   : > { %9973 = vst [vmem:[#allocation53_spill] sm:$0xff] %v6778_v29  ;;  %vm609_vm11 = vcmp.eq.s32.totalorder %v6778_v29, %v6448_v8  ;;  %vm576_vm8 = vcmp.eq.s32.totalorder %v6775_v26, %v6450_v9  ;;  %v5074_v39 = vsel %vm9732_vm2, 1.0, %v9744_v12  ;;  %v5010_v40 = vsel %vm577_vm3, 1.0, %v9744_v12  ;;  %1068 = vmatpush.msra.mxu0 %v6845_v4  ;;  %1181 = vmatpush.msra.mxu1 %v6847_v15 }
  0xa4   : > { %5657 = vxpose.xlu2.b32.cont [6/16] %v5656_v21, 128  ;;  %v5071_v21 = vsel %vm9729_vm10, 1.0, %v9744_v12  ;;  %vm9731_vm10 = vcmp.eq.s32.totalorder %v6775_v26, %v6441_v5  ;;  %v5042_v43 = vsel %vm609_vm11, 1.0, %v9744_v12  ;;  %9974 = vst [vmem:[#allocation54_spill] sm:$0xff] %v6805_v44  ;;  %vm9734_vm11 = vcmp.eq.s32.totalorder %v6805_v44, %v6443_v6  ;;  %1422 = vmatpush.msra.mxu2 %v6845_v4  ;;  %v7047_v26 = vld [vmem:[#allocation2 + $0x10] sm:$0xff] }
  0xa5   : > { %v5073_v36 = vsel %vm9731_vm10, 1.0, %v9744_v12  ;;  %v5444_v49 = vpack.i.bf16 %v5042_v43, %v5010_v40  ;;  %vm9733_vm10 = vcmp.eq.s32.totalorder %v6805_v44, %v6441_v5  ;;  %vm579_vm3 = vcmp.eq.s32.totalorder %v6805_v44, %v6448_v8  ;;  %9977 = vst [vmem:[#allocation57_spill] sm:$0xff] %v6840_v0  ;;  %5188 = vmatpush.msra.mxu3 %v6845_v4 }
  0xa6   : > { %v5556_v48 = vpack.i.bf16 %v5073_v36, %v5074_v39  ;;  %v5075_v53 = vsel %vm9733_vm10, 1.0, %v9744_v12  ;;  %v5076_v57 = vsel %vm9734_vm11, 1.0, %v9744_v12  ;;  %v5012_v58 = vsel %vm579_vm3, 1.0, %v9744_v12  ;;  %9978 = vst [vmem:[#allocation58_spill] sm:$0xff] %v6843_v1  ;;  %1069 = vmatpush.msra.mxu0 %v6851_v17  ;;  %1423 = vmatpush.msra.mxu2 %v6851_v17  ;;  %v6992_v1 = vld [vmem:[#allocation2 + $0xb0] sm:$0xff] }
  0xa7   : > { %9979 = vst [vmem:[#allocation59_spill] sm:$0xff] %v6845_v4  ;;  %5189 = vmatpush.msra.mxu3 %v6851_v17  ;;  %vm612_vm11 = vcmp.eq.s32.totalorder %v6840_v0, %v6450_v9  ;;  %v6904_v40 = vadd.s32 112, %v6439_v2 }
  0xa8   : > { %9980 = vst [vmem:[#allocation60_spill] sm:$0xff] %v6847_v15 }
  0xa9   : > { %5547 = vxpose.xlu1.b32.cont [7/16] %v5546_v32, 128  ;;  %v5039_v32 = vsel %vm606_vm9, 1.0, %v9744_v12  ;;  %vm608_vm9 = vcmp.eq.s32.totalorder %v6778_v29, %v6450_v9  ;;  %9981 = vst [vmem:[#allocation61_spill] sm:$0xff] %v6851_v17 }
  0xaa   : > { %5435 = vxpose.xlu0.b32.cont [7/16] %v5434_v33, 128  ;;  %v5554_v33 = vpack.i.bf16 %v5071_v21, %v5072_v22  ;;  %v5666_v35 = vpack.i.bf16 %v5039_v32, %v5007_v30  ;;  %v6855_v21 = vld [vmem:[#allocation2 + $0x68] sm:$0xff]  ;;  %v6873_v30 = vld [vmem:[#allocation2 + $0xe0] sm:$0xff]  ;;  %9989 = vst [vmem:[#allocation69_spill] sm:$0xff] %v6904_v40 }
  0xab   : > { %9983 = vst [vmem:[#allocation63_spill] sm:$0xff] %v6855_v21  ;;  %v6857_v22 = vld [vmem:[#allocation2 + $0xe8] sm:$0xff]  ;;  %1070 = vmatpush.msra.mxu0 %v6855_v21  ;;  %1424 = vmatpush.msra.mxu2 %v6855_v21 }
  0xac   : > { %5659 = vxpose.xlu2.b32.cont [7/16] %v5658_v34, 128  ;;  %v5442_v34 = vpack.i.bf16 %v5040_v25, %v5008_v24  ;;  %9984 = vst [vmem:[#allocation64_spill] sm:$0xff] %v6857_v22  ;;  %v6871_v25 = vld [vmem:[#allocation2 + $0x60] sm:$0xff]  ;;  %5190 = vmatpush.msra.mxu3 %v6855_v21 }
  0xad   : > { %9985 = vst [vmem:[#allocation65_spill] sm:$0xff] %v6871_v25  ;;  %1071 = vmatpush.msra.mxu0 %v6871_v25  ;;  %1425 = vmatpush.msra.mxu2 %v6871_v25 }
  0xae   : > { %9986 = vst [vmem:[#allocation66_spill] sm:$0xff] %v6873_v30  ;;  %5191 = vmatpush.msra.mxu3 %v6871_v25 }
  0xaf   : > { %10002 = vst [vmem:[#allocation82_spill] sm:$0xff] %v6992_v1 }
  0xb0   : > { %10010 = vst [vmem:[#allocation89_spill] sm:$0xff] %v7047_v26 }
  0xb1   : > { %5549 = vxpose.xlu1.b32.cont [8/16] %v5548_v45, 128  ;;  %v6808_v45 = vadd.s32 224, %v6439_v2 }
  0xb2   : > { %5437 = vxpose.xlu0.b32.cont [8/16] %v5436_v46, 128  ;;  %v5009_v46 = vsel %vm576_vm8, 1.0, %v9744_v12  ;;  %vm578_vm8 = vcmp.eq.s32.totalorder %v6805_v44, %v6450_v9  ;;  %v6999_v44 = vld [vmem:[#allocation2 + $0xa8] sm:$0xff] }
  0xb3   : > { %9975 = vst [vmem:[#allocation55_spill] sm:$0xff] %v6808_v45  ;;  %vm611_vm2 = vcmp.eq.s32.totalorder %v6808_v45, %v6448_v8 }
  0xb4   : > { %5661 = vxpose.xlu2.b32.cont [8/16] %v5660_v47, 128  ;;  %v5041_v47 = vsel %vm608_vm9, 1.0, %v9744_v12  ;;  %vm610_vm9 = vcmp.eq.s32.totalorder %v6808_v45, %v6450_v9  ;;  %10004 = vst [vmem:[#allocation84_spill] sm:$0xff] %v6999_v44 }
  0xb5   : > { %v5668_v52 = vpack.i.bf16 %v5041_v47, %v5009_v46  ;;  %v5043_v63 = vsel %vm610_vm9, 1.0, %v9744_v12  ;;  %vm613_vm9 = vcmp.eq.s32.totalorder %v6840_v0, %v6448_v8  ;;  %v5045_v46 = vsel %vm612_vm11, 1.0, %v9744_v12 }
  0xb6   : > { %v5046_v39 = vsel %vm613_vm9, 1.0, %v9744_v12  ;;  %v6917_v47 = vadd.s32 240, %v6439_v2  ;;  %vm9747_vm11 = vcmp.eq.s32.totalorder %v6904_v40, %v6443_v6 }
  0xb8   : > { %9990 = vst [vmem:[#allocation70_spill] sm:$0xff] %v6917_v47  ;;  %vm615_vm9 = vcmp.eq.s32.totalorder %v6917_v47, %v6448_v8 }
  0xb9   : > { %5551 = vxpose.xlu1.b32.cont [9/16] %v5550_v59, 128  ;;  %v5044_v59 = vsel %vm611_vm2, 1.0, %v9744_v12 }
  0xba   : > { %5439 = vxpose.xlu0.b32.cont [9/16] %v5438_v61, 128  ;;  %v6835_v61 = vadd.s32 104, %v6439_v2 }
  0xbc   : > { %5663 = vxpose.xlu2.b32.cont [9/16] %v5662_v62, 128  ;;  %9976 = vst [vmem:[#allocation56_spill] sm:$0xff] %v6835_v61  ;;  %v5011_v62 = vsel %vm578_vm8, 1.0, %v9744_v12  ;;  %vm9735_vm2 = vcmp.eq.s32.totalorder %v6835_v61, %v6441_v5  ;;  %vm9736_vm3 = vcmp.eq.s32.totalorder %v6835_v61, %v6443_v6  ;;  %vm581_vm8 = vcmp.eq.s32.totalorder %v6835_v61, %v6448_v8 }
  0xbd   : > { %v5670_v24 = vpack.i.bf16 %v5043_v63, %v5011_v62  ;;  %vm580_vm10 = vcmp.eq.s32.totalorder %v6835_v61, %v6450_v9  ;;  %v5077_v32 = vsel %vm9735_vm2, 1.0, %v9744_v12  ;;  %v5014_v36 = vsel %vm581_vm8, 1.0, %v9744_v12  ;;  %v6942_v62 = vld [vmem:[#allocation2 + $0x40] sm:$0xff]  ;;  %v6997_v61 = vld [vmem:[#allocation2 + $0x28] sm:$0xff] }
  0xbe   : > { %v5013_v43 = vsel %vm580_vm10, 1.0, %v9744_v12  ;;  %vm9746_vm10 = vcmp.eq.s32.totalorder %v6904_v40, %v6441_v5  ;;  %vm583_vm8 = vcmp.eq.s32.totalorder %v6904_v40, %v6448_v8  ;;  %9995 = vst [vmem:[#allocation75_spill] sm:$0xff] %v6942_v62  ;;  %v6944_v63 = vld [vmem:[#allocation2 + $0xc0] sm:$0xff]  ;;  %vm582_vm2 = vcmp.eq.s32.totalorder %v6904_v40, %v6450_v9 }
  0xbf   : > { %9996 = vst [vmem:[#allocation76_spill] sm:$0xff] %v6944_v63 }
  0xc0   : > { %10003 = vst [vmem:[#allocation83_spill] sm:$0xff] %v6997_v61 }
  0xc1   : > { %5553 = vxpose.xlu1.b32.cont [10/16] %v5552_v18, 128  ;;  %v6853_v18 = vld [vmem:[#allocation2 + $0xf0] sm:$0xff] }
  0xc2   : > { %5441 = vxpose.xlu0.b32.cont [10/16] %v5440_v19, 128  ;;  %9982 = vst [vmem:[#allocation62_spill] sm:$0xff] %v6853_v18  ;;  %v5558_v19 = vpack.i.bf16 %v5075_v53, %v5076_v57  ;;  %1182 = vmatpush.msra.mxu1 %v6853_v18  ;;  %v5448_v53 = vpack.i.bf16 %v5046_v39, %v5014_v36  ;;  %v6926_v57 = vld [vmem:[#allocation2 + $0x48] sm:$0xff]  ;;  %v5048_v36 = vsel %vm615_vm9, 1.0, %v9744_v12  ;;  %v6975_v39 = vadd.s32 120, %v6439_v2 }
  0xc3   : > { %9993 = vst [vmem:[#allocation73_spill] sm:$0xff] %v6926_v57 }
  0xc4   : > { %5665 = vxpose.xlu2.b32.cont [10/16] %v5664_v20, 128  ;;  %v5446_v20 = vpack.i.bf16 %v5044_v59, %v5012_v58  ;;  %1183 = vmatpush.msra.mxu1 %v6857_v22  ;;  %v6928_v58 = vld [vmem:[#allocation2 + $0xc8] sm:$0xff]  ;;  %v5672_v59 = vpack.i.bf16 %v5045_v46, %v5013_v43  ;;  %9999 = vst [vmem:[#allocation79_spill] sm:$0xff] %v6975_v39  ;;  %v5015_v43 = vsel %vm582_vm2, 1.0, %v9744_v12 }
  0xc5   : > { %9994 = vst [vmem:[#allocation74_spill] sm:$0xff] %v6928_v58  ;;  %vm9839_vm2 = vcmp.eq.s32.totalorder %v6975_v39, %v6441_v5 }
  0xc6   : > { %1184 = vmatpush.msra.mxu1 %v6873_v30 }
  0xc9   : > { %5555 = vxpose.xlu1.b32.cont [11/16] %v5554_v33, 128  ;;  %v6887_v33 = vld [vmem:[#allocation2 + $0x58] sm:$0xff] }
  0xca   : > { %5443 = vxpose.xlu0.b32.cont [11/16] %v5442_v34, 128  ;;  %9987 = vst [vmem:[#allocation67_spill] sm:$0xff] %v6887_v33  ;;  %v6889_v34 = vld [vmem:[#allocation2 + $0xd8] sm:$0xff]  ;;  %1072 = vmatpush.msra.mxu0 %v6887_v33 }
  0xcb   : > { %9988 = vst [vmem:[#allocation68_spill] sm:$0xff] %v6889_v34  ;;  %1185 = vmatpush.msra.mxu1 %v6889_v34  ;;  %1426 = vmatpush.msra.mxu2 %v6887_v33 }
  0xcc   : > { %5667 = vxpose.xlu2.b32.cont [11/16] %v5666_v35, 128  ;;  %v5078_v35 = vsel %vm9736_vm3, 1.0, %v9744_v12  ;;  %vm614_vm3 = vcmp.eq.s32.totalorder %v6917_v47, %v6450_v9  ;;  %5192 = vmatpush.msra.mxu3 %v6887_v33 }
  0xcd   : > { %v5047_v46 = vsel %vm614_vm3, 1.0, %v9744_v12  ;;  %vm9923_vm3 = vcmp.eq.s32.totalorder %v6975_v39, %v6443_v6 }
  0xd1   : > { %5557 = vxpose.xlu1.b32.cont [12/16] %v5556_v48, 128  ;;  %v6919_v48 = vld [vmem:[#allocation2 + $0x50] sm:$0xff] }
  0xd2   : > { %5445 = vxpose.xlu0.b32.cont [12/16] %v5444_v49, 128  ;;  %9991 = vst [vmem:[#allocation71_spill] sm:$0xff] %v6919_v48  ;;  %v6921_v49 = vld [vmem:[#allocation2 + $0xd0] sm:$0xff]  ;;  %1073 = vmatpush.msra.mxu0 %v6919_v48 }
  0xd3   : > { %9992 = vst [vmem:[#allocation72_spill] sm:$0xff] %v6921_v49  ;;  %1186 = vmatpush.msra.mxu1 %v6921_v49  ;;  %1427 = vmatpush.msra.mxu2 %v6919_v48 }
  0xd4   : > { %5669 = vxpose.xlu2.b32.cont [12/16] %v5668_v52, 128  ;;  %v5560_v52 = vpack.i.bf16 %v5077_v32, %v5078_v35  ;;  %1074 = vmatpush.msra.mxu0 %v6926_v57  ;;  %v5080_v32 = vsel %vm9747_vm11, 1.0, %v9744_v12  ;;  %v5016_v35 = vsel %vm583_vm8, 1.0, %v9744_v12  ;;  %vm585_vm8 = vcmp.eq.s32.totalorder %v6975_v39, %v6448_v8 }
  0xd5   : > { %1187 = vmatpush.msra.mxu1 %v6928_v58  ;;  %v5450_v40 = vpack.i.bf16 %v5048_v36, %v5016_v35  ;;  %1428 = vmatpush.msra.mxu2 %v6926_v57  ;;  %v7025_v35 = vld [vmem:[#allocation2 + $0x18] sm:$0xff] }
  0xd6   : > { %1075 = vmatpush.msra.mxu0 %v6942_v62  ;;  %5193 = vmatpush.msra.mxu3 %v6919_v48  ;;  %10007 = vst [vmem:[#allocation87_spill] sm:$0xff] %v7025_v35  ;;  %v7027_v36 = vld [vmem:[#allocation2 + $0x98] sm:$0xff] }
  0xd7   : > { %1188 = vmatpush.msra.mxu1 %v6944_v63  ;;  %1429 = vmatpush.msra.mxu2 %v6942_v62  ;;  %10008 = vst [vmem:[#allocation88_spill] sm:$0xff] %v7027_v36 }
  0xd8   : > { %5194 = vmatpush.msra.mxu3 %v6926_v57 }
  0xd9   : > { %5559 = vxpose.xlu1.b32.cont [13/16] %v5558_v19, 128  ;;  %v5079_v19 = vsel %vm9746_vm10, 1.0, %v9744_v12  ;;  %v5674_v12 = vpack.i.bf16 %v5047_v46, %v5015_v43  ;;  %vm584_vm10 = vcmp.eq.s32.totalorder %v6975_v39, %v6450_v9  ;;  %v10009_v43 = vmov 0.0  }
  0xda   : > { %5447 = vxpose.xlu0.b32.cont [13/16] %v5446_v20, 128  ;;  %v6958_v20 = vld [vmem:[#allocation2 + $0x38] sm:$0xff]  ;;  %v5081_v46 = vsel %vm9839_vm2, 1.0, %v10009_v43  ;;  %v5017_v54 = vsel %vm584_vm10, 1.0, %v10009_v43  ;;  %5195 = vmatpush.msra.mxu3 %v6942_v62 }
  0xdb   : > { %9997 = vst [vmem:[#allocation77_spill] sm:$0xff] %v6958_v20  ;;  %1076 = vmatpush.msra.mxu0 %v6958_v20  ;;  %1430 = vmatpush.msra.mxu2 %v6958_v20 }
  0xdc   : > { %5671 = vxpose.xlu2.b32.cont [13/16] %v5670_v24, 128  ;;  %v6960_v24 = vld [vmem:[#allocation2 + $0xb8] sm:$0xff]  ;;  %5196 = vmatpush.msra.mxu3 %v6958_v20 }
  0xdd   : > { %9998 = vst [vmem:[#allocation78_spill] sm:$0xff] %v6960_v24  ;;  %1189 = vmatpush.msra.mxu1 %v6960_v24 }
  0xdf   : > { %1190 = vmatpush.msra.mxu1 %v6992_v1 }
  0xe1   : > { %5561 = vxpose.xlu1.b32.cont [14/16] %v5560_v52, 128  ;;  %v6988_v52 = vadd.s32 248, %v6439_v2  ;;  %1191 = vmatpush.msra.mxu1 %v6999_v44 }
  0xe2   : > { %5449 = vxpose.xlu0.b32.cont [14/16] %v5448_v53, 128  ;;  %v6990_v53 = vld [vmem:[#allocation2 + $0x30] sm:$0xff] }
  0xe3   : > { %10000 = vst [vmem:[#allocation80_spill] sm:$0xff] %v6988_v52  ;;  %1077 = vmatpush.msra.mxu0 %v6990_v53  ;;  %vm617_vm9 = vcmp.eq.s32.totalorder %v6988_v52, %v6448_v8  ;;  %vm616_vm11 = vcmp.eq.s32.totalorder %v6988_v52, %v6450_v9  ;;  %1431 = vmatpush.msra.mxu2 %v6990_v53 }
  0xe4   : > { %5673 = vxpose.xlu2.b32.cont [14/16] %v5672_v59, 128  ;;  %10001 = vst [vmem:[#allocation81_spill] sm:$0xff] %v6990_v53  ;;  %v5562_v59 = vpack.i.bf16 %v5079_v19, %v5080_v32  ;;  %v7013_v19 = vld [vmem:[#allocation2 + $0x20] sm:$0xff]  ;;  %v5050_v9 = vsel %vm617_vm9, 1.0, %v10009_v43  ;;  %v5049_v39 = vsel %vm616_vm11, 1.0, %v10009_v43  ;;  %5197 = vmatpush.msra.mxu3 %v6990_v53  ;;  %vm9829_vm10 = vcmp.eq.s32.totalorder %v6988_v52, %v6441_v5 }
  0xe5   : > { %10005 = vst [vmem:[#allocation85_spill] sm:$0xff] %v7013_v19  ;;  %v7015_v32 = vld [vmem:[#allocation2 + $0xa0] sm:$0xff]  ;;  %1078 = vmatpush.msra.mxu0 %v6997_v61  ;;  %1432 = vmatpush.msra.mxu2 %v6997_v61  ;;  %vm9830_vm11 = vcmp.eq.s32.totalorder %v6917_v47, %v6441_v5  ;;  %vm9832_vm9 = vcmp.eq.s32.totalorder %v6808_v45, %v6441_v5 }
  0xe6   : > { %10006 = vst [vmem:[#allocation86_spill] sm:$0xff] %v7015_v32  ;;  %1192 = vmatpush.msra.mxu1 %v7015_v32  ;;  %5198 = vmatpush.msra.mxu3 %v6997_v61 }
  0xe7   : > { %1079 = vmatpush.msra.mxu0 %v7013_v19  ;;  %1433 = vmatpush.msra.mxu2 %v7013_v19 }
  0xe8   : > { %1193 = vmatpush.msra.mxu1 %v7027_v36  ;;  %5199 = vmatpush.msra.mxu3 %v7013_v19 }
  0xe9   : > { %5563 = vxpose.xlu1.b32.cont [15/16] %v5562_v59, 128  ;;  %v5018_v59 = vsel %vm585_vm8, 1.0, %v10009_v43  ;;  %1080 = vmatpush.msra.mxu0 %v7025_v35  ;;  %vm9831_vm8 = vcmp.eq.s32.totalorder %v6840_v0, %v6441_v5 }
  0xea   : > { %5451 = vxpose.xlu0.b32.cont [15/16] %v5450_v40, 128  ;;  %v5082_v40 = vsel %vm9923_vm3, 1.0, %v10009_v43  ;;  %v5452_v41 = vpack.i.bf16 %v5050_v9, %v5018_v59  ;;  %1194 = vmatpush.msra.mxu1 %v7049_v13 }
  0xeb   : > { %v5564_v8 = vpack.i.bf16 %v5081_v46, %v5082_v40  ;;  %1081 = vmatpush.msra.mxu0 %v7047_v26  ;;  %v7064_v46 = vld [vmem:[#allocation2 + $0x8] sm:$0xff]  ;;  %1434 = vmatpush.msra.mxu2 %v7025_v35 }
  0xec   : > { %5675 = vxpose.xlu2.b32.cont [15/16] %v5674_v12, 128  ;;  %v5676_v12 = vpack.i.bf16 %v5049_v39, %v5017_v54  ;;  %10012 = vst [vmem:[#allocation91_spill] sm:$0xff] %v7064_v46  ;;  %v7066_v40 = vld [vmem:[#allocation2 + $0x88] sm:$0xff]  ;;  %v7070_v54 = vld [vmem:[#allocation2] sm:$0xff]  ;;  %5200 = vmatpush.msra.mxu3 %v7025_v35 }
  0xed   : > { %10013 = vst [vmem:[#allocation92_spill] sm:$0xff] %v7066_v40  ;;  %1082 = vmatpush.msra.mxu0 %v7064_v46  ;;  %1195 = vmatpush.msra.mxu1 %v7066_v40  ;;  %v7072_v39 = vld [vmem:[#allocation2 + $0x80] sm:$0xff] }
  0xee   : > { %10014 = vst [vmem:[#allocation93_spill] sm:$0xff] %v7070_v54  ;;  %1435 = vmatpush.msra.mxu2 %v7047_v26  ;;  %5201 = vmatpush.msra.mxu3 %v7047_v26 }
  0xef   : > { %10015 = vst [vmem:[#allocation94_spill] sm:$0xff] %v7072_v39  ;;  %1083 = vmatpush.msra.mxu0 %v7070_v54  ;;  %1196 = vmatpush.msra.mxu1 %v7072_v39 }
  0xf0   : > { %1436 = vmatpush.msra.mxu2 %v7064_v46  ;;  %5202 = vmatpush.msra.mxu3 %v7064_v46 }
  0xf1   : > { %5565 = vxpose.xlu1.b32.end [16/16] %v5564_v8, 128 }
  0xf2   : > { %5453 = vxpose.xlu0.b32.end [16/16] %v5452_v41, 128  ;;  %1437 = vmatpush.msra.mxu2 %v7070_v54 }
  0xf3   : > { %5203 = vmatpush.msra.mxu3 %v7070_v54 }
  0xf4   : > { %5677 = vxpose.xlu2.b32.end [16/16] %v5676_v12, 128 }
 0x115   : > { %v5678_v41 = vpop.trf.xlu2 }
 0x116   : > { %v5679_v59 = vunpack.i.l.bf16 %v5678_v41  ;;  %v5682_v9 = vunpack.i.h.bf16 %v5678_v41 }
 0x118   : > { %1084 = vmatmul.f32.vlgmr.msra.gmra.mxu0 %v5679_v59  ;;  %1197 = vmatmul.f32.vlgmr.msra.gmra.mxu1 %v5682_v9 }
 0x11d   : > { %v5683_v8 = vpop.trf.xlu2  ;;  %v7087_v12 = vpop.trf.xlu1 }
 0x11e   : > { %v7089_v27 = vpop.trf.xlu0  ;;  %v5684_v3 = vunpack.i.l.bf16 %v5683_v8  ;;  %v5687_v55 = vunpack.i.h.bf16 %v5683_v8  ;;  %v5570_v50 = vunpack.i.h.bf16 %v7087_v12 }
 0x120   : > { %1087 = vmatmul.f32.gmra.mxu0 %v5684_v3  ;;  %1200 = vmatmul.f32.gmra.mxu1 %v5687_v55 }
 0x121   : > { %1438 = vmatmul.f32.vlgmr.msra.gmra.mxu2 %v5570_v50 }
 0x125   : > { %v5688_v37 = vpop.trf.xlu2  ;;  %v7092_v23 = vpop.trf.xlu1 }
 0x126   : > { %v7094_v10 = vpop.trf.xlu0  ;;  %v5689_v41 = vunpack.i.l.bf16 %v5688_v37  ;;  %v5692_v59 = vunpack.i.h.bf16 %v5688_v37  ;;  %v5575_v9 = vunpack.i.h.bf16 %v7092_v23 }
 0x128   : > { %1090 = vmatmul.f32.gmra.mxu0 %v5689_v41  ;;  %1203 = vmatmul.f32.gmra.mxu1 %v5692_v59 }
 0x129   : > { %1441 = vmatmul.f32.gmra.mxu2 %v5575_v9 }
 0x12d   : > { %v5693_v2 = vpop.trf.xlu2  ;;  %v7097_v11 = vpop.trf.xlu1 }
 0x12e   : > { %v7099_v3 = vpop.trf.xlu0  ;;  %v5694_v55 = vunpack.i.l.bf16 %v5693_v2  ;;  %v5697_v8 = vunpack.i.h.bf16 %v5693_v2  ;;  %v5580_v50 = vunpack.i.h.bf16 %v7097_v11 }
 0x130   : > { %1093 = vmatmul.f32.gmra.mxu0 %v5694_v55  ;;  %1206 = vmatmul.f32.gmra.mxu1 %v5697_v8 }
 0x131   : > { %1444 = vmatmul.f32.gmra.mxu2 %v5580_v50 }
 0x135   : > { %v5698_v43 = vpop.trf.xlu2  ;;  %v7102_v7 = vpop.trf.xlu1 }
 0x136   : > { %v7104_v37 = vpop.trf.xlu0  ;;  %v5699_v41 = vunpack.i.l.bf16 %v5698_v43  ;;  %v5702_v59 = vunpack.i.h.bf16 %v5698_v43  ;;  %v5585_v9 = vunpack.i.h.bf16 %v7102_v7 }
 0x138   : > { %1096 = vmatmul.f32.gmra.mxu0 %v5699_v41  ;;  %1209 = vmatmul.f32.gmra.mxu1 %v5702_v59 }
 0x139   : > { %1447 = vmatmul.f32.gmra.mxu2 %v5585_v9 }
 0x13d   : > { %v5703_v6 = vpop.trf.xlu2  ;;  %v7107_v31 = vpop.trf.xlu1 }
 0x13e   : > { %v7109_v2 = vpop.trf.xlu0  ;;  %v5704_v55 = vunpack.i.l.bf16 %v5703_v6  ;;  %v5707_v8 = vunpack.i.h.bf16 %v5703_v6  ;;  %v5590_v50 = vunpack.i.h.bf16 %v7107_v31 }
 0x140   : > { %1099 = vmatmul.f32.gmra.mxu0 %v5704_v55  ;;  %1212 = vmatmul.f32.gmra.mxu1 %v5707_v8 }
 0x141   : > { %1450 = vmatmul.f32.gmra.mxu2 %v5590_v50 }
 0x145   : > { %v5708_v38 = vpop.trf.xlu2  ;;  %v7112_v51 = vpop.trf.xlu1 }
 0x146   : > { %v7114_v43 = vpop.trf.xlu0  ;;  %v5709_v41 = vunpack.i.l.bf16 %v5708_v38  ;;  %v5712_v59 = vunpack.i.h.bf16 %v5708_v38  ;;  %v5595_v9 = vunpack.i.h.bf16 %v7112_v51 }
 0x148   : > { %1102 = vmatmul.f32.gmra.mxu0 %v5709_v41  ;;  %1215 = vmatmul.f32.gmra.mxu1 %v5712_v59 }
 0x149   : > { %1453 = vmatmul.f32.gmra.mxu2 %v5595_v9 }
 0x14d   : > { %v5713_v60 = vpop.trf.xlu2  ;;  %v7117_v16 = vpop.trf.xlu1 }
 0x14e   : > { %10016 = vst [vmem:[#allocation95_spill] sm:$0xff] %v7117_v16  ;;  %v7119_v6 = vpop.trf.xlu0  ;;  %v5714_v55 = vunpack.i.l.bf16 %v5713_v60  ;;  %v5717_v8 = vunpack.i.h.bf16 %v5713_v60  ;;  %v5600_v50 = vunpack.i.h.bf16 %v7117_v16 }
 0x150   : > { %1105 = vmatmul.f32.gmra.mxu0 %v5714_v55  ;;  %1218 = vmatmul.f32.gmra.mxu1 %v5717_v8 }
 0x151   : > { %1456 = vmatmul.f32.gmra.mxu2 %v5600_v50 }
 0x155   : > { %v5718_v28 = vpop.trf.xlu2  ;;  %v7122_v42 = vpop.trf.xlu1 }
 0x156   : > { %10017 = vst [vmem:[#allocation96_spill] sm:$0xff] %v7122_v42  ;;  %v7124_v38 = vpop.trf.xlu0  ;;  %v5719_v41 = vunpack.i.l.bf16 %v5718_v28  ;;  %v5722_v59 = vunpack.i.h.bf16 %v5718_v28  ;;  %v5605_v9 = vunpack.i.h.bf16 %v7122_v42 }
 0x158   : > { %1108 = vmatmul.f32.gmra.mxu0 %v5719_v41  ;;  %1221 = vmatmul.f32.gmra.mxu1 %v5722_v59 }
 0x159   : > { %1459 = vmatmul.f32.gmra.mxu2 %v5605_v9 }
 0x15d   : > { %v5723_v56 = vpop.trf.xlu2  ;;  %v7127_v14 = vpop.trf.xlu1 }
 0x15e   : > { %v7129_v60 = vpop.trf.xlu0  ;;  %v5724_v55 = vunpack.i.l.bf16 %v5723_v56  ;;  %v5727_v8 = vunpack.i.h.bf16 %v5723_v56  ;;  %v5610_v16 = vunpack.i.h.bf16 %v7127_v14 }
 0x15f   : > { %v5495_v50 = vunpack.i.l.bf16 %v7129_v60 }
 0x160   : > { %1111 = vmatmul.f32.gmra.mxu0 %v5724_v55  ;;  %1224 = vmatmul.f32.gmra.mxu1 %v5727_v8 }
 0x161   : > { %1156 = vmatmul.f32.vlgmr.msra.gmra.mxu3 %v5495_v50  ;;  %1462 = vmatmul.f32.gmra.mxu2 %v5610_v16 }
 0x162   : > { %5204 = vmatpush.msra.mxu3 %v6847_v15 }
 0x164   : > { %5205 = vmatpush.msra.mxu3 %v6853_v18 }
 0x165   : > { %v5728_v28 = vpop.trf.xlu2  ;;  %v7135_v41 = vpop.trf.xlu1 }
 0x166   : > { %v7137_v59 = vpop.trf.xlu0  ;;  %v5729_v9 = vunpack.i.l.bf16 %v5728_v28  ;;  %v5732_v42 = vunpack.i.h.bf16 %v5728_v28  ;;  %5206 = vmatpush.msra.mxu3 %v6857_v22  ;;  %v5615_v55 = vunpack.i.h.bf16 %v7135_v41 }
 0x167   : > { %v5500_v56 = vunpack.i.l.bf16 %v7137_v59 }
 0x168   : > { %1114 = vmatmul.f32.gmra.mxu0 %v5729_v9  ;;  %1227 = vmatmul.f32.gmra.mxu1 %v5732_v42 }
 0x169   : > { %5207 = vmatpush.msra.mxu3 %v6873_v30  ;;  %1465 = vmatmul.f32.gmra.mxu2 %v5615_v55 }
 0x16a   : > { %1159 = vmatmul.f32.gmra.mxu3 %v5500_v56 }
 0x16b   : > { %5208 = vmatpush.msra.mxu3 %v6889_v34 }
 0x16d   : > { %v5733_v16 = vpop.trf.xlu2  ;;  %5209 = vmatpush.msra.mxu3 %v6921_v49  ;;  %v7145_v8 = vpop.trf.xlu1 }
 0x16e   : > { %v7147_v50 = vpop.trf.xlu0  ;;  %v5734_v28 = vunpack.i.l.bf16 %v5733_v16  ;;  %v5737_v9 = vunpack.i.h.bf16 %v5733_v16  ;;  %v5620_v56 = vunpack.i.h.bf16 %v7145_v8 }
 0x16f   : > { %5210 = vmatpush.msra.mxu3 %v6928_v58  ;;  %v5505_v42 = vunpack.i.l.bf16 %v7147_v50 }
 0x170   : > { %1117 = vmatmul.f32.gmra.mxu0 %v5734_v28  ;;  %1230 = vmatmul.f32.gmra.mxu1 %v5737_v9 }
 0x171   : > { %5211 = vmatpush.msra.mxu3 %v6944_v63  ;;  %1468 = vmatmul.f32.gmra.mxu2 %v5620_v56 }
 0x172   : > { %1162 = vmatmul.f32.gmra.mxu3 %v5505_v42 }
 0x173   : > { %5212 = vmatpush.msra.mxu3 %v6960_v24 }
 0x175   : > { %v5738_v55 = vpop.trf.xlu2  ;;  %5213 = vmatpush.msra.mxu3 %v6992_v1  ;;  %v7155_v15 = vpop.trf.xlu1 }
 0x176   : > { %v7157_v16 = vpop.trf.xlu0  ;;  %v5739_v18 = vunpack.i.l.bf16 %v5738_v55  ;;  %v5742_v28 = vunpack.i.h.bf16 %v5738_v55  ;;  %v5625_v42 = vunpack.i.h.bf16 %v7155_v15 }
 0x177   : > { %5214 = vmatpush.msra.mxu3 %v6999_v44  ;;  %v5510_v9 = vunpack.i.l.bf16 %v7157_v16  ;;  %v5458_v44 = vunpack.i.h.bf16 %v7089_v27 }
 0x178   : > { %1120 = vmatmul.f32.gmra.mxu0 %v5739_v18  ;;  %1233 = vmatmul.f32.gmra.mxu1 %v5742_v28 }
 0x179   : > { %5215 = vmatpush.msra.mxu3 %v7015_v32  ;;  %1471 = vmatmul.f32.gmra.mxu2 %v5625_v42 }
 0x17a   : > { %1165 = vmatmul.f32.gmra.mxu3 %v5510_v9 }
 0x17b   : > { %5216 = vmatpush.msra.mxu3 %v7027_v36  ;;  %v389_v36 = vld [vmem:[%s6410_s12 + $0xe8] sm:$0xff] }
 0x17d   : > { %v5743_v56 = vpop.trf.xlu2  ;;  %5217 = vmatpush.msra.mxu3 %v7049_v13  ;;  %v7165_v22 = vpop.trf.xlu1  ;;  %v5460_v13 = vunpack.i.l.bf16 %v7094_v10 }
 0x17e   : > { %v7167_v55 = vpop.trf.xlu0  ;;  %v5744_v30 = vunpack.i.l.bf16 %v5743_v56  ;;  %v5747_v18 = vunpack.i.h.bf16 %v5743_v56  ;;  %v5630_v9 = vunpack.i.h.bf16 %v7165_v22 }
 0x17f   : > { %5218 = vmatpush.msra.mxu3 %v7066_v40  ;;  %v5515_v28 = vunpack.i.l.bf16 %v7167_v55 }
 0x180   : > { %1123 = vmatmul.f32.gmra.mxu0 %v5744_v30  ;;  %1236 = vmatmul.f32.gmra.mxu1 %v5747_v18 }
 0x181   : > { %5219 = vmatpush.msra.mxu3 %v7072_v39  ;;  %1474 = vmatmul.f32.gmra.mxu2 %v5630_v9  ;;  %v464_v39 = vld [vmem:[%s7350_s20 + $0xa0] sm:$0xff] }
 0x182   : > { %1168 = vmatmul.f32.gmra.mxu3 %v5515_v28 }
 0x185   : > { %v5748_v42 = vpop.trf.xlu2  ;;  %v7173_v34 = vpop.trf.xlu1 }
 0x186   : > { %v7175_v49 = vpop.trf.xlu0  ;;  %v5749_v58 = vunpack.i.l.bf16 %v5748_v42  ;;  %v5752_v63 = vunpack.i.h.bf16 %v5748_v42  ;;  %v5635_v56 = vunpack.i.h.bf16 %v7173_v34 }
 0x187   : > { %v5520_v30 = vunpack.i.l.bf16 %v7175_v49 }
 0x188   : > { %1126 = vmatmul.f32.gmra.mxu0 %v5749_v58  ;;  %1239 = vmatmul.f32.gmra.mxu1 %v5752_v63 }
 0x189   : > { %1477 = vmatmul.f32.gmra.mxu2 %v5635_v56  ;;  %v5455_v56 = vunpack.i.l.bf16 %v7089_v27  ;;  %v374_v27 = vld [vmem:[%s6410_s12 + $0x70] sm:$0xff] }
 0x18a   : > { %1171 = vmatmul.f32.gmra.mxu3 %v5520_v30 }
 0x18d   : > { %v5753_v18 = vpop.trf.xlu2  ;;  %v7179_v24 = vpop.trf.xlu1 }
 0x18e   : > { %v7181_v28 = vpop.trf.xlu0  ;;  %v5754_v9 = vunpack.i.l.bf16 %v5753_v18  ;;  %v5757_v1 = vunpack.i.h.bf16 %v5753_v18  ;;  %v5640_v63 = vunpack.i.h.bf16 %v7179_v24 }
 0x18f   : > { %v5525_v58 = vunpack.i.l.bf16 %v7181_v28 }
 0x190   : > { %1129 = vmatmul.f32.gmra.mxu0 %v5754_v9  ;;  %1242 = vmatmul.f32.gmra.mxu1 %v5757_v1  ;;  %v375_v9 = vld [vmem:[%s6410_s12 + $0x78] sm:$0xff] }
 0x191   : > { %1480 = vmatmul.f32.gmra.mxu2 %v5640_v63  ;;  %1649 = vmatpush.msrb.mxu0 %v375_v9  ;;  %v5463_v9 = vunpack.i.h.bf16 %v7094_v10  ;;  %v370_v10 = vld [vmem:[%s6410_s12 + $0x50] sm:$0xff] }
 0x192   : > { %1174 = vmatmul.f32.gmra.mxu3 %v5525_v58  ;;  %v391_v58 = vld [vmem:[%s6410_s12 + $0xf8] sm:$0xff] }
 0x193   : > { %1762 = vmatpush.msrb.mxu1 %v391_v58  ;;  %1650 = vmatpush.msrb.mxu0 %v374_v27  ;;  %v5567_v58 = vunpack.i.l.bf16 %v7087_v12  ;;  %v5498_v27 = vunpack.i.h.bf16 %v7129_v60  ;;  %v386_v12 = vld [vmem:[%s6410_s12 + $0xd0] sm:$0xff]  ;;  %v385_v60 = vld [vmem:[%s6410_s12 + $0xc8] sm:$0xff] }
 0x195   : > { %v7185_v42 = vpop.trf.xlu1  ;;  %v7195_v63 = vpop.f32.mrf.mxu0 }
 0x196   : > { %v7187_v30 = vpop.trf.xlu0  ;;  %v5645_v18 = vunpack.i.h.bf16 %v7185_v42  ;;  %v7197_v32 = vpop.f32.mrf.mxu1 }
 0x197   : > { %v5530_v1 = vunpack.i.l.bf16 %v7187_v30 }
 0x198   : > { %1132 = vmatmul.f32.gmra.mxu0 %v5455_v56  ;;  %1245 = vmatmul.f32.gmra.mxu1 %v5458_v44  ;;  %v390_v56 = vld [vmem:[%s6410_s12 + $0xf0] sm:$0xff]  ;;  %v373_v44 = vld [vmem:[%s6410_s12 + $0x68] sm:$0xff] }
 0x199   : > { %1483 = vmatmul.f32.gmra.mxu2 %v5645_v18  ;;  %1763 = vmatpush.msrb.mxu1 %v390_v56  ;;  %v388_v18 = vld [vmem:[%s6410_s12 + $0xe0] sm:$0xff]  ;;  %v371_v56 = vld [vmem:[%s6410_s12 + $0x58] sm:$0xff] }
 0x19a   : > { %1177 = vmatmul.f32.gmra.mxu3 %v5530_v1  ;;  %1651 = vmatpush.msrb.mxu0 %v373_v44  ;;  %v372_v1 = vld [vmem:[%s6410_s12 + $0x60] sm:$0xff] }
 0x19b   : > { %1764 = vmatpush.msrb.mxu1 %v389_v36  ;;  %v387_v36 = vld [vmem:[%s6410_s12 + $0xd8] sm:$0xff] }
 0x19c   : > { %1652 = vmatpush.msrb.mxu0 %v372_v1 }
 0x19d   : > { %1765 = vmatpush.msrb.mxu1 %v388_v18  ;;  %v7213_v44 = vpop.f32.mrf.mxu0  ;;  %v5572_v18 = vunpack.i.l.bf16 %v7092_v23  ;;  %v366_v23 = vld [vmem:[%s6410_s12 + $0x30] sm:$0xff] }
 0x19e   : > { %1653 = vmatpush.msrb.mxu0 %v371_v56  ;;  %v7215_v1 = vpop.f32.mrf.mxu1  ;;  %v384_v56 = vld [vmem:[%s6410_s12 + $0xc0] sm:$0xff] }
 0x19f   : > { %1766 = vmatpush.msrb.mxu1 %v387_v36  ;;  %v5503_v36 = vunpack.i.h.bf16 %v7137_v59 }
 0x1a0   : > { %1135 = vmatmul.f32.gmra.mxu0 %v5460_v13  ;;  %1248 = vmatmul.f32.gmra.mxu1 %v5463_v9  ;;  %v369_v13 = vld [vmem:[%s6410_s12 + $0x48] sm:$0xff]  ;;  %v5465_v9 = vunpack.i.l.bf16 %v7099_v3 }
 0x1a1   : > { %1486 = vmatmul.f32.gmra.mxu2 %v5567_v58  ;;  %1654 = vmatpush.msrb.mxu0 %v370_v10  ;;  %v5468_v58 = vunpack.i.h.bf16 %v7099_v3  ;;  %v367_v10 = vld [vmem:[%s6410_s12 + $0x38] sm:$0xff]  ;;  %v382_v3 = vld [vmem:[%s6410_s12 + $0xb0] sm:$0xff] }
 0x1a2   : > { %1269 = vmatmul.f32.vlgmr.msra.gmra.mxu3 %v5498_v27  ;;  %1767 = vmatpush.msrb.mxu1 %v386_v12  ;;  %v368_v27 = vld [vmem:[%s6410_s12 + $0x40] sm:$0xff]  ;;  %v383_v12 = vld [vmem:[%s6410_s12 + $0xb8] sm:$0xff] }
 0x1a3   : > { %5220 = vmatpush.msra.mxu3 %v6845_v4  ;;  %1655 = vmatpush.msrb.mxu0 %v369_v13  ;;  %v365_v13 = vld [vmem:[%s6410_s12 + $0x28] sm:$0xff] }
 0x1a4   : > { %1768 = vmatpush.msrb.mxu1 %v385_v60  ;;  %v381_v60 = vld [vmem:[%s6410_s12 + $0xa8] sm:$0xff] }
 0x1a5   : > { %5221 = vmatpush.msra.mxu3 %v6851_v17  ;;  %1656 = vmatpush.msrb.mxu0 %v368_v27  ;;  %v5577_v27 = vunpack.i.l.bf16 %v7097_v11  ;;  %v362_v11 = vld [vmem:[%s6410_s12 + $0x10] sm:$0xff] }
 0x1a6   : > { %1769 = vmatpush.msrb.mxu1 %v384_v56  ;;  %v7238_v59 = vpop.f32.mrf.mxu1  ;;  %v364_v56 = vld [vmem:[%s6410_s12 + $0x20] sm:$0xff] }
 0x1a7   : > { %5222 = vmatpush.msra.mxu3 %v6855_v21  ;;  %1657 = vmatpush.msrb.mxu0 %v367_v10  ;;  %v5508_v10 = vunpack.i.h.bf16 %v7147_v50  ;;  %v5475_v50 = vunpack.i.l.bf16 %v7109_v2  ;;  %v394_v21 = vld [vmem:[%s6410_s12 + $0x110] sm:$0xff] }
 0x1a8   : > { %1138 = vmatmul.f32.gmra.mxu0 %v5465_v9  ;;  %1251 = vmatmul.f32.gmra.mxu1 %v5468_v58  ;;  %v7235_v9 = vpop.f32.mrf.mxu0  ;;  %v5470_v58 = vunpack.i.l.bf16 %v7104_v37 }
 0x1a9   : > { %1489 = vmatmul.f32.gmra.mxu2 %v5572_v18  ;;  %1770 = vmatpush.msrb.mxu1 %v383_v12  ;;  %v5473_v18 = vunpack.i.h.bf16 %v7104_v37  ;;  %v363_v12 = vld [vmem:[%s6410_s12 + $0x18] sm:$0xff] }
 0x1aa   : > { %1272 = vmatmul.f32.gmra.mxu3 %v5503_v36  ;;  %1658 = vmatpush.msrb.mxu0 %v366_v23  ;;  %v380_v36 = vld [vmem:[%s6410_s12 + $0xa0] sm:$0xff]  ;;  %v379_v37 = vld [vmem:[%s6410_s12 + $0x98] sm:$0xff]  ;;  %v378_v23 = vld [vmem:[%s6410_s12 + $0x90] sm:$0xff] }
 0x1ab   : > { %5223 = vmatpush.msra.mxu3 %v6871_v25  ;;  %1771 = vmatpush.msrb.mxu1 %v382_v3  ;;  %v361_v3 = vld [vmem:[%s6410_s12 + $0x8] sm:$0xff] }
 0x1ac   : > { %1659 = vmatpush.msrb.mxu0 %v365_v13  ;;  %v5478_v13 = vunpack.i.h.bf16 %v7109_v2  ;;  %v5483_v2 = vunpack.i.h.bf16 %v7114_v43 }
 0x1ad   : > { %5224 = vmatpush.msra.mxu3 %v6887_v33  ;;  %1772 = vmatpush.msrb.mxu1 %v381_v60  ;;  %v5582_v60 = vunpack.i.l.bf16 %v7102_v7  ;;  %v5480_v7 = vunpack.i.l.bf16 %v7114_v43  ;;  %v5485_v43 = vunpack.i.l.bf16 %v7119_v6 }
 0x1ae   : > { %1660 = vmatpush.msrb.mxu0 %v364_v56  ;;  %v5513_v56 = vunpack.i.h.bf16 %v7157_v16  ;;  %v5518_v16 = vunpack.i.h.bf16 %v7167_v55  ;;  %v5488_v55 = vunpack.i.h.bf16 %v7119_v6  ;;  %v10018_v6 = vld [vmem:[#allocation51_spill] sm:$0xff] }
 0x1af   : > { %5225 = vmatpush.msra.mxu3 %v6919_v48  ;;  %1773 = vmatpush.msrb.mxu1 %v380_v36  ;;  %v360_v36 = vld [vmem:[%s6410_s12] sm:$0xff] }
 0x1b0   : > { %1141 = vmatmul.f32.gmra.mxu0 %v5470_v58  ;;  %1254 = vmatmul.f32.gmra.mxu1 %v5473_v18  ;;  %v377_v58 = vld [vmem:[%s6410_s12 + $0x88] sm:$0xff]  ;;  %v7258_v18 = vpop.f32.mrf.mxu0 }
 0x1b1   : > { %1492 = vmatmul.f32.gmra.mxu2 %v5577_v27  ;;  %5226 = vmatpush.msra.mxu3 %v6926_v57  ;;  %v7261_v27 = vpop.f32.mrf.mxu1 }
 0x1b2   : > { %1275 = vmatmul.f32.gmra.mxu3 %v5508_v10  ;;  %1661 = vmatpush.msrb.mxu0 %v363_v12  ;;  %v376_v10 = vld [vmem:[%s6410_s12 + $0x80] sm:$0xff]  ;;  %v5587_v12 = vunpack.i.l.bf16 %v7107_v31  ;;  %v9843_v31 = vmov 1.0   ;;  %v1208_v40 = vadd.f32 %v7261_v27, %v7258_v18 }
 0x1b3   : > { %1774 = vmatpush.msrb.mxu1 %v379_v37  ;;  %5227 = vmatpush.msra.mxu3 %v6942_v62  ;;  %v5830_v18 = vld [vmem:[#allocation2 + $0xc8] sm:$0xff] }
 0x1b4   : > { %1662 = vmatpush.msrb.mxu0 %v362_v11 }
 0x1b5   : > { %1775 = vmatpush.msrb.mxu1 %v378_v23  ;;  %5228 = vmatpush.msra.mxu3 %v6958_v20  ;;  %v5592_v23 = vunpack.i.l.bf16 %v7112_v51 }
 0x1b6   : > { %1663 = vmatpush.msrb.mxu0 %v361_v3  ;;  %v5523_v3 = vunpack.i.h.bf16 %v7175_v49 }
 0x1b7   : > { %1776 = vmatpush.msrb.mxu1 %v377_v58  ;;  %5229 = vmatpush.msra.mxu3 %v6990_v53  ;;  %v470_v53 = vld [vmem:[%s7350_s20 + $0xd0] sm:$0xff] }
 0x1b8   : > { %1144 = vmatmul.f32.gmra.mxu0 %v5475_v50  ;;  %1257 = vmatmul.f32.gmra.mxu1 %v5478_v13  ;;  %v7273_v37 = vpop.f32.mrf.mxu0  ;;  %v5490_v50 = vunpack.i.l.bf16 %v7124_v38  ;;  %v5493_v13 = vunpack.i.h.bf16 %v7124_v38  ;;  %v10022_v38 = vld [vmem:[#allocation45_spill] sm:$0xff] }
 0x1b9   : > { %1495 = vmatmul.f32.gmra.mxu2 %v5582_v60  ;;  %1664 = vmatpush.msrb.mxu0 %v360_v36  ;;  %v7276_v11 = vpop.f32.mrf.mxu1  ;;  %v10019_v60 = vld [vmem:[#allocation95_spill] sm:$0xff]  ;;  %v5528_v36 = vunpack.i.h.bf16 %v7181_v28  ;;  %v1199_v28 = vadd.f32 %v7197_v32, %v7195_v63  ;;  %v10025_v32 = vld [vmem:[#allocation41_spill] sm:$0xff]  ;;  %v5533_v63 = vunpack.i.h.bf16 %v7187_v30  ;;  %v1202_v30 = vadd.f32 %v7215_v1, %v7213_v44 }
 0x1ba   : > { %1278 = vmatmul.f32.gmra.mxu3 %v5513_v56  ;;  %1777 = vmatpush.msrb.mxu1 %v376_v10  ;;  %v5597_v58 = vunpack.i.l.bf16 %v10019_v60  ;;  %v10020_v56 = vld [vmem:[#allocation49_spill] sm:$0xff]  ;;  %v10021_v10 = vld [vmem:[#allocation47_spill] sm:$0xff]  ;;  %v5607_v44 = vunpack.i.l.bf16 %v7127_v14  ;;  %v1205_v14 = vadd.f32 %v7238_v59, %v7235_v9 }
 0x1bb   : > { %5230 = vmatpush.msra.mxu3 %v6997_v61  ;;  %v10030_v60 = vld [vmem:[#allocation31_spill] sm:$0xff]  ;;  %v10032_v1 = vld [vmem:[#allocation33_spill] sm:$0xff] }
 0x1bc   : > { %v5826_v59 = vld [vmem:[#allocation2 + $0xe8] sm:$0xff] }
 0x1bd   : > { %5231 = vmatpush.msra.mxu3 %v7013_v19 }
 0x1bf   : > { %5232 = vmatpush.msra.mxu3 %v7025_v35 }
 0x1c0   : > { %1147 = vmatmul.f32.gmra.mxu0 %v5480_v7  ;;  %1260 = vmatmul.f32.gmra.mxu1 %v5483_v2  ;;  %v7307_v51 = vpop.f32.mrf.mxu0  ;;  %v10023_v7 = vld [vmem:[#allocation43_spill] sm:$0xff] }
 0x1c1   : > { %1498 = vmatmul.f32.gmra.mxu2 %v5587_v12  ;;  %5233 = vmatpush.msra.mxu3 %v7047_v26  ;;  %v7313_v49 = vpop.f32.mrf.mxu1  ;;  %v444_v12 = vld [vmem:[%s7350_s20] sm:$0xff] }
 0x1c2   : > { %1281 = vmatmul.f32.gmra.mxu3 %v5518_v16 }
 0x1c3   : > { %5284 = vmatpush.lsf.msk.msk.msrb.mxu3 %vm9829_vm10, %v9843_v31  ;;  %vm9833_vm10 = vcmp.eq.s32.totalorder %v6778_v29, %v6441_v5 }
 0x1c5   : > { %5234 = vmatpush.msra.mxu3 %v7064_v46 }
 0x1c7   : > { %5285 = vmatpush.lsf.msk.msk.msrb.mxu3 %vm9830_vm11, %v9843_v31  ;;  %vm9834_vm11 = vcmp.eq.s32.totalorder %v10018_v6, %v6441_v5 }
 0x1c8   : > { %1150 = vmatmul.f32.gmra.mxu0 %v5485_v43  ;;  %1263 = vmatmul.f32.gmra.mxu1 %v5488_v55  ;;  %v7348_v2 = vpop.f32.mrf.mxu0  ;;  %v10024_v43 = vld [vmem:[#allocation96_spill] sm:$0xff] }
 0x1c9   : > { %5235 = vmatpush.msra.mxu3 %v7070_v54  ;;  %1501 = vmatmul.f32.gmra.mxu2 %v5592_v23  ;;  %v7357_v16 = vpop.f32.mrf.mxu1  ;;  %v5602_v55 = vunpack.i.l.bf16 %v10024_v43  ;;  %v10026_v23 = vld [vmem:[#allocation39_spill] sm:$0xff] }
 0x1ca   : > { %1284 = vmatmul.f32.gmra.mxu3 %v5523_v3  ;;  %v10027_v3 = vld [vmem:[#allocation37_spill] sm:$0xff] }
 0x1cb   : > { %5286 = vmatpush.lsf.msk.msk.msrb.mxu3 %vm9831_vm8, %v9843_v31  ;;  %vm9835_vm8 = vcmp.eq.s32.totalorder %v10020_v56, %v6441_v5 }
 0x1cd   : > { %5287 = vmatpush.lsf.msk.msk.msrb.mxu3 %vm9832_vm9, %v9843_v31  ;;  %vm9836_vm9 = vcmp.eq.s32.totalorder %v10021_v10, %v6441_v5 }
 0x1cf   : > { %5288 = vmatpush.lsf.msk.msk.msrb.mxu3 %vm9833_vm10, %v9843_v31  ;;  %vm9837_vm10 = vcmp.eq.s32.totalorder %v10022_v38, %v6441_v5 }
 0x1d0   : > { %1153 = vmatmul.f32.gmra.mxu0 %v5490_v50  ;;  %1266 = vmatmul.f32.gmra.mxu1 %v5493_v13  ;;  %v10028_v50 = vld [vmem:[#allocation35_spill] sm:$0xff]  ;;  %v10029_v13 = vld [vmem:[#allocation30_spill] sm:$0xff] }
 0x1d1   : > { %5289 = vmatpush.lsf.msk.msk.msrb.mxu3 %vm9834_vm11, %v9843_v31  ;;  %1504 = vmatmul.f32.gmra.mxu2 %v5597_v58  ;;  %vm9838_vm11 = vcmp.eq.s32.totalorder %v10023_v7, %v6441_v5  ;;  %vm9922_vm2 = vcmp.eq.s32.totalorder %v10030_v60, %v10029_v13  ;;  %v445_v58 = vld [vmem:[%s7350_s20 + $0x8] sm:$0xff]  ;;  %v7403_v43 = vpop.f32.mrf.mxu1 }
 0x1d2   : > { %1287 = vmatmul.f32.gmra.mxu3 %v5528_v36  ;;  %v10031_v36 = vmov 0.0  }
 0x1d3   : > { %5290 = vmatpush.lsf.msk.msk.msrb.mxu3 %vm9835_vm8, %v9843_v31  ;;  %vm9840_vm8 = vcmp.eq.s32.totalorder %v10025_v32, %v6441_v5 }
 0x1d5   : > { %5291 = vmatpush.lsf.msk.msk.msrb.mxu3 %vm9836_vm9, %v9843_v31  ;;  %vm9841_vm9 = vcmp.eq.s32.totalorder %v10026_v23, %v6441_v5 }
 0x1d7   : > { %5292 = vmatpush.lsf.msk.msk.msrb.mxu3 %vm9837_vm10, %v9843_v31  ;;  %vm9842_vm10 = vcmp.eq.s32.totalorder %v10027_v3, %v6441_v5 }
 0x1d8   : > { %1665 = vmatmul.f32.vlgmr.msrb.gmra.mxu0 %v444_v12  ;;  %1778 = vmatmul.f32.vlgmr.msrb.gmra.mxu1 %v1199_v28  ;;  %v5084_v28 = vsel %vm9922_vm2, 1.0, %v10031_v36  ;;  %v7397_v12 = vpop.f32.mrf.mxu0 }
 0x1d9   : > { %5293 = vmatpush.lsf.msk.msk.msrb.mxu3 %vm9838_vm11, %v9843_v31  ;;  %1507 = vmatmul.f32.gmra.mxu2 %v5602_v55  ;;  %vm9847_vm11 = vcmp.eq.s32.totalorder %v10028_v50, %v6441_v5  ;;  %v446_v55 = vld [vmem:[%s7350_s20 + $0x10] sm:$0xff] }
 0x1da   : > { %1290 = vmatmul.f32.gmra.mxu3 %v5533_v63  ;;  %1390 = vxpose.xlu0.b32.start [1/16] %v5084_v28, 128  ;;  %v5824_v63 = vld [vmem:[#allocation2 + $0xf8] sm:$0xff]  ;;  %v5612_v28 = vunpack.i.l.bf16 %v7135_v41 }
 0x1db   : > { %5294 = vmatpush.lsf.msk.msk.msrb.mxu3 %vm9840_vm8, %v9843_v31  ;;  %vm9851_vm8 = vcmp.eq.s32.totalorder %v10032_v1, %v6441_v5  ;;  %v447_v41 = vld [vmem:[%s7350_s20 + $0x18] sm:$0xff] }
 0x1dd   : > { %5295 = vmatpush.lsf.msk.msk.msrb.mxu3 %vm9841_vm9, %v9843_v31  ;;  %vm9921_vm9 = vcmp.eq.s32.totalorder %v10030_v60, %v6441_v5 }
 0x1df   : > { %5296 = vmatpush.lsf.msk.msk.msrb.mxu3 %vm9842_vm10, %v9843_v31  ;;  %vm9918_vm10 = vcmp.eq.s32.totalorder %v10032_v1, %v10029_v13 }
 0x1e0   : > { %1668 = vmatmul.f32.gmra.mxu0 %v445_v58  ;;  %1781 = vmatmul.f32.gmra.mxu1 %v1202_v30  ;;  %v5086_v30 = vsel %vm9918_vm10, 1.0, %v10031_v36  ;;  %v7427_v9 = vpop.f32.mrf.mxu0 }
 0x1e1   : > { %5297 = vmatpush.lsf.msk.msk.msrb.mxu3 %vm9847_vm11, %v9843_v31  ;;  %vm9848_vm11 = vcmp.eq.s32.totalorder %v10028_v50, %v10029_v13 }
 0x1e2   : > { %1510 = vmatmul.f32.vlgmr.msra.gmra.mxu3 %v5607_v44  ;;  %1391 = vxpose.xlu0.b32.cont [2/16] %v5086_v30, 128  ;;  %v5825_v44 = vld [vmem:[#allocation2 + $0xf0] sm:$0xff]  ;;  %v5828_v30 = vld [vmem:[#allocation2 + $0xd8] sm:$0xff] }
 0x1e3   : > { %5298 = vmatpush.lsf.msk.msk.msrb.mxu3 %vm9851_vm8, %v9843_v31  ;;  %vm9853_vm8 = vcmp.eq.s32.totalorder %v10023_v7, %v10029_v13 }
 0x1e4   : > { %v7424_v58 = vpop.f32.mrf.mxu3 }
 0x1e5   : > { %5299 = vmatpush.lsf.msk.msk.msrb.mxu3 %vm9921_vm9, %v9843_v31  ;;  %v5827_v31 = vld [vmem:[#allocation2 + $0xe0] sm:$0xff] }
 0x1e7   : > { %1535 = vmatpush.msra.mxu3 %v5824_v63  ;;  %v7429_v63 = vpop.f32.mrf.mxu1 }
 0x1e8   : > { %1671 = vmatmul.f32.gmra.mxu0 %v446_v55  ;;  %1784 = vmatmul.f32.gmra.mxu1 %v1205_v14  ;;  %v5088_v14 = vsel %vm9848_vm11, 1.0, %v10031_v36  ;;  %v7443_v27 = vpop.f32.mrf.mxu0  ;;  %vm9849_vm11 = vcmp.eq.s32.totalorder %v10027_v3, %v10029_v13 }
 0x1e9   : > { %5267 = vllmr.16.mxu3 }
 0x1ea   : > { %1536 = vmatpush.msra.mxu3 %v5825_v44  ;;  %1392 = vxpose.xlu0.b32.cont [3/16] %v5088_v14, 128  ;;  %v5831_v44 = vld [vmem:[#allocation2 + $0xc0] sm:$0xff]  ;;  %v5832_v14 = vld [vmem:[#allocation2 + $0xb8] sm:$0xff] }
 0x1eb   : > { %1513 = vmatmul.f32.gmra.mxu3 %v5612_v28  ;;  %v5617_v28 = vunpack.i.l.bf16 %v7145_v8  ;;  %v448_v8 = vld [vmem:[%s7350_s20 + $0x20] sm:$0xff] }
 0x1ec   : > { %1537 = vmatpush.msra.mxu3 %v5826_v59  ;;  %v1211_v59 = vadd.f32 %v7276_v11, %v7273_v37  ;;  %v5833_v37 = vld [vmem:[#allocation2 + $0xb0] sm:$0xff]  ;;  %v5834_v11 = vld [vmem:[#allocation2 + $0xa8] sm:$0xff] }
 0x1ed   : > { %v7440_v55 = vpop.f32.mrf.mxu3 }
 0x1ee   : > { %1538 = vmatpush.msra.mxu3 %v5827_v31  ;;  %v5829_v31 = vld [vmem:[#allocation2 + $0xd0] sm:$0xff] }
 0x1f0   : > { %1539 = vmatpush.msra.mxu3 %v5828_v30  ;;  %1674 = vmatmul.f32.gmra.mxu0 %v447_v41  ;;  %v7447_v30 = vpop.f32.mrf.mxu1 }
 0x1f1   : > { %1787 = vmatmul.f32.gmra.mxu1 %v1208_v40  ;;  %v5090_v40 = vsel %vm9849_vm11, 1.0, %v10031_v36  ;;  %vm9850_vm11 = vcmp.eq.s32.totalorder %v10026_v23, %v10029_v13 }
 0x1f2   : > { %1540 = vmatpush.msra.mxu3 %v5829_v31  ;;  %1393 = vxpose.xlu0.b32.cont [4/16] %v5090_v40, 128  ;;  %v5835_v31 = vld [vmem:[#allocation2 + $0xa0] sm:$0xff] }
 0x1f3   : > { %1516 = vmatmul.f32.gmra.mxu3 %v5617_v28  ;;  %v5622_v28 = vunpack.i.l.bf16 %v7155_v15  ;;  %v5836_v15 = vld [vmem:[#allocation2 + $0x98] sm:$0xff] }
 0x1f4   : > { %1541 = vmatpush.msra.mxu3 %v5830_v18  ;;  %v1214_v18 = vadd.f32 %v7313_v49, %v7307_v51  ;;  %v5837_v51 = vld [vmem:[#allocation2 + $0x90] sm:$0xff]  ;;  %v5838_v49 = vld [vmem:[#allocation2 + $0x88] sm:$0xff] }
 0x1f5   : > { %v7456_v41 = vpop.f32.mrf.mxu3 }
 0x1f6   : > { %1542 = vmatpush.msra.mxu3 %v5831_v44  ;;  %v7463_v44 = vpop.f32.mrf.mxu0 }
 0x1f8   : > { %1543 = vmatpush.msra.mxu3 %v5832_v14  ;;  %1677 = vmatmul.f32.gmra.mxu0 %v448_v8  ;;  %v449_v14 = vld [vmem:[%s7350_s20 + $0x28] sm:$0xff]  ;;  %v1228_v8 = vpop.f32.mrf.mxu1 }
 0x1f9   : > { %1790 = vmatmul.f32.gmra.mxu1 %v1211_v59  ;;  %v5092_v59 = vsel %vm9850_vm11, 1.0, %v10031_v36  ;;  %vm9852_vm11 = vcmp.eq.s32.totalorder %v10025_v32, %v10029_v13 }
 0x1fa   : > { %1544 = vmatpush.msra.mxu3 %v5833_v37  ;;  %1394 = vxpose.xlu0.b32.cont [5/16] %v5092_v59, 128  ;;  %v5839_v37 = vld [vmem:[#allocation2 + $0x80] sm:$0xff] }
 0x1fb   : > { %1519 = vmatmul.f32.gmra.mxu3 %v5622_v28  ;;  %v5627_v28 = vunpack.i.l.bf16 %v7165_v22  ;;  %v5094_v22 = vsel %vm9852_vm11, 1.0, %v10031_v36  ;;  %vm9854_vm11 = vcmp.eq.s32.totalorder %v10022_v38, %v10029_v13 }
 0x1fc   : > { %1545 = vmatpush.msra.mxu3 %v5834_v11  ;;  %v1217_v11 = vadd.f32 %v7357_v16, %v7348_v2  ;;  %v1220_v2 = vadd.f32 %v7403_v43, %v7397_v12  ;;  %v451_v16 = vld [vmem:[%s7350_s20 + $0x38] sm:$0xff]  ;;  %v1223_v12 = vadd.f32 %v7429_v63, %v7427_v9  ;;  %v452_v43 = vld [vmem:[%s7350_s20 + $0x40] sm:$0xff]  ;;  %v1226_v9 = vadd.f32 %v7447_v30, %v7443_v27  ;;  %v454_v30 = vld [vmem:[%s7350_s20 + $0x50] sm:$0xff] }
 0x1fd   : > { %v7470_v40 = vpop.f32.mrf.mxu3 }
 0x1fe   : > { %1546 = vmatpush.msra.mxu3 %v5835_v31  ;;  %v450_v31 = vld [vmem:[%s7350_s20 + $0x30] sm:$0xff] }
 0x200   : > { %1547 = vmatpush.msra.mxu3 %v5836_v15  ;;  %1680 = vmatmul.f32.gmra.mxu0 %v449_v14  ;;  %v1118_v15 = vpop.f32.mrf.mxu0  ;;  %v1231_v59 = vpop.f32.mrf.mxu1 }
 0x201   : > { %1793 = vmatmul.f32.gmra.mxu1 %v1214_v18  ;;  %v5632_v18 = vunpack.i.l.bf16 %v7173_v34 }
 0x202   : > { %1548 = vmatpush.msra.mxu3 %v5837_v51  ;;  %1395 = vxpose.xlu0.b32.cont [6/16] %v5094_v22, 128  ;;  %v5637_v51 = vunpack.i.l.bf16 %v7179_v24 }
 0x203   : > { %1522 = vmatmul.f32.gmra.mxu3 %v5627_v28  ;;  %v5096_v28 = vsel %vm9853_vm8, 1.0, %v10031_v36  ;;  %vm9855_vm8 = vcmp.eq.s32.totalorder %v10021_v10, %v10029_v13 }
 0x204   : > { %1549 = vmatpush.msra.mxu3 %v5838_v49 }
 0x205   : > { %v7482_v14 = vpop.f32.mrf.mxu3 }
 0x206   : > { %1550 = vmatpush.msra.mxu3 %v5839_v37 }
 0x208   : > { %1683 = vmatmul.f32.gmra.mxu0 %v450_v31  ;;  %v1121_v49 = vpop.f32.mrf.mxu0  ;;  %v1234_v37 = vpop.f32.mrf.mxu1  ;;  %v5642_v31 = vunpack.i.l.bf16 %v7185_v42 }
 0x209   : > { %1796 = vmatmul.f32.gmra.mxu1 %v1217_v11  ;;  %v5098_v11 = vsel %vm9854_vm11, 1.0, %v10031_v36  ;;  %vm9856_vm11 = vcmp.eq.s32.totalorder %v10020_v56, %v10029_v13 }
 0x20a   : > { %1396 = vxpose.xlu0.b32.cont [7/16] %v5096_v28, 128  ;;  %v5102_v28 = vsel %vm9856_vm11, 1.0, %v10031_v36  ;;  %vm9858_vm11 = vcmp.eq.s32.totalorder %v6778_v29, %v10029_v13 }
 0x20b   : > { %1525 = vmatmul.f32.gmra.mxu3 %v5632_v18  ;;  %v453_v18 = vld [vmem:[%s7350_s20 + $0x48] sm:$0xff] }
 0x20d   : > { %v7494_v34 = vpop.f32.mrf.mxu3 }
 0x210   : > { %1686 = vmatmul.f32.gmra.mxu0 %v451_v16  ;;  %v1124_v22 = vpop.f32.mrf.mxu0  ;;  %v1237_v63 = vpop.f32.mrf.mxu1  ;;  %v1229_v16 = vadd.f32 %v1228_v8, %v7463_v44  ;;  %v1232_v44 = vadd.f32 %v1231_v59, %v1118_v15  ;;  %v455_v8 = vld [vmem:[%s7350_s20 + $0x58] sm:$0xff]  ;;  %v1235_v15 = vadd.f32 %v1234_v37, %v1121_v49  ;;  %v456_v59 = vld [vmem:[%s7350_s20 + $0x60] sm:$0xff]  ;;  %v457_v37 = vld [vmem:[%s7350_s20 + $0x68] sm:$0xff] }
 0x211   : > { %1799 = vmatmul.f32.gmra.mxu1 %v1220_v2  ;;  %v5100_v2 = vsel %vm9855_vm8, 1.0, %v10031_v36  ;;  %vm9857_vm8 = vcmp.eq.s32.totalorder %v10018_v6, %v10029_v13  ;;  %v1238_v49 = vadd.f32 %v1237_v63, %v1124_v22 }
 0x212   : > { %1397 = vxpose.xlu0.b32.cont [8/16] %v5098_v11, 128  ;;  %v5104_v11 = vsel %vm9857_vm8, 1.0, %v10031_v36  ;;  %vm9859_vm8 = vcmp.eq.s32.totalorder %v6808_v45, %v10029_v13 }
 0x213   : > { %1528 = vmatmul.f32.gmra.mxu3 %v5637_v51 }
 0x215   : > { %v7506_v24 = vpop.f32.mrf.mxu3 }
 0x218   : > { %1689 = vmatmul.f32.gmra.mxu0 %v452_v43  ;;  %v1127_v27 = vpop.f32.mrf.mxu0  ;;  %v1240_v51 = vpop.f32.mrf.mxu1 }
 0x219   : > { %1802 = vmatmul.f32.gmra.mxu1 %v1223_v12  ;;  %v1241_v63 = vadd.f32 %v1240_v51, %v1127_v27 }
 0x21a   : > { %1398 = vxpose.xlu0.b32.cont [9/16] %v5100_v2, 128  ;;  %v5106_v2 = vsel %vm9858_vm11, 1.0, %v10031_v36  ;;  %vm9860_vm11 = vcmp.eq.s32.totalorder %v6840_v0, %v10029_v13 }
 0x21b   : > { %1531 = vmatmul.f32.gmra.mxu3 %v5642_v31 }
 0x21d   : > { %v7518_v42 = vpop.f32.mrf.mxu3 }
 0x220   : > { %1692 = vmatmul.f32.gmra.mxu0 %v453_v18  ;;  %v1243_v18 = vpop.f32.mrf.mxu1 }
 0x221   : > { %1805 = vmatmul.f32.gmra.mxu1 %v1226_v9  ;;  %v1130_v9 = vpop.f32.mrf.mxu0 }
 0x222   : > { %1399 = vxpose.xlu0.b32.cont [10/16] %v5102_v28, 128  ;;  %v1244_v27 = vadd.f32 %v1243_v18, %v1130_v9  ;;  %v460_v18 = vld [vmem:[%s7350_s20 + $0x80] sm:$0xff] }
 0x223   : > { %5268 = vmatmul.lmr.bf16.vlgmr.msra.gmra.16.mxu3 }
 0x225   : > { %v1270_v12 = vpop.f32.mrf.mxu3 }
 0x226   : > { %v7529_v43 = vadd.f32 %v1270_v12, %v7424_v58  ;;  %v5108_v12 = vsel %vm9859_vm8, 1.0, %v10031_v36  ;;  %vm9917_vm8 = vcmp.eq.s32.totalorder %v6917_v47, %v10029_v13 }
 0x228   : > { %1695 = vmatmul.f32.gmra.mxu0 %v454_v30  ;;  %v1246_v28 = vpop.f32.mrf.mxu1 }
 0x229   : > { %1808 = vmatmul.f32.gmra.mxu1 %v1229_v16  ;;  %v1133_v30 = vpop.f32.mrf.mxu0 }
 0x22a   : > { %1400 = vxpose.xlu0.b32.cont [11/16] %v5104_v11, 128 }
 0x22b   : > { %5269 = vmatmul.lmr.bf16.gmra.16.mxu3 }
 0x22d   : > { %v1273_v31 = vpop.f32.mrf.mxu3 }
 0x22e   : > { %v7539_v58 = vadd.f32 %v1273_v31, %v7440_v55  ;;  %v458_v31 = vld [vmem:[%s7350_s20 + $0x70] sm:$0xff] }
 0x230   : > { %1698 = vmatmul.f32.gmra.mxu0 %v455_v8  ;;  %v1249_v11 = vpop.f32.mrf.mxu1 }
 0x231   : > { %1811 = vmatmul.f32.gmra.mxu1 %v1232_v44  ;;  %v7558_v44 = vpop.f32.mrf.mxu2  ;;  %v1136_v22 = vpop.f32.mrf.mxu0 }
 0x232   : > { %1401 = vxpose.xlu0.b32.cont [12/16] %v5106_v2, 128 }
 0x233   : > { %5270 = vmatmul.lmr.bf16.gmra.16.mxu3 }
 0x235   : > { %v1276_v16 = vpop.f32.mrf.mxu3 }
 0x236   : > { %v7549_v55 = vadd.f32 %v1276_v16, %v7456_v41  ;;  %v459_v16 = vld [vmem:[%s7350_s20 + $0x78] sm:$0xff] }
 0x238   : > { %1701 = vmatmul.f32.gmra.mxu0 %v456_v59 }
 0x239   : > { %1814 = vmatmul.f32.gmra.mxu1 %v1235_v15  ;;  %v5110_v15 = vsel %vm9860_vm11, 1.0, %v10031_v36  ;;  %v7573_v2 = vpop.f32.mrf.mxu2  ;;  %v1139_v51 = vpop.f32.mrf.mxu0  ;;  %vm9897_vm11 = vcmp.eq.s32.totalorder %v6988_v52, %v10029_v13 }
 0x23a   : > { %1402 = vxpose.xlu0.b32.cont [13/16] %v5108_v12, 128 }
 0x23b   : > { %5271 = vmatmul.lmr.bf16.gmra.16.mxu3 }
 0x23d   : > { %v1279_v41 = vpop.f32.mrf.mxu3 }
 0x23e   : > { %v7561_v8 = vadd.f32 %v1279_v41, %v7470_v40  ;;  %v5114_v41 = vsel %vm9897_vm11, 1.0, %v10031_v36 }
 0x240   : > { %1704 = vmatmul.f32.gmra.mxu0 %v457_v37  ;;  %v1252_v37 = vpop.f32.mrf.mxu1 }
 0x241   : > { %1817 = vmatmul.f32.gmra.mxu1 %v1238_v49  ;;  %v5112_v49 = vsel %vm9917_vm8, 1.0, %v10031_v36  ;;  %v7585_v9 = vpop.f32.mrf.mxu2 }
 0x242   : > { %1403 = vxpose.xlu0.b32.cont [14/16] %v5110_v15, 128 }
 0x243   : > { %5272 = vmatmul.lmr.bf16.gmra.16.mxu3 }
 0x245   : > { %v1282_v59 = vpop.f32.mrf.mxu3 }
 0x246   : > { %v7571_v40 = vadd.f32 %v1282_v59, %v7482_v14 }
 0x248   : > { %1707 = vmatmul.f32.gmra.mxu0 %v458_v31  ;;  %v1255_v59 = vpop.f32.mrf.mxu1 }
 0x249   : > { %1820 = vmatmul.f32.gmra.mxu1 %v1241_v63  ;;  %v1247_v63 = vadd.f32 %v1246_v28, %v1133_v30  ;;  %v462_v28 = vld [vmem:[%s7350_s20 + $0x90] sm:$0xff] }
 0x24a   : > { %1404 = vxpose.xlu0.b32.cont [15/16] %v5112_v49, 128  ;;  %v1250_v49 = vadd.f32 %v1249_v11, %v1136_v22  ;;  %v407_v22 = vld [vmem:[%s6410_s12 + $0x178] sm:$0xff] }
 0x24b   : > { %5273 = vmatmul.lmr.bf16.gmra.16.mxu3  ;;  %1875 = vmatpush.msrb.mxu2 %v407_v22  ;;  %v402_v22 = vld [vmem:[%s6410_s12 + $0x150] sm:$0xff] }
 0x24d   : > { %v1285_v14 = vpop.f32.mrf.mxu3 }
 0x24e   : > { %v7583_v12 = vadd.f32 %v1285_v14, %v7494_v34  ;;  %v1142_v34 = vpop.f32.mrf.mxu0 }
 0x250   : > { %1710 = vmatmul.f32.gmra.mxu0 %v459_v16  ;;  %v461_v16 = vld [vmem:[%s7350_s20 + $0x88] sm:$0xff] }
 0x251   : > { %1823 = vmatmul.f32.gmra.mxu1 %v1244_v27  ;;  %v7597_v27 = vpop.f32.mrf.mxu2 }
 0x252   : > { %1405 = vxpose.xlu0.b32.end [16/16] %v5114_v41, 128  ;;  %v1253_v41 = vadd.f32 %v1252_v37, %v1139_v51  ;;  %v404_v37 = vld [vmem:[%s6410_s12 + $0x160] sm:$0xff] }
 0x253   : > { %5274 = vmatmul.lmr.bf16.gmra.16.mxu3 }
 0x255   : > { %v1288_v31 = vpop.f32.mrf.mxu3 }
 0x256   : > { %v7595_v15 = vadd.f32 %v1288_v31, %v7506_v24  ;;  %v1145_v30 = vpop.f32.mrf.mxu0  ;;  %v1258_v24 = vpop.f32.mrf.mxu1 }
 0x258   : > { %1713 = vmatmul.f32.gmra.mxu0 %v460_v18 }
 0x259   : > { %1826 = vmatmul.f32.gmra.mxu1 %v1247_v63  ;;  %v7604_v18 = vpop.f32.mrf.mxu2 }
 0x25b   : > { %5275 = vmatmul.lmr.bf16.gmra.16.mxu3 }
 0x25d   : > { %v1291_v14 = vpop.f32.mrf.mxu3 }
 0x25e   : > { %v7601_v36 = vadd.f32 %v1291_v14, %v7518_v42  ;;  %v406_v42 = vld [vmem:[%s6410_s12 + $0x170] sm:$0xff]  ;;  %v1148_v11 = vpop.f32.mrf.mxu0  ;;  %v1261_v31 = vpop.f32.mrf.mxu1  ;;  %v1256_v14 = vadd.f32 %v1255_v59, %v1142_v34  ;;  %v401_v34 = vld [vmem:[%s6410_s12 + $0x148] sm:$0xff]  ;;  %v1259_v59 = vadd.f32 %v1258_v24, %v1145_v30 }
 0x25f   : > { %1876 = vmatpush.msrb.mxu2 %v406_v42  ;;  %v397_v30 = vld [vmem:[%s6410_s12 + $0x128] sm:$0xff]  ;;  %v1262_v24 = vadd.f32 %v1261_v31, %v1148_v11 }
 0x260   : > { %1716 = vmatmul.f32.gmra.mxu0 %v461_v16  ;;  %v463_v16 = vld [vmem:[%s7350_s20 + $0x98] sm:$0xff]  ;;  %v466_v11 = vld [vmem:[%s7350_s20 + $0xb0] sm:$0xff] }
 0x261   : > { %1829 = vmatmul.f32.gmra.mxu1 %v1250_v49  ;;  %v405_v49 = vld [vmem:[%s6410_s12 + $0x168] sm:$0xff] }
 0x262   : > { %1877 = vmatpush.msrb.mxu2 %v405_v49  ;;  %v393_v31 = vld [vmem:[%s6410_s12 + $0x108] sm:$0xff] }
 0x263   : > { %5276 = vmatmul.lmr.bf16.gmra.16.mxu3 }
 0x264   : > { %1878 = vmatpush.msrb.mxu2 %v404_v37 }
 0x265   : > { %v7606_v63 = vpop.f32.mrf.mxu3 }
 0x266   : > { %v1151_v42 = vpop.f32.mrf.mxu0  ;;  %v1264_v49 = vpop.f32.mrf.mxu1 }
 0x267   : > { %v1265_v25 = vadd.f32 %v1264_v49, %v1151_v42 }
 0x268   : > { %1719 = vmatmul.f32.gmra.mxu0 %v462_v28  ;;  %v7615_v28 = vpop.f32.mrf.mxu2 }
 0x269   : > { %1832 = vmatmul.f32.gmra.mxu1 %v1253_v41  ;;  %v403_v41 = vld [vmem:[%s6410_s12 + $0x158] sm:$0xff] }
 0x26a   : > { %1879 = vmatpush.msrb.mxu2 %v403_v41  ;;  %v398_v41 = vld [vmem:[%s6410_s12 + $0x130] sm:$0xff] }
 0x26b   : > { %5277 = vmatmul.lmr.bf16.gmra.16.mxu3 }
 0x26c   : > { %1880 = vmatpush.msrb.mxu2 %v402_v22  ;;  %v465_v22 = vld [vmem:[%s7350_s20 + $0xa8] sm:$0xff] }
 0x26e   : > { %v7612_v51 = vpop.f32.mrf.mxu3  ;;  %1881 = vmatpush.msrb.mxu2 %v401_v34  ;;  %v1154_v34 = vpop.f32.mrf.mxu0 }
 0x270   : > { %1722 = vmatmul.f32.gmra.mxu0 %v463_v16  ;;  %v400_v16 = vld [vmem:[%s6410_s12 + $0x140] sm:$0xff]  ;;  %v7625_v37 = vpop.f32.mrf.mxu2 }
 0x271   : > { %1835 = vmatmul.f32.gmra.mxu1 %v1256_v14  ;;  %v399_v14 = vld [vmem:[%s6410_s12 + $0x138] sm:$0xff]  ;;  %1882 = vmatpush.msrb.mxu2 %v400_v16 }
 0x272   : > { %v395_v16 = vld [vmem:[%s6410_s12 + $0x118] sm:$0xff] }
 0x273   : > { %5278 = vmatmul.lmr.bf16.gmra.16.mxu3  ;;  %1883 = vmatpush.msrb.mxu2 %v399_v14 }
 0x275   : > { %1884 = vmatpush.msrb.mxu2 %v398_v41 }
 0x276   : > { %v7621_v4 = vpop.f32.mrf.mxu3 }
 0x277   : > { %1885 = vmatpush.msrb.mxu2 %v397_v30  ;;  %v392_v30 = vld [vmem:[%s6410_s12 + $0x100] sm:$0xff] }
 0x278   : > { %1725 = vmatmul.f32.gmra.mxu0 %v464_v39  ;;  %v396_v39 = vld [vmem:[%s6410_s12 + $0x120] sm:$0xff]  ;;  %v7635_v41 = vpop.f32.mrf.mxu2 }
 0x279   : > { %1838 = vmatmul.f32.gmra.mxu1 %v1259_v59  ;;  %v1267_v59 = vpop.f32.mrf.mxu1  ;;  %1886 = vmatpush.msrb.mxu2 %v396_v39 }
 0x27b   : > { %5279 = vmatmul.lmr.bf16.gmra.16.mxu3  ;;  %1887 = vmatpush.msrb.mxu2 %v395_v16  ;;  %v467_v16 = vld [vmem:[%s7350_s20 + $0xb8] sm:$0xff] }
 0x27d   : > { %1888 = vmatpush.msrb.mxu2 %v394_v21  ;;  %v1268_v21 = vadd.f32 %v1267_v59, %v1154_v34  ;;  %v469_v59 = vld [vmem:[%s7350_s20 + $0xc8] sm:$0xff] }
 0x27e   : > { %v7630_v17 = vpop.f32.mrf.mxu3  ;;  %v1406_v14 = vpop.trf.xlu0 }
 0x27f   : > { %1889 = vmatpush.msrb.mxu2 %v393_v31 }
 0x280   : > { %1728 = vmatmul.f32.gmra.mxu0 %v465_v22  ;;  %v7642_v22 = vpop.f32.mrf.mxu0  ;;  %v7647_v48 = vpop.f32.mrf.mxu2 }
 0x281   : > { %1841 = vmatmul.f32.gmra.mxu1 %v1262_v24  ;;  %1890 = vmatpush.msrb.mxu2 %v392_v30  ;;  %v7644_v24 = vpop.f32.mrf.mxu1 }
 0x283   : > { %5280 = vmatmul.lmr.bf16.gmra.16.mxu3 }
 0x286   : > { %v7639_v33 = vpop.f32.mrf.mxu3  ;;  %v1407_v39 = vpop.trf.xlu0 }
 0x288   : > { %1731 = vmatmul.f32.gmra.mxu0 %v466_v11  ;;  %v7651_v49 = vpop.f32.mrf.mxu0  ;;  %v468_v11 = vld [vmem:[%s7350_s20 + $0xc0] sm:$0xff]  ;;  %v7658_v57 = vpop.f32.mrf.mxu2 }
 0x289   : > { %1844 = vmatmul.f32.gmra.mxu1 %v1265_v25  ;;  %v7653_v25 = vpop.f32.mrf.mxu1 }
 0x28b   : > { %5281 = vmatmul.lmr.bf16.gmra.16.mxu3 }
 0x28e   : > { %v7649_v42 = vpop.f32.mrf.mxu3  ;;  %v1408_v31 = vpop.trf.xlu0 }
 0x290   : > { %1734 = vmatmul.f32.gmra.mxu0 %v467_v16  ;;  %v7661_v34 = vpop.f32.mrf.mxu0  ;;  %v7669_v20 = vpop.f32.mrf.mxu2 }
 0x291   : > { %1847 = vmatmul.f32.gmra.mxu1 %v1268_v21  ;;  %v7664_v16 = vpop.f32.mrf.mxu1 }
 0x293   : > { %5282 = vmatmul.lmr.bf16.gmra.16.mxu3 }
 0x296   : > { %v7656_v30 = vpop.f32.mrf.mxu3  ;;  %v1409_v62 = vpop.trf.xlu0 }
 0x298   : > { %1737 = vmatmul.f32.gmra.mxu0 %v468_v11  ;;  %v7672_v61 = vpop.f32.mrf.mxu0 }
 0x299   : > { %1850 = vmatmul.f32.gmra.mxu1 %v7529_v43  ;;  %v7675_v19 = vpop.f32.mrf.mxu1 }
 0x29b   : > { %5283 = vmatmul.lmr.bf16.gmra.16.mxu3 }
 0x29e   : > { %v7666_v21 = vpop.f32.mrf.mxu3  ;;  %v1410_v35 = vpop.trf.xlu0 }
 0x2a0   : > { %1740 = vmatmul.f32.gmra.mxu0 %v469_v59  ;;  %v7678_v59 = vpop.f32.mrf.mxu2 }
 0x2a1   : > { %1853 = vmatmul.f32.gmra.mxu1 %v7539_v58  ;;  %v471_v58 = vld [vmem:[%s7350_s20 + $0xd8] sm:$0xff] }
 0x2a3   : > { %1599 = vmatmul.f32.gmra.mxu3 %v1406_v14 }
 0x2a6   : > { %v1552_v11 = vpop.f32.mrf.mxu3 }
 0x2a7   : > { %v1553_v43 = vadd.f32 %v1552_v11, %v7558_v44  ;;  %v7683_v44 = vpop.f32.mrf.mxu0  ;;  %v472_v11 = vld [vmem:[%s7350_s20 + $0xe0] sm:$0xff] }
 0x2a8   : > { %1743 = vmatmul.f32.gmra.mxu0 %v470_v53  ;;  %v7685_v53 = vpop.f32.mrf.mxu1 }
 0x2a9   : > { %1856 = vmatmul.f32.gmra.mxu1 %v7549_v55  ;;  %1891 = vmatmul.f32.vlgmr.msrb.gmra.mxu2 %v1553_v43  ;;  %v1411_v55 = vpop.trf.xlu0  ;;  %v7688_v43 = vpop.f32.mrf.mxu2 }
 0x2ab   : > { %1602 = vmatmul.f32.gmra.mxu3 %v1407_v39 }
 0x2ae   : > { %v1555_v26 = vpop.f32.mrf.mxu3 }
 0x2af   : > { %v1556_v14 = vadd.f32 %v1555_v26, %v7573_v2  ;;  %v7692_v26 = vpop.f32.mrf.mxu0  ;;  %v473_v2 = vld [vmem:[%s7350_s20 + $0xe8] sm:$0xff] }
 0x2b0   : > { %1746 = vmatmul.f32.gmra.mxu0 %v471_v58 }
 0x2b1   : > { %1859 = vmatmul.f32.gmra.mxu1 %v7561_v8  ;;  %1894 = vmatmul.f32.gmra.mxu2 %v1556_v14  ;;  %v7694_v8 = vpop.f32.mrf.mxu1  ;;  %v1412_v58 = vpop.trf.xlu0 }
 0x2b2   : > { %v7698_v54 = vpop.f32.mrf.mxu2 }
 0x2b3   : > { %1605 = vmatmul.f32.gmra.mxu3 %v1408_v31 }
 0x2b6   : > { %v1558_v39 = vpop.f32.mrf.mxu3 }
 0x2b7   : > { %v1559_v46 = vadd.f32 %v1558_v39, %v7585_v9 }
 0x2b8   : > { %1749 = vmatmul.f32.gmra.mxu0 %v472_v11 }
 0x2b9   : > { %1862 = vmatmul.f32.gmra.mxu1 %v7571_v40  ;;  %1897 = vmatmul.f32.gmra.mxu2 %v1559_v46  ;;  %v7701_v40 = vpop.f32.mrf.mxu0  ;;  %v7704_v46 = vpop.f32.mrf.mxu1 }
 0x2ba   : > { %v1413_v39 = vpop.trf.xlu0 }
 0x2bb   : > { %1608 = vmatmul.f32.gmra.mxu3 %v1409_v62  ;;  %v474_v62 = vld [vmem:[%s7350_s20 + $0xf0] sm:$0xff] }
 0x2be   : > { %v1561_v31 = vpop.f32.mrf.mxu3 }
 0x2bf   : > { %v1562_v14 = vadd.f32 %v1561_v31, %v7597_v27  ;;  %v7708_v27 = vpop.f32.mrf.mxu2 }
 0x2c0   : > { %1752 = vmatmul.f32.gmra.mxu0 %v473_v2  ;;  %v475_v2 = vld [vmem:[%s7350_s20 + $0xf8] sm:$0xff] }
 0x2c1   : > { %1865 = vmatmul.f32.gmra.mxu1 %v7583_v12  ;;  %1900 = vmatmul.f32.gmra.mxu2 %v1562_v14  ;;  %v7712_v31 = vpop.f32.mrf.mxu0  ;;  %v7714_v14 = vpop.f32.mrf.mxu1 }
 0x2c3   : > { %1611 = vmatmul.f32.gmra.mxu3 %v1410_v35 }
 0x2c6   : > { %v1564_v9 = vpop.f32.mrf.mxu3 }
 0x2c7   : > { %v1565_v11 = vadd.f32 %v1564_v9, %v7604_v18  ;;  %v1414_v18 = vpop.trf.xlu0 }
 0x2c8   : > { %1755 = vmatmul.f32.gmra.mxu0 %v474_v62  ;;  %v7717_v62 = vpop.f32.mrf.mxu2 }
 0x2c9   : > { %1868 = vmatmul.f32.gmra.mxu1 %v7595_v15  ;;  %1903 = vmatmul.f32.gmra.mxu2 %v1565_v11 }
 0x2cb   : > { %1614 = vmatmul.f32.gmra.mxu3 %v1411_v55 }
 0x2ce   : > { %v1567_v12 = vpop.f32.mrf.mxu3 }
 0x2cf   : > { %v1568_v35 = vadd.f32 %v1567_v12, %v7615_v28  ;;  %v1415_v55 = vpop.trf.xlu0 }
 0x2d0   : > { %1758 = vmatmul.f32.gmra.mxu0 %v475_v2  ;;  %v7720_v28 = vpop.f32.mrf.mxu2 }
 0x2d1   : > { %1871 = vmatmul.f32.gmra.mxu1 %v7601_v36  ;;  %1906 = vmatmul.f32.gmra.mxu2 %v1568_v35 }
 0x2d3   : > { %1617 = vmatmul.f32.gmra.mxu3 %v1412_v58 }
 0x2d6   : > { %v1570_v15 = vpop.f32.mrf.mxu3 }
 0x2d7   : > { %v1571_v9 = vadd.f32 %v1570_v15, %v7625_v37  ;;  %v1416_v36 = vpop.trf.xlu0 }
 0x2d8   : > { %v7724_v35 = vpop.f32.mrf.mxu2 }
 0x2d9   : > { %1909 = vmatmul.f32.gmra.mxu2 %v1571_v9  ;;  %v423_v9 = vld [vmem:[%s6410_s12 + $0x1f8] sm:$0xff] }
 0x2da   : > { %2021 = vmatpush.msra.mxu3 %v423_v9 }
 0x2db   : > { %1620 = vmatmul.f32.gmra.mxu3 %v1413_v39 }
 0x2de   : > { %v1573_v11 = vpop.f32.mrf.mxu3 }
 0x2df   : > { %v1574_v12 = vadd.f32 %v1573_v11, %v7635_v41  ;;  %v1417_v15 = vpop.trf.xlu0 }
 0x2e0   : > { %v7728_v41 = vpop.f32.mrf.mxu2 }
 0x2e1   : > { %1912 = vmatmul.f32.gmra.mxu2 %v1574_v12  ;;  %v420_v12 = vld [vmem:[%s6410_s12 + $0x1e0] sm:$0xff] }
 0x2e3   : > { %1623 = vmatmul.f32.gmra.mxu3 %v1414_v18  ;;  %v422_v18 = vld [vmem:[%s6410_s12 + $0x1f0] sm:$0xff] }
 0x2e4   : > { %2022 = vmatpush.msra.mxu3 %v422_v18  ;;  %v415_v18 = vld [vmem:[%s6410_s12 + $0x1b8] sm:$0xff] }
 0x2e6   : > { %v1576_v58 = vpop.f32.mrf.mxu3 }
 0x2e7   : > { %v1577_v2 = vadd.f32 %v1576_v58, %v7647_v48  ;;  %v421_v48 = vld [vmem:[%s6410_s12 + $0x1e8] sm:$0xff]  ;;  %v419_v58 = vld [vmem:[%s6410_s12 + $0x1d8] sm:$0xff] }
 0x2e8   : > { %2023 = vmatpush.msra.mxu3 %v421_v48 }
 0x2e9   : > { %1915 = vmatmul.f32.gmra.mxu2 %v1577_v2  ;;  %v418_v2 = vld [vmem:[%s6410_s12 + $0x1d0] sm:$0xff] }
 0x2ea   : > { %2024 = vmatpush.msra.mxu3 %v420_v12 }
 0x2eb   : > { %1626 = vmatmul.f32.gmra.mxu3 %v1415_v55 }
 0x2ec   : > { %2025 = vmatpush.msra.mxu3 %v419_v58  ;;  %v412_v58 = vld [vmem:[%s6410_s12 + $0x1a0] sm:$0xff] }
 0x2ee   : > { %v1579_v37 = vpop.f32.mrf.mxu3  ;;  %2026 = vmatpush.msra.mxu3 %v418_v2  ;;  %v411_v2 = vld [vmem:[%s6410_s12 + $0x198] sm:$0xff] }
 0x2ef   : > { %v1580_v39 = vadd.f32 %v1579_v37, %v7658_v57  ;;  %v1418_v57 = vpop.trf.xlu0  ;;  %v417_v37 = vld [vmem:[%s6410_s12 + $0x1c8] sm:$0xff] }
 0x2f0   : > { %2027 = vmatpush.msra.mxu3 %v417_v37 }
 0x2f1   : > { %1918 = vmatmul.f32.gmra.mxu2 %v1580_v39 }
 0x2f3   : > { %1629 = vmatmul.f32.gmra.mxu3 %v1416_v36  ;;  %v7736_v36 = vpop.f32.mrf.mxu2 }
 0x2f6   : > { %v1582_v11 = vpop.f32.mrf.mxu3 }
 0x2f7   : > { %v1583_v55 = vadd.f32 %v1582_v11, %v7669_v20  ;;  %v416_v20 = vld [vmem:[%s6410_s12 + $0x1c0] sm:$0xff]  ;;  %v1419_v48 = vpop.trf.xlu0  ;;  %v413_v11 = vld [vmem:[%s6410_s12 + $0x1a8] sm:$0xff] }
 0x2f8   : > { %2028 = vmatpush.msra.mxu3 %v416_v20 }
 0x2f9   : > { %1921 = vmatmul.f32.gmra.mxu2 %v1583_v55 }
 0x2fa   : > { %2029 = vmatpush.msra.mxu3 %v415_v18  ;;  %v408_v18 = vld [vmem:[%s6410_s12 + $0x180] sm:$0xff] }
 0x2fb   : > { %1632 = vmatmul.f32.gmra.mxu3 %v1417_v15  ;;  %v414_v15 = vld [vmem:[%s6410_s12 + $0x1b0] sm:$0xff]  ;;  %v7744_v55 = vpop.f32.mrf.mxu2 }
 0x2fc   : > { %2030 = vmatpush.msra.mxu3 %v414_v15 }
 0x2fe   : > { %v1585_v39 = vpop.f32.mrf.mxu3  ;;  %2031 = vmatpush.msra.mxu3 %v413_v11 }
 0x2ff   : > { %v1586_v9 = vadd.f32 %v1585_v39, %v7678_v59  ;;  %v1420_v37 = vpop.trf.xlu0  ;;  %v409_v39 = vld [vmem:[%s6410_s12 + $0x188] sm:$0xff] }
 0x300   : > { %2032 = vmatpush.msra.mxu3 %v412_v58 }
 0x301   : > { %1924 = vmatmul.f32.gmra.mxu2 %v1586_v9 }
 0x302   : > { %2033 = vmatpush.msra.mxu3 %v411_v2 }
 0x303   : > { %1635 = vmatmul.f32.gmra.mxu3 %v1418_v57  ;;  %v410_v57 = vld [vmem:[%s6410_s12 + $0x190] sm:$0xff]  ;;  %v7753_v15 = vpop.f32.mrf.mxu2 }
 0x304   : > { %2034 = vmatpush.msra.mxu3 %v410_v57 }
 0x306   : > { %v1588_v12 = vpop.f32.mrf.mxu3  ;;  %2035 = vmatpush.msra.mxu3 %v409_v39 }
 0x307   : > { %v1589_v59 = vadd.f32 %v1588_v12, %v7688_v43 }
 0x308   : > { %2036 = vmatpush.msra.mxu3 %v408_v18 }
 0x309   : > { %1927 = vmatmul.f32.gmra.mxu2 %v1589_v59 }
 0x30b   : > { %1638 = vmatmul.f32.gmra.mxu3 %v1419_v48  ;;  %v1421_v48 = vpop.trf.xlu0  ;;  %v7756_v12 = vpop.f32.mrf.mxu2 }
 0x30e   : > { %v1591_v9 = vpop.f32.mrf.mxu3 }
 0x30f   : > { %v1592_v20 = vadd.f32 %v1591_v9, %v7698_v54  ;;  %v7760_v54 = vld [vmem:[%s6434_s6] sm:$0xff] }
 0x310   : > { %10033 = vst [vmem:[#allocation95_spill] sm:$0xff] %v7760_v54  ;;  %v7765_v57 = vperm.slane %v7760_v54, 0 }
 0x311   : > { %1930 = vmatmul.f32.gmra.mxu2 %v1592_v20 }
 0x313   : > { %1641 = vmatmul.f32.gmra.mxu3 %v1420_v37  ;;  %v7762_v2 = vpop.f32.mrf.mxu2 }
 0x316   : > { %v1594_v43 = vpop.f32.mrf.mxu3 }
 0x317   : > { %v1595_v11 = vadd.f32 %v1594_v43, %v7708_v27  ;;  %v1667_v27 = vadd.f32 %v7642_v22, %v7765_v57  ;;  %v1670_v43 = vadd.f32 %v7651_v49, %v7765_v57  ;;  %v7775_v22 = vpop.f32.mrf.mxu0 }
 0x319   : > { %1933 = vmatmul.f32.gmra.mxu2 %v1595_v11  ;;  %v1780_v9 = vadd.f32 %v7644_v24, %v1667_v27  ;;  %v1673_v24 = vadd.f32 %v7661_v34, %v7765_v57 }
 0x31b   : > { %1644 = vmatmul.f32.gmra.mxu3 %v1421_v48  ;;  %v1786_v49 = vadd.f32 %v7664_v16, %v1673_v24 }
 0x31e   : > { %v1597_v59 = vpop.f32.mrf.mxu3 }
 0x31f   : > { %v1598_v58 = vadd.f32 %v1597_v59, %v7717_v62  ;;  %v1783_v59 = vadd.f32 %v7653_v25, %v1670_v43 }
 0x321   : > { %1936 = vmatmul.f32.gmra.mxu2 %v1598_v58 }
 0x326   : > { %v1600_v37 = vpop.f32.mrf.mxu3 }
 0x327   : > { %v1601_v39 = vadd.f32 %v1600_v37, %v7720_v28 }
 0x329   : > { %1939 = vmatmul.f32.gmra.mxu2 %v1601_v39 }
 0x32c   : > { %v1892_v20 = vpop.f32.mrf.mxu2 }
 0x32d   : > { %v1893_v18 = vadd.f32 %v1892_v20, %v1780_v9 }
 0x32e   : > { %v1603_v62 = vpop.f32.mrf.mxu3 }
 0x32f   : > { %v1988_v11 = vmax.f32 %v1893_v18, 0.0  ;;  %v1604_v48 = vadd.f32 %v1603_v62, %v7724_v35  ;;  %v7781_v35 = vpop.f32.mrf.mxu1  ;;  %v1676_v18 = vadd.f32 %v7672_v61, %v7765_v57  ;;  %v7785_v62 = vpop.f32.mrf.mxu0 }
 0x331   : > { %1942 = vmatmul.f32.gmra.mxu2 %v1604_v48  ;;  %2037 = vmatmul.f32.vlgmr.msra.gmra.mxu3 %v1988_v11 }
 0x334   : > { %v1895_v58 = vpop.f32.mrf.mxu2 }
 0x335   : > { %v1896_v28 = vadd.f32 %v1895_v58, %v1783_v59  ;;  %v1679_v58 = vadd.f32 %v7683_v44, %v7765_v57 }
 0x336   : > { %v1606_v37 = vpop.f32.mrf.mxu3 }
 0x337   : > { %v1989_v27 = vmax.f32 %v1896_v28, 0.0  ;;  %v1607_v39 = vadd.f32 %v1606_v37, %v7728_v41  ;;  %v1789_v41 = vadd.f32 %v7675_v19, %v1676_v18  ;;  %v1806_v48 = vpop.f32.mrf.mxu1  ;;  %v1696_v61 = vpop.f32.mrf.mxu0  ;;  %v1792_v24 = vadd.f32 %v7685_v53, %v1679_v58 }
 0x338   : > { %v1682_v19 = vadd.f32 %v7692_v26, %v7765_v57  ;;  %v1685_v53 = vadd.f32 %v7701_v40, %v7765_v57  ;;  %v1688_v58 = vadd.f32 %v7712_v31, %v7765_v57 }
 0x339   : > { %1945 = vmatmul.f32.gmra.mxu2 %v1607_v39  ;;  %2040 = vmatmul.f32.gmra.mxu3 %v1989_v27 }
 0x33a   : > { %v1795_v44 = vadd.f32 %v7694_v8, %v1682_v19 }
 0x33c   : > { %v1898_v9 = vpop.f32.mrf.mxu2 }
 0x33d   : > { %v1899_v20 = vadd.f32 %v1898_v9, %v1786_v49 }
 0x33e   : > { %v1609_v25 = vpop.f32.mrf.mxu3 }
 0x33f   : > { %v1990_v43 = vmax.f32 %v1899_v20, 0.0  ;;  %v1610_v34 = vadd.f32 %v1609_v25, %v7736_v36  ;;  %v1809_v49 = vpop.f32.mrf.mxu1 }
 0x341   : > { %1948 = vmatmul.f32.gmra.mxu2 %v1610_v34  ;;  %2043 = vmatmul.f32.gmra.mxu3 %v1990_v43 }
 0x344   : > { %v1901_v11 = vpop.f32.mrf.mxu2 }
 0x345   : > { %v1902_v16 = vadd.f32 %v1901_v11, %v1789_v41 }
 0x346   : > { %v1612_v59 = vpop.f32.mrf.mxu3 }
 0x347   : > { %v1991_v28 = vmax.f32 %v1902_v16, 0.0  ;;  %v1613_v37 = vadd.f32 %v1612_v59, %v7744_v55  ;;  %v7797_v55 = vpop.f32.mrf.mxu0  ;;  %v7802_v26 = vpop.f32.mrf.mxu1 }
 0x349   : > { %1951 = vmatmul.f32.gmra.mxu2 %v1613_v37  ;;  %2046 = vmatmul.f32.gmra.mxu3 %v1991_v28 }
 0x34c   : > { %v1904_v36 = vpop.f32.mrf.mxu2 }
 0x34d   : > { %v1905_v27 = vadd.f32 %v1904_v36, %v1792_v24 }
 0x34e   : > { %v1615_v39 = vpop.f32.mrf.mxu3 }
 0x34f   : > { %v1992_v9 = vmax.f32 %v1905_v27, 0.0  ;;  %v1616_v20 = vadd.f32 %v1615_v39, %v7753_v15  ;;  %v1798_v15 = vadd.f32 %v7704_v46, %v1685_v53  ;;  %v7805_v16 = vpop.f32.mrf.mxu0  ;;  %v7811_v37 = vpop.f32.mrf.mxu1  ;;  %v1691_v27 = vadd.f32 %v7775_v22, %v7765_v57 }
 0x351   : > { %1954 = vmatmul.f32.gmra.mxu2 %v1616_v20  ;;  %2049 = vmatmul.f32.gmra.mxu3 %v1992_v9 }
 0x354   : > { %v1907_v25 = vpop.f32.mrf.mxu2 }
 0x355   : > { %v1908_v18 = vadd.f32 %v1907_v25, %v1795_v44  ;;  %v1694_v25 = vadd.f32 %v7785_v62, %v7765_v57 }
 0x356   : > { %v1618_v43 = vpop.f32.mrf.mxu3 }
 0x357   : > { %v1993_v34 = vmax.f32 %v1908_v18, 0.0  ;;  %v1619_v41 = vadd.f32 %v1618_v43, %v7756_v12  ;;  %v1801_v12 = vadd.f32 %v7714_v14, %v1688_v58  ;;  %v7815_v39 = vpop.f32.mrf.mxu0  ;;  %v7819_v20 = vpop.f32.mrf.mxu1 }
 0x359   : > { %1957 = vmatmul.f32.gmra.mxu2 %v1619_v41  ;;  %2052 = vmatmul.f32.gmra.mxu3 %v1993_v34  ;;  %v1697_v41 = vadd.f32 %v1696_v61, %v7765_v57  ;;  %v437_v61 = vld [vmem:[%s6410_s12 + $0x268] sm:$0xff] }
 0x35c   : > { %v1910_v11 = vpop.f32.mrf.mxu2 }
 0x35d   : > { %v1911_v8 = vadd.f32 %v1910_v11, %v1798_v15 }
 0x35e   : > { %v1621_v59 = vpop.f32.mrf.mxu3 }
 0x35f   : > { %v1994_v28 = vmax.f32 %v1911_v8, 0.0  ;;  %v1622_v40 = vadd.f32 %v1621_v59, %v7762_v2  ;;  %v1804_v2 = vadd.f32 %v7781_v35, %v1691_v27  ;;  %v7824_v43 = vpop.f32.mrf.mxu0  ;;  %v7827_v15 = vpop.f32.mrf.mxu1  ;;  %v439_v8 = vld [vmem:[%s6410_s12 + $0x278] sm:$0xff] }
 0x360   : > { %2167 = vmatpush.msra.mxu0 %v439_v8 }
 0x361   : > { %1960 = vmatmul.f32.gmra.mxu2 %v1622_v40  ;;  %2055 = vmatmul.f32.gmra.mxu3 %v1994_v28 }
 0x364   : > { %v1913_v24 = vpop.f32.mrf.mxu2 }
 0x365   : > { %v1914_v36 = vadd.f32 %v1913_v24, %v1801_v12 }
 0x366   : > { %v1624_v46 = vpop.f32.mrf.mxu3 }
 0x367   : > { %v1995_v19 = vmax.f32 %v1914_v36, 0.0  ;;  %v1625_v31 = vadd.f32 %v1624_v46, %v7606_v63  ;;  %v1807_v63 = vadd.f32 %v1806_v48, %v1694_v25  ;;  %v7831_v59 = vpop.f32.mrf.mxu0  ;;  %v438_v48 = vld [vmem:[%s6410_s12 + $0x270] sm:$0xff]  ;;  %v436_v36 = vld [vmem:[%s6410_s12 + $0x260] sm:$0xff]  ;;  %v435_v46 = vld [vmem:[%s6410_s12 + $0x258] sm:$0xff] }
 0x368   : > { %2168 = vmatpush.msra.mxu0 %v438_v48 }
 0x369   : > { %1963 = vmatmul.f32.gmra.mxu2 %v1625_v31  ;;  %2058 = vmatmul.f32.gmra.mxu3 %v1995_v19  ;;  %v434_v19 = vld [vmem:[%s6410_s12 + $0x250] sm:$0xff] }
 0x36a   : > { %2169 = vmatpush.msra.mxu0 %v437_v61 }
 0x36c   : > { %v1916_v9 = vpop.f32.mrf.mxu2  ;;  %2170 = vmatpush.msra.mxu0 %v436_v36  ;;  %v424_v36 = vld [vmem:[%s6410_s12 + $0x200] sm:$0xff] }
 0x36d   : > { %v1917_v14 = vadd.f32 %v1916_v9, %v1804_v2 }
 0x36e   : > { %v1627_v44 = vpop.f32.mrf.mxu3  ;;  %2171 = vmatpush.msra.mxu0 %v435_v46 }
 0x36f   : > { %v1996_v18 = vmax.f32 %v1917_v14, 0.0  ;;  %v1628_v22 = vadd.f32 %v1627_v44, %v7612_v51  ;;  %v1810_v51 = vadd.f32 %v1809_v49, %v1697_v41  ;;  %v7839_v49 = vpop.f32.mrf.mxu1  ;;  %v1703_v14 = vadd.f32 %v7805_v16, %v7765_v57  ;;  %v429_v16 = vld [vmem:[%s6410_s12 + $0x228] sm:$0xff] }
 0x370   : > { %2172 = vmatpush.msra.mxu0 %v434_v19 }
 0x371   : > { %1966 = vmatmul.f32.gmra.mxu2 %v1628_v22  ;;  %2061 = vmatmul.f32.gmra.mxu3 %v1996_v18  ;;  %v432_v18 = vld [vmem:[%s6410_s12 + $0x240] sm:$0xff]  ;;  %v1816_v22 = vadd.f32 %v7811_v37, %v1703_v14  ;;  %v427_v37 = vld [vmem:[%s6410_s12 + $0x218] sm:$0xff] }
 0x374   : > { %v1919_v53 = vpop.f32.mrf.mxu2 }
 0x375   : > { %v1920_v35 = vadd.f32 %v1919_v53, %v1807_v63  ;;  %v430_v53 = vld [vmem:[%s6410_s12 + $0x230] sm:$0xff] }
 0x376   : > { %v1630_v34 = vpop.f32.mrf.mxu3 }
 0x377   : > { %v1997_v11 = vmax.f32 %v1920_v35, 0.0  ;;  %v1631_v62 = vadd.f32 %v1630_v34, %v7621_v4  ;;  %v1700_v4 = vadd.f32 %v7797_v55, %v7765_v57  ;;  %v7844_v55 = vpop.f32.mrf.mxu0  ;;  %v1827_v63 = vpop.f32.mrf.mxu1 }
 0x379   : > { %1969 = vmatmul.f32.gmra.mxu2 %v1631_v62  ;;  %2064 = vmatmul.f32.gmra.mxu3 %v1997_v11  ;;  %v1813_v27 = vadd.f32 %v7802_v26, %v1700_v4  ;;  %v431_v26 = vld [vmem:[%s6410_s12 + $0x238] sm:$0xff] }
 0x37c   : > { %v1922_v58 = vpop.f32.mrf.mxu2 }
 0x37d   : > { %v1923_v28 = vadd.f32 %v1922_v58, %v1810_v51  ;;  %v428_v51 = vld [vmem:[%s6410_s12 + $0x220] sm:$0xff]  ;;  %v426_v58 = vld [vmem:[%s6410_s12 + $0x210] sm:$0xff] }
 0x37e   : > { %v1633_v40 = vpop.f32.mrf.mxu3 }
 0x37f   : > { %v1998_v12 = vmax.f32 %v1923_v28, 0.0  ;;  %v1634_v24 = vadd.f32 %v1633_v40, %v7630_v17  ;;  %v433_v17 = vld [vmem:[%s6410_s12 + $0x248] sm:$0xff]  ;;  %v1717_v11 = vpop.f32.mrf.mxu0  ;;  %v1830_v61 = vpop.f32.mrf.mxu1 }
 0x380   : > { %2173 = vmatpush.msra.mxu0 %v433_v17 }
 0x381   : > { %1972 = vmatmul.f32.gmra.mxu2 %v1634_v24  ;;  %2067 = vmatmul.f32.gmra.mxu3 %v1998_v12 }
 0x382   : > { %2174 = vmatpush.msra.mxu0 %v432_v18 }
 0x384   : > { %v1925_v31 = vpop.f32.mrf.mxu2  ;;  %2175 = vmatpush.msra.mxu0 %v431_v26 }
 0x385   : > { %v1926_v2 = vadd.f32 %v1925_v31, %v1813_v27 }
 0x386   : > { %v1636_v9 = vpop.f32.mrf.mxu3  ;;  %2176 = vmatpush.msra.mxu0 %v430_v53 }
 0x387   : > { %v1999_v44 = vmax.f32 %v1926_v2, 0.0  ;;  %v1637_v25 = vadd.f32 %v1636_v9, %v7639_v33  ;;  %v1706_v33 = vadd.f32 %v7815_v39, %v7765_v57  ;;  %v425_v39 = vld [vmem:[%s6410_s12 + $0x208] sm:$0xff]  ;;  %v1720_v46 = vpop.f32.mrf.mxu0  ;;  %v1712_v2 = vadd.f32 %v7831_v59, %v7765_v57  ;;  %v1833_v17 = vpop.f32.mrf.mxu1 }
 0x388   : > { %2177 = vmatpush.msra.mxu0 %v429_v16  ;;  %v7876_v16 = vperm.slane %v7760_v54, 1 }
 0x389   : > { %1975 = vmatmul.f32.gmra.mxu2 %v1637_v25  ;;  %2070 = vmatmul.f32.gmra.mxu3 %v1999_v44  ;;  %v1819_v48 = vadd.f32 %v7819_v20, %v1706_v33 }
 0x38a   : > { %2178 = vmatpush.msra.mxu0 %v428_v51  ;;  %v1721_v51 = vadd.f32 %v1720_v46, %v7765_v57 }
 0x38c   : > { %v1928_v35 = vpop.f32.mrf.mxu2  ;;  %2179 = vmatpush.msra.mxu0 %v427_v37 }
 0x38d   : > { %v1929_v34 = vadd.f32 %v1928_v35, %v1816_v22 }
 0x38e   : > { %v1639_v41 = vpop.f32.mrf.mxu3  ;;  %2180 = vmatpush.msra.mxu0 %v426_v58 }
 0x38f   : > { %v2000_v62 = vmax.f32 %v1929_v34, 0.0  ;;  %v1640_v8 = vadd.f32 %v1639_v41, %v7649_v42  ;;  %v1709_v42 = vadd.f32 %v7824_v43, %v7765_v57  ;;  %v1723_v14 = vpop.f32.mrf.mxu0  ;;  %v1836_v26 = vpop.f32.mrf.mxu1  ;;  %v1718_v34 = vadd.f32 %v1717_v11, %v7765_v57 }
 0x390   : > { %2181 = vmatpush.msra.mxu0 %v425_v39  ;;  %v1834_v11 = vadd.f32 %v1833_v17, %v1721_v51 }
 0x391   : > { %1978 = vmatmul.f32.gmra.mxu2 %v1640_v8  ;;  %2073 = vmatmul.f32.gmra.mxu3 %v2000_v62  ;;  %v1822_v20 = vadd.f32 %v7827_v15, %v1709_v42  ;;  %v1715_v15 = vadd.f32 %v7844_v55, %v7765_v57 }
 0x392   : > { %2182 = vmatpush.msra.mxu0 %v424_v36 }
 0x393   : > { %v1828_v22 = vadd.f32 %v1827_v63, %v1715_v15 }
 0x394   : > { %v1931_v28 = vpop.f32.mrf.mxu2 }
 0x395   : > { %v1932_v40 = vadd.f32 %v1931_v28, %v1819_v48 }
 0x396   : > { %v1642_v4 = vpop.f32.mrf.mxu3 }
 0x397   : > { %v2001_v12 = vmax.f32 %v1932_v40, 0.0  ;;  %v1643_v24 = vadd.f32 %v1642_v4, %v7656_v30  ;;  %v1825_v30 = vadd.f32 %v7839_v49, %v1712_v2  ;;  %v1726_v59 = vpop.f32.mrf.mxu0  ;;  %v1831_v49 = vadd.f32 %v1830_v61, %v1718_v34  ;;  %v1839_v41 = vpop.f32.mrf.mxu1 }
 0x398   : > { %v1724_v4 = vadd.f32 %v1723_v14, %v7765_v57 }
 0x399   : > { %1981 = vmatmul.f32.gmra.mxu2 %v1643_v24  ;;  %2076 = vmatmul.f32.gmra.mxu3 %v2001_v12 }
 0x39a   : > { %v1837_v36 = vadd.f32 %v1836_v26, %v1724_v4 }
 0x39c   : > { %v1934_v27 = vpop.f32.mrf.mxu2 }
 0x39d   : > { %v1935_v19 = vadd.f32 %v1934_v27, %v1822_v20 }
 0x39e   : > { %v1645_v31 = vpop.f32.mrf.mxu3 }
 0x39f   : > { %v2002_v9 = vmax.f32 %v1935_v19, 0.0  ;;  %v1646_v43 = vadd.f32 %v1645_v31, %v7666_v21  ;;  %v1729_v63 = vpop.f32.mrf.mxu0  ;;  %v1842_v40 = vpop.f32.mrf.mxu1  ;;  %v1727_v31 = vadd.f32 %v1726_v59, %v7765_v57 }
 0x3a1   : > { %1984 = vmatmul.f32.gmra.mxu2 %v1646_v43  ;;  %2079 = vmatmul.f32.gmra.mxu3 %v2002_v9  ;;  %v1840_v43 = vadd.f32 %v1839_v41, %v1727_v31 }
 0x3a4   : > { %v1937_v44 = vpop.f32.mrf.mxu2 }
 0x3a5   : > { %v1938_v25 = vadd.f32 %v1937_v44, %v1825_v30 }
 0x3a7   : > { %v2003_v18 = vmax.f32 %v1938_v25, 0.0  ;;  %v1732_v24 = vpop.f32.mrf.mxu0  ;;  %v1845_v2 = vpop.f32.mrf.mxu1 }
 0x3a9   : > { %2082 = vmatmul.f32.gmra.mxu3 %v2003_v18  ;;  %v1730_v18 = vadd.f32 %v1729_v63, %v7765_v57 }
 0x3ab   : > { %v1843_v59 = vadd.f32 %v1842_v40, %v1730_v18 }
 0x3ac   : > { %v1940_v53 = vpop.f32.mrf.mxu2 }
 0x3ad   : > { %v1941_v35 = vadd.f32 %v1940_v53, %v1828_v22 }
 0x3af   : > { %v2004_v21 = vmax.f32 %v1941_v35, 0.0  ;;  %v1735_v30 = vpop.f32.mrf.mxu0  ;;  %v1848_v53 = vpop.f32.mrf.mxu1 }
 0x3b1   : > { %2085 = vmatmul.f32.gmra.mxu3 %v2004_v21 }
 0x3b4   : > { %v1943_v33 = vpop.f32.mrf.mxu2  ;;  %v2038_v62 = vpop.f32.mrf.mxu3 }
 0x3b5   : > { %v1944_v8 = vadd.f32 %v1943_v33, %v1831_v49  ;;  %v2039_v55 = vadd.f32 %v2038_v62, %v7876_v16  ;;  %v1733_v33 = vadd.f32 %v1732_v24, %v7765_v57 }
 0x3b7   : > { %v2005_v37 = vmax.f32 %v1944_v8, 0.0  ;;  %v2134_v48 = vmax.f32 %v2039_v55, 0.0  ;;  %v1738_v21 = vpop.f32.mrf.mxu0  ;;  %v1846_v55 = vadd.f32 %v1845_v2, %v1733_v33  ;;  %v1851_v51 = vpop.f32.mrf.mxu1 }
 0x3b9   : > { %2088 = vmatmul.f32.gmra.mxu3 %v2005_v37  ;;  %2183 = vmatmul.f32.vlgmr.msra.gmra.mxu0 %v2134_v48 }
 0x3bc   : > { %v1946_v58 = vpop.f32.mrf.mxu2  ;;  %v2041_v28 = vpop.f32.mrf.mxu3 }
 0x3bd   : > { %v1947_v39 = vadd.f32 %v1946_v58, %v1834_v11  ;;  %v2042_v61 = vadd.f32 %v2041_v28, %v7876_v16  ;;  %v1736_v58 = vadd.f32 %v1735_v30, %v7765_v57 }
 0x3bf   : > { %v2006_v42 = vmax.f32 %v1947_v39, 0.0  ;;  %v2135_v12 = vmax.f32 %v2042_v61, 0.0  ;;  %v1741_v28 = vpop.f32.mrf.mxu0  ;;  %v1849_v61 = vadd.f32 %v1848_v53, %v1736_v58 }
 0x3c0   : > { %v1742_v30 = vadd.f32 %v1741_v28, %v7765_v57 }
 0x3c1   : > { %2091 = vmatmul.f32.gmra.mxu3 %v2006_v42  ;;  %2186 = vmatmul.f32.gmra.mxu0 %v2135_v12  ;;  %v1854_v12 = vpop.f32.mrf.mxu1 }
 0x3c4   : > { %v1949_v46 = vpop.f32.mrf.mxu2  ;;  %v2044_v20 = vpop.f32.mrf.mxu3 }
 0x3c5   : > { %v1950_v27 = vadd.f32 %v1949_v46, %v1837_v36  ;;  %v2045_v19 = vadd.f32 %v2044_v20, %v7876_v16  ;;  %v1739_v46 = vadd.f32 %v1738_v21, %v7765_v57 }
 0x3c7   : > { %v2007_v17 = vmax.f32 %v1950_v27, 0.0  ;;  %v2136_v9 = vmax.f32 %v2045_v19, 0.0  ;;  %v1744_v19 = vpop.f32.mrf.mxu0  ;;  %v1852_v31 = vadd.f32 %v1851_v51, %v1739_v46 }
 0x3c9   : > { %2094 = vmatmul.f32.gmra.mxu3 %v2007_v17  ;;  %2189 = vmatmul.f32.gmra.mxu0 %v2136_v9 }
 0x3cc   : > { %v1952_v14 = vpop.f32.mrf.mxu2  ;;  %v2047_v44 = vpop.f32.mrf.mxu3 }
 0x3cd   : > { %v1953_v25 = vadd.f32 %v1952_v14, %v1840_v43  ;;  %v2048_v15 = vadd.f32 %v2047_v44, %v7876_v16  ;;  %v1857_v14 = vpop.f32.mrf.mxu1 }
 0x3cf   : > { %v2008_v26 = vmax.f32 %v1953_v25, 0.0  ;;  %v2137_v22 = vmax.f32 %v2048_v15, 0.0  ;;  %v1855_v15 = vadd.f32 %v1854_v12, %v1742_v30  ;;  %v1747_v18 = vpop.f32.mrf.mxu0 }
 0x3d1   : > { %2097 = vmatmul.f32.gmra.mxu3 %v2008_v26  ;;  %2192 = vmatmul.f32.gmra.mxu0 %v2137_v22 }
 0x3d4   : > { %v1955_v35 = vpop.f32.mrf.mxu2  ;;  %v2050_v34 = vpop.f32.mrf.mxu3 }
 0x3d5   : > { %v1956_v49 = vadd.f32 %v1955_v35, %v1843_v59  ;;  %v2051_v41 = vadd.f32 %v2050_v34, %v7876_v16  ;;  %v1745_v35 = vadd.f32 %v1744_v19, %v7765_v57 }
 0x3d7   : > { %v2009_v62 = vmax.f32 %v1956_v49, 0.0  ;;  %v2138_v8 = vmax.f32 %v2051_v41, 0.0  ;;  %v1860_v49 = vpop.f32.mrf.mxu1  ;;  %v1858_v41 = vadd.f32 %v1857_v14, %v1745_v35 }
 0x3d9   : > { %2100 = vmatmul.f32.gmra.mxu3 %v2009_v62  ;;  %2195 = vmatmul.f32.gmra.mxu0 %v2138_v8  ;;  %v1750_v8 = vpop.f32.mrf.mxu0 }
 0x3dc   : > { %v1958_v63 = vpop.f32.mrf.mxu2  ;;  %v2053_v37 = vpop.f32.mrf.mxu3 }
 0x3dd   : > { %v1959_v48 = vadd.f32 %v1958_v63, %v1846_v55  ;;  %v2054_v11 = vadd.f32 %v2053_v37, %v7876_v16  ;;  %v1748_v63 = vadd.f32 %v1747_v18, %v7765_v57 }
 0x3df   : > { %v2010_v40 = vmax.f32 %v1959_v48, 0.0  ;;  %v2139_v39 = vmax.f32 %v2054_v11, 0.0  ;;  %v1861_v11 = vadd.f32 %v1860_v49, %v1748_v63  ;;  %v1863_v58 = vpop.f32.mrf.mxu1 }
 0x3e1   : > { %2103 = vmatmul.f32.gmra.mxu3 %v2010_v40  ;;  %2198 = vmatmul.f32.gmra.mxu0 %v2139_v39 }
 0x3e4   : > { %v1961_v4 = vpop.f32.mrf.mxu2  ;;  %v2056_v42 = vpop.f32.mrf.mxu3 }
 0x3e5   : > { %v1962_v24 = vadd.f32 %v1961_v4, %v1849_v61  ;;  %v2057_v36 = vadd.f32 %v2056_v42, %v7876_v16  ;;  %v1751_v4 = vadd.f32 %v1750_v8, %v7765_v57  ;;  %v1753_v42 = vpop.f32.mrf.mxu0 }
 0x3e7   : > { %v2011_v20 = vmax.f32 %v1962_v24, 0.0  ;;  %v2140_v27 = vmax.f32 %v2057_v36, 0.0  ;;  %v1864_v36 = vadd.f32 %v1863_v58, %v1751_v4 }
 0x3e9   : > { %2106 = vmatmul.f32.gmra.mxu3 %v2011_v20  ;;  %2201 = vmatmul.f32.gmra.mxu0 %v2140_v27 }
 0x3ec   : > { %v1964_v2 = vpop.f32.mrf.mxu2  ;;  %v2059_v17 = vpop.f32.mrf.mxu3 }
 0x3ed   : > { %v1965_v9 = vadd.f32 %v1964_v2, %v1852_v31  ;;  %v2060_v43 = vadd.f32 %v2059_v17, %v7876_v16  ;;  %v1866_v31 = vpop.f32.mrf.mxu1  ;;  %v1754_v2 = vadd.f32 %v1753_v42, %v7765_v57 }
 0x3ef   : > { %v2012_v44 = vmax.f32 %v1965_v9, 0.0  ;;  %v2141_v25 = vmax.f32 %v2060_v43, 0.0  ;;  %v1756_v43 = vpop.f32.mrf.mxu0  ;;  %v1867_v30 = vadd.f32 %v1866_v31, %v1754_v2 }
 0x3f0   : > { %v1757_v18 = vadd.f32 %v1756_v43, %v7765_v57 }
 0x3f1   : > { %2109 = vmatmul.f32.gmra.mxu3 %v2012_v44  ;;  %2204 = vmatmul.f32.gmra.mxu0 %v2141_v25 }
 0x3f4   : > { %v1967_v26 = vpop.f32.mrf.mxu2  ;;  %v2062_v22 = vpop.f32.mrf.mxu3 }
 0x3f5   : > { %v1968_v53 = vadd.f32 %v1967_v26, %v1855_v15  ;;  %v2063_v59 = vadd.f32 %v2062_v22, %v7876_v16 }
 0x3f7   : > { %v2013_v34 = vmax.f32 %v1968_v53, 0.0  ;;  %v2142_v21 = vmax.f32 %v2063_v59, 0.0  ;;  %v1869_v53 = vpop.f32.mrf.mxu1  ;;  %v1759_v35 = vpop.f32.mrf.mxu0 }
 0x3f8   : > { %v1870_v59 = vadd.f32 %v1869_v53, %v1757_v18 }
 0x3f9   : > { %2112 = vmatmul.f32.gmra.mxu3 %v2013_v34  ;;  %2207 = vmatmul.f32.gmra.mxu0 %v2142_v21 }
 0x3fc   : > { %v1970_v33 = vpop.f32.mrf.mxu2  ;;  %v2065_v62 = vpop.f32.mrf.mxu3 }
 0x3fd   : > { %v1971_v55 = vadd.f32 %v1970_v33, %v1858_v41  ;;  %v2066_v51 = vadd.f32 %v2065_v62, %v7876_v16  ;;  %v1760_v33 = vadd.f32 %v1759_v35, %v7765_v57  ;;  %v7909_v57 = vperm.slane %v7760_v54, 2 }
 0x3ff   : > { %v2014_v37 = vmax.f32 %v1971_v55, 0.0  ;;  %v2143_v48 = vmax.f32 %v2066_v51, 0.0  ;;  %v1872_v55 = vpop.f32.mrf.mxu1 }
 0x400   : > { %v1873_v51 = vadd.f32 %v1872_v55, %v1760_v33 }
 0x401   : > { %2115 = vmatmul.f32.gmra.mxu3 %v2014_v37  ;;  %2210 = vmatmul.f32.gmra.mxu0 %v2143_v48 }
 0x404   : > { %v1973_v28 = vpop.f32.mrf.mxu2  ;;  %v2068_v40 = vpop.f32.mrf.mxu3 }
 0x405   : > { %v1974_v39 = vadd.f32 %v1973_v28, %v1861_v11  ;;  %v2069_v61 = vadd.f32 %v2068_v40, %v7876_v16 }
 0x407   : > { %v2015_v12 = vmax.f32 %v1974_v39, 0.0  ;;  %v2144_v24 = vmax.f32 %v2069_v61, 0.0 }
 0x409   : > { %2118 = vmatmul.f32.gmra.mxu3 %v2015_v12  ;;  %2213 = vmatmul.f32.gmra.mxu0 %v2144_v24 }
 0x40c   : > { %v1976_v46 = vpop.f32.mrf.mxu2  ;;  %v2071_v20 = vpop.f32.mrf.mxu3 }
 0x40d   : > { %v1977_v27 = vadd.f32 %v1976_v46, %v1864_v36  ;;  %v2072_v19 = vadd.f32 %v2071_v20, %v7876_v16 }
 0x40f   : > { %v2016_v17 = vmax.f32 %v1977_v27, 0.0  ;;  %v2145_v9 = vmax.f32 %v2072_v19, 0.0 }
 0x411   : > { %2121 = vmatmul.f32.gmra.mxu3 %v2016_v17  ;;  %2216 = vmatmul.f32.gmra.mxu0 %v2145_v9 }
 0x414   : > { %v1979_v14 = vpop.f32.mrf.mxu2  ;;  %v2074_v44 = vpop.f32.mrf.mxu3 }
 0x415   : > { %v1980_v25 = vadd.f32 %v1979_v14, %v1867_v30  ;;  %v2075_v15 = vadd.f32 %v2074_v44, %v7876_v16 }
 0x417   : > { %v2017_v26 = vmax.f32 %v1980_v25, 0.0  ;;  %v2146_v22 = vmax.f32 %v2075_v15, 0.0 }
 0x419   : > { %2124 = vmatmul.f32.gmra.mxu3 %v2017_v26  ;;  %2219 = vmatmul.f32.gmra.mxu0 %v2146_v22 }
 0x41c   : > { %v1982_v34 = vpop.f32.mrf.mxu2  ;;  %v2077_v21 = vpop.f32.mrf.mxu3 }
 0x41d   : > { %v1983_v49 = vadd.f32 %v1982_v34, %v1870_v59  ;;  %v2078_v41 = vadd.f32 %v2077_v21, %v7876_v16 }
 0x41f   : > { %v2018_v62 = vmax.f32 %v1983_v49, 0.0  ;;  %v2147_v8 = vmax.f32 %v2078_v41, 0.0 }
 0x421   : > { %2127 = vmatmul.f32.gmra.mxu3 %v2018_v62  ;;  %2222 = vmatmul.f32.gmra.mxu0 %v2147_v8 }
 0x424   : > { %v1985_v63 = vpop.f32.mrf.mxu2  ;;  %v2080_v37 = vpop.f32.mrf.mxu3 }
 0x425   : > { %v1986_v48 = vadd.f32 %v1985_v63, %v1873_v51  ;;  %v2081_v11 = vadd.f32 %v2080_v37, %v7876_v16 }
 0x427   : > { %v2019_v58 = vmax.f32 %v1986_v48, 0.0  ;;  %v2148_v28 = vmax.f32 %v2081_v11, 0.0 }
 0x429   : > { %2130 = vmatmul.f32.gmra.mxu3 %v2019_v58  ;;  %2225 = vmatmul.f32.gmra.mxu0 %v2148_v28 }
 0x42c   : > { %v2083_v40 = vpop.f32.mrf.mxu3 }
 0x42d   : > { %v2084_v39 = vadd.f32 %v2083_v40, %v7876_v16 }
 0x42f   : > { %v2149_v61 = vmax.f32 %v2084_v39, 0.0 }
 0x431   : > { %2228 = vmatmul.f32.gmra.mxu0 %v2149_v61 }
 0x434   : > { %v2086_v4 = vpop.f32.mrf.mxu3 }
 0x435   : > { %v2087_v42 = vadd.f32 %v2086_v4, %v7876_v16 }
 0x436   : > { %v2184_v12 = vpop.f32.mrf.mxu0 }
 0x437   : > { %v2150_v24 = vmax.f32 %v2087_v42, 0.0  ;;  %v7913_v36 = vadd.f32 %v2184_v12, %v7909_v57 }
 0x439   : > { %2231 = vmatmul.f32.gmra.mxu0 %v2150_v24  ;;  %2280 = vadd.xlane.f32.xlu1 %v7913_v36 }
 0x43c   : > { %v2089_v46 = vpop.f32.mrf.mxu3 }
 0x43d   : > { %v2090_v20 = vadd.f32 %v2089_v46, %v7876_v16 }
 0x43e   : > { %v2187_v27 = vpop.f32.mrf.mxu0 }
 0x43f   : > { %v2151_v19 = vmax.f32 %v2090_v20, 0.0  ;;  %v7918_v31 = vadd.f32 %v2187_v27, %v7909_v57 }
 0x441   : > { %2234 = vmatmul.f32.gmra.mxu0 %v2151_v19  ;;  %2282 = vadd.xlane.f32.xlu2 %v7918_v31 }
 0x444   : > { %v2092_v2 = vpop.f32.mrf.mxu3 }
 0x445   : > { %v2093_v17 = vadd.f32 %v2092_v2, %v7876_v16 }
 0x446   : > { %v2190_v9 = vpop.f32.mrf.mxu0 }
 0x447   : > { %v2152_v43 = vmax.f32 %v2093_v17, 0.0  ;;  %v7923_v30 = vadd.f32 %v2190_v9, %v7909_v57 }
 0x449   : > { %2237 = vmatmul.f32.gmra.mxu0 %v2152_v43  ;;  %2284 = vadd.xlane.f32.xlu1 %v7923_v30 }
 0x44c   : > { %v2095_v14 = vpop.f32.mrf.mxu3 }
 0x44d   : > { %v2096_v44 = vadd.f32 %v2095_v14, %v7876_v16 }
 0x44e   : > { %v2193_v25 = vpop.f32.mrf.mxu0 }
 0x44f   : > { %v2153_v15 = vmax.f32 %v2096_v44, 0.0  ;;  %v7928_v18 = vadd.f32 %v2193_v25, %v7909_v57 }
 0x451   : > { %2240 = vmatmul.f32.gmra.mxu0 %v2153_v15  ;;  %2286 = vadd.xlane.f32.xlu1 %v7928_v18 }
 0x454   : > { %v2098_v26 = vpop.f32.mrf.mxu3 }
 0x455   : > { %v2099_v22 = vadd.f32 %v2098_v26, %v7876_v16 }
 0x456   : > { %v2196_v53 = vpop.f32.mrf.mxu0 }
 0x457   : > { %v2154_v59 = vmax.f32 %v2099_v22, 0.0  ;;  %v7933_v35 = vadd.f32 %v2196_v53, %v7909_v57 }
 0x459   : > { %2243 = vmatmul.f32.gmra.mxu0 %v2154_v59  ;;  %2288 = vadd.xlane.f32.xlu1 %v7933_v35 }
 0x45c   : > { %v2101_v34 = vpop.f32.mrf.mxu3 }
 0x45d   : > { %v2102_v21 = vadd.f32 %v2101_v34, %v7876_v16 }
 0x45e   : > { %v2199_v49 = vpop.f32.mrf.mxu0 }
 0x45f   : > { %v2155_v41 = vmax.f32 %v2102_v21, 0.0  ;;  %v7938_v33 = vadd.f32 %v2199_v49, %v7909_v57 }
 0x461   : > { %2246 = vmatmul.f32.gmra.mxu0 %v2155_v41  ;;  %2290 = vadd.xlane.f32.xlu1 %v7938_v33 }
 0x464   : > { %v2104_v62 = vpop.f32.mrf.mxu3 }
 0x465   : > { %v2105_v8 = vadd.f32 %v2104_v62, %v7876_v16 }
 0x466   : > { %v2202_v55 = vpop.f32.mrf.mxu0 }
 0x467   : > { %v2156_v51 = vmax.f32 %v2105_v8, 0.0  ;;  %v7943_v63 = vadd.f32 %v2202_v55, %v7909_v57 }
 0x469   : > { %2249 = vmatmul.f32.gmra.mxu0 %v2156_v51  ;;  %2292 = vadd.xlane.f32.xlu1 %v7943_v63 }
 0x46c   : > { %v2107_v37 = vpop.f32.mrf.mxu3 }
 0x46d   : > { %v2108_v48 = vadd.f32 %v2107_v37, %v7876_v16 }
 0x46e   : > { %v2205_v11 = vpop.f32.mrf.mxu0 }
 0x46f   : > { %v2157_v58 = vmax.f32 %v2108_v48, 0.0  ;;  %v7948_v28 = vadd.f32 %v2205_v11, %v7909_v57 }
 0x471   : > { %2252 = vmatmul.f32.gmra.mxu0 %v2157_v58  ;;  %2294 = vadd.xlane.f32.xlu1 %v7948_v28 }
 0x474   : > { %v2110_v40 = vpop.f32.mrf.mxu3 }
 0x475   : > { %v2111_v39 = vadd.f32 %v2110_v40, %v7876_v16 }
 0x476   : > { %v2208_v61 = vpop.f32.mrf.mxu0 }
 0x477   : > { %v2158_v4 = vmax.f32 %v2111_v39, 0.0  ;;  %v7953_v42 = vadd.f32 %v2208_v61, %v7909_v57 }
 0x479   : > { %2255 = vmatmul.f32.gmra.mxu0 %v2158_v4  ;;  %2296 = vadd.xlane.f32.xlu1 %v7953_v42 }
 0x47c   : > { %v2113_v12 = vpop.f32.mrf.mxu3 }
 0x47d   : > { %v2114_v24 = vadd.f32 %v2113_v12, %v7876_v16 }
 0x47e   : > { %v2211_v46 = vpop.f32.mrf.mxu0 }
 0x47f   : > { %v2159_v20 = vmax.f32 %v2114_v24, 0.0  ;;  %v7958_v27 = vadd.f32 %v2211_v46, %v7909_v57 }
 0x481   : > { %2258 = vmatmul.f32.gmra.mxu0 %v2159_v20  ;;  %2298 = vadd.xlane.f32.xlu1 %v7958_v27 }
 0x484   : > { %v2116_v19 = vpop.f32.mrf.mxu3 }
 0x485   : > { %v2117_v2 = vadd.f32 %v2116_v19, %v7876_v16 }
 0x486   : > { %v2214_v17 = vpop.f32.mrf.mxu0 }
 0x487   : > { %v2160_v9 = vmax.f32 %v2117_v2, 0.0  ;;  %v7963_v43 = vadd.f32 %v2214_v17, %v7909_v57 }
 0x489   : > { %2261 = vmatmul.f32.gmra.mxu0 %v2160_v9  ;;  %2300 = vadd.xlane.f32.xlu1 %v7963_v43 }
 0x48c   : > { %v2119_v14 = vpop.f32.mrf.mxu3 }
 0x48d   : > { %v2120_v44 = vadd.f32 %v2119_v14, %v7876_v16 }
 0x48e   : > { %v2217_v25 = vpop.f32.mrf.mxu0 }
 0x48f   : > { %v2161_v15 = vmax.f32 %v2120_v44, 0.0  ;;  %v7968_v26 = vadd.f32 %v2217_v25, %v7909_v57 }
 0x491   : > { %2264 = vmatmul.f32.gmra.mxu0 %v2161_v15  ;;  %2302 = vadd.xlane.f32.xlu1 %v7968_v26 }
 0x494   : > { %v2122_v22 = vpop.f32.mrf.mxu3 }
 0x495   : > { %v2123_v53 = vadd.f32 %v2122_v22, %v7876_v16 }
 0x496   : > { %v2220_v59 = vpop.f32.mrf.mxu0 }
 0x497   : > { %v2162_v34 = vmax.f32 %v2123_v53, 0.0  ;;  %v7973_v21 = vadd.f32 %v2220_v59, %v7909_v57 }
 0x499   : > { %2267 = vmatmul.f32.gmra.mxu0 %v2162_v34  ;;  %2304 = vadd.xlane.f32.xlu1 %v7973_v21 }
 0x49c   : > { %v2125_v49 = vpop.f32.mrf.mxu3 }
 0x49d   : > { %v2126_v41 = vadd.f32 %v2125_v49, %v7876_v16 }
 0x49e   : > { %v2223_v62 = vpop.f32.mrf.mxu0 }
 0x49f   : > { %v2163_v8 = vmax.f32 %v2126_v41, 0.0  ;;  %v7978_v55 = vadd.f32 %v2223_v62, %v7909_v57 }
 0x4a1   : > { %2270 = vmatmul.f32.gmra.mxu0 %v2163_v8  ;;  %2306 = vadd.xlane.f32.xlu2 %v7978_v55 }
 0x4a4   : > { %v2128_v51 = vpop.f32.mrf.mxu3 }
 0x4a5   : > { %v2129_v37 = vadd.f32 %v2128_v51, %v7876_v16 }
 0x4a6   : > { %v2226_v48 = vpop.f32.mrf.mxu0 }
 0x4a7   : > { %v2164_v11 = vmax.f32 %v2129_v37, 0.0  ;;  %v7983_v58 = vadd.f32 %v2226_v48, %v7909_v57 }
 0x4a9   : > { %2273 = vmatmul.f32.gmra.mxu0 %v2164_v11  ;;  %2308 = vadd.xlane.f32.xlu2 %v7983_v58 }
 0x4ac   : > { %v2131_v40 = vpop.f32.mrf.mxu3  ;;  %v7991_v24 = vpop.xlane.xlu1 %2280 }
 0x4ad   : > { %v2132_v39 = vadd.f32 %v2131_v40, %v7876_v16  ;;  %v6242_v40 = vmov 128.0  }
 0x4ae   : > { %v2229_v61 = vpop.f32.mrf.mxu0  ;;  %5758 = vrcp.f32 %v6242_v40 }
 0x4af   : > { %v2165_v4 = vmax.f32 %v2132_v39, 0.0  ;;  %v7988_v12 = vadd.f32 %v2229_v61, %v7909_v57 }
 0x4b1   : > { %2276 = vmatmul.f32.gmra.mxu0 %v2165_v4  ;;  %2310 = vadd.xlane.f32.xlu1 %v7988_v12 }
 0x4b6   : > { %v2232_v46 = vpop.f32.mrf.mxu0 }
 0x4b7   : > { %v7994_v20 = vadd.f32 %v2232_v46, %v7909_v57  ;;  %v5759_v46 = vpop.eup %5758 }
 0x4b8   : > { %vm2349_vm11 = vweird.f32 %v5759_v46 }
 0x4b9   : > { %2312 = vadd.xlane.f32.xlu2 %v7994_v20 }
 0x4bc   : > { %v7997_v19 = vpop.xlane.xlu1 %2284 }
 0x4be   : > { %v2235_v2 = vpop.f32.mrf.mxu0 }
 0x4bf   : > { %v8000_v16 = vadd.f32 %v2235_v2, %v7909_v57  ;;  %v2345_v2 = vmul.f32 128.0, %v5759_v46 }
 0x4c1   : > { %2314 = vadd.xlane.f32.xlu2 %v8000_v16 }
 0x4c4   : > { %v8003_v17 = vpop.xlane.xlu1 %2286 }
 0x4c6   : > { %v2238_v9 = vpop.f32.mrf.mxu0 }
 0x4c7   : > { %v8006_v14 = vadd.f32 %v2238_v9, %v7909_v57 }
 0x4c9   : > { %2316 = vadd.xlane.f32.xlu2 %v8006_v14 }
 0x4cc   : > { %v8009_v44 = vpop.xlane.xlu1 %2288 }
 0x4ce   : > { %v2241_v25 = vpop.f32.mrf.mxu0 }
 0x4cf   : > { %v8012_v15 = vadd.f32 %v2241_v25, %v7909_v57 }
 0x4d1   : > { %2318 = vadd.xlane.f32.xlu2 %v8012_v15 }
 0x4d4   : > { %v8015_v22 = vpop.xlane.xlu1 %2290 }
 0x4d6   : > { %v2244_v53 = vpop.f32.mrf.mxu0 }
 0x4d7   : > { %v8018_v59 = vadd.f32 %v2244_v53, %v7909_v57 }
 0x4d9   : > { %2320 = vadd.xlane.f32.xlu2 %v8018_v59 }
 0x4dc   : > { %v8021_v34 = vpop.xlane.xlu1 %2292 }
 0x4de   : > { %v2247_v49 = vpop.f32.mrf.mxu0 }
 0x4df   : > { %v8024_v41 = vadd.f32 %v2247_v49, %v7909_v57  ;;  %v2346_v49 = vsub.f32 1.0, %v2345_v2 }
 0x4e1   : > { %2322 = vadd.xlane.f32.xlu2 %v8024_v41 }
 0x4e4   : > { %v8027_v62 = vpop.xlane.xlu1 %2294 }
 0x4e6   : > { %v2250_v8 = vpop.f32.mrf.mxu0 }
 0x4e7   : > { %v8030_v51 = vadd.f32 %v2250_v8, %v7909_v57  ;;  %v2347_v8 = vmul.f32 %v5759_v46, %v2346_v49 }
 0x4e9   : > { %2324 = vadd.xlane.f32.xlu2 %v8030_v51 }
 0x4ec   : > { %v8033_v37 = vpop.xlane.xlu1 %2296 }
 0x4ee   : > { %v2253_v48 = vpop.f32.mrf.mxu0 }
 0x4ef   : > { %v8036_v11 = vadd.f32 %v2253_v48, %v7909_v57 }
 0x4f1   : > { %2326 = vadd.xlane.f32.xlu2 %v8036_v11 }
 0x4f4   : > { %v2299_v39 = vpop.xlane.xlu1 %2298 }
 0x4f6   : > { %v2256_v61 = vpop.f32.mrf.mxu0 }
 0x4f7   : > { %v8040_v4 = vadd.f32 %v2256_v61, %v7909_v57  ;;  %v2348_v61 = vadd.f32 %v5759_v46, %v2347_v8 }
 0x4f9   : > { %2328 = vadd.xlane.f32.xlu2 %v8040_v4  ;;  %v8051_v52 = vsel %vm2349_vm11, %v5759_v46, %v2348_v61 }
 0x4fa   : > { %v2360_v45 = vmul.f32 %v8051_v52, %v2299_v39 }
 0x4fc   : > { %v2301_v9 = vpop.xlane.xlu1 %2300  ;;  %v8067_v46 = vsub.f32 %v7958_v27, %v2360_v45 }
 0x4fe   : > { %v2259_v25 = vpop.f32.mrf.mxu0 }
 0x4ff   : > { %v8044_v53 = vadd.f32 %v2259_v25, %v7909_v57 }
 0x501   : > { %2330 = vadd.xlane.f32.xlu2 %v8044_v53 }
 0x504   : > { %v2303_v48 = vpop.xlane.xlu1 %2302 }
 0x506   : > { %v2262_v40 = vpop.f32.mrf.mxu0 }
 0x507   : > { %v8048_v54 = vadd.f32 %v2262_v40, %v7909_v57  ;;  %v8064_v40 = vpop.xlane.xlu2 %2282 }
 0x509   : > { %2332 = vadd.xlane.f32.xlu0 %v8048_v54 }
 0x50c   : > { %v2305_v47 = vpop.xlane.xlu1 %2304 }
 0x50d   : > { %v2363_v0 = vmul.f32 %v8051_v52, %v2305_v47 }
 0x50e   : > { %v2265_v25 = vpop.f32.mrf.mxu0 }
 0x50f   : > { %v8055_v2 = vsub.f32 %v7973_v21, %v2363_v0  ;;  %v8058_v49 = vadd.f32 %v2265_v25, %v7909_v57  ;;  %v2424_v21 = vmul.f32 %v8067_v46, %v8067_v46 }
 0x511   : > { %2334 = vadd.xlane.f32.xlu1 %v8058_v49  ;;  %v2427_v8 = vmul.f32 %v8055_v2, %v8055_v2 }
 0x513   : > { %2471 = vadd.xlane.f32.xlu0 %v2427_v8 }
 0x514   : > { %v2307_v39 = vpop.xlane.xlu2 %2306 }
 0x516   : > { %v2268_v47 = vpop.f32.mrf.mxu0 }
 0x517   : > { %v8070_v0 = vadd.f32 %v2268_v47, %v7909_v57  ;;  %v2364_v47 = vmul.f32 %v8051_v52, %v2307_v39  ;;  %v2361_v39 = vmul.f32 %v8051_v52, %v2301_v9 }
 0x519   : > { %2336 = vadd.xlane.f32.xlu1 %v8070_v0  ;;  %v8103_v38 = vsub.f32 %v7963_v43, %v2361_v39 }
 0x51b   : > { %2465 = vadd.xlane.f32.xlu0 %v2424_v21  ;;  %v2425_v9 = vmul.f32 %v8103_v38, %v8103_v38 }
 0x51c   : > { %v2309_v8 = vpop.xlane.xlu2 %2308 }
 0x51e   : > { %v2271_v61 = vpop.f32.mrf.mxu0 }
 0x51f   : > { %v8076_v25 = vadd.f32 %v2271_v61, %v7909_v57  ;;  %v8091_v61 = vsub.f32 %v7978_v55, %v2364_v47 }
 0x521   : > { %2338 = vadd.xlane.f32.xlu1 %v8076_v25 }
 0x524   : > { %v2311_v45 = vpop.xlane.xlu1 %2310 }
 0x525   : > { %v2366_v27 = vmul.f32 %v8051_v52, %v2311_v45 }
 0x526   : > { %v2274_v29 = vpop.f32.mrf.mxu0 }
 0x527   : > { %v8082_v6 = vsub.f32 %v7988_v12, %v2366_v27  ;;  %v8085_v56 = vadd.f32 %v2274_v29, %v7909_v57  ;;  %v2428_v12 = vmul.f32 %v8091_v61, %v8091_v61  ;;  %v2365_v29 = vmul.f32 %v8051_v52, %v2309_v8 }
 0x529   : > { %2340 = vadd.xlane.f32.xlu2 %v8085_v56  ;;  %v2430_v21 = vmul.f32 %v8082_v6, %v8082_v6  ;;  %v8109_v47 = vsub.f32 %v7983_v58, %v2365_v29 }
 0x52b   : > { %2477 = vadd.xlane.f32.xlu1 %v2430_v21  ;;  %v2362_v21 = vmul.f32 %v8051_v52, %v2303_v48 }
 0x52c   : > { %v8093_v10 = vpop.xlane.xlu2 %2312 }
 0x52d   : > { %v8117_v43 = vsub.f32 %v7968_v26, %v2362_v21 }
 0x52e   : > { %v2277_v45 = vpop.f32.mrf.mxu0 }
 0x52f   : > { %v8100_v27 = vadd.f32 %v2277_v45, %v7909_v57  ;;  %v2429_v57 = vmul.f32 %v8109_v47, %v8109_v47  ;;  %v2359_v45 = vmul.f32 %v8051_v52, %v8033_v37  ;;  %v2426_v58 = vmul.f32 %v8117_v43, %v8117_v43 }
 0x531   : > { %2473 = vadd.xlane.f32.xlu2 %v2428_v12  ;;  %v8126_v48 = vsub.f32 %v7953_v42, %v2359_v45 }
 0x533   : > { %2342 = vadd.xlane.f32.xlu1 %v8100_v27  ;;  %v2423_v12 = vmul.f32 %v8126_v48, %v8126_v48 }
 0x534   : > { %v8106_v55 = vpop.xlane.xlu2 %2314 }
 0x539   : > { %2467 = vadd.xlane.f32.xlu2 %v2425_v9 }
 0x53b   : > { %2475 = vadd.xlane.f32.xlu1 %v2429_v57 }
 0x53c   : > { %v2317_v8 = vpop.xlane.xlu2 %2316 }
 0x543   : > { %2469 = vadd.xlane.f32.xlu1 %v2426_v58 }
 0x544   : > { %v8123_v39 = vpop.xlane.xlu2 %2318 }
 0x54b   : > { %2463 = vadd.xlane.f32.xlu1 %v2423_v12 }
 0x54c   : > { %v8130_v29 = vpop.xlane.xlu2 %2320 }
 0x554   : > { %v2323_v26 = vpop.xlane.xlu2 %2322 }
 0x555   : > { %v2372_v9 = vmul.f32 %v8051_v52, %v2323_v26 }
 0x557   : > { %v8134_v37 = vsub.f32 %v8024_v41, %v2372_v9 }
 0x559   : > { %v2436_v21 = vmul.f32 %v8134_v37, %v8134_v37 }
 0x55b   : > { %2489 = vadd.xlane.f32.xlu0 %v2436_v21 }
 0x55c   : > { %v2325_v57 = vpop.xlane.xlu2 %2324 }
 0x55d   : > { %v2373_v42 = vmul.f32 %v8051_v52, %v2325_v57 }
 0x55f   : > { %v8140_v45 = vsub.f32 %v8030_v51, %v2373_v42 }
 0x561   : > { %v2437_v58 = vmul.f32 %v8140_v45, %v8140_v45 }
 0x563   : > { %2491 = vadd.xlane.f32.xlu2 %v2437_v58 }
 0x564   : > { %v2327_v12 = vpop.xlane.xlu2 %2326 }
 0x565   : > { %v2374_v26 = vmul.f32 %v8051_v52, %v2327_v12 }
 0x567   : > { %v8146_v41 = vsub.f32 %v8036_v11, %v2374_v26 }
 0x569   : > { %v2438_v9 = vmul.f32 %v8146_v41, %v8146_v41 }
 0x56b   : > { %2493 = vadd.xlane.f32.xlu1 %v2438_v9 }
 0x56c   : > { %v2329_v21 = vpop.xlane.xlu2 %2328 }
 0x56d   : > { %v2375_v57 = vmul.f32 %v8051_v52, %v2329_v21 }
 0x56f   : > { %v8152_v51 = vsub.f32 %v8040_v4, %v2375_v57 }
 0x571   : > { %v2439_v42 = vmul.f32 %v8152_v51, %v8152_v51 }
 0x573   : > { %2495 = vadd.xlane.f32.xlu0 %v2439_v42 }
 0x574   : > { %v2331_v58 = vpop.xlane.xlu2 %2330 }
 0x575   : > { %v2376_v12 = vmul.f32 %v8051_v52, %v2331_v58 }
 0x577   : > { %v8158_v11 = vsub.f32 %v8044_v53, %v2376_v12 }
 0x579   : > { %v2440_v26 = vmul.f32 %v8158_v11, %v8158_v11 }
 0x57b   : > { %2497 = vadd.xlane.f32.xlu2 %v2440_v26  ;;  %v2357_v26 = vmul.f32 %v8051_v52, %v8021_v34  ;;  %v2369_v34 = vmul.f32 %v8051_v52, %v2317_v8 }
 0x57c   : > { %v2333_v9 = vpop.xlane.xlu0 %2332 }
 0x57d   : > { %v2377_v21 = vmul.f32 %v8051_v52, %v2333_v9 }
 0x57f   : > { %v8164_v4 = vsub.f32 %v8048_v54, %v2377_v21 }
 0x581   : > { %v2441_v57 = vmul.f32 %v8164_v4, %v8164_v4 }
 0x583   : > { %2499 = vadd.xlane.f32.xlu1 %v2441_v57  ;;  %v8178_v57 = vsub.f32 %v7943_v63, %v2357_v26 }
 0x584   : > { %v2335_v42 = vpop.xlane.xlu1 %2334 }
 0x585   : > { %v2378_v58 = vmul.f32 %v8051_v52, %v2335_v42  ;;  %v2421_v23 = vmul.f32 %v8178_v57, %v8178_v57 }
 0x586   : > { %v2472_v7 = vpop.xlane.xlu0 %2471 }
 0x587   : > { %v8170_v53 = vsub.f32 %v8058_v49, %v2378_v58  ;;  %v2523_v12 = vmul.f32 %v2472_v7, %v8051_v52 }
 0x589   : > { %v2555_v9 = vadd.f32 1e-05, %v2523_v12  ;;  %v2442_v54 = vmul.f32 %v8170_v53, %v8170_v53 }
 0x58b   : > { %5760 = vrsqrt.f32 %v2555_v9  ;;  %2501 = vadd.xlane.f32.xlu0 %v2442_v54  ;;  %vm2701_vm8 = vweird.f32 %v2555_v9 }
 0x58c   : > { %v2337_v21 = vpop.xlane.xlu1 %2336 }
 0x58d   : > { %v2379_v42 = vmul.f32 %v8051_v52, %v2337_v21 }
 0x58e   : > { %v2466_v32 = vpop.xlane.xlu0 %2465 }
 0x58f   : > { %v8182_v49 = vsub.f32 %v8070_v0, %v2379_v42  ;;  %v2520_v7 = vmul.f32 %v2466_v32, %v8051_v52  ;;  %v8191_v0 = vsub.f32 %v8006_v14, %v2369_v34 }
 0x591   : > { %v5761_v58 = vpop.eup %5760  ;;  %v2552_v12 = vadd.f32 1e-05, %v2520_v7  ;;  %v2443_v54 = vmul.f32 %v8182_v49, %v8182_v49  ;;  %v2354_v7 = vmul.f32 %v8051_v52, %v8003_v17 }
 0x592   : > { %v2696_v63 = vmul.f32 %v5761_v58, %v2555_v9  ;;  %vm2702_vm11 = vweird.f32 %v5761_v58 }
 0x593   : > { %5762 = vrsqrt.f32 %v2552_v12  ;;  %2459 = vadd.xlane.f32.xlu0 %v2421_v23  ;;  %2503 = vadd.xlane.f32.xlu2 %v2443_v54  ;;  %v2433_v23 = vmul.f32 %v8191_v0, %v8191_v0  ;;  %vm2703_vm10 = vmor %vm2701_vm8, %vm2702_vm11  ;;  %v8207_v17 = vsub.f32 %v7928_v18, %v2354_v7  ;;  %vm2671_vm8 = vweird.f32 %v2552_v12 }
 0x594   : > { %v2697_v26 = vmul.f32 %v5761_v58, %v2696_v63  ;;  %v2339_v21 = vpop.xlane.xlu1 %2338 }
 0x595   : > { %v2380_v32 = vmul.f32 %v8051_v52, %v2339_v21 }
 0x596   : > { %v2698_v8 = vmul.f32 0.5, %v2697_v26 }
 0x597   : > { %v8195_v42 = vsub.f32 %v8076_v25, %v2380_v32  ;;  %v5840_v25 = vld [vmem:[%s6434_s6] sm:$0xff] }
 0x598   : > { %v2699_v3 = vsub.f32 1.5, %v2698_v8  ;;  %v8204_v63 = vperm.slane %v5840_v25, 3  ;;  %v8211_v60 = vperm.slane %v5840_v25, 4 }
 0x599   : > { %v5763_v50 = vpop.eup %5762  ;;  %v2444_v14 = vmul.f32 %v8195_v42, %v8195_v42 }
 0x59a   : > { %v2700_v34 = vmul.f32 %v5761_v58, %v2699_v3  ;;  %v2666_v54 = vmul.f32 %v5763_v50, %v2552_v12 }
 0x59b   : > { %2483 = vadd.xlane.f32.xlu0 %v2433_v23  ;;  %2505 = vadd.xlane.f32.xlu2 %v2444_v14 }
 0x59c   : > { %v2704_v26 = vsel %vm2703_vm10, %v5761_v58, %v2700_v34  ;;  %v2667_v21 = vmul.f32 %v5763_v50, %v2666_v54  ;;  %v2341_v32 = vpop.xlane.xlu2 %2340  ;;  %v2352_v58 = vmul.f32 %v8051_v52, %v8064_v40  ;;  %vm2672_vm10 = vweird.f32 %v5763_v50  ;;  %v5841_v40 = vld [vmem:[%s7350_s20 + $0x60] sm:$0xff] }
 0x59d   : > { %v2907_v8 = vmul.f32 %v2704_v26, %v8055_v2  ;;  %v2381_v1 = vmul.f32 %v8051_v52, %v2341_v32  ;;  %v2418_v2 = vmul.f32 %v8207_v17, %v8207_v17  ;;  %v2371_v34 = vmul.f32 %v8051_v52, %v8130_v29  ;;  %vm2673_vm11 = vmor %vm2671_vm8, %vm2672_vm10 }
 0x59e   : > { %v2668_v3 = vmul.f32 0.5, %v2667_v21  ;;  %v2478_v9 = vpop.xlane.xlu1 %2477  ;;  %v8231_v21 = vsub.f32 %v7918_v31, %v2352_v58 }
 0x59f   : > { %v8214_v23 = vsub.f32 %v8085_v56, %v2381_v1  ;;  %v2526_v14 = vmul.f32 %v2478_v9, %v8051_v52  ;;  %v2940_v18 = vmul.f32 %v8204_v63, %v2907_v8  ;;  %v8234_v8 = vsub.f32 %v8018_v59, %v2371_v34 }
 0x5a0   : > { %v2669_v7 = vsub.f32 1.5, %v2668_v3  ;;  %v2416_v31 = vmul.f32 %v8231_v21, %v8231_v21 }
 0x5a1   : > { %v2558_v54 = vadd.f32 1e-05, %v2526_v14  ;;  %v2445_v56 = vmul.f32 %v8214_v23, %v8214_v23  ;;  %v2973_v1 = vadd.f32 %v8211_v60, %v2940_v18  ;;  %v2435_v58 = vmul.f32 %v8234_v8, %v8234_v8 }
 0x5a2   : > { %v2670_v25 = vmul.f32 %v5763_v50, %v2669_v7 }
 0x5a3   : > { %5764 = vrsqrt.f32 %v2558_v54  ;;  %2507 = vadd.xlane.f32.xlu1 %v2445_v56  ;;  %2453 = vadd.xlane.f32.xlu0 %v2418_v2  ;;  %v8228_v26 = vadd.f32 %v5841_v40, %v2973_v1  ;;  %v2358_v56 = vmul.f32 %v8051_v52, %v8027_v62  ;;  %v5842_v1 = vld [vmem:[%s7350_s20 + $0x48] sm:$0xff]  ;;  %vm2731_vm8 = vweird.f32 %v2558_v54 }
 0x5a4   : > { %v2674_v29 = vsel %vm2673_vm11, %v5763_v50, %v2670_v25  ;;  %v2474_v32 = vpop.xlane.xlu2 %2473  ;;  %v2356_v50 = vmul.f32 %v8051_v52, %v8015_v22 }
 0x5a5   : > { %v2904_v3 = vmul.f32 %v2674_v29, %v8067_v46  ;;  %v2524_v9 = vmul.f32 %v2474_v32, %v8051_v52  ;;  %3037 = vst [vmem:[%s7350_s20 + $0x60] sm:$0xff] %v8228_v26 }
 0x5a6   : > { %v2343_v12 = vpop.xlane.xlu1 %2342  ;;  %v8260_v29 = vsub.f32 %v7938_v33, %v2356_v50  ;;  %v2368_v33 = vmul.f32 %v8051_v52, %v8106_v55 }
 0x5a7   : > { %v2556_v14 = vadd.f32 1e-05, %v2524_v9  ;;  %v2382_v18 = vmul.f32 %v8051_v52, %v2343_v12  ;;  %v2937_v7 = vmul.f32 %v8204_v63, %v2904_v3  ;;  %v8266_v12 = vsub.f32 %v7948_v28, %v2358_v56 }
 0x5a8   : > { %v2370_v56 = vmul.f32 %v8051_v52, %v8123_v39 }
 0x5a9   : > { %v5765_v59 = vpop.eup %5764  ;;  %5766 = vrsqrt.f32 %v2556_v14  ;;  %v8247_v46 = vsub.f32 %v8100_v27, %v2382_v18  ;;  %v2970_v2 = vadd.f32 %v8211_v60, %v2937_v7  ;;  %v2422_v55 = vmul.f32 %v8266_v12, %v8266_v12 }
 0x5aa   : > { %v2726_v34 = vmul.f32 %v5765_v59, %v2558_v54  ;;  %vm2732_vm10 = vweird.f32 %v5765_v59  ;;  %v8288_v39 = vsub.f32 %v8012_v15, %v2370_v56 }
 0x5ab   : > { %2487 = vadd.xlane.f32.xlu1 %v2435_v58  ;;  %2449 = vadd.xlane.f32.xlu0 %v2416_v31  ;;  %v2446_v22 = vmul.f32 %v8247_v46, %v8247_v46  ;;  %v8257_v25 = vadd.f32 %v5842_v1, %v2970_v2  ;;  %v2420_v2 = vmul.f32 %v8260_v29, %v8260_v29  ;;  %vm2733_vm11 = vmor %vm2731_vm8, %vm2732_vm10  ;;  %vm2711_vm10 = vweird.f32 %v2556_v14 }
 0x5ac   : > { %v2727_v40 = vmul.f32 %v5765_v59, %v2726_v34  ;;  %v2468_v27 = vpop.xlane.xlu2 %2467 }
 0x5ad   : > { %v2521_v32 = vmul.f32 %v2468_v27, %v8051_v52  ;;  %2509 = vadd.xlane.f32.xlu2 %v2446_v22  ;;  %3034 = vst [vmem:[%s7350_s20 + $0x48] sm:$0xff] %v8257_v25 }
 0x5ae   : > { %v2728_v3 = vmul.f32 0.5, %v2727_v40  ;;  %v2476_v62 = vpop.xlane.xlu1 %2475  ;;  %v8284_v40 = vsub.f32 %v8000_v16, %v2368_v33 }
 0x5af   : > { %v5767_v9 = vpop.eup %5766  ;;  %v8268_v18 = vadd.f32 1e-05, %v2521_v32  ;;  %v2525_v7 = vmul.f32 %v2476_v62, %v8051_v52 }
 0x5b0   : > { %v2729_v31 = vsub.f32 1.5, %v2728_v3  ;;  %v2706_v58 = vmul.f32 %v5767_v9, %v2556_v14  ;;  %vm2712_vm9 = vweird.f32 %v5767_v9  ;;  %v2432_v15 = vmul.f32 %v8284_v40, %v8284_v40 }
 0x5b1   : > { %5768 = vrsqrt.f32 %v8268_v18  ;;  %v8274_v50 = vadd.f32 1e-05, %v2525_v7  ;;  %vm2713_vm8 = vmor %vm2711_vm10, %vm2712_vm9 }
 0x5b2   : > { %v2730_v34 = vmul.f32 %v5765_v59, %v2729_v31  ;;  %v2707_v28 = vmul.f32 %v5767_v9, %v2706_v58 }
 0x5b3   : > { %5770 = vrsqrt.f32 %v8274_v50  ;;  %2457 = vadd.xlane.f32.xlu1 %v2420_v2  ;;  %v2355_v2 = vmul.f32 %v8051_v52, %v8009_v44  ;;  %vm2721_vm2 = vweird.f32 %v8274_v50 }
 0x5b4   : > { %v2734_v22 = vsel %vm2733_vm11, %v5765_v59, %v2730_v34  ;;  %v2708_v1 = vmul.f32 0.5, %v2707_v28  ;;  %vm2681_vm11 = vweird.f32 %v8268_v18 }
 0x5b5   : > { %v2910_v27 = vmul.f32 %v2734_v22, %v8082_v6  ;;  %2461 = vadd.xlane.f32.xlu2 %v2422_v55  ;;  %v2353_v6 = vmul.f32 %v8051_v52, %v7997_v19  ;;  %v5843_v19 = vld [vmem:[%s7350_s20 + $0x78] sm:$0xff]  ;;  %v2434_v22 = vmul.f32 %v8288_v39, %v8288_v39 }
 0x5b6   : > { %v2709_v54 = vsub.f32 1.5, %v2708_v1  ;;  %v2470_v32 = vpop.xlane.xlu1 %2469 }
 0x5b7   : > { %v5769_v3 = vpop.eup %5768  ;;  %v2522_v62 = vmul.f32 %v2470_v32, %v8051_v52  ;;  %v2943_v7 = vmul.f32 %v8204_v63, %v2910_v27 }
 0x5b8   : > { %v2710_v31 = vmul.f32 %v5767_v9, %v2709_v54  ;;  %v2676_v16 = vmul.f32 %v5769_v3, %v8268_v18  ;;  %v8309_v54 = vsub.f32 %v7923_v30, %v2353_v6  ;;  %vm2682_vm9 = vweird.f32 %v5769_v3 }
 0x5b9   : > { %v5771_v59 = vpop.eup %5770  ;;  %v8295_v58 = vadd.f32 1e-05, %v2522_v62  ;;  %v2976_v33 = vadd.f32 %v8211_v60, %v2943_v7  ;;  %v8314_v62 = vsub.f32 %v7933_v35, %v2355_v2  ;;  %v2367_v18 = vmul.f32 %v8051_v52, %v8093_v10 }
 0x5ba   : > { %v2714_v34 = vsel %vm2713_vm8, %v5767_v9, %v2710_v31  ;;  %v2677_v14 = vmul.f32 %v5769_v3, %v2676_v16  ;;  %v2716_v28 = vmul.f32 %v5771_v59, %v8274_v50  ;;  %vm2722_vm10 = vweird.f32 %v5771_v59  ;;  %vm2683_vm8 = vmor %vm2681_vm11, %vm2682_vm9 }
 0x5bb   : > { %v2908_v56 = vmul.f32 %v2714_v34, %v8091_v61  ;;  %5772 = vrsqrt.f32 %v8295_v58  ;;  %2481 = vadd.xlane.f32.xlu1 %v2432_v15  ;;  %v3008_v55 = vadd.f32 %v5843_v19, %v2976_v33  ;;  %v2417_v33 = vmul.f32 %v8309_v54, %v8309_v54  ;;  %v5844_v34 = vld [vmem:[%s7350_s20 + $0x68] sm:$0xff]  ;;  %vm2723_vm3 = vmor %vm2721_vm2, %vm2722_vm10 }
 0x5bc   : > { %v2678_v1 = vmul.f32 0.5, %v2677_v14  ;;  %v2717_v27 = vmul.f32 %v5771_v59, %v2716_v28  ;;  %v2419_v19 = vmul.f32 %v8314_v62, %v8314_v62  ;;  %v8333_v10 = vsub.f32 %v7994_v20, %v2367_v18 }
 0x5bd   : > { %3040 = vst [vmem:[%s7350_s20 + $0x78] sm:$0xff] %v3008_v55  ;;  %3089 = vmatpush.msra.mxu1 %v3008_v55  ;;  %2485 = vadd.xlane.f32.xlu2 %v2434_v22  ;;  %v2941_v44 = vmul.f32 %v8204_v63, %v2908_v56  ;;  %v2351_v20 = vmul.f32 %v8051_v52, %v7991_v24 }
 0x5be   : > { %v2679_v61 = vsub.f32 1.5, %v2678_v1  ;;  %v2718_v9 = vmul.f32 0.5, %v2717_v27  ;;  %v2464_v32 = vpop.xlane.xlu1 %2463 }
 0x5bf   : > { %v2519_v7 = vmul.f32 %v2464_v32, %v8051_v52  ;;  %v2974_v31 = vadd.f32 %v8211_v60, %v2941_v44 }
 0x5c0   : > { %v2680_v16 = vmul.f32 %v5769_v3, %v2679_v61  ;;  %v2719_v30 = vsub.f32 1.5, %v2718_v9 }
 0x5c1   : > { %v5773_v6 = vpop.eup %5772  ;;  %v2551_v15 = vadd.f32 1e-05, %v2519_v7  ;;  %v3006_v14 = vadd.f32 %v5844_v34, %v2974_v31  ;;  %v2431_v31 = vmul.f32 %v8333_v10, %v8333_v10 }
 0x5c2   : > { %v2684_v35 = vsel %vm2683_vm8, %v5769_v3, %v2680_v16  ;;  %v2720_v2 = vmul.f32 %v5771_v59, %v2719_v30  ;;  %v2686_v28 = vmul.f32 %v5773_v6, %v8295_v58  ;;  %vm2692_vm2 = vweird.f32 %v5773_v6  ;;  %v5846_v16 = vld [vmem:[%s7350_s20 + $0x70] sm:$0xff] }
 0x5c3   : > { %v2905_v56 = vmul.f32 %v2684_v35, %v8103_v38  ;;  %5774 = vrsqrt.f32 %v2551_v15  ;;  %2451 = vadd.xlane.f32.xlu1 %v2417_v33  ;;  %3038 = vst [vmem:[%s7350_s20 + $0x68] sm:$0xff] %v3006_v14  ;;  %vm2661_vm10 = vweird.f32 %v2551_v15 }
 0x5c4   : > { %v2724_v55 = vsel %vm2723_vm3, %v5771_v59, %v2720_v2  ;;  %v2687_v3 = vmul.f32 %v5773_v6, %v2686_v28  ;;  %vm2691_vm3 = vweird.f32 %v8295_v58  ;;  %v8349_v28 = vsub.f32 %v7913_v36, %v2351_v20 }
 0x5c5   : > { %v2909_v22 = vmul.f32 %v2724_v55, %v8109_v47  ;;  %2455 = vadd.xlane.f32.xlu2 %v2419_v19  ;;  %v2938_v50 = vmul.f32 %v8204_v63, %v2905_v56  ;;  %v5845_v47 = vld [vmem:[%s7350_s20 + $0x50] sm:$0xff]  ;;  %vm2693_vm9 = vmor %vm2691_vm3, %vm2692_vm2  ;;  %v5847_v55 = vld [vmem:[%s7350_s20 + $0x58] sm:$0xff] }
 0x5c6   : > { %v2688_v1 = vmul.f32 0.5, %v2687_v3  ;;  %v2415_v36 = vmul.f32 %v8349_v28, %v8349_v28 }
 0x5c7   : > { %v2942_v38 = vmul.f32 %v8204_v63, %v2909_v22  ;;  %v2971_v27 = vadd.f32 %v8211_v60, %v2938_v50 }
 0x5c8   : > { %v2689_v44 = vsub.f32 1.5, %v2688_v1 }
 0x5c9   : > { %v5775_v61 = vpop.eup %5774  ;;  %v2975_v59 = vadd.f32 %v8211_v60, %v2942_v38  ;;  %v3003_v9 = vadd.f32 %v5845_v47, %v2971_v27 }
 0x5ca   : > { %v2690_v32 = vmul.f32 %v5773_v6, %v2689_v44  ;;  %v2656_v7 = vmul.f32 %v5775_v61, %v2551_v15  ;;  %vm2662_vm11 = vweird.f32 %v5775_v61 }
 0x5cb   : > { %v3007_v30 = vadd.f32 %v5846_v16, %v2975_v59  ;;  %3035 = vst [vmem:[%s7350_s20 + $0x50] sm:$0xff] %v3003_v9  ;;  %vm2663_vm8 = vmor %vm2661_vm10, %vm2662_vm11 }
 0x5cc   : > { %v2694_v33 = vsel %vm2693_vm9, %v5773_v6, %v2690_v32  ;;  %v2657_v34 = vmul.f32 %v5775_v61, %v2656_v7 }
 0x5cd   : > { %v2906_v35 = vmul.f32 %v2694_v33, %v8117_v43  ;;  %2479 = vadd.xlane.f32.xlu2 %v2431_v31  ;;  %3039 = vst [vmem:[%s7350_s20 + $0x70] sm:$0xff] %v3007_v30  ;;  %3090 = vmatpush.msra.mxu1 %v3007_v30 }
 0x5ce   : > { %v2658_v2 = vmul.f32 0.5, %v2657_v34  ;;  %v2490_v58 = vpop.xlane.xlu0 %2489 }
 0x5cf   : > { %v2532_v24 = vmul.f32 %v2490_v58, %v8051_v52  ;;  %3091 = vmatpush.msra.mxu1 %v3006_v14  ;;  %v2939_v18 = vmul.f32 %v8204_v63, %v2906_v35 }
 0x5d0   : > { %v2659_v56 = vsub.f32 1.5, %v2658_v2 }
 0x5d1   : > { %v2564_v6 = vadd.f32 1e-05, %v2532_v24  ;;  %3092 = vmatpush.msra.mxu1 %v8228_v26  ;;  %v2972_v43 = vadd.f32 %v8211_v60, %v2939_v18 }
 0x5d2   : > { %v2660_v19 = vmul.f32 %v5775_v61, %v2659_v56 }
 0x5d3   : > { %5776 = vrsqrt.f32 %v2564_v6  ;;  %v3004_v3 = vadd.f32 %v5847_v55, %v2972_v43  ;;  %vm2791_vm3 = vweird.f32 %v2564_v6  ;;  %v5849_v55 = vld [vmem:[%s7350_s20 + $0xa8] sm:$0xff] }
 0x5d4   : > { %v2664_v14 = vsel %vm2663_vm8, %v5775_v61, %v2660_v19  ;;  %v5848_v61 = vld [vmem:[%s7350_s20 + $0x40] sm:$0xff] }
 0x5d5   : > { %v2903_v22 = vmul.f32 %v2664_v14, %v8126_v48  ;;  %2447 = vadd.xlane.f32.xlu2 %v2415_v36  ;;  %3036 = vst [vmem:[%s7350_s20 + $0x58] sm:$0xff] %v3004_v3  ;;  %3093 = vmatpush.msra.mxu1 %v3004_v3 }
 0x5d6   : > { %v2492_v26 = vpop.xlane.xlu2 %2491 }
 0x5d7   : > { %v2533_v50 = vmul.f32 %v2492_v26, %v8051_v52  ;;  %3094 = vmatpush.msra.mxu1 %v3003_v9  ;;  %v2936_v15 = vmul.f32 %v8204_v63, %v2903_v22 }
 0x5d9   : > { %v5777_v1 = vpop.eup %5776  ;;  %v2565_v38 = vadd.f32 1e-05, %v2533_v50  ;;  %3095 = vmatpush.msra.mxu1 %v8257_v25  ;;  %v2969_v27 = vadd.f32 %v8211_v60, %v2936_v15 }
 0x5da   : > { %v2786_v44 = vmul.f32 %v5777_v1, %v2564_v6  ;;  %vm2792_vm2 = vweird.f32 %v5777_v1 }
 0x5db   : > { %5778 = vrsqrt.f32 %v2565_v38  ;;  %v3001_v48 = vadd.f32 %v5848_v61, %v2969_v27  ;;  %vm2793_vm9 = vmor %vm2791_vm3, %vm2792_vm2  ;;  %vm2801_vm10 = vweird.f32 %v2565_v38 }
 0x5dc   : > { %v2787_v59 = vmul.f32 %v5777_v1, %v2786_v44 }
 0x5dd   : > { %3033 = vst [vmem:[%s7350_s20 + $0x40] sm:$0xff] %v3001_v48  ;;  %3096 = vmatpush.msra.mxu1 %v3001_v48 }
 0x5de   : > { %v2788_v47 = vmul.f32 0.5, %v2787_v59  ;;  %v2494_v32 = vpop.xlane.xlu1 %2493 }
 0x5df   : > { %v2534_v7 = vmul.f32 %v2494_v32, %v8051_v52 }
 0x5e0   : > { %v2789_v9 = vsub.f32 1.5, %v2788_v47 }
 0x5e1   : > { %v5779_v20 = vpop.eup %5778  ;;  %v2566_v31 = vadd.f32 1e-05, %v2534_v7 }
 0x5e2   : > { %v2790_v16 = vmul.f32 %v5777_v1, %v2789_v9  ;;  %v2796_v25 = vmul.f32 %v5779_v20, %v2565_v38  ;;  %vm2802_vm11 = vweird.f32 %v5779_v20 }
 0x5e3   : > { %5780 = vrsqrt.f32 %v2566_v31  ;;  %vm2803_vm8 = vmor %vm2801_vm10, %vm2802_vm11  ;;  %vm2811_vm3 = vweird.f32 %v2566_v31 }
 0x5e4   : > { %v2794_v30 = vsel %vm2793_vm9, %v5777_v1, %v2790_v16  ;;  %v2797_v33 = vmul.f32 %v5779_v20, %v2796_v25 }
 0x5e5   : > { %v2916_v34 = vmul.f32 %v2794_v30, %v8134_v37 }
 0x5e6   : > { %v2798_v35 = vmul.f32 0.5, %v2797_v33  ;;  %v2496_v2 = vpop.xlane.xlu0 %2495 }
 0x5e7   : > { %v2535_v58 = vmul.f32 %v2496_v2, %v8051_v52  ;;  %v2949_v24 = vmul.f32 %v8204_v63, %v2916_v34 }
 0x5e8   : > { %v2799_v18 = vsub.f32 1.5, %v2798_v35 }
 0x5e9   : > { %v5781_v56 = vpop.eup %5780  ;;  %v2567_v43 = vadd.f32 1e-05, %v2535_v58  ;;  %v2982_v6 = vadd.f32 %v8211_v60, %v2949_v24 }
 0x5ea   : > { %v2800_v19 = vmul.f32 %v5779_v20, %v2799_v18  ;;  %v2806_v36 = vmul.f32 %v5781_v56, %v2566_v31  ;;  %vm2812_vm2 = vweird.f32 %v5781_v56 }
 0x5eb   : > { %5782 = vrsqrt.f32 %v2567_v43  ;;  %v8372_v37 = vadd.f32 %v5849_v55, %v2982_v6  ;;  %vm2813_vm9 = vmor %vm2811_vm3, %vm2812_vm2  ;;  %vm2821_vm10 = vweird.f32 %v2567_v43 }
 0x5ec   : > { %v2804_v3 = vsel %vm2803_vm8, %v5779_v20, %v2800_v19  ;;  %v2807_v14 = vmul.f32 %v5781_v56, %v2806_v36 }
 0x5ed   : > { %v2917_v22 = vmul.f32 %v2804_v3, %v8140_v45  ;;  %3046 = vst [vmem:[%s7350_s20 + $0xa8] sm:$0xff] %v8372_v37  ;;  %v5850_v45 = vld [vmem:[%s7350_s20 + $0xb0] sm:$0xff] }
 0x5ee   : > { %v2808_v26 = vmul.f32 0.5, %v2807_v14  ;;  %v2498_v50 = vpop.xlane.xlu2 %2497 }
 0x5ef   : > { %v2536_v15 = vmul.f32 %v2498_v50, %v8051_v52  ;;  %v2950_v1 = vmul.f32 %v8204_v63, %v2917_v22 }
 0x5f0   : > { %v2809_v38 = vsub.f32 1.5, %v2808_v26 }
 0x5f1   : > { %v5783_v27 = vpop.eup %5782  ;;  %v2568_v44 = vadd.f32 1e-05, %v2536_v15  ;;  %v2983_v61 = vadd.f32 %v8211_v60, %v2950_v1 }
 0x5f2   : > { %v2810_v48 = vmul.f32 %v5781_v56, %v2809_v38  ;;  %v2816_v59 = vmul.f32 %v5783_v27, %v2567_v43  ;;  %vm2822_vm11 = vweird.f32 %v5783_v27 }
 0x5f3   : > { %5784 = vrsqrt.f32 %v2568_v44  ;;  %v8381_v47 = vadd.f32 %v5850_v45, %v2983_v61  ;;  %vm2823_vm8 = vmor %vm2821_vm10, %vm2822_vm11  ;;  %vm2831_vm3 = vweird.f32 %v2568_v44 }
 0x5f4   : > { %v2814_v32 = vsel %vm2813_vm9, %v5781_v56, %v2810_v48  ;;  %v2817_v7 = vmul.f32 %v5783_v27, %v2816_v59 }
 0x5f5   : > { %v2918_v9 = vmul.f32 %v2814_v32, %v8146_v41  ;;  %3047 = vst [vmem:[%s7350_s20 + $0xb0] sm:$0xff] %v8381_v47  ;;  %v5851_v41 = vld [vmem:[%s7350_s20 + $0xb8] sm:$0xff] }
 0x5f6   : > { %v2818_v20 = vmul.f32 0.5, %v2817_v7  ;;  %v2500_v16 = vpop.xlane.xlu1 %2499 }
 0x5f7   : > { %v2537_v25 = vmul.f32 %v2500_v16, %v8051_v52  ;;  %v2951_v30 = vmul.f32 %v8204_v63, %v2918_v9 }
 0x5f8   : > { %v2819_v31 = vsub.f32 1.5, %v2818_v20 }
 0x5f9   : > { %v5785_v33 = vpop.eup %5784  ;;  %v2569_v34 = vadd.f32 1e-05, %v2537_v25  ;;  %v2984_v35 = vadd.f32 %v8211_v60, %v2951_v30 }
 0x5fa   : > { %v2820_v2 = vmul.f32 %v5783_v27, %v2819_v31  ;;  %v2826_v58 = vmul.f32 %v5785_v33, %v2568_v44  ;;  %vm2832_vm2 = vweird.f32 %v5785_v33 }
 0x5fb   : > { %5786 = vrsqrt.f32 %v2569_v34  ;;  %v8390_v24 = vadd.f32 %v5851_v41, %v2984_v35  ;;  %vm2833_vm9 = vmor %vm2831_vm3, %vm2832_vm2  ;;  %vm2841_vm10 = vweird.f32 %v2569_v34 }
 0x5fc   : > { %v2824_v18 = vsel %vm2823_vm8, %v5783_v27, %v2820_v2  ;;  %v2827_v56 = vmul.f32 %v5785_v33, %v2826_v58 }
 0x5fd   : > { %v2919_v6 = vmul.f32 %v2824_v18, %v8152_v51  ;;  %3048 = vst [vmem:[%s7350_s20 + $0xb8] sm:$0xff] %v8390_v24  ;;  %v5852_v51 = vld [vmem:[%s7350_s20 + $0xc0] sm:$0xff] }
 0x5fe   : > { %v2828_v19 = vmul.f32 0.5, %v2827_v56  ;;  %v2502_v36 = vpop.xlane.xlu0 %2501 }
 0x5ff   : > { %v2538_v55 = vmul.f32 %v2502_v36, %v8051_v52  ;;  %v2952_v3 = vmul.f32 %v8204_v63, %v2919_v6 }
 0x600   : > { %v2829_v43 = vsub.f32 1.5, %v2828_v19 }
 0x601   : > { %v5787_v14 = vpop.eup %5786  ;;  %v2570_v22 = vadd.f32 1e-05, %v2538_v55  ;;  %v2985_v26 = vadd.f32 %v8211_v60, %v2952_v3 }
 0x602   : > { %v2830_v50 = vmul.f32 %v5785_v33, %v2829_v43  ;;  %v2836_v15 = vmul.f32 %v5787_v14, %v2569_v34  ;;  %vm2842_vm11 = vweird.f32 %v5787_v14 }
 0x603   : > { %5788 = vrsqrt.f32 %v2570_v22  ;;  %v8399_v1 = vadd.f32 %v5852_v51, %v2985_v26  ;;  %vm2843_vm8 = vmor %vm2841_vm10, %vm2842_vm11  ;;  %vm2851_vm3 = vweird.f32 %v2570_v22 }
 0x604   : > { %v2834_v38 = vsel %vm2833_vm9, %v5785_v33, %v2830_v50  ;;  %v2837_v27 = vmul.f32 %v5787_v14, %v2836_v15  ;;  %v5853_v33 = vld [vmem:[%s7350_s20 + $0xc8] sm:$0xff] }
 0x605   : > { %v2920_v61 = vmul.f32 %v2834_v38, %v8158_v11  ;;  %3049 = vst [vmem:[%s7350_s20 + $0xc0] sm:$0xff] %v8399_v1 }
 0x606   : > { %v2838_v48 = vmul.f32 0.5, %v2837_v27  ;;  %v2460_v59 = vpop.xlane.xlu0 %2459  ;;  %v2504_v45 = vpop.xlane.xlu2 %2503 }
 0x607   : > { %v2517_v32 = vmul.f32 %v2460_v59, %v8051_v52  ;;  %v2539_v44 = vmul.f32 %v2504_v45, %v8051_v52  ;;  %v2953_v7 = vmul.f32 %v8204_v63, %v2920_v61  ;;  %v5854_v59 = vld [vmem:[%s7350_s20 + $0xd0] sm:$0xff] }
 0x608   : > { %v2839_v9 = vsub.f32 1.5, %v2838_v48 }
 0x609   : > { %v5789_v20 = vpop.eup %5788  ;;  %v2549_v16 = vadd.f32 1e-05, %v2517_v32  ;;  %v8407_v25 = vadd.f32 1e-05, %v2539_v44  ;;  %v2986_v11 = vadd.f32 %v8211_v60, %v2953_v7 }
 0x60a   : > { %v2840_v30 = vmul.f32 %v5787_v14, %v2839_v9  ;;  %v2846_v31 = vmul.f32 %v5789_v20, %v2570_v22  ;;  %vm2852_vm2 = vweird.f32 %v5789_v20 }
 0x60b   : > { %5790 = vrsqrt.f32 %v2549_v16  ;;  %v8411_v35 = vadd.f32 %v5853_v33, %v2986_v11  ;;  %vm2853_vm9 = vmor %vm2851_vm3, %vm2852_vm2  ;;  %vm2861_vm3 = vweird.f32 %v8407_v25 }
 0x60c   : > { %v2844_v2 = vsel %vm2843_vm8, %v5787_v14, %v2840_v30  ;;  %v2847_v58 = vmul.f32 %v5789_v20, %v2846_v31  ;;  %5792 = vrsqrt.f32 %v8407_v25  ;;  %vm2641_vm8 = vweird.f32 %v2549_v16 }
 0x60d   : > { %v2921_v41 = vmul.f32 %v2844_v2, %v8164_v4  ;;  %3050 = vst [vmem:[%s7350_s20 + $0xc8] sm:$0xff] %v8411_v35 }
 0x60e   : > { %v2848_v18 = vmul.f32 0.5, %v2847_v58  ;;  %v2484_v56 = vpop.xlane.xlu0 %2483  ;;  %v2506_v6 = vpop.xlane.xlu2 %2505 }
 0x60f   : > { %v2529_v19 = vmul.f32 %v2484_v56, %v8051_v52  ;;  %v2540_v34 = vmul.f32 %v2506_v6, %v8051_v52  ;;  %v2954_v36 = vmul.f32 %v8204_v63, %v2921_v41 }
 0x610   : > { %v2849_v55 = vsub.f32 1.5, %v2848_v18 }
 0x611   : > { %v5791_v3 = vpop.eup %5790  ;;  %v8420_v43 = vadd.f32 1e-05, %v2529_v19  ;;  %v8422_v14 = vadd.f32 1e-05, %v2540_v34  ;;  %v2987_v4 = vadd.f32 %v8211_v60, %v2954_v36 }
 0x612   : > { %v5793_v26 = vpop.eup %5792  ;;  %v2850_v50 = vmul.f32 %v5789_v20, %v2849_v55  ;;  %v2636_v15 = vmul.f32 %v5791_v3, %v2549_v16  ;;  %vm2642_vm11 = vweird.f32 %v5791_v3 }
 0x613   : > { %v2856_v51 = vmul.f32 %v5793_v26, %v8407_v25  ;;  %5794 = vrsqrt.f32 %v8420_v43  ;;  %v8430_v45 = vadd.f32 %v5854_v59, %v2987_v4  ;;  %vm2862_vm10 = vweird.f32 %v5793_v26  ;;  %vm2643_vm2 = vmor %vm2641_vm8, %vm2642_vm11 }
 0x614   : > { %v2854_v38 = vsel %vm2853_vm9, %v5789_v20, %v2850_v50  ;;  %v2637_v27 = vmul.f32 %v5791_v3, %v2636_v15  ;;  %5796 = vrsqrt.f32 %v8422_v14  ;;  %vm2863_vm9 = vmor %vm2861_vm3, %vm2862_vm10  ;;  %vm2871_vm10 = vweird.f32 %v8422_v14 }
 0x615   : > { %v2922_v61 = vmul.f32 %v2854_v38, %v8170_v53  ;;  %v2857_v48 = vmul.f32 %v5793_v26, %v2856_v51  ;;  %3051 = vst [vmem:[%s7350_s20 + $0xd0] sm:$0xff] %v8430_v45  ;;  %v5855_v38 = vld [vmem:[%s7350_s20 + $0xd8] sm:$0xff]  ;;  %vm2761_vm3 = vweird.f32 %v8420_v43 }
 0x616   : > { %v2638_v32 = vmul.f32 0.5, %v2637_v27  ;;  %v2454_v44 = vpop.xlane.xlu0 %2453  ;;  %v2508_v22 = vpop.xlane.xlu1 %2507 }
 0x617   : > { %v2858_v7 = vmul.f32 0.5, %v2857_v48  ;;  %v2514_v9 = vmul.f32 %v2454_v44, %v8051_v52  ;;  %v2541_v11 = vmul.f32 %v2508_v22, %v8051_v52  ;;  %v2955_v30 = vmul.f32 %v8204_v63, %v2922_v61 }
 0x618   : > { %v2639_v20 = vsub.f32 1.5, %v2638_v32 }
 0x619   : > { %v8437_v31 = vpop.eup %5794  ;;  %v2859_v53 = vsub.f32 1.5, %v2858_v7  ;;  %v8439_v33 = vadd.f32 1e-05, %v2514_v9  ;;  %v8441_v2 = vadd.f32 1e-05, %v2541_v11  ;;  %v2988_v56 = vadd.f32 %v8211_v60, %v2955_v30 }
 0x61a   : > { %v5797_v58 = vpop.eup %5796  ;;  %v2640_v41 = vmul.f32 %v5791_v3, %v2639_v20  ;;  %v2756_v18 = vmul.f32 %v8437_v31, %v8420_v43  ;;  %vm2762_vm11 = vweird.f32 %v8437_v31 }
 0x61b   : > { %v2860_v6 = vmul.f32 %v5793_v26, %v2859_v53  ;;  %v2866_v19 = vmul.f32 %v5797_v58, %v8422_v14  ;;  %5798 = vrsqrt.f32 %v8439_v33  ;;  %v8454_v27 = vadd.f32 %v5855_v38, %v2988_v56  ;;  %vm8485_vm14 = vmor %vm2761_vm3, %vm2762_vm11 }
 0x61c   : > { %v2644_v34 = vsel %vm2643_vm2, %v5791_v3, %v2640_v41  ;;  %v2757_v36 = vmul.f32 %v8437_v31, %v2756_v18  ;;  %5800 = vrsqrt.f32 %v8441_v2  ;;  %vm2872_vm8 = vweird.f32 %v5797_v58 }
 0x61d   : > { %v2864_v16 = vsel %vm2863_vm9, %v5793_v26, %v2860_v6  ;;  %v2867_v55 = vmul.f32 %v5797_v58, %v2866_v19  ;;  %v2901_v4 = vmul.f32 %v2644_v34, %v8178_v57  ;;  %3052 = vst [vmem:[%s7350_s20 + $0xd8] sm:$0xff] %v8454_v27  ;;  %vm2873_vm2 = vmor %vm2871_vm10, %vm2872_vm8  ;;  %vm2881_vm9 = vweird.f32 %v8441_v2 }
 0x61e   : > { %v2923_v50 = vmul.f32 %v2864_v16, %v8182_v49  ;;  %v2758_v15 = vmul.f32 0.5, %v2757_v36  ;;  %v2450_v51 = vpop.xlane.xlu0 %2449  ;;  %v2488_v25 = vpop.xlane.xlu1 %2487  ;;  %vm2611_vm10 = vweird.f32 %v8439_v33 }
 0x61f   : > { %v2868_v61 = vmul.f32 0.5, %v2867_v55  ;;  %v2512_v3 = vmul.f32 %v2450_v51, %v8051_v52  ;;  %v2531_v48 = vmul.f32 %v2488_v25, %v8051_v52  ;;  %v2934_v20 = vmul.f32 %v8204_v63, %v2901_v4  ;;  %v5856_v4 = vld [vmem:[%s7350_s20 + $0xe0] sm:$0xff] }
 0x620   : > { %v2759_v59 = vsub.f32 1.5, %v2758_v15  ;;  %v2510_v26 = vpop.xlane.xlu2 %2509  ;;  %v2956_v57 = vmul.f32 %v8204_v63, %v2923_v50 }
 0x621   : > { %v8463_v49 = vpop.eup %5798  ;;  %v2869_v32 = vsub.f32 1.5, %v2868_v61  ;;  %v8465_v44 = vadd.f32 1e-05, %v2512_v3  ;;  %v8467_v22 = vadd.f32 1e-05, %v2531_v48  ;;  %v2542_v11 = vmul.f32 %v2510_v26, %v8051_v52 }
 0x622   : > { %v5801_v7 = vpop.eup %5800  ;;  %v2606_v9 = vmul.f32 %v8463_v49, %v8439_v33  ;;  %v2989_v30 = vadd.f32 %v8211_v60, %v2956_v57  ;;  %v2760_v53 = vmul.f32 %v8437_v31, %v2759_v59  ;;  %v2967_v51 = vadd.f32 %v8211_v60, %v2934_v20  ;;  %v5857_v59 = vld [vmem:[%s7350_s20 + $0x30] sm:$0xff] }
 0x623   : > { %v2870_v41 = vmul.f32 %v5797_v58, %v2869_v32  ;;  %v2876_v18 = vmul.f32 %v5801_v7, %v8441_v2  ;;  %5802 = vrsqrt.f32 %v8465_v44  ;;  %v8490_v16 = vadd.f32 1e-05, %v2542_v11 }
 0x624   : > { %v2607_v56 = vmul.f32 %v8463_v49, %v2606_v9  ;;  %5804 = vrsqrt.f32 %v8467_v22  ;;  %v8493_v43 = vadd.f32 %v5856_v4, %v2989_v30  ;;  %vm2882_vm11 = vweird.f32 %v5801_v7 }
 0x625   : > { %v2874_v6 = vsel %vm2873_vm2, %v5797_v58, %v2870_v41  ;;  %v2877_v19 = vmul.f32 %v5801_v7, %v2876_v18  ;;  %v2764_v58 = vsel %vm8485_vm14, %v8437_v31, %v2760_v53  ;;  %5806 = vrsqrt.f32 %v8490_v16  ;;  %vm2883_vm8 = vmor %vm2881_vm9, %vm2882_vm11 }
 0x626   : > { %v2924_v14 = vmul.f32 %v2874_v6, %v8195_v42  ;;  %v2608_v36 = vmul.f32 0.5, %v2607_v56  ;;  %v2458_v55 = vpop.xlane.xlu1 %2457  ;;  %3053 = vst [vmem:[%s7350_s20 + $0xe0] sm:$0xff] %v8493_v43  ;;  %v8510_v26 = vadd.f32 %v5857_v59, %v2967_v51  ;;  %v2913_v32 = vmul.f32 %v2764_v58, %v8191_v0  ;;  %v5858_v6 = vld [vmem:[%s7350_s20 + $0xe8] sm:$0xff] }
 0x627   : > { %v2878_v50 = vmul.f32 0.5, %v2877_v19  ;;  %v2516_v15 = vmul.f32 %v2458_v55, %v8051_v52  ;;  %vm2612_vm14 = vweird.f32 %v8463_v49  ;;  %vm2781_vm2 = vweird.f32 %v8467_v22 }
 0x628   : > { %v2609_v25 = vsub.f32 1.5, %v2608_v36  ;;  %v2462_v42 = vpop.xlane.xlu2 %2461  ;;  %v2957_v38 = vmul.f32 %v8204_v63, %v2924_v14  ;;  %3031 = vst [vmem:[%s7350_s20 + $0x30] sm:$0xff] %v8510_v26  ;;  %vm8541_vm3 = vmor %vm2611_vm10, %vm2612_vm14  ;;  %vm2591_vm9 = vweird.f32 %v8465_v44  ;;  %v2946_v36 = vmul.f32 %v8204_v63, %v2913_v32 }
 0x629   : > { %v8504_v61 = vpop.eup %5802  ;;  %v2879_v3 = vsub.f32 1.5, %v2878_v50  ;;  %v8506_v48 = vadd.f32 1e-05, %v2516_v15  ;;  %v2518_v31 = vmul.f32 %v2462_v42, %v8051_v52  ;;  %vm2891_vm11 = vweird.f32 %v8490_v16 }
 0x62a   : > { %v8512_v57 = vpop.eup %5804  ;;  %v2586_v9 = vmul.f32 %v8504_v61, %v8465_v44  ;;  %v2990_v11 = vadd.f32 %v8211_v60, %v2957_v38  ;;  %v2610_v30 = vmul.f32 %v8463_v49, %v2609_v25  ;;  %vm2592_vm14 = vweird.f32 %v8504_v61 }
 0x62b   : > { %v2880_v20 = vmul.f32 %v5801_v7, %v2879_v3  ;;  %v2776_v53 = vmul.f32 %v8512_v57, %v8467_v22  ;;  %5808 = vrsqrt.f32 %v8506_v48  ;;  %v8530_v41 = vadd.f32 1e-05, %v2518_v31  ;;  %v8537_v34 = vpop.eup %5806 }
 0x62c   : > { %v2587_v0 = vmul.f32 %v8504_v61, %v2586_v9  ;;  %v8535_v19 = vadd.f32 %v5858_v6, %v2990_v11  ;;  %v2614_v55 = vsel %vm8541_vm3, %v8463_v49, %v2610_v30  ;;  %v2886_v58 = vmul.f32 %v8537_v34, %v8490_v16 }
 0x62d   : > { %v2884_v18 = vsel %vm2883_vm8, %v5801_v7, %v2880_v20  ;;  %v2777_v56 = vmul.f32 %v8512_v57, %v2776_v53  ;;  %5810 = vrsqrt.f32 %v8530_v41  ;;  %vm2782_vm10 = vweird.f32 %v8512_v57 }
 0x62e   : > { %v2925_v2 = vmul.f32 %v2884_v18, %v8214_v23  ;;  %v2588_v14 = vmul.f32 0.5, %v2587_v0  ;;  %v2482_v7 = vpop.xlane.xlu1 %2481  ;;  %3054 = vst [vmem:[%s7350_s20 + $0xe8] sm:$0xff] %v8535_v19  ;;  %v2887_v42 = vmul.f32 %v8537_v34, %v2886_v58  ;;  %v2898_v31 = vmul.f32 %v2614_v55, %v8207_v17  ;;  %vm2783_vm3 = vmor %vm2781_vm2, %vm2782_vm10  ;;  %v5859_v18 = vld [vmem:[%s7350_s20 + $0xf0] sm:$0xff] }
 0x62f   : > { %v2778_v4 = vmul.f32 0.5, %v2777_v56  ;;  %v2528_v23 = vmul.f32 %v2482_v7, %v8051_v52  ;;  %vm2631_vm8 = vweird.f32 %v8506_v48  ;;  %v2979_v30 = vadd.f32 %v8211_v60, %v2946_v36  ;;  %vm8602_vm2 = vmor %vm2591_vm9, %vm2592_vm14 }
 0x630   : > { %v2589_v50 = vsub.f32 1.5, %v2588_v14  ;;  %v2486_v15 = vpop.xlane.xlu2 %2485  ;;  %v2958_v51 = vmul.f32 %v8204_v63, %v2925_v2  ;;  %v2888_v11 = vmul.f32 0.5, %v2887_v42  ;;  %vm2892_vm15 = vweird.f32 %v8537_v34 }
 0x631   : > { %v8561_v25 = vpop.eup %5808  ;;  %v2779_v49 = vsub.f32 1.5, %v2778_v4  ;;  %v8564_v38 = vadd.f32 1e-05, %v2528_v23  ;;  %v2530_v3 = vmul.f32 %v2486_v15, %v8051_v52  ;;  %vm2651_vm4 = vweird.f32 %v8530_v41  ;;  %vm2893_vm9 = vmor %vm2891_vm11, %vm2892_vm15  ;;  %v5860_v15 = vld [vmem:[%s7350_s20 + $0x90] sm:$0xff] }
 0x632   : > { %v2626_v59 = vmul.f32 %v8561_v25, %v8506_v48  ;;  %v2991_v32 = vadd.f32 %v8211_v60, %v2958_v51  ;;  %v2590_v53 = vmul.f32 %v8504_v61, %v2589_v50  ;;  %v2889_v33 = vsub.f32 1.5, %v2888_v11 }
 0x633   : > { %v2780_v9 = vmul.f32 %v8512_v57, %v2779_v49  ;;  %5812 = vrsqrt.f32 %v8564_v38  ;;  %v8575_v20 = vpop.eup %5810  ;;  %v8583_v0 = vadd.f32 1e-05, %v2530_v3  ;;  %v2931_v36 = vmul.f32 %v8204_v63, %v2898_v31 }
 0x634   : > { %v2627_v17 = vmul.f32 %v8561_v25, %v2626_v59  ;;  %v8586_v56 = vadd.f32 %v5859_v18, %v2991_v32  ;;  %v2646_v2 = vmul.f32 %v8575_v20, %v8530_v41  ;;  %v2890_v55 = vmul.f32 %v8537_v34, %v2889_v33 }
 0x635   : > { %v2784_v6 = vsel %vm2783_vm3, %v8512_v57, %v2780_v9  ;;  %5814 = vrsqrt.f32 %v8583_v0  ;;  %vm2632_vm10 = vweird.f32 %v8561_v25  ;;  %v2594_v58 = vsel %vm8602_vm2, %v8504_v61, %v2590_v53 }
 0x636   : > { %v2915_v22 = vmul.f32 %v2784_v6, %v8234_v8  ;;  %v2628_v14 = vmul.f32 0.5, %v2627_v17  ;;  %v2452_v7 = vpop.xlane.xlu1 %2451  ;;  %3055 = vst [vmem:[%s7350_s20 + $0xf0] sm:$0xff] %v8586_v56  ;;  %v2647_v8 = vmul.f32 %v8575_v20, %v2646_v2  ;;  %v8619_v51 = vadd.f32 %v5860_v15, %v2979_v30  ;;  %vm2633_vm14 = vmor %vm2631_vm8, %vm2632_vm10 }
 0x637   : > { %v2513_v4 = vmul.f32 %v2452_v7, %v8051_v52  ;;  %v2894_v42 = vsel %vm2893_vm9, %v8537_v34, %v2890_v55  ;;  %vm2652_vm15 = vweird.f32 %v8575_v20  ;;  %vm2751_vm11 = vweird.f32 %v8564_v38  ;;  %v5861_v7 = vld [vmem:[%s7350_s20 + $0xa0] sm:$0xff]  ;;  %v5862_v55 = vld [vmem:[%s7350_s20 + $0xf8] sm:$0xff] }
 0x638   : > { %v2629_v44 = vsub.f32 1.5, %v2628_v14  ;;  %v2456_v23 = vpop.xlane.xlu2 %2455  ;;  %v2948_v50 = vmul.f32 %v8204_v63, %v2915_v22  ;;  %v2648_v3 = vmul.f32 0.5, %v2647_v8  ;;  %v2926_v16 = vmul.f32 %v2894_v42, %v8247_v46  ;;  %3043 = vst [vmem:[%s7350_s20 + $0x90] sm:$0xff] %v8619_v51  ;;  %vm2653_vm8 = vmor %vm2651_vm4, %vm2652_vm15 }
 0x639   : > { %v8621_v49 = vpop.eup %5812  ;;  %v8624_v31 = vadd.f32 1e-05, %v2513_v4  ;;  %v2515_v61 = vmul.f32 %v2456_v23, %v8051_v52  ;;  %v2964_v9 = vadd.f32 %v8211_v60, %v2931_v36  ;;  %v2896_v48 = vmul.f32 %v2594_v58, %v8231_v21  ;;  %v5863_v58 = vld [vmem:[%s7350_s20 + $0x18] sm:$0xff] }
 0x63a   : > { %v2630_v59 = vmul.f32 %v8561_v25, %v2629_v44  ;;  %v2746_v32 = vmul.f32 %v8621_v49, %v8564_v38  ;;  %v2649_v34 = vsub.f32 1.5, %v2648_v3  ;;  %v2959_v17 = vmul.f32 %v8204_v63, %v2926_v16 }
 0x63b   : > { %5816 = vrsqrt.f32 %v8624_v31  ;;  %v8640_v46 = vadd.f32 1e-05, %v2515_v61  ;;  %v8643_v11 = vpop.eup %5814  ;;  %v2981_v18 = vadd.f32 %v8211_v60, %v2948_v50  ;;  %vm2752_vm3 = vweird.f32 %v8621_v49 }
 0x63c   : > { %v2634_v30 = vsel %vm2633_vm14, %v8561_v25, %v2630_v59  ;;  %v2747_v53 = vmul.f32 %v8621_v49, %v2746_v32  ;;  %v2650_v33 = vmul.f32 %v8575_v20, %v2649_v34  ;;  %v2766_v2 = vmul.f32 %v8643_v11, %v8583_v0  ;;  %vm2753_vm2 = vmor %vm2751_vm11, %vm2752_vm3  ;;  %v5864_v32 = vld [vmem:[%s7350_s20 + $0x28] sm:$0xff] }
 0x63d   : > { %v2900_v6 = vmul.f32 %v2634_v30, %v8260_v29  ;;  %5818 = vrsqrt.f32 %v8640_v46  ;;  %v2992_v21 = vadd.f32 %v8211_v60, %v2959_v17  ;;  %v8665_v36 = vadd.f32 %v5861_v7, %v2981_v18 }
 0x63e   : > { %v2748_v25 = vmul.f32 0.5, %v2747_v53  ;;  %v2654_v29 = vsel %vm2653_vm8, %v8575_v20, %v2650_v33  ;;  %v2767_v22 = vmul.f32 %v8643_v11, %v2766_v2  ;;  %v8670_v44 = vadd.f32 %v5863_v58, %v2964_v9 }
 0x63f   : > { %v2933_v14 = vmul.f32 %v8204_v63, %v2900_v6  ;;  %v2902_v41 = vmul.f32 %v2654_v29, %v8266_v12  ;;  %v3024_v8 = vadd.f32 %v5862_v55, %v2992_v21  ;;  %3045 = vst [vmem:[%s7350_s20 + $0xa0] sm:$0xff] %v8665_v36  ;;  %v2929_v12 = vmul.f32 %v8204_v63, %v2896_v48  ;;  %v5867_v55 = vld [vmem:[%s7350_s20 + $0x88] sm:$0xff] }
 0x640   : > { %v2749_v57 = vsub.f32 1.5, %v2748_v25  ;;  %v2480_v4 = vpop.xlane.xlu2 %2479  ;;  %v2768_v23 = vmul.f32 0.5, %v2767_v22  ;;  %vm2772_vm4 = vweird.f32 %v8643_v11  ;;  %3028 = vst [vmem:[%s7350_s20 + $0x18] sm:$0xff] %v8670_v44  ;;  %vm2771_vm10 = vweird.f32 %v8583_v0  ;;  %v5866_v25 = vld [vmem:[%s7350_s20 + $0x8] sm:$0xff] }
 0x641   : > { %v8672_v20 = vpop.eup %5816  ;;  %v2527_v50 = vmul.f32 %v2480_v4, %v8051_v52  ;;  %v2966_v15 = vadd.f32 %v8211_v60, %v2933_v14  ;;  %3056 = vst [vmem:[%s7350_s20 + $0xf8] sm:$0xff] %v3024_v8  ;;  %3202 = vmatpush.msra.mxu2 %v3024_v8  ;;  %v2935_v61 = vmul.f32 %v8204_v63, %v2902_v41  ;;  %vm2773_vm9 = vmor %vm2771_vm10, %vm2772_vm4  ;;  %vm2601_vm11 = vweird.f32 %v8624_v31 }
 0x642   : > { %v2750_v42 = vmul.f32 %v8621_v49, %v2749_v57  ;;  %v2596_v3 = vmul.f32 %v8672_v20, %v8624_v31  ;;  %v2769_v16 = vsub.f32 1.5, %v2768_v23  ;;  %v2962_v9 = vadd.f32 %v8211_v60, %v2929_v12 }
 0x643   : > { %v8689_v59 = vadd.f32 1e-05, %v2527_v50  ;;  %v2998_v34 = vadd.f32 %v5864_v32, %v2966_v15  ;;  %v5819_v30 = vpop.eup %5818  ;;  %3203 = vmatpush.msra.mxu2 %v8586_v56  ;;  %v2968_v38 = vadd.f32 %v8211_v60, %v2935_v61  ;;  %v5865_v56 = vld [vmem:[%s7350_s20 + $0x38] sm:$0xff]  ;;  %vm2602_vm15 = vweird.f32 %v8672_v20  ;;  %v5869_v61 = vld [vmem:[%s7350_s20 + $0x10] sm:$0xff] }
 0x644   : > { %v2754_v53 = vsel %vm2753_vm2, %v8621_v49, %v2750_v42  ;;  %v2597_v17 = vmul.f32 %v8672_v20, %v2596_v3  ;;  %v2770_v48 = vmul.f32 %v8643_v11, %v2769_v16  ;;  %v2616_v6 = vmul.f32 %v5819_v30, %v8640_v46  ;;  %vm2603_vm14 = vmor %vm2601_vm11, %vm2602_vm15 }
 0x645   : > { %v2912_v18 = vmul.f32 %v2754_v53, %v8284_v40  ;;  %3030 = vst [vmem:[%s7350_s20 + $0x28] sm:$0xff] %v2998_v34  ;;  %5820 = vrsqrt.f32 %v8689_v59  ;;  %3204 = vmatpush.msra.mxu2 %v8535_v19  ;;  %v3000_v33 = vadd.f32 %v5865_v56, %v2968_v38  ;;  %v8712_v21 = vadd.f32 %v5866_v25, %v2962_v9  ;;  %v10052_v25 = vld [vmem:[#allocation42_spill] sm:$0xff] }
 0x646   : > { %v2598_v49 = vmul.f32 0.5, %v2597_v17  ;;  %v2774_v40 = vsel %vm2773_vm9, %v8643_v11, %v2770_v48  ;;  %v2617_v2 = vmul.f32 %v5819_v30, %v2616_v6  ;;  %vm2622_vm8 = vweird.f32 %v5819_v30 }
 0x647   : > { %v2945_v0 = vmul.f32 %v8204_v63, %v2912_v18  ;;  %v2914_v29 = vmul.f32 %v2774_v40, %v8288_v39  ;;  %3205 = vmatpush.msra.mxu2 %v8493_v43  ;;  %3032 = vst [vmem:[%s7350_s20 + $0x38] sm:$0xff] %v3000_v33  ;;  %3097 = vmatpush.msra.mxu1 %v3000_v33  ;;  %vm2621_vm3 = vweird.f32 %v8640_v46  ;;  %vm2741_vm10 = vweird.f32 %v8689_v59  ;;  %v5872_v33 = vld [vmem:[%s7350_s20] sm:$0xff] }
 0x648   : > { %v2599_v22 = vsub.f32 1.5, %v2598_v49  ;;  %v2448_v19 = vpop.xlane.xlu2 %2447  ;;  %v2618_v14 = vmul.f32 0.5, %v2617_v2  ;;  %3026 = vst [vmem:[%s7350_s20 + $0x8] sm:$0xff] %v8712_v21  ;;  %vm2623_vm4 = vmor %vm2621_vm3, %vm2622_vm8  ;;  %v10040_v6 = vmov 1.0   ;;  %v10046_v2 = vld [vmem:[#allocation38_spill] sm:$0xff] }
 0x649   : > { %v2511_v11 = vmul.f32 %v2448_v19, %v8051_v52  ;;  %v2978_v7 = vadd.f32 %v8211_v60, %v2945_v0  ;;  %3206 = vmatpush.msra.mxu2 %v8454_v27  ;;  %3098 = vmatpush.msra.mxu1 %v8510_v26  ;;  %v2947_v39 = vmul.f32 %v8204_v63, %v2914_v29  ;;  %v10049_v0 = vld [vmem:[#allocation40_spill] sm:$0xff]  ;;  %v10058_v29 = vld [vmem:[#allocation46_spill] sm:$0xff] }
 0x64a   : > { %v2600_v41 = vmul.f32 %v8672_v20, %v2599_v22  ;;  %v2619_v43 = vsub.f32 1.5, %v2618_v14  ;;  %v10061_v22 = vld [vmem:[#allocation48_spill] sm:$0xff]  ;;  %v10064_v19 = vld [vmem:[#allocation50_spill] sm:$0xff] }
 0x64b   : > { %v2543_v57 = vadd.f32 1e-05, %v2511_v11  ;;  %v3010_v8 = vadd.f32 %v5867_v55, %v2978_v7  ;;  %v5821_v4 = vpop.eup %5820  ;;  %3207 = vmatpush.msra.mxu2 %v8430_v45  ;;  %3099 = vmatpush.msra.mxu1 %v2998_v34  ;;  %v2980_v27 = vadd.f32 %v8211_v60, %v2947_v39  ;;  %v10067_v14 = vld [vmem:[#allocation52_spill] sm:$0xff]  ;;  %v10070_v11 = vld [vmem:[#allocation54_spill] sm:$0xff]  ;;  %v10079_v39 = vld [vmem:[#allocation79_spill] sm:$0xff] }
 0x64c   : > { %v2604_v58 = vsel %vm2603_vm14, %v8672_v20, %v2600_v41  ;;  %v2620_v31 = vmul.f32 %v5819_v30, %v2619_v43  ;;  %v2736_v23 = vmul.f32 %v5821_v4, %v8689_v59  ;;  %v5868_v20 = vld [vmem:[%s7350_s20 + $0x98] sm:$0xff]  ;;  %vm2742_vm2 = vweird.f32 %v5821_v4  ;;  %v10073_v7 = vld [vmem:[#allocation56_spill] sm:$0xff]  ;;  %v10076_v41 = vld [vmem:[#allocation69_spill] sm:$0xff] }
 0x64d   : > { %v2897_v26 = vmul.f32 %v2604_v58, %v8309_v54  ;;  %3042 = vst [vmem:[%s7350_s20 + $0x88] sm:$0xff] %v3010_v8  ;;  %5822 = vrsqrt.f32 %v2543_v57  ;;  %3208 = vmatpush.msra.mxu2 %v8411_v35  ;;  %v3012_v50 = vadd.f32 %v5868_v20, %v2980_v27  ;;  %vm2743_vm9 = vmor %vm2741_vm10, %vm2742_vm2  ;;  %vm2581_vm11 = vweird.f32 %v2543_v57  ;;  %v10082_v43 = vld [vmem:[#allocation31_spill] sm:$0xff]  ;;  %v10085_v27 = vld [vmem:[#allocation33_spill] sm:$0xff] }
 0x64e   : > { %v2624_v45 = vsel %vm2623_vm4, %v5819_v30, %v2620_v31  ;;  %v2737_v15 = vmul.f32 %v5821_v4, %v2736_v23  ;;  %vm10059_vm4 = vcmp.eq.s32.totalorder %v10058_v29, %v10029_v13  ;;  %vm10060_vm2 = vcmp.eq.s32.totalorder %v10058_v29, %v6441_v5  ;;  %v3058_v23 = vld [vmem:[#allocation4] sm:$0xff] }
 0x64f   : > { %v2930_v12 = vmul.f32 %v8204_v63, %v2897_v26  ;;  %v2899_v42 = vmul.f32 %v2624_v45, %v8314_v62  ;;  %3209 = vmatpush.msra.mxu2 %v8399_v1  ;;  %3044 = vst [vmem:[%s7350_s20 + $0x98] sm:$0xff] %v3012_v50  ;;  %vm10062_vm10 = vcmp.eq.s32.totalorder %v10061_v22, %v10029_v13  ;;  %v10088_v45 = vld [vmem:[#allocation35_spill] sm:$0xff] }
 0x650   : > { %v2738_v54 = vmul.f32 0.5, %v2737_v15 }
 0x651   : > { %v2963_v46 = vadd.f32 %v8211_v60, %v2930_v12  ;;  %3210 = vmatpush.msra.mxu2 %v8390_v24  ;;  %v2932_v35 = vmul.f32 %v8204_v63, %v2899_v42  ;;  %v5870_v24 = vld [vmem:[%s7350_s20 + $0x20] sm:$0xff]  ;;  %v3059_v42 = vld [vmem:[#allocation4 + $0xd8] sm:$0xff] }
 0x652   : > { %v2739_v3 = vsub.f32 1.5, %v2738_v54 }
 0x653   : > { %v2995_v16 = vadd.f32 %v5869_v61, %v2963_v46  ;;  %v5823_v32 = vpop.eup %5822  ;;  %3211 = vmatpush.msra.mxu2 %v8381_v47  ;;  %v2965_v62 = vadd.f32 %v8211_v60, %v2932_v35  ;;  %v10091_v35 = vld [vmem:[#allocation37_spill] sm:$0xff] }
 0x654   : > { %v2740_v1 = vmul.f32 %v5821_v4, %v2739_v3  ;;  %v2576_v34 = vmul.f32 %v5823_v32, %v2543_v57  ;;  %vm2582_vm15 = vweird.f32 %v5823_v32 }
 0x655   : > { %3027 = vst [vmem:[%s7350_s20 + $0x10] sm:$0xff] %v2995_v16  ;;  %3212 = vmatpush.msra.mxu2 %v8372_v37  ;;  %v2997_v9 = vadd.f32 %v5870_v24, %v2965_v62  ;;  %vm2583_vm14 = vmor %vm2581_vm11, %vm2582_vm15  ;;  %vm10065_vm15 = vcmp.eq.s32.totalorder %v10064_v19, %v10029_v13  ;;  %vm10066_vm11 = vcmp.eq.s32.totalorder %v10064_v19, %v6441_v5  ;;  %v10109_v19 = vld [vmem:[#allocation49_spill] sm:$0xff] }
 0x656   : > { %v2744_v30 = vsel %vm2743_vm9, %v5821_v4, %v2740_v1  ;;  %v2577_v53 = vmul.f32 %v5823_v32, %v2576_v34  ;;  %vm10063_vm9 = vcmp.eq.s32.totalorder %v10061_v22, %v6441_v5  ;;  %v10094_v1 = vld [vmem:[#allocation39_spill] sm:$0xff] }
 0x657   : > { %v2911_v17 = vmul.f32 %v2744_v30, %v8333_v10  ;;  %3213 = vmatpush.msra.mxu2 %v8665_v36  ;;  %3029 = vst [vmem:[%s7350_s20 + $0x20] sm:$0xff] %v2997_v9  ;;  %3100 = vmatpush.msra.mxu1 %v2997_v9  ;;  %v5871_v36 = vld [vmem:[%s7350_s20 + $0x80] sm:$0xff]  ;;  %v3061_v9 = vld [vmem:[#allocation4 + $0x50] sm:$0xff] }
 0x658   : > { %v2578_v47 = vmul.f32 0.5, %v2577_v53 }
 0x659   : > { %3214 = vmatpush.msra.mxu2 %v3012_v50  ;;  %3101 = vmatpush.msra.mxu1 %v8670_v44  ;;  %v2944_v59 = vmul.f32 %v8204_v63, %v2911_v17  ;;  %v10097_v17 = vld [vmem:[#allocation41_spill] sm:$0xff] }
 0x65a   : > { %v2579_v38 = vsub.f32 1.5, %v2578_v47 }
 0x65b   : > { %3215 = vmatpush.msra.mxu2 %v8619_v51  ;;  %3102 = vmatpush.msra.mxu1 %v2995_v16  ;;  %v2977_v10 = vadd.f32 %v8211_v60, %v2944_v59  ;;  %v3060_v16 = vld [vmem:[#allocation4 + $0x18] sm:$0xff] }
 0x65c   : > { %v2580_v37 = vmul.f32 %v5823_v32, %v2579_v38  ;;  %v3062_v38 = vld [vmem:[#allocation4 + $0x68] sm:$0xff] }
 0x65d   : > { %3216 = vmatpush.msra.mxu2 %v3010_v8  ;;  %3103 = vmatpush.msra.mxu1 %v8712_v21  ;;  %v3009_v44 = vadd.f32 %v5871_v36, %v2977_v10  ;;  %v10055_v21 = vld [vmem:[#allocation44_spill] sm:$0xff]  ;;  %v3057_v8 = vld [vmem:[#allocation4 + $0xb0] sm:$0xff]  ;;  %v10100_v36 = vld [vmem:[#allocation43_spill] sm:$0xff] }
 0x65e   : > { %v2584_v18 = vsel %vm2583_vm14, %v5823_v32, %v2580_v37  ;;  %vm10056_vm8 = vcmp.eq.s32.totalorder %v10055_v21, %v10029_v13  ;;  %vm10057_vm3 = vcmp.eq.s32.totalorder %v10055_v21, %v6441_v5  ;;  %vm10068_vm14 = vcmp.eq.s32.totalorder %v10067_v14, %v10029_v13  ;;  %v3065_v21 = vld [vmem:[#allocation4 + $0x80] sm:$0xff] }
 0x65f   : > { %v2895_v48 = vmul.f32 %v2584_v18, %v8349_v28  ;;  %3041 = vst [vmem:[%s7350_s20 + $0x80] sm:$0xff] %v3009_v44  ;;  %3217 = vmatpush.msra.mxu2 %v3009_v44  ;;  %v3064_v28 = vld [vmem:[#allocation4 + $0x48] sm:$0xff] }
 0x660   : > { %5147 = vmatmul.msk.f32.vlgmr.msra.gmra.mxu2 %vm749_vm1, %v10040_v6  ;;  %vm10047_vm1 = vcmp.eq.s32.totalorder %v10046_v2, %v10029_v13 }
 0x661   : > { %v2928_v49 = vmul.f32 %v8204_v63, %v2895_v48  ;;  %v10044_v63 = vld [vmem:[#allocation36_spill] sm:$0xff]  ;;  %v3063_v48 = vld [vmem:[#allocation4 + $0x30] sm:$0xff] }
 0x663   : > { %v2961_v56 = vadd.f32 %v8211_v60, %v2928_v49 }
 0x665   : > { %v2993_v40 = vadd.f32 %v5872_v33, %v2961_v56  ;;  %v10103_v56 = vld [vmem:[#allocation45_spill] sm:$0xff] }
 0x667   : > { %3025 = vst [vmem:[%s7350_s20] sm:$0xff] %v2993_v40  ;;  %3104 = vmatpush.msra.mxu1 %v2993_v40 }
 0x668   : > { %5115 = vmatmul.msk.f32.vlgmr.msra.gmra.mxu1 %vm748_vm0, %v10040_v6  ;;  %5148 = vmatmul.msk.f32.gmra.mxu2 %vm751_vm7, %v10040_v6  ;;  %vm10045_vm0 = vcmp.eq.s32.totalorder %v10044_v63, %v6441_v5  ;;  %vm10050_vm7 = vcmp.eq.s32.totalorder %v10049_v0, %v10029_v13 }
 0x670   : > { %5116 = vmatmul.msk.f32.gmra.mxu1 %vm750_vm6, %v10040_v6  ;;  %5149 = vmatmul.msk.f32.gmra.mxu2 %vm753_vm13, %v10040_v6  ;;  %vm10048_vm6 = vcmp.eq.s32.totalorder %v10046_v2, %v6441_v5  ;;  %vm10053_vm13 = vcmp.eq.s32.totalorder %v10052_v25, %v10029_v13  ;;  %v10106_v2 = vld [vmem:[#allocation47_spill] sm:$0xff] }
 0x678   : > { %5117 = vmatmul.msk.f32.gmra.mxu1 %vm752_vm12, %v10040_v6  ;;  %5150 = vmatmul.msk.f32.gmra.mxu2 %vm755_vm5, %v10040_v6  ;;  %vm10051_vm12 = vcmp.eq.s32.totalorder %v10049_v0, %v6441_v5  ;;  %vm10054_vm5 = vcmp.eq.s32.totalorder %v10052_v25, %v6441_v5 }
 0x680   : > { %5118 = vmatmul.msk.f32.gmra.mxu1 %vm10045_vm0, %v10040_v6  ;;  %5151 = vmatmul.msk.f32.gmra.mxu2 %vm10047_vm1, %v10040_v6  ;;  %vm10069_vm0 = vcmp.eq.s32.totalorder %v10067_v14, %v6441_v5  ;;  %vm10071_vm1 = vcmp.eq.s32.totalorder %v10070_v11, %v10029_v13 }
 0x688   : > { %5119 = vmatmul.msk.f32.gmra.mxu1 %vm10048_vm6, %v10040_v6  ;;  %5152 = vmatmul.msk.f32.gmra.mxu2 %vm10050_vm7, %v10040_v6  ;;  %vm10072_vm6 = vcmp.eq.s32.totalorder %v10070_v11, %v6441_v5  ;;  %vm10074_vm7 = vcmp.eq.s32.totalorder %v10073_v7, %v10029_v13 }
 0x690   : > { %5120 = vmatmul.msk.f32.gmra.mxu1 %vm10051_vm12, %v10040_v6  ;;  %5153 = vmatmul.msk.f32.gmra.mxu2 %vm10053_vm13, %v10040_v6  ;;  %vm10075_vm12 = vcmp.eq.s32.totalorder %v10073_v7, %v6441_v5  ;;  %vm10077_vm13 = vcmp.eq.s32.totalorder %v10076_v41, %v10029_v13  ;;  %v3066_v7 = vld [vmem:[#allocation4 + $0x88] sm:$0xff] }
 0x698   : > { %5121 = vmatmul.msk.f32.gmra.mxu1 %vm10054_vm5, %v10040_v6  ;;  %5154 = vmatmul.msk.f32.gmra.mxu2 %vm10056_vm8, %v10040_v6  ;;  %vm10078_vm5 = vcmp.eq.s32.totalorder %v10076_v41, %v6441_v5  ;;  %vm10080_vm8 = vcmp.eq.s32.totalorder %v10079_v39, %v10029_v13 }
 0x6a0   : > { %5122 = vmatmul.msk.f32.gmra.mxu1 %vm10057_vm3, %v10040_v6  ;;  %5155 = vmatmul.msk.f32.gmra.mxu2 %vm10059_vm4, %v10040_v6  ;;  %vm10081_vm3 = vcmp.eq.s32.totalorder %v10079_v39, %v6441_v5  ;;  %vm10083_vm4 = vcmp.eq.s32.totalorder %v10082_v43, %v10029_v13 }
 0x6a8   : > { %5123 = vmatmul.msk.f32.gmra.mxu1 %vm10060_vm2, %v10040_v6  ;;  %5156 = vmatmul.msk.f32.gmra.mxu2 %vm10062_vm10, %v10040_v6  ;;  %vm10084_vm2 = vcmp.eq.s32.totalorder %v10082_v43, %v6441_v5  ;;  %vm10086_vm10 = vcmp.eq.s32.totalorder %v10085_v27, %v10029_v13  ;;  %v10112_v43 = vld [vmem:[#allocation51_spill] sm:$0xff] }
 0x6b0   : > { %5124 = vmatmul.msk.f32.gmra.mxu1 %vm10063_vm9, %v10040_v6  ;;  %5157 = vmatmul.msk.f32.gmra.mxu2 %vm10065_vm15, %v10040_v6  ;;  %vm10087_vm9 = vcmp.eq.s32.totalorder %v10085_v27, %v6441_v5  ;;  %vm10089_vm15 = vcmp.eq.s32.totalorder %v10088_v45, %v10029_v13  ;;  %v10115_v27 = vld [vmem:[#allocation53_spill] sm:$0xff] }
 0x6b8   : > { %5125 = vmatmul.msk.f32.gmra.mxu1 %vm10066_vm11, %v10040_v6  ;;  %5158 = vmatmul.msk.f32.gmra.mxu2 %vm10068_vm14, %v10040_v6  ;;  %vm10090_vm11 = vcmp.eq.s32.totalorder %v10088_v45, %v6441_v5  ;;  %vm10092_vm14 = vcmp.eq.s32.totalorder %v10091_v35, %v10029_v13  ;;  %v10118_v45 = vld [vmem:[#allocation55_spill] sm:$0xff] }
 0x6c0   : > { %5126 = vmatmul.msk.f32.gmra.mxu1 %vm10069_vm0, %v10040_v6  ;;  %5159 = vmatmul.msk.f32.gmra.mxu2 %vm10071_vm1, %v10040_v6  ;;  %vm10093_vm0 = vcmp.eq.s32.totalorder %v10091_v35, %v6441_v5  ;;  %vm10095_vm1 = vcmp.eq.s32.totalorder %v10094_v1, %v10029_v13  ;;  %v10121_v35 = vld [vmem:[#allocation57_spill] sm:$0xff] }
 0x6c8   : > { %5127 = vmatmul.msk.f32.gmra.mxu1 %vm10072_vm6, %v10040_v6  ;;  %5160 = vmatmul.msk.f32.gmra.mxu2 %vm10074_vm7, %v10040_v6  ;;  %vm10096_vm6 = vcmp.eq.s32.totalorder %v10094_v1, %v6441_v5  ;;  %vm10098_vm7 = vcmp.eq.s32.totalorder %v10097_v17, %v10029_v13  ;;  %v10124_v1 = vld [vmem:[#allocation70_spill] sm:$0xff] }
 0x6d0   : > { %5128 = vmatmul.msk.f32.gmra.mxu1 %vm10075_vm12, %v10040_v6  ;;  %5161 = vmatmul.msk.f32.gmra.mxu2 %vm10077_vm13, %v10040_v6  ;;  %vm10099_vm12 = vcmp.eq.s32.totalorder %v10097_v17, %v6441_v5  ;;  %vm10101_vm13 = vcmp.eq.s32.totalorder %v10100_v36, %v10029_v13  ;;  %v10127_v17 = vld [vmem:[#allocation80_spill] sm:$0xff] }
 0x6d8   : > { %5129 = vmatmul.msk.f32.gmra.mxu1 %vm10078_vm5, %v10040_v6  ;;  %5162 = vmatmul.msk.f32.gmra.mxu2 %vm10080_vm8, %v10040_v6  ;;  %vm10102_vm5 = vcmp.eq.s32.totalorder %v10100_v36, %v6441_v5  ;;  %vm10104_vm8 = vcmp.eq.s32.totalorder %v10103_v56, %v10029_v13 }
 0x6e0   : > { %5130 = vmatmul.msk.f32.gmra.mxu1 %vm10081_vm3, %v10040_v6  ;;  %5163 = vmatmul.msk.f32.gmra.mxu2 %vm10083_vm4, %v10040_v6  ;;  %vm10105_vm3 = vcmp.eq.s32.totalorder %v10103_v56, %v6441_v5  ;;  %vm10107_vm4 = vcmp.eq.s32.totalorder %v10106_v2, %v10029_v13  ;;  %v3074_v56 = vld [vmem:[#allocation4 + $0x58] sm:$0xff] }
 0x6e3   : > { %v3219_v57 = vpop.f32.mrf.mxu2 }
 0x6e5   : > { %v3106_v55 = vpop.f32.mrf.mxu1 }
 0x6e6   : > { %v3220_v4 = vadd.f32 %v3219_v57, %v3106_v55 }
 0x6e8   : > { %v3315_v58 = vadd.f32 %v3220_v4, %v3057_v8  ;;  %5131 = vmatmul.msk.f32.gmra.mxu1 %vm10084_vm2, %v10040_v6  ;;  %5164 = vmatmul.msk.f32.gmra.mxu2 %vm10086_vm10, %v10040_v6  ;;  %vm10108_vm2 = vcmp.eq.s32.totalorder %v10106_v2, %v6441_v5  ;;  %vm10110_vm10 = vcmp.eq.s32.totalorder %v10109_v19, %v10029_v13  ;;  %v3067_v8 = vld [vmem:[#allocation4 + $0xe8] sm:$0xff] }
 0x6ea   : > { %3347 = vst [vmem:[#allocation4 + $0xb0] sm:$0xff] %v3315_v58 }
 0x6eb   : > { %v3222_v26 = vpop.f32.mrf.mxu2 }
 0x6ed   : > { %v3109_v31 = vpop.f32.mrf.mxu1 }
 0x6ee   : > { %v3223_v20 = vadd.f32 %v3222_v26, %v3109_v31 }
 0x6f0   : > { %v3316_v50 = vadd.f32 %v3223_v20, %v3058_v23  ;;  %5132 = vmatmul.msk.f32.gmra.mxu1 %vm10087_vm9, %v10040_v6  ;;  %5165 = vmatmul.msk.f32.gmra.mxu2 %vm10089_vm15, %v10040_v6  ;;  %vm10111_vm9 = vcmp.eq.s32.totalorder %v10109_v19, %v6441_v5  ;;  %vm10113_vm15 = vcmp.eq.s32.totalorder %v10112_v43, %v10029_v13  ;;  %v3068_v23 = vld [vmem:[#allocation4 + $0xb8] sm:$0xff] }
 0x6f2   : > { %3348 = vst [vmem:[#allocation4] sm:$0xff] %v3316_v50 }
 0x6f3   : > { %v3225_v15 = vpop.f32.mrf.mxu2 }
 0x6f5   : > { %v3112_v12 = vpop.f32.mrf.mxu1 }
 0x6f6   : > { %v3226_v54 = vadd.f32 %v3225_v15, %v3112_v12 }
 0x6f8   : > { %v3317_v46 = vadd.f32 %v3226_v54, %v3059_v42  ;;  %5133 = vmatmul.msk.f32.gmra.mxu1 %vm10090_vm11, %v10040_v6  ;;  %5166 = vmatmul.msk.f32.gmra.mxu2 %vm10092_vm14, %v10040_v6  ;;  %vm10114_vm11 = vcmp.eq.s32.totalorder %v10112_v43, %v6441_v5  ;;  %vm10116_vm14 = vcmp.eq.s32.totalorder %v10115_v27, %v10029_v13  ;;  %v3069_v42 = vld [vmem:[#allocation4 + $0x60] sm:$0xff]  ;;  %v3078_v43 = vld [vmem:[#allocation4 + $0x90] sm:$0xff] }
 0x6fa   : > { %3349 = vst [vmem:[#allocation4 + $0xd8] sm:$0xff] %v3317_v46 }
 0x6fb   : > { %v3228_v3 = vpop.f32.mrf.mxu2 }
 0x6fd   : > { %v3115_v61 = vpop.f32.mrf.mxu1 }
 0x6fe   : > { %v3229_v32 = vadd.f32 %v3228_v3, %v3115_v61 }
 0x700   : > { %v3318_v62 = vadd.f32 %v3229_v32, %v3060_v16  ;;  %5134 = vmatmul.msk.f32.gmra.mxu1 %vm10093_vm0, %v10040_v6  ;;  %5167 = vmatmul.msk.f32.gmra.mxu2 %vm10095_vm1, %v10040_v6  ;;  %vm10117_vm0 = vcmp.eq.s32.totalorder %v10115_v27, %v6441_v5  ;;  %vm10119_vm1 = vcmp.eq.s32.totalorder %v10118_v45, %v10029_v13  ;;  %v3070_v16 = vld [vmem:[#allocation4 + $0xf0] sm:$0xff] }
 0x702   : > { %3350 = vst [vmem:[#allocation4 + $0x18] sm:$0xff] %v3318_v62 }
 0x703   : > { %v3231_v34 = vpop.f32.mrf.mxu2 }
 0x705   : > { %v3118_v24 = vpop.f32.mrf.mxu1 }
 0x706   : > { %v3232_v30 = vadd.f32 %v3231_v34, %v3118_v24 }
 0x708   : > { %v3319_v53 = vadd.f32 %v3232_v30, %v3061_v9  ;;  %5135 = vmatmul.msk.f32.gmra.mxu1 %vm10096_vm6, %v10040_v6  ;;  %5168 = vmatmul.msk.f32.gmra.mxu2 %vm10098_vm7, %v10040_v6  ;;  %vm10120_vm6 = vcmp.eq.s32.totalorder %v10118_v45, %v6441_v5  ;;  %vm10122_vm7 = vcmp.eq.s32.totalorder %v10121_v35, %v10029_v13  ;;  %v3071_v9 = vld [vmem:[#allocation4 + $0x8] sm:$0xff] }
 0x70a   : > { %3351 = vst [vmem:[#allocation4 + $0x50] sm:$0xff] %v3319_v53 }
 0x70b   : > { %v3234_v47 = vpop.f32.mrf.mxu2 }
 0x70d   : > { %v3121_v59 = vpop.f32.mrf.mxu1 }
 0x70e   : > { %v3235_v10 = vadd.f32 %v3234_v47, %v3121_v59 }
 0x710   : > { %v3320_v37 = vadd.f32 %v3235_v10, %v3062_v38  ;;  %5136 = vmatmul.msk.f32.gmra.mxu1 %vm10099_vm12, %v10040_v6  ;;  %5169 = vmatmul.msk.f32.gmra.mxu2 %vm10101_vm13, %v10040_v6  ;;  %vm10123_vm12 = vcmp.eq.s32.totalorder %v10121_v35, %v6441_v5  ;;  %vm10125_vm13 = vcmp.eq.s32.totalorder %v10124_v1, %v10029_v13  ;;  %v3072_v38 = vld [vmem:[#allocation4 + $0x78] sm:$0xff] }
 0x712   : > { %3352 = vst [vmem:[#allocation4 + $0x68] sm:$0xff] %v3320_v37 }
 0x713   : > { %v3237_v44 = vpop.f32.mrf.mxu2 }
 0x715   : > { %v3124_v18 = vpop.f32.mrf.mxu1 }
 0x716   : > { %v3238_v51 = vadd.f32 %v3237_v44, %v3124_v18  ;;  %v3073_v18 = vld [vmem:[#allocation4 + $0x38] sm:$0xff] }
 0x718   : > { %v3321_v49 = vadd.f32 %v3238_v51, %v3063_v48  ;;  %5137 = vmatmul.msk.f32.gmra.mxu1 %vm10102_vm5, %v10040_v6  ;;  %5170 = vmatmul.msk.f32.gmra.mxu2 %vm10104_vm8, %v10040_v6  ;;  %vm10126_vm5 = vcmp.eq.s32.totalorder %v10124_v1, %v6441_v5  ;;  %vm10128_vm8 = vcmp.eq.s32.totalorder %v10127_v17, %v10029_v13 }
 0x71a   : > { %3353 = vst [vmem:[#allocation4 + $0x30] sm:$0xff] %v3321_v49 }
 0x71b   : > { %v3240_v33 = vpop.f32.mrf.mxu2 }
 0x71d   : > { %v3127_v40 = vpop.f32.mrf.mxu1 }
 0x71e   : > { %v3241_v60 = vadd.f32 %v3240_v33, %v3127_v40 }
 0x720   : > { %v3322_v63 = vadd.f32 %v3241_v60, %v3064_v28  ;;  %5138 = vmatmul.msk.f32.gmra.mxu1 %vm10105_vm3, %v10040_v6  ;;  %5171 = vmatmul.msk.f32.gmra.mxu2 %vm10107_vm4, %v10040_v6  ;;  %vm10129_vm3 = vcmp.eq.s32.totalorder %v10127_v17, %v6441_v5  ;;  %v3084_v17 = vld [vmem:[#allocation4 + $0x28] sm:$0xff] }
 0x722   : > { %3354 = vst [vmem:[#allocation4 + $0x48] sm:$0xff] %v3322_v63  ;;  %v3075_v63 = vld [vmem:[#allocation4 + $0x40] sm:$0xff] }
 0x723   : > { %v3243_v0 = vpop.f32.mrf.mxu2 }
 0x725   : > { %v3130_v25 = vpop.f32.mrf.mxu1 }
 0x726   : > { %v3244_v29 = vadd.f32 %v3243_v0, %v3130_v25  ;;  %v3076_v25 = vld [vmem:[#allocation4 + $0xc8] sm:$0xff] }
 0x728   : > { %v3323_v22 = vadd.f32 %v3244_v29, %v3065_v21  ;;  %5139 = vmatmul.msk.f32.gmra.mxu1 %vm10108_vm2, %v10040_v6  ;;  %5172 = vmatmul.msk.f32.gmra.mxu2 %vm10110_vm10, %v10040_v6 }
 0x72a   : > { %3355 = vst [vmem:[#allocation4 + $0x80] sm:$0xff] %v3323_v22 }
 0x72b   : > { %v3246_v14 = vpop.f32.mrf.mxu2 }
 0x72d   : > { %v3133_v11 = vpop.f32.mrf.mxu1 }
 0x72e   : > { %v3247_v41 = vadd.f32 %v3246_v14, %v3133_v11  ;;  %v3077_v14 = vld [vmem:[#allocation4 + $0xe0] sm:$0xff] }
 0x730   : > { %v3324_v39 = vadd.f32 %v3247_v41, %v3066_v7  ;;  %5140 = vmatmul.msk.f32.gmra.mxu1 %vm10111_vm9, %v10040_v6  ;;  %5173 = vmatmul.msk.f32.gmra.mxu2 %vm10113_vm15, %v10040_v6 }
 0x732   : > { %3356 = vst [vmem:[#allocation4 + $0x88] sm:$0xff] %v3324_v39 }
 0x733   : > { %v3249_v57 = vpop.f32.mrf.mxu2 }
 0x735   : > { %v3136_v55 = vpop.f32.mrf.mxu1 }
 0x736   : > { %v3250_v4 = vadd.f32 %v3249_v57, %v3136_v55 }
 0x738   : > { %v3325_v58 = vadd.f32 %v3250_v4, %v3067_v8  ;;  %5141 = vmatmul.msk.f32.gmra.mxu1 %vm10114_vm11, %v10040_v6  ;;  %5174 = vmatmul.msk.f32.gmra.mxu2 %vm10116_vm14, %v10040_v6 }
 0x73a   : > { %3357 = vst [vmem:[#allocation4 + $0xe8] sm:$0xff] %v3325_v58  ;;  %v3079_v58 = vld [vmem:[#allocation4 + $0x70] sm:$0xff] }
 0x73b   : > { %v3252_v26 = vpop.f32.mrf.mxu2 }
 0x73d   : > { %v3139_v31 = vpop.f32.mrf.mxu1 }
 0x73e   : > { %v3253_v20 = vadd.f32 %v3252_v26, %v3139_v31 }
 0x740   : > { %v3326_v50 = vadd.f32 %v3253_v20, %v3068_v23  ;;  %5142 = vmatmul.msk.f32.gmra.mxu1 %vm10117_vm0, %v10040_v6  ;;  %5175 = vmatmul.msk.f32.gmra.mxu2 %vm10119_vm1, %v10040_v6  ;;  %v3080_v20 = vld [vmem:[#allocation4 + $0xc0] sm:$0xff] }
 0x742   : > { %3358 = vst [vmem:[#allocation4 + $0xb8] sm:$0xff] %v3326_v50 }
 0x743   : > { %v3255_v15 = vpop.f32.mrf.mxu2 }
 0x745   : > { %v3142_v12 = vpop.f32.mrf.mxu1 }
 0x746   : > { %v3256_v54 = vadd.f32 %v3255_v15, %v3142_v12 }
 0x748   : > { %v3327_v46 = vadd.f32 %v3256_v54, %v3069_v42  ;;  %5143 = vmatmul.msk.f32.gmra.mxu1 %vm10120_vm6, %v10040_v6  ;;  %5176 = vmatmul.msk.f32.gmra.mxu2 %vm10122_vm7, %v10040_v6  ;;  %v3081_v42 = vld [vmem:[#allocation4 + $0xa8] sm:$0xff] }
 0x74a   : > { %3359 = vst [vmem:[#allocation4 + $0x60] sm:$0xff] %v3327_v46 }
 0x74b   : > { %v3258_v3 = vpop.f32.mrf.mxu2 }
 0x74d   : > { %v3145_v61 = vpop.f32.mrf.mxu1 }
 0x74e   : > { %v3259_v32 = vadd.f32 %v3258_v3, %v3145_v61  ;;  %v3082_v61 = vld [vmem:[#allocation4 + $0xd0] sm:$0xff] }
 0x750   : > { %v3328_v62 = vadd.f32 %v3259_v32, %v3070_v16  ;;  %5144 = vmatmul.msk.f32.gmra.mxu1 %vm10123_vm12, %v10040_v6  ;;  %5177 = vmatmul.msk.f32.gmra.mxu2 %vm10125_vm13, %v10040_v6 }
 0x752   : > { %3360 = vst [vmem:[#allocation4 + $0xf0] sm:$0xff] %v3328_v62 }
 0x753   : > { %v3261_v34 = vpop.f32.mrf.mxu2 }
 0x755   : > { %v3148_v24 = vpop.f32.mrf.mxu1 }
 0x756   : > { %v3262_v30 = vadd.f32 %v3261_v34, %v3148_v24  ;;  %v3083_v34 = vld [vmem:[#allocation4 + $0x10] sm:$0xff] }
 0x758   : > { %v3329_v53 = vadd.f32 %v3262_v30, %v3071_v9  ;;  %5145 = vmatmul.msk.f32.gmra.mxu1 %vm10126_vm5, %v10040_v6  ;;  %5178 = vmatmul.msk.f32.gmra.mxu2 %vm10128_vm8, %v10040_v6 }
 0x75a   : > { %3361 = vst [vmem:[#allocation4 + $0x8] sm:$0xff] %v3329_v53 }
 0x75b   : > { %v3264_v47 = vpop.f32.mrf.mxu2 }
 0x75d   : > { %v3151_v59 = vpop.f32.mrf.mxu1 }
 0x75e   : > { %v3265_v10 = vadd.f32 %v3264_v47, %v3151_v59 }
 0x760   : > { %v3330_v37 = vadd.f32 %v3265_v10, %v3072_v38  ;;  %5146 = vmatmul.msk.f32.gmra.mxu1 %vm10129_vm3, %v10040_v6 }
 0x762   : > { %3362 = vst [vmem:[#allocation4 + $0x78] sm:$0xff] %v3330_v37  ;;  %v3085_v37 = vld [vmem:[#allocation4 + $0xa0] sm:$0xff] }
 0x763   : > { %v3267_v36 = vpop.f32.mrf.mxu2 }
 0x765   : > { %v3154_v44 = vpop.f32.mrf.mxu1 }
 0x766   : > { %v3268_v48 = vadd.f32 %v3267_v36, %v3154_v44 }
 0x768   : > { %v3331_v51 = vadd.f32 %v3268_v48, %v3073_v18 }
 0x76a   : > { %3363 = vst [vmem:[#allocation4 + $0x38] sm:$0xff] %v3331_v51  ;;  %v3086_v51 = vld [vmem:[#allocation4 + $0xf8] sm:$0xff] }
 0x76b   : > { %v3270_v13 = vpop.f32.mrf.mxu2 }
 0x76d   : > { %v3157_v49 = vpop.f32.mrf.mxu1 }
 0x76e   : > { %v3271_v33 = vadd.f32 %v3270_v13, %v3157_v49 }
 0x770   : > { %v3332_v40 = vadd.f32 %v3271_v33, %v3074_v56 }
 0x772   : > { %3364 = vst [vmem:[#allocation4 + $0x58] sm:$0xff] %v3332_v40  ;;  %v3087_v40 = vld [vmem:[#allocation4 + $0x20] sm:$0xff] }
 0x773   : > { %v3273_v28 = vpop.f32.mrf.mxu2 }
 0x775   : > { %v3160_v60 = vpop.f32.mrf.mxu1 }
 0x776   : > { %v3274_v2 = vadd.f32 %v3273_v28, %v3160_v60 }
 0x778   : > { %v3333_v5 = vadd.f32 %v3274_v2, %v3075_v63 }
 0x77a   : > { %3365 = vst [vmem:[#allocation4 + $0x40] sm:$0xff] %v3333_v5  ;;  %v3088_v5 = vld [vmem:[#allocation4 + $0x98] sm:$0xff] }
 0x77b   : > { %v3276_v6 = vpop.f32.mrf.mxu2 }
 0x77d   : > { %v3163_v0 = vpop.f32.mrf.mxu1 }
 0x77e   : > { %v3277_v21 = vadd.f32 %v3276_v6, %v3163_v0 }
 0x780   : > { %v3334_v29 = vadd.f32 %v3277_v21, %v3076_v25 }
 0x782   : > { %3366 = vst [vmem:[#allocation4 + $0xc8] sm:$0xff] %v3334_v29 }
 0x783   : > { %v3279_v22 = vpop.f32.mrf.mxu2 }
 0x785   : > { %v3166_v19 = vpop.f32.mrf.mxu1 }
 0x786   : > { %v3280_v11 = vadd.f32 %v3279_v22, %v3166_v19 }
 0x788   : > { %v3335_v7 = vadd.f32 %v3280_v11, %v3077_v14 }
 0x78a   : > { %3367 = vst [vmem:[#allocation4 + $0xe0] sm:$0xff] %v3335_v7 }
 0x78b   : > { %v3282_v41 = vpop.f32.mrf.mxu2 }
 0x78d   : > { %v3169_v39 = vpop.f32.mrf.mxu1 }
 0x78e   : > { %v3283_v57 = vadd.f32 %v3282_v41, %v3169_v39 }
 0x790   : > { %v3336_v55 = vadd.f32 %v3283_v57, %v3078_v43 }
 0x792   : > { %3368 = vst [vmem:[#allocation4 + $0x90] sm:$0xff] %v3336_v55 }
 0x793   : > { %v3285_v8 = vpop.f32.mrf.mxu2 }
 0x795   : > { %v3172_v4 = vpop.f32.mrf.mxu1 }
 0x796   : > { %v3286_v27 = vadd.f32 %v3285_v8, %v3172_v4 }
 0x798   : > { %v3337_v26 = vadd.f32 %v3286_v27, %v3079_v58 }
 0x79a   : > { %3369 = vst [vmem:[#allocation4 + $0x70] sm:$0xff] %v3337_v26 }
 0x79b   : > { %v3288_v31 = vpop.f32.mrf.mxu2 }
 0x79d   : > { %v3175_v23 = vpop.f32.mrf.mxu1 }
 0x79e   : > { %v3289_v50 = vadd.f32 %v3288_v31, %v3175_v23 }
 0x7a0   : > { %v3338_v45 = vadd.f32 %v3289_v50, %v3080_v20 }
 0x7a2   : > { %3370 = vst [vmem:[#allocation4 + $0xc0] sm:$0xff] %v3338_v45 }
 0x7a3   : > { %v3291_v15 = vpop.f32.mrf.mxu2 }
 0x7a5   : > { %v3178_v12 = vpop.f32.mrf.mxu1 }
 0x7a6   : > { %v3292_v54 = vadd.f32 %v3291_v15, %v3178_v12 }
 0x7a8   : > { %v3339_v46 = vadd.f32 %v3292_v54, %v3081_v42 }
 0x7aa   : > { %3371 = vst [vmem:[#allocation4 + $0xa8] sm:$0xff] %v3339_v46 }
 0x7ab   : > { %v3294_v35 = vpop.f32.mrf.mxu2 }
 0x7ad   : > { %v3181_v3 = vpop.f32.mrf.mxu1 }
 0x7ae   : > { %v3295_v16 = vadd.f32 %v3294_v35, %v3181_v3 }
 0x7b0   : > { %v3340_v32 = vadd.f32 %v3295_v16, %v3082_v61 }
 0x7b2   : > { %3372 = vst [vmem:[#allocation4 + $0xd0] sm:$0xff] %v3340_v32 }
 0x7b3   : > { %v3297_v62 = vpop.f32.mrf.mxu2 }
 0x7b5   : > { %v3184_v1 = vpop.f32.mrf.mxu1 }
 0x7b6   : > { %v3298_v24 = vadd.f32 %v3297_v62, %v3184_v1 }
 0x7b8   : > { %v3341_v9 = vadd.f32 %v3298_v24, %v3083_v34 }
 0x7ba   : > { %3373 = vst [vmem:[#allocation4 + $0x10] sm:$0xff] %v3341_v9 }
 0x7bb   : > { %v3300_v30 = vpop.f32.mrf.mxu2 }
 0x7bd   : > { %v3187_v53 = vpop.f32.mrf.mxu1 }
 0x7be   : > { %v3301_v47 = vadd.f32 %v3300_v30, %v3187_v53 }
 0x7c0   : > { %v3342_v59 = vadd.f32 %v3301_v47, %v3084_v17 }
 0x7c2   : > { %3374 = vst [vmem:[#allocation4 + $0x28] sm:$0xff] %v3342_v59 }
 0x7c3   : > { %v3303_v38 = vpop.f32.mrf.mxu2 }
 0x7c5   : > { %v3190_v10 = vpop.f32.mrf.mxu1 }
 0x7c6   : > { %v3304_v36 = vadd.f32 %v3303_v38, %v3190_v10 }
 0x7c8   : > { %v3343_v44 = vadd.f32 %v3304_v36, %v3085_v37 }
 0x7ca   : > { %3375 = vst [vmem:[#allocation4 + $0xa0] sm:$0xff] %v3343_v44 }
 0x7cb   : > { %v3306_v18 = vpop.f32.mrf.mxu2 }
 0x7cd   : > { %v3193_v48 = vpop.f32.mrf.mxu1 }
 0x7ce   : > { %v3307_v13 = vadd.f32 %v3306_v18, %v3193_v48 }
 0x7d0   : > { %v3344_v49 = vadd.f32 %v3307_v13, %v3086_v51 }
 0x7d2   : > { %3376 = vst [vmem:[#allocation4 + $0xf8] sm:$0xff] %v3344_v49 }
 0x7d3   : > { %v3309_v56 = vpop.f32.mrf.mxu2 }
 0x7d5   : > { %v3196_v33 = vpop.f32.mrf.mxu1 }
 0x7d6   : > { %v3310_v28 = vadd.f32 %v3309_v56, %v3196_v33 }
 0x7d8   : > { %v3345_v60 = vadd.f32 %v3310_v28, %v3087_v40 }
 0x7da   : > { %3377 = vst [vmem:[#allocation4 + $0x20] sm:$0xff] %v3345_v60 }
 0x7db   : > { %v3312_v63 = vpop.f32.mrf.mxu2 }
 0x7dd   : > { %v3199_v2 = vpop.f32.mrf.mxu1 }
 0x7de   : > { %v3313_v6 = vadd.f32 %v3312_v63, %v3199_v2  ;;  %3382 = sbr.rel (%p5179_p8) target bundleno = 2970 (0xb9a), region = 72 }
 0x7e0   : > { %v3346_v0 = vadd.f32 %v3313_v6, %v3088_v5 }
 0x7e2   : > { %3378 = vst [vmem:[#allocation4 + $0x98] sm:$0xff] %v3346_v0 }
 0x7e3   : > { %v3398_v25 = vld [vmem:[%s6410_s12 + $0x2f8] sm:$0xff]  ;;  %v3397_v21 = vld [vmem:[%s6410_s12 + $0x2f0] sm:$0xff]  ;;  %v3396_v19 = vld [vmem:[%s6410_s12 + $0x2e8] sm:$0xff] }
 0x7e4   : > { %v3414_v29 = vld [vmem:[%s6410_s12 + $0x378] sm:$0xff]  ;;  %3480 = vmatpush.msra.mxu0 %v3398_v25  ;;  %v3413_v22 = vld [vmem:[%s6410_s12 + $0x370] sm:$0xff]  ;;  %v3412_v14 = vld [vmem:[%s6410_s12 + $0x368] sm:$0xff] }
 0x7e5   : > { %3593 = vmatpush.msra.mxu1 %v3414_v29  ;;  %v3395_v11 = vld [vmem:[%s6410_s12 + $0x2e0] sm:$0xff]  ;;  %v3394_v41 = vld [vmem:[%s6410_s12 + $0x2d8] sm:$0xff]  ;;  %v3393_v43 = vld [vmem:[%s6410_s12 + $0x2d0] sm:$0xff] }
 0x7e6   : > { %3481 = vmatpush.msra.mxu0 %v3397_v21  ;;  %v3411_v7 = vld [vmem:[%s6410_s12 + $0x360] sm:$0xff]  ;;  %v3410_v39 = vld [vmem:[%s6410_s12 + $0x358] sm:$0xff]  ;;  %v3409_v57 = vld [vmem:[%s6410_s12 + $0x350] sm:$0xff] }
 0x7e7   : > { %3594 = vmatpush.msra.mxu1 %v3413_v22  ;;  %v3392_v55 = vld [vmem:[%s6410_s12 + $0x2c8] sm:$0xff]  ;;  %v3391_v4 = vld [vmem:[%s6410_s12 + $0x2c0] sm:$0xff]  ;;  %v3390_v27 = vld [vmem:[%s6410_s12 + $0x2b8] sm:$0xff] }
 0x7e8   : > { %3482 = vmatpush.msra.mxu0 %v3396_v19  ;;  %v3408_v8 = vld [vmem:[%s6410_s12 + $0x348] sm:$0xff]  ;;  %v3407_v58 = vld [vmem:[%s6410_s12 + $0x340] sm:$0xff]  ;;  %v3406_v26 = vld [vmem:[%s6410_s12 + $0x338] sm:$0xff] }
 0x7e9   : > { %3595 = vmatpush.msra.mxu1 %v3412_v14  ;;  %v3389_v31 = vld [vmem:[%s6410_s12 + $0x2b0] sm:$0xff]  ;;  %v3388_v20 = vld [vmem:[%s6410_s12 + $0x2a8] sm:$0xff]  ;;  %v3387_v45 = vld [vmem:[%s6410_s12 + $0x2a0] sm:$0xff] }
 0x7ea   : > { %3483 = vmatpush.msra.mxu0 %v3395_v11  ;;  %v3405_v23 = vld [vmem:[%s6410_s12 + $0x330] sm:$0xff]  ;;  %v3404_v50 = vld [vmem:[%s6410_s12 + $0x328] sm:$0xff]  ;;  %v3403_v15 = vld [vmem:[%s6410_s12 + $0x320] sm:$0xff] }
 0x7eb   : > { %3596 = vmatpush.msra.mxu1 %v3411_v7  ;;  %v3386_v12 = vld [vmem:[%s6410_s12 + $0x298] sm:$0xff]  ;;  %v3385_v54 = vld [vmem:[%s6410_s12 + $0x290] sm:$0xff]  ;;  %v3384_v35 = vld [vmem:[%s6410_s12 + $0x288] sm:$0xff] }
 0x7ec   : > { %3484 = vmatpush.msra.mxu0 %v3394_v41  ;;  %v3402_v42 = vld [vmem:[%s6410_s12 + $0x318] sm:$0xff]  ;;  %v3401_v46 = vld [vmem:[%s6410_s12 + $0x310] sm:$0xff]  ;;  %v3400_v3 = vld [vmem:[%s6410_s12 + $0x308] sm:$0xff] }
 0x7ed   : > { %3597 = vmatpush.msra.mxu1 %v3410_v39  ;;  %v3383_v61 = vld [vmem:[%s6410_s12 + $0x280] sm:$0xff]  ;;  %v3447_v32 = vld [vmem:[#allocation4 + $0xb0] sm:$0xff]  ;;  %v3448_v1 = vld [vmem:[#allocation4] sm:$0xff] }
 0x7ee   : > { %3485 = vmatpush.msra.mxu0 %v3393_v43  ;;  %v3399_v16 = vld [vmem:[%s6410_s12 + $0x300] sm:$0xff]  ;;  %v10131_v34 = vld [vmem:[#allocation91_spill] sm:$0xff]  ;;  %v3451_v17 = vld [vmem:[#allocation4 + $0x50] sm:$0xff] }
 0x7ef   : > { %3598 = vmatpush.msra.mxu1 %v3409_v57  ;;  %v10130_v62 = vld [vmem:[#allocation93_spill] sm:$0xff]  ;;  %v3449_v24 = vld [vmem:[#allocation4 + $0xd8] sm:$0xff]  ;;  %v3453_v10 = vld [vmem:[#allocation4 + $0x30] sm:$0xff] }
 0x7f0   : > { %3486 = vmatpush.msra.mxu0 %v3392_v55  ;;  %v10132_v9 = vld [vmem:[#allocation89_spill] sm:$0xff]  ;;  %v3450_v30 = vld [vmem:[#allocation4 + $0x18] sm:$0xff]  ;;  %v3455_v18 = vld [vmem:[#allocation4 + $0x80] sm:$0xff] }
 0x7f1   : > { %3599 = vmatpush.msra.mxu1 %v3408_v8  ;;  %v10133_v53 = vld [vmem:[#allocation87_spill] sm:$0xff]  ;;  %v10134_v47 = vld [vmem:[#allocation85_spill] sm:$0xff]  ;;  %v3430_v51 = vld [vmem:[%s6410_s12 + $0x3f8] sm:$0xff] }
 0x7f2   : > { %3487 = vmatpush.msra.mxu0 %v3391_v4  ;;  %v3452_v59 = vld [vmem:[#allocation4 + $0x68] sm:$0xff]  ;;  %v10135_v38 = vld [vmem:[#allocation83_spill] sm:$0xff]  ;;  %3739 = vmatpush.msra.mxu2 %v3430_v51  ;;  %v3428_v33 = vld [vmem:[%s6410_s12 + $0x3e8] sm:$0xff] }
 0x7f3   : > { %3600 = vmatpush.msra.mxu1 %v3407_v58  ;;  %v10136_v37 = vld [vmem:[#allocation81_spill] sm:$0xff]  ;;  %v10138_v48 = vld [vmem:[#allocation75_spill] sm:$0xff]  ;;  %v3426_v28 = vld [vmem:[%s6410_s12 + $0x3d8] sm:$0xff] }
 0x7f4   : > { %3488 = vmatpush.msra.mxu0 %v3390_v27  ;;  %v3454_v36 = vld [vmem:[#allocation4 + $0x48] sm:$0xff]  ;;  %v3429_v13 = vld [vmem:[%s6410_s12 + $0x3f0] sm:$0xff]  ;;  %v3424_v5 = vld [vmem:[%s6410_s12 + $0x3c8] sm:$0xff] }
 0x7f5   : > { %3601 = vmatpush.msra.mxu1 %v3406_v26  ;;  %v10137_v44 = vld [vmem:[#allocation77_spill] sm:$0xff]  ;;  %3740 = vmatpush.msra.mxu2 %v3429_v13  ;;  %v3425_v60 = vld [vmem:[%s6410_s12 + $0x3d0] sm:$0xff]  ;;  %v3422_v0 = vld [vmem:[%s6410_s12 + $0x3b8] sm:$0xff] }
 0x7f6   : > { %3489 = vmatpush.msra.mxu0 %v3389_v31  ;;  %v3456_v49 = vld [vmem:[#allocation4 + $0x88] sm:$0xff]  ;;  %v10140_v2 = vld [vmem:[#allocation71_spill] sm:$0xff]  ;;  %v3420_v22 = vld [vmem:[%s6410_s12 + $0x3a8] sm:$0xff] }
 0x7f7   : > { %3602 = vmatpush.msra.mxu1 %v3405_v23  ;;  %v10139_v56 = vld [vmem:[#allocation73_spill] sm:$0xff]  ;;  %3741 = vmatpush.msra.mxu2 %v3428_v33  ;;  %v3421_v25 = vld [vmem:[%s6410_s12 + $0x3b0] sm:$0xff]  ;;  %v3418_v14 = vld [vmem:[%s6410_s12 + $0x398] sm:$0xff] }
 0x7f8   : > { %3490 = vmatpush.msra.mxu0 %v3388_v20  ;;  %v3427_v40 = vld [vmem:[%s6410_s12 + $0x3e0] sm:$0xff]  ;;  %v3458_v21 = vld [vmem:[#allocation4 + $0xb8] sm:$0xff]  ;;  %v3459_v11 = vld [vmem:[#allocation4 + $0x60] sm:$0xff] }
 0x7f9   : > { %3603 = vmatpush.msra.mxu1 %v3404_v50  ;;  %3742 = vmatpush.msra.mxu2 %v3427_v40  ;;  %v3457_v63 = vld [vmem:[#allocation4 + $0xe8] sm:$0xff]  ;;  %v10141_v29 = vld [vmem:[#allocation67_spill] sm:$0xff]  ;;  %v3416_v39 = vld [vmem:[%s6410_s12 + $0x388] sm:$0xff] }
 0x7fa   : > { %3491 = vmatpush.msra.mxu0 %v3387_v45  ;;  %v3423_v6 = vld [vmem:[%s6410_s12 + $0x3c0] sm:$0xff]  ;;  %v3417_v7 = vld [vmem:[%s6410_s12 + $0x390] sm:$0xff]  ;;  %v3460_v57 = vld [vmem:[#allocation4 + $0xf0] sm:$0xff] }
 0x7fb   : > { %3604 = vmatpush.msra.mxu1 %v3403_v15  ;;  %3743 = vmatpush.msra.mxu2 %v3426_v28  ;;  %v3419_v19 = vld [vmem:[%s6410_s12 + $0x3a0] sm:$0xff]  ;;  %v10143_v55 = vld [vmem:[#allocation63_spill] sm:$0xff]  ;;  %v10150_v40 = vld [vmem:[#allocation88_spill] sm:$0xff] }
 0x7fc   : > { %3492 = vmatpush.msra.mxu0 %v3386_v12  ;;  %v10142_v41 = vld [vmem:[#allocation65_spill] sm:$0xff]  ;;  %v3462_v58 = vld [vmem:[#allocation4 + $0x78] sm:$0xff]  ;;  %v10147_v12 = vld [vmem:[#allocation94_spill] sm:$0xff] }
 0x7fd   : > { %3605 = vmatpush.msra.mxu1 %v3402_v42  ;;  %3744 = vmatpush.msra.mxu2 %v3425_v60  ;;  %v3415_v43 = vld [vmem:[%s6410_s12 + $0x380] sm:$0xff]  ;;  %v10145_v27 = vld [vmem:[#allocation59_spill] sm:$0xff] }
 0x7fe   : > { %3493 = vmatpush.msra.mxu0 %v3385_v54  ;;  %v3461_v8 = vld [vmem:[#allocation4 + $0x8] sm:$0xff]  ;;  %v10146_v26 = vld [vmem:[#allocation95_spill] sm:$0xff] }
 0x7ff   : > { %3606 = vmatpush.msra.mxu1 %v3401_v46  ;;  %3745 = vmatpush.msra.mxu2 %v3424_v5  ;;  %v10144_v4 = vld [vmem:[#allocation61_spill] sm:$0xff]  ;;  %v9089_v31 = vperm.slane %v10146_v26, 5  ;;  %v3463_v50 = vld [vmem:[#allocation4 + $0x38] sm:$0xff]  ;;  %v3467_v5 = vld [vmem:[#allocation4 + $0xe0] sm:$0xff] }
 0x800   : > { %3494 = vmatpush.msra.mxu0 %v3384_v35  ;;  %v3464_v35 = vld [vmem:[#allocation4 + $0x58] sm:$0xff]  ;;  %v3466_v13 = vld [vmem:[#allocation4 + $0xc8] sm:$0xff] }
 0x801   : > { %3607 = vmatpush.msra.mxu1 %v3400_v3  ;;  %3746 = vmatpush.msra.mxu2 %v3423_v6 }
 0x802   : > { %3495 = vmatpush.msra.mxu0 %v3383_v61 }
 0x803   : > { %3608 = vmatpush.msra.mxu1 %v3399_v16  ;;  %3496 = vmatmul.f32.vlgmr.msra.gmra.mxu0 %v3447_v32  ;;  %v10148_v16 = vld [vmem:[#allocation92_spill] sm:$0xff] }
 0x804   : > { %3609 = vmatmul.f32.vlgmr.msra.gmra.mxu1 %v10130_v62  ;;  %3747 = vmatpush.msra.mxu2 %v3422_v0 }
 0x806   : > { %3748 = vmatpush.msra.mxu2 %v3421_v25  ;;  %v10151_v25 = vld [vmem:[#allocation86_spill] sm:$0xff] }
 0x808   : > { %3749 = vmatpush.msra.mxu2 %v3420_v22 }
 0x80a   : > { %3750 = vmatpush.msra.mxu2 %v3419_v19 }
 0x80b   : > { %3499 = vmatmul.f32.gmra.mxu0 %v3448_v1 }
 0x80c   : > { %3612 = vmatmul.f32.gmra.mxu1 %v10131_v34  ;;  %3751 = vmatpush.msra.mxu2 %v3418_v14  ;;  %v3468_v14 = vld [vmem:[#allocation4 + $0x90] sm:$0xff] }
 0x80e   : > { %3752 = vmatpush.msra.mxu2 %v3417_v7 }
 0x810   : > { %3753 = vmatpush.msra.mxu2 %v3416_v39  ;;  %v10152_v39 = vld [vmem:[#allocation84_spill] sm:$0xff] }
 0x812   : > { %3754 = vmatpush.msra.mxu2 %v3415_v43 }
 0x813   : > { %3502 = vmatmul.f32.gmra.mxu0 %v3449_v24 }
 0x814   : > { %3615 = vmatmul.f32.gmra.mxu1 %v10132_v9 }
 0x81b   : > { %3505 = vmatmul.f32.gmra.mxu0 %v3450_v30  ;;  %v3465_v30 = vld [vmem:[#allocation4 + $0x40] sm:$0xff] }
 0x81c   : > { %3618 = vmatmul.f32.gmra.mxu1 %v10133_v53 }
 0x823   : > { %3508 = vmatmul.f32.gmra.mxu0 %v3451_v17 }
 0x824   : > { %3621 = vmatmul.f32.gmra.mxu1 %v10134_v47 }
 0x82b   : > { %3511 = vmatmul.f32.gmra.mxu0 %v3452_v59 }
 0x82c   : > { %3624 = vmatmul.f32.gmra.mxu1 %v10135_v38 }
 0x833   : > { %3514 = vmatmul.f32.gmra.mxu0 %v3453_v10  ;;  %v10149_v10 = vld [vmem:[#allocation90_spill] sm:$0xff] }
 0x834   : > { %3627 = vmatmul.f32.gmra.mxu1 %v10136_v37 }
 0x83b   : > { %3517 = vmatmul.f32.gmra.mxu0 %v3454_v36 }
 0x83c   : > { %3630 = vmatmul.f32.gmra.mxu1 %v10137_v44 }
 0x843   : > { %3520 = vmatmul.f32.gmra.mxu0 %v3455_v18 }
 0x844   : > { %3633 = vmatmul.f32.gmra.mxu1 %v10138_v48 }
 0x84b   : > { %3523 = vmatmul.f32.gmra.mxu0 %v3456_v49 }
 0x84c   : > { %3636 = vmatmul.f32.gmra.mxu1 %v10139_v56 }
 0x853   : > { %3526 = vmatmul.f32.gmra.mxu0 %v3457_v63 }
 0x854   : > { %3639 = vmatmul.f32.gmra.mxu1 %v10140_v2 }
 0x85b   : > { %3529 = vmatmul.f32.gmra.mxu0 %v3458_v21 }
 0x85c   : > { %3642 = vmatmul.f32.gmra.mxu1 %v10141_v29 }
 0x863   : > { %3532 = vmatmul.f32.gmra.mxu0 %v3459_v11 }
 0x864   : > { %3645 = vmatmul.f32.gmra.mxu1 %v10142_v41 }
 0x86b   : > { %3535 = vmatmul.f32.gmra.mxu0 %v3460_v57 }
 0x86c   : > { %3648 = vmatmul.f32.gmra.mxu1 %v10143_v55 }
 0x873   : > { %3538 = vmatmul.f32.gmra.mxu0 %v3461_v8 }
 0x874   : > { %3651 = vmatmul.f32.gmra.mxu1 %v10144_v4 }
 0x87b   : > { %3541 = vmatmul.f32.gmra.mxu0 %v3462_v58  ;;  %v3469_v58 = vld [vmem:[#allocation4 + $0x70] sm:$0xff] }
 0x87c   : > { %3654 = vmatmul.f32.gmra.mxu1 %v10145_v27 }
 0x880   : > { %v3497_v23 = vpop.f32.mrf.mxu0 }
 0x881   : > { %v3610_v20 = vpop.f32.mrf.mxu1  ;;  %v3498_v45 = vadd.f32 %v3497_v23, %v9089_v31 }
 0x883   : > { %v3611_v15 = vadd.f32 %v3610_v20, %v3498_v45  ;;  %3544 = vmatmul.f32.gmra.mxu0 %v3463_v50  ;;  %v10153_v50 = vld [vmem:[#allocation82_spill] sm:$0xff] }
 0x884   : > { %3657 = vmatmul.f32.gmra.mxu1 %v10147_v12 }
 0x885   : > { %v3706_v42 = vmax.f32 %v3611_v15, 0.0 }
 0x887   : > { %3755 = vmatmul.f32.vlgmr.msra.gmra.mxu2 %v3706_v42 }
 0x888   : > { %v3500_v54 = vpop.f32.mrf.mxu0 }
 0x889   : > { %v3613_v46 = vpop.f32.mrf.mxu1  ;;  %v3501_v3 = vadd.f32 %v3500_v54, %v9089_v31  ;;  %v3470_v54 = vld [vmem:[#allocation4 + $0xc0] sm:$0xff] }
 0x88b   : > { %v3614_v61 = vadd.f32 %v3613_v46, %v3501_v3  ;;  %3547 = vmatmul.f32.gmra.mxu0 %v3464_v35  ;;  %v10154_v3 = vld [vmem:[#allocation78_spill] sm:$0xff] }
 0x88c   : > { %3660 = vmatmul.f32.gmra.mxu1 %v10148_v16 }
 0x88d   : > { %v3707_v32 = vmax.f32 %v3614_v61, 0.0 }
 0x88f   : > { %3758 = vmatmul.f32.gmra.mxu2 %v3707_v32 }
 0x890   : > { %v3503_v1 = vpop.f32.mrf.mxu0 }
 0x891   : > { %v3616_v24 = vpop.f32.mrf.mxu1  ;;  %v3504_v17 = vadd.f32 %v3503_v1, %v9089_v31 }
 0x893   : > { %v3617_v59 = vadd.f32 %v3616_v24, %v3504_v17  ;;  %3550 = vmatmul.f32.gmra.mxu0 %v3465_v30  ;;  %v3471_v24 = vld [vmem:[#allocation4 + $0xa8] sm:$0xff] }
 0x894   : > { %3663 = vmatmul.f32.gmra.mxu1 %v10149_v10 }
 0x895   : > { %v3708_v36 = vmax.f32 %v3617_v59, 0.0  ;;  %v10155_v59 = vld [vmem:[#allocation76_spill] sm:$0xff] }
 0x897   : > { %3761 = vmatmul.f32.gmra.mxu2 %v3708_v36 }
 0x898   : > { %v3506_v18 = vpop.f32.mrf.mxu0 }
 0x899   : > { %v3619_v51 = vpop.f32.mrf.mxu1  ;;  %v3507_v49 = vadd.f32 %v3506_v18, %v9089_v31 }
 0x89b   : > { %v3620_v33 = vadd.f32 %v3619_v51, %v3507_v49  ;;  %3553 = vmatmul.f32.gmra.mxu0 %v3466_v13  ;;  %v3472_v13 = vld [vmem:[#allocation4 + $0xd0] sm:$0xff] }
 0x89c   : > { %3666 = vmatmul.f32.gmra.mxu1 %v10150_v40 }
 0x89d   : > { %v3709_v28 = vmax.f32 %v3620_v33, 0.0 }
 0x89f   : > { %3764 = vmatmul.f32.gmra.mxu2 %v3709_v28  ;;  %v10156_v28 = vld [vmem:[#allocation74_spill] sm:$0xff] }
 0x8a0   : > { %v3509_v60 = vpop.f32.mrf.mxu0 }
 0x8a1   : > { %v3622_v63 = vpop.f32.mrf.mxu1  ;;  %v3510_v6 = vadd.f32 %v3509_v60, %v9089_v31 }
 0x8a3   : > { %v3623_v0 = vadd.f32 %v3622_v63, %v3510_v6  ;;  %3556 = vmatmul.f32.gmra.mxu0 %v3467_v5  ;;  %v3446_v63 = vld [vmem:[%s6410_s12 + $0x478] sm:$0xff] }
 0x8a4   : > { %3669 = vmatmul.f32.gmra.mxu1 %v10151_v25  ;;  %3885 = vmatpush.msra.mxu3 %v3446_v63 }
 0x8a5   : > { %v3710_v21 = vmax.f32 %v3623_v0, 0.0  ;;  %v3473_v0 = vld [vmem:[#allocation4 + $0x10] sm:$0xff] }
 0x8a7   : > { %3767 = vmatmul.f32.gmra.mxu2 %v3710_v21 }
 0x8a8   : > { %v3512_v22 = vpop.f32.mrf.mxu0 }
 0x8a9   : > { %v3625_v19 = vpop.f32.mrf.mxu1  ;;  %v3513_v11 = vadd.f32 %v3512_v22, %v9089_v31  ;;  %v3445_v22 = vld [vmem:[%s6410_s12 + $0x470] sm:$0xff] }
 0x8aa   : > { %3886 = vmatpush.msra.mxu3 %v3445_v22  ;;  %v10160_v22 = vld [vmem:[#allocation64_spill] sm:$0xff] }
 0x8ab   : > { %v3626_v7 = vadd.f32 %v3625_v19, %v3513_v11  ;;  %3559 = vmatmul.f32.gmra.mxu0 %v3468_v14  ;;  %v10157_v14 = vld [vmem:[#allocation72_spill] sm:$0xff]  ;;  %v3444_v11 = vld [vmem:[%s6410_s12 + $0x468] sm:$0xff] }
 0x8ac   : > { %3672 = vmatmul.f32.gmra.mxu1 %v10152_v39  ;;  %3887 = vmatpush.msra.mxu3 %v3444_v11 }
 0x8ad   : > { %v3711_v43 = vmax.f32 %v3626_v7, 0.0 }
 0x8af   : > { %3770 = vmatmul.f32.gmra.mxu2 %v3711_v43  ;;  %v3443_v43 = vld [vmem:[%s6410_s12 + $0x460] sm:$0xff] }
 0x8b0   : > { %v3515_v57 = vpop.f32.mrf.mxu0  ;;  %3888 = vmatpush.msra.mxu3 %v3443_v43 }
 0x8b1   : > { %v3628_v8 = vpop.f32.mrf.mxu1  ;;  %v3516_v23 = vadd.f32 %v3515_v57, %v9089_v31  ;;  %v3442_v57 = vld [vmem:[%s6410_s12 + $0x458] sm:$0xff] }
 0x8b2   : > { %3889 = vmatpush.msra.mxu3 %v3442_v57 }
 0x8b3   : > { %v3629_v20 = vadd.f32 %v3628_v8, %v3516_v23  ;;  %3562 = vmatmul.f32.gmra.mxu0 %v3469_v58  ;;  %v3474_v23 = vld [vmem:[#allocation4 + $0x28] sm:$0xff] }
 0x8b4   : > { %3675 = vmatmul.f32.gmra.mxu1 %v10153_v50 }
 0x8b5   : > { %v3712_v45 = vmax.f32 %v3629_v20, 0.0 }
 0x8b7   : > { %3773 = vmatmul.f32.gmra.mxu2 %v3712_v45  ;;  %v3441_v45 = vld [vmem:[%s6410_s12 + $0x450] sm:$0xff] }
 0x8b8   : > { %v3518_v15 = vpop.f32.mrf.mxu0  ;;  %3890 = vmatpush.msra.mxu3 %v3441_v45 }
 0x8b9   : > { %v3631_v42 = vpop.f32.mrf.mxu1  ;;  %v3519_v46 = vadd.f32 %v3518_v15, %v9089_v31 }
 0x8bb   : > { %v3632_v35 = vadd.f32 %v3631_v42, %v3519_v46  ;;  %3565 = vmatmul.f32.gmra.mxu0 %v3470_v54  ;;  %v10158_v42 = vld [vmem:[#allocation68_spill] sm:$0xff]  ;;  %v3440_v54 = vld [vmem:[%s6410_s12 + $0x448] sm:$0xff] }
 0x8bc   : > { %3678 = vmatmul.f32.gmra.mxu1 %v10154_v3  ;;  %3891 = vmatpush.msra.mxu3 %v3440_v54 }
 0x8bd   : > { %v3713_v61 = vmax.f32 %v3632_v35, 0.0  ;;  %v3439_v35 = vld [vmem:[%s6410_s12 + $0x440] sm:$0xff] }
 0x8be   : > { %3892 = vmatpush.msra.mxu3 %v3439_v35 }
 0x8bf   : > { %3776 = vmatmul.f32.gmra.mxu2 %v3713_v61  ;;  %v3438_v61 = vld [vmem:[%s6410_s12 + $0x438] sm:$0xff] }
 0x8c0   : > { %v3521_v32 = vpop.f32.mrf.mxu0  ;;  %3893 = vmatpush.msra.mxu3 %v3438_v61 }
 0x8c1   : > { %v3634_v1 = vpop.f32.mrf.mxu1  ;;  %v3522_v30 = vadd.f32 %v3521_v32, %v9089_v31 }
 0x8c3   : > { %v3635_v17 = vadd.f32 %v3634_v1, %v3522_v30  ;;  %3568 = vmatmul.f32.gmra.mxu0 %v3471_v24  ;;  %v3475_v24 = vld [vmem:[#allocation4 + $0xa0] sm:$0xff] }
 0x8c4   : > { %3681 = vmatmul.f32.gmra.mxu1 %v10155_v59 }
 0x8c5   : > { %v3714_v36 = vmax.f32 %v3635_v17, 0.0  ;;  %v3437_v17 = vld [vmem:[%s6410_s12 + $0x430] sm:$0xff] }
 0x8c6   : > { %3894 = vmatpush.msra.mxu3 %v3437_v17 }
 0x8c7   : > { %3779 = vmatmul.f32.gmra.mxu2 %v3714_v36 }
 0x8c8   : > { %v3524_v18 = vpop.f32.mrf.mxu0 }
 0x8c9   : > { %v3637_v51 = vpop.f32.mrf.mxu1  ;;  %v3525_v49 = vadd.f32 %v3524_v18, %v9089_v31  ;;  %v10159_v18 = vld [vmem:[#allocation66_spill] sm:$0xff] }
 0x8cb   : > { %v3638_v33 = vadd.f32 %v3637_v51, %v3525_v49  ;;  %3571 = vmatmul.f32.gmra.mxu0 %v3472_v13  ;;  %v3436_v51 = vld [vmem:[%s6410_s12 + $0x428] sm:$0xff]  ;;  %v3435_v49 = vld [vmem:[%s6410_s12 + $0x420] sm:$0xff] }
 0x8cc   : > { %3684 = vmatmul.f32.gmra.mxu1 %v10156_v28  ;;  %3895 = vmatpush.msra.mxu3 %v3436_v51 }
 0x8cd   : > { %v3715_v60 = vmax.f32 %v3638_v33, 0.0  ;;  %v3434_v33 = vld [vmem:[%s6410_s12 + $0x418] sm:$0xff] }
 0x8ce   : > { %3896 = vmatpush.msra.mxu3 %v3435_v49 }
 0x8cf   : > { %3782 = vmatmul.f32.gmra.mxu2 %v3715_v60 }
 0x8d0   : > { %v3527_v5 = vpop.f32.mrf.mxu0  ;;  %3897 = vmatpush.msra.mxu3 %v3434_v33 }
 0x8d1   : > { %v3640_v6 = vpop.f32.mrf.mxu1  ;;  %v3528_v21 = vadd.f32 %v3527_v5, %v9089_v31  ;;  %v3476_v5 = vld [vmem:[#allocation4 + $0xf8] sm:$0xff] }
 0x8d3   : > { %v3641_v19 = vadd.f32 %v3640_v6, %v3528_v21  ;;  %3574 = vmatmul.f32.gmra.mxu0 %v3473_v0  ;;  %v3433_v0 = vld [vmem:[%s6410_s12 + $0x410] sm:$0xff] }
 0x8d4   : > { %3687 = vmatmul.f32.gmra.mxu1 %v10157_v14  ;;  %3898 = vmatpush.msra.mxu3 %v3433_v0 }
 0x8d5   : > { %v3716_v7 = vmax.f32 %v3641_v19, 0.0  ;;  %v3432_v19 = vld [vmem:[%s6410_s12 + $0x408] sm:$0xff] }
 0x8d6   : > { %3899 = vmatpush.msra.mxu3 %v3432_v19 }
 0x8d7   : > { %3785 = vmatmul.f32.gmra.mxu2 %v3716_v7  ;;  %v3431_v7 = vld [vmem:[%s6410_s12 + $0x400] sm:$0xff] }
 0x8d8   : > { %v3530_v8 = vpop.f32.mrf.mxu0  ;;  %3900 = vmatpush.msra.mxu3 %v3431_v7 }
 0x8d9   : > { %v3643_v58 = vpop.f32.mrf.mxu1  ;;  %v3531_v20 = vadd.f32 %v3530_v8, %v9089_v31  ;;  %v3477_v8 = vld [vmem:[#allocation4 + $0x20] sm:$0xff] }
 0x8db   : > { %v3644_v15 = vadd.f32 %v3643_v58, %v3531_v20  ;;  %3577 = vmatmul.f32.gmra.mxu0 %v3474_v23  ;;  %v10161_v20 = vld [vmem:[#allocation62_spill] sm:$0xff] }
 0x8dc   : > { %3690 = vmatmul.f32.gmra.mxu1 %v10158_v42 }
 0x8dd   : > { %v3717_v46 = vmax.f32 %v3644_v15, 0.0 }
 0x8df   : > { %3788 = vmatmul.f32.gmra.mxu2 %v3717_v46  ;;  %v3478_v46 = vld [vmem:[#allocation4 + $0x98] sm:$0xff] }
 0x8e0   : > { %v3533_v32 = vpop.f32.mrf.mxu0 }
 0x8e1   : > { %v3646_v1 = vpop.f32.mrf.mxu1  ;;  %v3534_v30 = vadd.f32 %v3533_v32, %v9089_v31  ;;  %v10162_v32 = vld [vmem:[#allocation60_spill] sm:$0xff] }
 0x8e3   : > { %v3647_v36 = vadd.f32 %v3646_v1, %v3534_v30  ;;  %3580 = vmatmul.f32.gmra.mxu0 %v3475_v24 }
 0x8e4   : > { %3693 = vmatmul.f32.gmra.mxu1 %v10159_v18 }
 0x8e5   : > { %v3718_v13 = vmax.f32 %v3647_v36, 0.0 }
 0x8e7   : > { %3791 = vmatmul.f32.gmra.mxu2 %v3718_v13  ;;  %v9141_v13 = vperm.slane %v10146_v26, 6 }
 0x8e8   : > { %v3536_v60 = vpop.f32.mrf.mxu0 }
 0x8e9   : > { %v3649_v63 = vpop.f32.mrf.mxu1  ;;  %v3537_v6 = vadd.f32 %v3536_v60, %v9089_v31 }
 0x8eb   : > { %v3650_v21 = vadd.f32 %v3649_v63, %v3537_v6  ;;  %3583 = vmatmul.f32.gmra.mxu0 %v3476_v5 }
 0x8ec   : > { %3696 = vmatmul.f32.gmra.mxu1 %v10160_v22 }
 0x8ed   : > { %v3719_v11 = vmax.f32 %v3650_v21, 0.0 }
 0x8ef   : > { %3794 = vmatmul.f32.gmra.mxu2 %v3719_v11 }
 0x8f0   : > { %v3539_v43 = vpop.f32.mrf.mxu0 }
 0x8f1   : > { %v3652_v57 = vpop.f32.mrf.mxu1  ;;  %v3540_v58 = vadd.f32 %v3539_v43, %v9089_v31 }
 0x8f3   : > { %v3653_v23 = vadd.f32 %v3652_v57, %v3540_v58  ;;  %3586 = vmatmul.f32.gmra.mxu0 %v3477_v8 }
 0x8f4   : > { %3699 = vmatmul.f32.gmra.mxu1 %v10161_v20 }
 0x8f5   : > { %v3720_v45 = vmax.f32 %v3653_v23, 0.0 }
 0x8f7   : > { %3797 = vmatmul.f32.gmra.mxu2 %v3720_v45 }
 0x8f8   : > { %v3542_v15 = vpop.f32.mrf.mxu0 }
 0x8f9   : > { %v3655_v54 = vpop.f32.mrf.mxu1  ;;  %v3543_v35 = vadd.f32 %v3542_v15, %v9089_v31 }
 0x8fb   : > { %v3656_v61 = vadd.f32 %v3655_v54, %v3543_v35  ;;  %3589 = vmatmul.f32.gmra.mxu0 %v3478_v46 }
 0x8fc   : > { %3702 = vmatmul.f32.gmra.mxu1 %v10162_v32 }
 0x8fd   : > { %v3721_v1 = vmax.f32 %v3656_v61, 0.0 }
 0x8ff   : > { %3800 = vmatmul.f32.gmra.mxu2 %v3721_v1 }
 0x900   : > { %v3545_v24 = vpop.f32.mrf.mxu0 }
 0x901   : > { %v3658_v30 = vpop.f32.mrf.mxu1  ;;  %v3546_v17 = vadd.f32 %v3545_v24, %v9089_v31 }
 0x903   : > { %v3659_v36 = vadd.f32 %v3658_v30, %v3546_v17 }
 0x905   : > { %v3722_v51 = vmax.f32 %v3659_v36, 0.0 }
 0x907   : > { %3803 = vmatmul.f32.gmra.mxu2 %v3722_v51 }
 0x908   : > { %v3548_v49 = vpop.f32.mrf.mxu0 }
 0x909   : > { %v3661_v33 = vpop.f32.mrf.mxu1  ;;  %v3549_v60 = vadd.f32 %v3548_v49, %v9089_v31 }
 0x90a   : > { %v3756_v63 = vpop.f32.mrf.mxu2 }
 0x90b   : > { %v3662_v5 = vadd.f32 %v3661_v33, %v3549_v60  ;;  %v3757_v6 = vadd.f32 %v3756_v63, %v9141_v13 }
 0x90d   : > { %v3723_v0 = vmax.f32 %v3662_v5, 0.0  ;;  %v3852_v21 = vmax.f32 %v3757_v6, 0.0 }
 0x90f   : > { %3806 = vmatmul.f32.gmra.mxu2 %v3723_v0  ;;  %3901 = vmatmul.f32.vlgmr.msra.gmra.mxu3 %v3852_v21 }
 0x910   : > { %v3551_v19 = vpop.f32.mrf.mxu0 }
 0x911   : > { %v3664_v11 = vpop.f32.mrf.mxu1  ;;  %v3552_v7 = vadd.f32 %v3551_v19, %v9089_v31 }
 0x912   : > { %v3759_v43 = vpop.f32.mrf.mxu2 }
 0x913   : > { %v3665_v57 = vadd.f32 %v3664_v11, %v3552_v7  ;;  %v3760_v8 = vadd.f32 %v3759_v43, %v9141_v13 }
 0x915   : > { %v3724_v58 = vmax.f32 %v3665_v57, 0.0  ;;  %v3853_v23 = vmax.f32 %v3760_v8, 0.0 }
 0x917   : > { %3809 = vmatmul.f32.gmra.mxu2 %v3724_v58  ;;  %3904 = vmatmul.f32.gmra.mxu3 %v3853_v23 }
 0x918   : > { %v3554_v45 = vpop.f32.mrf.mxu0 }
 0x919   : > { %v3667_v15 = vpop.f32.mrf.mxu1  ;;  %v3555_v54 = vadd.f32 %v3554_v45, %v9089_v31 }
 0x91a   : > { %v3762_v46 = vpop.f32.mrf.mxu2 }
 0x91b   : > { %v3668_v35 = vadd.f32 %v3667_v15, %v3555_v54  ;;  %v3763_v61 = vadd.f32 %v3762_v46, %v9141_v13 }
 0x91d   : > { %v3725_v1 = vmax.f32 %v3668_v35, 0.0  ;;  %v3854_v24 = vmax.f32 %v3763_v61, 0.0 }
 0x91f   : > { %3812 = vmatmul.f32.gmra.mxu2 %v3725_v1  ;;  %3907 = vmatmul.f32.gmra.mxu3 %v3854_v24 }
 0x920   : > { %v3557_v30 = vpop.f32.mrf.mxu0 }
 0x921   : > { %v3670_v17 = vpop.f32.mrf.mxu1  ;;  %v3558_v36 = vadd.f32 %v3557_v30, %v9089_v31 }
 0x922   : > { %v3765_v51 = vpop.f32.mrf.mxu2 }
 0x923   : > { %v3671_v49 = vadd.f32 %v3670_v17, %v3558_v36  ;;  %v3766_v33 = vadd.f32 %v3765_v51, %v9141_v13 }
 0x925   : > { %v3726_v60 = vmax.f32 %v3671_v49, 0.0  ;;  %v3855_v63 = vmax.f32 %v3766_v33, 0.0 }
 0x927   : > { %3815 = vmatmul.f32.gmra.mxu2 %v3726_v60  ;;  %3910 = vmatmul.f32.gmra.mxu3 %v3855_v63 }
 0x928   : > { %v3560_v5 = vpop.f32.mrf.mxu0 }
 0x929   : > { %v3673_v6 = vpop.f32.mrf.mxu1  ;;  %v3561_v0 = vadd.f32 %v3560_v5, %v9089_v31 }
 0x92a   : > { %v3768_v21 = vpop.f32.mrf.mxu2 }
 0x92b   : > { %v3674_v19 = vadd.f32 %v3673_v6, %v3561_v0  ;;  %v3769_v11 = vadd.f32 %v3768_v21, %v9141_v13 }
 0x92d   : > { %v3727_v7 = vmax.f32 %v3674_v19, 0.0  ;;  %v3856_v43 = vmax.f32 %v3769_v11, 0.0 }
 0x92f   : > { %3818 = vmatmul.f32.gmra.mxu2 %v3727_v7  ;;  %3913 = vmatmul.f32.gmra.mxu3 %v3856_v43 }
 0x930   : > { %v3563_v57 = vpop.f32.mrf.mxu0 }
 0x931   : > { %v3676_v8 = vpop.f32.mrf.mxu1  ;;  %v3564_v58 = vadd.f32 %v3563_v57, %v9089_v31 }
 0x932   : > { %v3771_v23 = vpop.f32.mrf.mxu2 }
 0x933   : > { %v3677_v45 = vadd.f32 %v3676_v8, %v3564_v58  ;;  %v3772_v15 = vadd.f32 %v3771_v23, %v9141_v13 }
 0x935   : > { %v3728_v54 = vmax.f32 %v3677_v45, 0.0  ;;  %v3857_v46 = vmax.f32 %v3772_v15, 0.0 }
 0x937   : > { %3821 = vmatmul.f32.gmra.mxu2 %v3728_v54  ;;  %3916 = vmatmul.f32.gmra.mxu3 %v3857_v46 }
 0x938   : > { %v3566_v35 = vpop.f32.mrf.mxu0 }
 0x939   : > { %v3679_v61 = vpop.f32.mrf.mxu1  ;;  %v3567_v1 = vadd.f32 %v3566_v35, %v9089_v31 }
 0x93a   : > { %v3774_v24 = vpop.f32.mrf.mxu2 }
 0x93b   : > { %v3680_v30 = vadd.f32 %v3679_v61, %v3567_v1  ;;  %v3775_v17 = vadd.f32 %v3774_v24, %v9141_v13 }
 0x93d   : > { %v3729_v36 = vmax.f32 %v3680_v30, 0.0  ;;  %v3858_v51 = vmax.f32 %v3775_v17, 0.0 }
 0x93f   : > { %3824 = vmatmul.f32.gmra.mxu2 %v3729_v36  ;;  %3919 = vmatmul.f32.gmra.mxu3 %v3858_v51 }
 0x940   : > { %v3569_v49 = vpop.f32.mrf.mxu0 }
 0x941   : > { %v3682_v33 = vpop.f32.mrf.mxu1  ;;  %v3570_v60 = vadd.f32 %v3569_v49, %v9089_v31 }
 0x942   : > { %v3777_v63 = vpop.f32.mrf.mxu2 }
 0x943   : > { %v3683_v5 = vadd.f32 %v3682_v33, %v3570_v60  ;;  %v3778_v6 = vadd.f32 %v3777_v63, %v9141_v13 }
 0x945   : > { %v3730_v0 = vmax.f32 %v3683_v5, 0.0  ;;  %v3859_v21 = vmax.f32 %v3778_v6, 0.0 }
 0x947   : > { %3827 = vmatmul.f32.gmra.mxu2 %v3730_v0  ;;  %3922 = vmatmul.f32.gmra.mxu3 %v3859_v21 }
 0x948   : > { %v3572_v19 = vpop.f32.mrf.mxu0 }
 0x949   : > { %v3685_v11 = vpop.f32.mrf.mxu1  ;;  %v3573_v7 = vadd.f32 %v3572_v19, %v9089_v31 }
 0x94a   : > { %v3780_v43 = vpop.f32.mrf.mxu2 }
 0x94b   : > { %v3686_v57 = vadd.f32 %v3685_v11, %v3573_v7  ;;  %v3781_v8 = vadd.f32 %v3780_v43, %v9141_v13 }
 0x94d   : > { %v3731_v58 = vmax.f32 %v3686_v57, 0.0  ;;  %v3860_v23 = vmax.f32 %v3781_v8, 0.0 }
 0x94f   : > { %3830 = vmatmul.f32.gmra.mxu2 %v3731_v58  ;;  %3925 = vmatmul.f32.gmra.mxu3 %v3860_v23 }
 0x950   : > { %v3575_v45 = vpop.f32.mrf.mxu0 }
 0x951   : > { %v3688_v15 = vpop.f32.mrf.mxu1  ;;  %v3576_v54 = vadd.f32 %v3575_v45, %v9089_v31 }
 0x952   : > { %v3783_v46 = vpop.f32.mrf.mxu2 }
 0x953   : > { %v3689_v35 = vadd.f32 %v3688_v15, %v3576_v54  ;;  %v3784_v61 = vadd.f32 %v3783_v46, %v9141_v13 }
 0x955   : > { %v3732_v1 = vmax.f32 %v3689_v35, 0.0  ;;  %v3861_v24 = vmax.f32 %v3784_v61, 0.0 }
 0x957   : > { %3833 = vmatmul.f32.gmra.mxu2 %v3732_v1  ;;  %3928 = vmatmul.f32.gmra.mxu3 %v3861_v24 }
 0x958   : > { %v3578_v30 = vpop.f32.mrf.mxu0 }
 0x959   : > { %v3691_v17 = vpop.f32.mrf.mxu1  ;;  %v3579_v36 = vadd.f32 %v3578_v30, %v9089_v31 }
 0x95a   : > { %v3786_v51 = vpop.f32.mrf.mxu2 }
 0x95b   : > { %v3692_v49 = vadd.f32 %v3691_v17, %v3579_v36  ;;  %v3787_v33 = vadd.f32 %v3786_v51, %v9141_v13 }
 0x95d   : > { %v3733_v60 = vmax.f32 %v3692_v49, 0.0  ;;  %v3862_v63 = vmax.f32 %v3787_v33, 0.0 }
 0x95f   : > { %3836 = vmatmul.f32.gmra.mxu2 %v3733_v60  ;;  %3931 = vmatmul.f32.gmra.mxu3 %v3862_v63 }
 0x960   : > { %v3581_v5 = vpop.f32.mrf.mxu0 }
 0x961   : > { %v3694_v6 = vpop.f32.mrf.mxu1  ;;  %v3582_v0 = vadd.f32 %v3581_v5, %v9089_v31 }
 0x962   : > { %v3789_v21 = vpop.f32.mrf.mxu2 }
 0x963   : > { %v3695_v19 = vadd.f32 %v3694_v6, %v3582_v0  ;;  %v3790_v11 = vadd.f32 %v3789_v21, %v9141_v13 }
 0x965   : > { %v3734_v7 = vmax.f32 %v3695_v19, 0.0  ;;  %v3863_v43 = vmax.f32 %v3790_v11, 0.0 }
 0x967   : > { %3839 = vmatmul.f32.gmra.mxu2 %v3734_v7  ;;  %3934 = vmatmul.f32.gmra.mxu3 %v3863_v43 }
 0x968   : > { %v3584_v57 = vpop.f32.mrf.mxu0 }
 0x969   : > { %v3697_v8 = vpop.f32.mrf.mxu1  ;;  %v3585_v58 = vadd.f32 %v3584_v57, %v9089_v31 }
 0x96a   : > { %v3792_v23 = vpop.f32.mrf.mxu2 }
 0x96b   : > { %v3698_v45 = vadd.f32 %v3697_v8, %v3585_v58  ;;  %v3793_v15 = vadd.f32 %v3792_v23, %v9141_v13 }
 0x96d   : > { %v3735_v54 = vmax.f32 %v3698_v45, 0.0  ;;  %v3864_v46 = vmax.f32 %v3793_v15, 0.0 }
 0x96f   : > { %3842 = vmatmul.f32.gmra.mxu2 %v3735_v54  ;;  %3937 = vmatmul.f32.gmra.mxu3 %v3864_v46 }
 0x970   : > { %v3587_v35 = vpop.f32.mrf.mxu0 }
 0x971   : > { %v3700_v61 = vpop.f32.mrf.mxu1  ;;  %v3588_v1 = vadd.f32 %v3587_v35, %v9089_v31 }
 0x972   : > { %v3795_v24 = vpop.f32.mrf.mxu2 }
 0x973   : > { %v3701_v30 = vadd.f32 %v3700_v61, %v3588_v1  ;;  %v3796_v17 = vadd.f32 %v3795_v24, %v9141_v13 }
 0x975   : > { %v3736_v36 = vmax.f32 %v3701_v30, 0.0  ;;  %v3865_v51 = vmax.f32 %v3796_v17, 0.0 }
 0x977   : > { %3845 = vmatmul.f32.gmra.mxu2 %v3736_v36  ;;  %3940 = vmatmul.f32.gmra.mxu3 %v3865_v51 }
 0x978   : > { %v3590_v49 = vpop.f32.mrf.mxu0 }
 0x979   : > { %v3703_v33 = vpop.f32.mrf.mxu1  ;;  %v3591_v60 = vadd.f32 %v3590_v49, %v9089_v31  ;;  %v9176_v31 = vperm.slane %v10146_v26, 7 }
 0x97a   : > { %v3798_v63 = vpop.f32.mrf.mxu2 }
 0x97b   : > { %v3704_v5 = vadd.f32 %v3703_v33, %v3591_v60  ;;  %v3799_v6 = vadd.f32 %v3798_v63, %v9141_v13 }
 0x97d   : > { %v3737_v0 = vmax.f32 %v3704_v5, 0.0  ;;  %v3866_v21 = vmax.f32 %v3799_v6, 0.0 }
 0x97f   : > { %3848 = vmatmul.f32.gmra.mxu2 %v3737_v0  ;;  %3943 = vmatmul.f32.gmra.mxu3 %v3866_v21 }
 0x982   : > { %v3801_v19 = vpop.f32.mrf.mxu2 }
 0x983   : > { %v3802_v11 = vadd.f32 %v3801_v19, %v9141_v13 }
 0x985   : > { %v3867_v7 = vmax.f32 %v3802_v11, 0.0 }
 0x987   : > { %3946 = vmatmul.f32.gmra.mxu3 %v3867_v7 }
 0x98a   : > { %v3804_v43 = vpop.f32.mrf.mxu2 }
 0x98b   : > { %v3805_v57 = vadd.f32 %v3804_v43, %v9141_v13 }
 0x98d   : > { %v3868_v8 = vmax.f32 %v3805_v57, 0.0 }
 0x98f   : > { %3949 = vmatmul.f32.gmra.mxu3 %v3868_v8 }
 0x992   : > { %v3807_v58 = vpop.f32.mrf.mxu2  ;;  %v3902_v23 = vpop.f32.mrf.mxu3 }
 0x993   : > { %v3808_v45 = vadd.f32 %v3807_v58, %v9141_v13  ;;  %v9180_v15 = vadd.f32 %v3902_v23, %v9176_v31 }
 0x995   : > { %v3869_v54 = vmax.f32 %v3808_v45, 0.0  ;;  %3998 = vadd.xlane.f32.xlu0 %v9180_v15 }
 0x997   : > { %3952 = vmatmul.f32.gmra.mxu3 %v3869_v54 }
 0x99a   : > { %v3810_v46 = vpop.f32.mrf.mxu2  ;;  %v3905_v35 = vpop.f32.mrf.mxu3 }
 0x99b   : > { %v3811_v61 = vadd.f32 %v3810_v46, %v9141_v13  ;;  %v9185_v1 = vadd.f32 %v3905_v35, %v9176_v31 }
 0x99d   : > { %v3870_v26 = vmax.f32 %v3811_v61, 0.0  ;;  %4000 = vadd.xlane.f32.xlu0 %v9185_v1 }
 0x99f   : > { %3955 = vmatmul.f32.gmra.mxu3 %v3870_v26 }
 0x9a2   : > { %v3813_v24 = vpop.f32.mrf.mxu2  ;;  %v3908_v30 = vpop.f32.mrf.mxu3 }
 0x9a3   : > { %v3814_v17 = vadd.f32 %v3813_v24, %v9141_v13  ;;  %v9190_v36 = vadd.f32 %v3908_v30, %v9176_v31 }
 0x9a5   : > { %v3871_v51 = vmax.f32 %v3814_v17, 0.0  ;;  %4002 = vadd.xlane.f32.xlu1 %v9190_v36 }
 0x9a7   : > { %3958 = vmatmul.f32.gmra.mxu3 %v3871_v51 }
 0x9aa   : > { %v3816_v49 = vpop.f32.mrf.mxu2  ;;  %v3911_v33 = vpop.f32.mrf.mxu3 }
 0x9ab   : > { %v3817_v60 = vadd.f32 %v3816_v49, %v9141_v13  ;;  %v9195_v63 = vadd.f32 %v3911_v33, %v9176_v31 }
 0x9ad   : > { %v3872_v5 = vmax.f32 %v3817_v60, 0.0  ;;  %4004 = vadd.xlane.f32.xlu1 %v9195_v63 }
 0x9af   : > { %3961 = vmatmul.f32.gmra.mxu3 %v3872_v5 }
 0x9b2   : > { %v3819_v6 = vpop.f32.mrf.mxu2  ;;  %v3914_v0 = vpop.f32.mrf.mxu3 }
 0x9b3   : > { %v3820_v21 = vadd.f32 %v3819_v6, %v9141_v13  ;;  %v9200_v19 = vadd.f32 %v3914_v0, %v9176_v31 }
 0x9b5   : > { %v3873_v11 = vmax.f32 %v3820_v21, 0.0  ;;  %4006 = vadd.xlane.f32.xlu2 %v9200_v19 }
 0x9b7   : > { %3964 = vmatmul.f32.gmra.mxu3 %v3873_v11 }
 0x9ba   : > { %v3822_v7 = vpop.f32.mrf.mxu2  ;;  %v3917_v43 = vpop.f32.mrf.mxu3 }
 0x9bb   : > { %v3823_v57 = vadd.f32 %v3822_v7, %v9141_v13  ;;  %v9205_v8 = vadd.f32 %v3917_v43, %v9176_v31 }
 0x9bd   : > { %v3874_v58 = vmax.f32 %v3823_v57, 0.0  ;;  %4008 = vadd.xlane.f32.xlu2 %v9205_v8 }
 0x9bf   : > { %3967 = vmatmul.f32.gmra.mxu3 %v3874_v58 }
 0x9c2   : > { %v3825_v23 = vpop.f32.mrf.mxu2  ;;  %v3920_v45 = vpop.f32.mrf.mxu3 }
 0x9c3   : > { %v3826_v54 = vadd.f32 %v3825_v23, %v9141_v13  ;;  %v9210_v46 = vadd.f32 %v3920_v45, %v9176_v31 }
 0x9c5   : > { %v3875_v35 = vmax.f32 %v3826_v54, 0.0  ;;  %4010 = vadd.xlane.f32.xlu0 %v9210_v46 }
 0x9c7   : > { %3970 = vmatmul.f32.gmra.mxu3 %v3875_v35 }
 0x9ca   : > { %v3828_v61 = vpop.f32.mrf.mxu2  ;;  %v3923_v26 = vpop.f32.mrf.mxu3 }
 0x9cb   : > { %v3829_v24 = vadd.f32 %v3828_v61, %v9141_v13  ;;  %v9215_v30 = vadd.f32 %v3923_v26, %v9176_v31 }
 0x9cd   : > { %v3876_v17 = vmax.f32 %v3829_v24, 0.0  ;;  %4012 = vadd.xlane.f32.xlu1 %v9215_v30 }
 0x9cf   : > { %3973 = vmatmul.f32.gmra.mxu3 %v3876_v17 }
 0x9d2   : > { %v3831_v51 = vpop.f32.mrf.mxu2  ;;  %v3926_v49 = vpop.f32.mrf.mxu3 }
 0x9d3   : > { %v3832_v33 = vadd.f32 %v3831_v51, %v9141_v13  ;;  %v9220_v60 = vadd.f32 %v3926_v49, %v9176_v31 }
 0x9d5   : > { %v3877_v5 = vmax.f32 %v3832_v33, 0.0  ;;  %4014 = vadd.xlane.f32.xlu2 %v9220_v60 }
 0x9d7   : > { %3976 = vmatmul.f32.gmra.mxu3 %v3877_v5 }
 0x9da   : > { %v3834_v6 = vpop.f32.mrf.mxu2  ;;  %v3929_v0 = vpop.f32.mrf.mxu3 }
 0x9db   : > { %v3835_v21 = vadd.f32 %v3834_v6, %v9141_v13  ;;  %v9225_v11 = vadd.f32 %v3929_v0, %v9176_v31 }
 0x9dd   : > { %v3878_v7 = vmax.f32 %v3835_v21, 0.0  ;;  %4016 = vadd.xlane.f32.xlu0 %v9225_v11 }
 0x9df   : > { %3979 = vmatmul.f32.gmra.mxu3 %v3878_v7 }
 0x9e2   : > { %v3837_v43 = vpop.f32.mrf.mxu2  ;;  %v3932_v57 = vpop.f32.mrf.mxu3 }
 0x9e3   : > { %v3838_v58 = vadd.f32 %v3837_v43, %v9141_v13  ;;  %v9230_v23 = vadd.f32 %v3932_v57, %v9176_v31 }
 0x9e5   : > { %v3879_v45 = vmax.f32 %v3838_v58, 0.0  ;;  %4018 = vadd.xlane.f32.xlu1 %v9230_v23 }
 0x9e7   : > { %3982 = vmatmul.f32.gmra.mxu3 %v3879_v45 }
 0x9ea   : > { %v3840_v54 = vpop.f32.mrf.mxu2  ;;  %v3935_v35 = vpop.f32.mrf.mxu3 }
 0x9eb   : > { %v3841_v61 = vadd.f32 %v3840_v54, %v9141_v13  ;;  %v9235_v26 = vadd.f32 %v3935_v35, %v9176_v31 }
 0x9ed   : > { %v3880_v24 = vmax.f32 %v3841_v61, 0.0  ;;  %4020 = vadd.xlane.f32.xlu2 %v9235_v26 }
 0x9ef   : > { %3985 = vmatmul.f32.gmra.mxu3 %v3880_v24 }
 0x9f2   : > { %v3843_v17 = vpop.f32.mrf.mxu2  ;;  %v3938_v51 = vpop.f32.mrf.mxu3 }
 0x9f3   : > { %v3844_v49 = vadd.f32 %v3843_v17, %v9141_v13  ;;  %v9240_v33 = vadd.f32 %v3938_v51, %v9176_v31 }
 0x9f5   : > { %v3881_v5 = vmax.f32 %v3844_v49, 0.0  ;;  %4022 = vadd.xlane.f32.xlu0 %v9240_v33 }
 0x9f7   : > { %3988 = vmatmul.f32.gmra.mxu3 %v3881_v5 }
 0x9fa   : > { %v3846_v6 = vpop.f32.mrf.mxu2  ;;  %v3941_v0 = vpop.f32.mrf.mxu3 }
 0x9fb   : > { %v3847_v21 = vadd.f32 %v3846_v6, %v9141_v13  ;;  %v9245_v7 = vadd.f32 %v3941_v0, %v9176_v31 }
 0x9fd   : > { %v3882_v43 = vmax.f32 %v3847_v21, 0.0  ;;  %4024 = vadd.xlane.f32.xlu1 %v9245_v7 }
 0x9ff   : > { %3991 = vmatmul.f32.gmra.mxu3 %v3882_v43 }
 0xa02   : > { %v3849_v57 = vpop.f32.mrf.mxu2  ;;  %v3944_v58 = vpop.f32.mrf.mxu3 }
 0xa03   : > { %v3850_v45 = vadd.f32 %v3849_v57, %v9141_v13  ;;  %v9250_v54 = vadd.f32 %v3944_v58, %v9176_v31 }
 0xa05   : > { %v3883_v35 = vmax.f32 %v3850_v45, 0.0  ;;  %4026 = vadd.xlane.f32.xlu2 %v9250_v54 }
 0xa07   : > { %3994 = vmatmul.f32.gmra.mxu3 %v3883_v35 }
 0xa08   : > { %v3999_v61 = vpop.xlane.xlu0 %3998 }
 0xa09   : > { %v4062_v24 = vmul.f32 %v3999_v61, %v8051_v52 }
 0xa0a   : > { %v3947_v17 = vpop.f32.mrf.mxu3 }
 0xa0b   : > { %v9255_v51 = vsub.f32 %v9180_v15, %v4062_v24  ;;  %v9258_v49 = vadd.f32 %v3947_v17, %v9176_v31 }
 0xa0d   : > { %4028 = vadd.xlane.f32.xlu0 %v9258_v49  ;;  %v4126_v13 = vmul.f32 %v9255_v51, %v9255_v51 }
 0xa0f   : > { %4158 = vadd.xlane.f32.xlu2 %v4126_v13 }
 0xa10   : > { %v4001_v5 = vpop.xlane.xlu0 %4000 }
 0xa11   : > { %v4063_v6 = vmul.f32 %v4001_v5, %v8051_v52 }
 0xa12   : > { %v3950_v0 = vpop.f32.mrf.mxu3 }
 0xa13   : > { %v9265_v21 = vsub.f32 %v9185_v1, %v4063_v6  ;;  %v9268_v43 = vadd.f32 %v3950_v0, %v9176_v31 }
 0xa15   : > { %4030 = vadd.xlane.f32.xlu1 %v9268_v43  ;;  %v4127_v15 = vmul.f32 %v9265_v21, %v9265_v21 }
 0xa17   : > { %4160 = vadd.xlane.f32.xlu0 %v4127_v15 }
 0xa18   : > { %v4003_v57 = vpop.xlane.xlu1 %4002 }
 0xa19   : > { %v4064_v58 = vmul.f32 %v4003_v57, %v8051_v52 }
 0xa1a   : > { %v3953_v45 = vpop.f32.mrf.mxu3 }
 0xa1b   : > { %v9275_v35 = vsub.f32 %v9190_v36, %v4064_v58  ;;  %v9278_v61 = vadd.f32 %v3953_v45, %v9176_v31 }
 0xa1d   : > { %4032 = vadd.xlane.f32.xlu2 %v9278_v61  ;;  %v4128_v1 = vmul.f32 %v9275_v35, %v9275_v35 }
 0xa1f   : > { %4162 = vadd.xlane.f32.xlu1 %v4128_v1 }
 0xa20   : > { %v4005_v24 = vpop.xlane.xlu1 %4004 }
 0xa21   : > { %v4065_v17 = vmul.f32 %v4005_v24, %v8051_v52 }
 0xa22   : > { %v3956_v13 = vpop.f32.mrf.mxu3 }
 0xa23   : > { %v9285_v5 = vsub.f32 %v9195_v63, %v4065_v17  ;;  %v9288_v6 = vadd.f32 %v3956_v13, %v9176_v31 }
 0xa25   : > { %4034 = vadd.xlane.f32.xlu0 %v9288_v6  ;;  %v4129_v36 = vmul.f32 %v9285_v5, %v9285_v5 }
 0xa27   : > { %4164 = vadd.xlane.f32.xlu2 %v4129_v36 }
 0xa28   : > { %v4007_v0 = vpop.xlane.xlu2 %4006 }
 0xa29   : > { %v4066_v15 = vmul.f32 %v4007_v0, %v8051_v52 }
 0xa2a   : > { %v3959_v57 = vpop.f32.mrf.mxu3 }
 0xa2b   : > { %v9295_v58 = vsub.f32 %v9200_v19, %v4066_v15  ;;  %v9298_v45 = vadd.f32 %v3959_v57, %v9176_v31 }
 0xa2d   : > { %4036 = vadd.xlane.f32.xlu1 %v9298_v45  ;;  %v4130_v63 = vmul.f32 %v9295_v58, %v9295_v58 }
 0xa2f   : > { %4166 = vadd.xlane.f32.xlu0 %v4130_v63 }
 0xa30   : > { %v4009_v1 = vpop.xlane.xlu2 %4008 }
 0xa31   : > { %v4067_v24 = vmul.f32 %v4009_v1, %v8051_v52 }
 0xa32   : > { %v3962_v17 = vpop.f32.mrf.mxu3 }
 0xa33   : > { %v9305_v13 = vsub.f32 %v9205_v8, %v4067_v24  ;;  %v9308_v36 = vadd.f32 %v3962_v17, %v9176_v31 }
 0xa35   : > { %4038 = vadd.xlane.f32.xlu2 %v9308_v36  ;;  %v4131_v19 = vmul.f32 %v9305_v13, %v9305_v13 }
 0xa37   : > { %4168 = vadd.xlane.f32.xlu1 %v4131_v19 }
 0xa38   : > { %v4011_v0 = vpop.xlane.xlu0 %4010 }
 0xa39   : > { %v4068_v15 = vmul.f32 %v4011_v0, %v8051_v52 }
 0xa3a   : > { %v3965_v57 = vpop.f32.mrf.mxu3 }
 0xa3b   : > { %v9315_v63 = vsub.f32 %v9210_v46, %v4068_v15  ;;  %v9318_v1 = vadd.f32 %v3965_v57, %v9176_v31 }
 0xa3d   : > { %4040 = vadd.xlane.f32.xlu0 %v9318_v1  ;;  %v4132_v8 = vmul.f32 %v9315_v63, %v9315_v63 }
 0xa3f   : > { %4170 = vadd.xlane.f32.xlu2 %v4132_v8 }
 0xa40   : > { %v4013_v24 = vpop.xlane.xlu1 %4012 }
 0xa41   : > { %v4069_v17 = vmul.f32 %v4013_v24, %v8051_v52 }
 0xa42   : > { %v3968_v19 = vpop.f32.mrf.mxu3 }
 0xa43   : > { %v9325_v32 = vsub.f32 %v9215_v30, %v4069_v17  ;;  %v9328_v0 = vadd.f32 %v3968_v19, %v9176_v31 }
 0xa45   : > { %4042 = vadd.xlane.f32.xlu1 %v9328_v0  ;;  %v4133_v46 = vmul.f32 %v9325_v32, %v9325_v32 }
 0xa47   : > { %4172 = vadd.xlane.f32.xlu0 %v4133_v46 }
 0xa48   : > { %v4015_v15 = vpop.xlane.xlu2 %4014 }
 0xa49   : > { %v4070_v57 = vmul.f32 %v4015_v15, %v8051_v52 }
 0xa4a   : > { %v3971_v8 = vpop.f32.mrf.mxu3 }
 0xa4b   : > { %v9335_v20 = vsub.f32 %v9220_v60, %v4070_v57  ;;  %v9338_v24 = vadd.f32 %v3971_v8, %v9176_v31 }
 0xa4d   : > { %4044 = vadd.xlane.f32.xlu2 %v9338_v24  ;;  %v4134_v30 = vmul.f32 %v9335_v20, %v9335_v20 }
 0xa4f   : > { %4174 = vadd.xlane.f32.xlu1 %v4134_v30 }
 0xa50   : > { %v4017_v17 = vpop.xlane.xlu0 %4016 }
 0xa51   : > { %v4071_v19 = vmul.f32 %v4017_v17, %v8051_v52 }
 0xa52   : > { %v3974_v46 = vpop.f32.mrf.mxu3 }
 0xa53   : > { %v9345_v22 = vsub.f32 %v9225_v11, %v4071_v19  ;;  %v9348_v15 = vadd.f32 %v3974_v46, %v9176_v31 }
 0xa55   : > { %4046 = vadd.xlane.f32.xlu0 %v9348_v15  ;;  %v4135_v60 = vmul.f32 %v9345_v22, %v9345_v22 }
 0xa57   : > { %4176 = vadd.xlane.f32.xlu2 %v4135_v60 }
 0xa58   : > { %v4019_v57 = vpop.xlane.xlu1 %4018 }
 0xa59   : > { %v4072_v8 = vmul.f32 %v4019_v57, %v8051_v52 }
 0xa5a   : > { %v3977_v30 = vpop.f32.mrf.mxu3 }
 0xa5b   : > { %v9355_v18 = vsub.f32 %v9230_v23, %v4072_v8  ;;  %v9358_v17 = vadd.f32 %v3977_v30, %v9176_v31 }
 0xa5d   : > { %4048 = vadd.xlane.f32.xlu1 %v9358_v17  ;;  %v4136_v11 = vmul.f32 %v9355_v18, %v9355_v18 }
 0xa5f   : > { %4178 = vadd.xlane.f32.xlu0 %v4136_v11 }
 0xa60   : > { %v4021_v19 = vpop.xlane.xlu2 %4020 }
 0xa61   : > { %v4073_v46 = vmul.f32 %v4021_v19, %v8051_v52 }
 0xa62   : > { %v3980_v60 = vpop.f32.mrf.mxu3 }
 0xa63   : > { %v9365_v42 = vsub.f32 %v9235_v26, %v4073_v46  ;;  %v9368_v57 = vadd.f32 %v3980_v60, %v9176_v31 }
 0xa65   : > { %4050 = vadd.xlane.f32.xlu2 %v9368_v57  ;;  %v4137_v23 = vmul.f32 %v9365_v42, %v9365_v42 }
 0xa67   : > { %4180 = vadd.xlane.f32.xlu1 %v4137_v23 }
 0xa68   : > { %v4023_v8 = vpop.xlane.xlu0 %4022 }
 0xa69   : > { %v4074_v30 = vmul.f32 %v4023_v8, %v8051_v52 }
 0xa6a   : > { %v3983_v11 = vpop.f32.mrf.mxu3 }
 0xa6b   : > { %v9375_v14 = vsub.f32 %v9240_v33, %v4074_v30  ;;  %v9378_v19 = vadd.f32 %v3983_v11, %v9176_v31 }
 0xa6d   : > { %4052 = vadd.xlane.f32.xlu0 %v9378_v19  ;;  %v4138_v26 = vmul.f32 %v9375_v14, %v9375_v14 }
 0xa6f   : > { %4182 = vadd.xlane.f32.xlu2 %v4138_v26 }
 0xa70   : > { %v4025_v46 = vpop.xlane.xlu1 %4024 }
 0xa71   : > { %v4075_v60 = vmul.f32 %v4025_v46, %v8051_v52 }
 0xa72   : > { %v3986_v23 = vpop.f32.mrf.mxu3 }
 0xa73   : > { %v9385_v28 = vsub.f32 %v9245_v7, %v4075_v60  ;;  %v9388_v8 = vadd.f32 %v3986_v23, %v9176_v31 }
 0xa75   : > { %4054 = vadd.xlane.f32.xlu1 %v9388_v8  ;;  %v4139_v33 = vmul.f32 %v9385_v28, %v9385_v28 }
 0xa77   : > { %4184 = vadd.xlane.f32.xlu0 %v4139_v33 }
 0xa78   : > { %v4027_v30 = vpop.xlane.xlu2 %4026 }
 0xa7a   : > { %v3989_v11 = vpop.f32.mrf.mxu3 }
 0xa7b   : > { %v9394_v26 = vadd.f32 %v3989_v11, %v9176_v31 }
 0xa7d   : > { %4056 = vadd.xlane.f32.xlu2 %v9394_v26 }
 0xa80   : > { %v4029_v46 = vpop.xlane.xlu0 %4028 }
 0xa81   : > { %v4077_v7 = vmul.f32 %v4029_v46, %v8051_v52 }
 0xa82   : > { %v3992_v60 = vpop.f32.mrf.mxu3  ;;  %v4159_v59 = vpop.xlane.xlu2 %4158 }
 0xa83   : > { %v9399_v23 = vsub.f32 %v9258_v49, %v4077_v7  ;;  %v9402_v3 = vadd.f32 %v3992_v60, %v9176_v31  ;;  %v4222_v33 = vmul.f32 %v4159_v59, %v8051_v52  ;;  %v4076_v49 = vmul.f32 %v4027_v30, %v8051_v52 }
 0xa85   : > { %10163 = vst [vmem:[#allocation97_spill] sm:$0xff] %v9399_v23  ;;  %v4254_v50 = vadd.f32 1e-05, %v4222_v33  ;;  %4058 = vadd.xlane.f32.xlu0 %v9402_v3  ;;  %v4141_v11 = vmul.f32 %v9399_v23, %v9399_v23  ;;  %v9421_v16 = vsub.f32 %v9250_v54, %v4076_v49 }
 0xa87   : > { %5873 = vrsqrt.f32 %v4254_v50  ;;  %4188 = vadd.xlane.f32.xlu2 %v4141_v11  ;;  %10165 = vst [vmem:[#allocation99_spill] sm:$0xff] %v9421_v16  ;;  %vm4292_vm2 = vweird.f32 %v4254_v50 }
 0xa88   : > { %v4031_v39 = vpop.xlane.xlu1 %4030 }
 0xa89   : > { %v4078_v46 = vmul.f32 %v4031_v39, %v8051_v52 }
 0xa8a   : > { %v3995_v25 = vpop.f32.mrf.mxu3  ;;  %v4161_v40 = vpop.xlane.xlu0 %4160 }
 0xa8b   : > { %v9411_v7 = vsub.f32 %v9268_v43, %v4078_v46  ;;  %v9414_v59 = vadd.f32 %v3995_v25, %v9176_v31  ;;  %v4223_v60 = vmul.f32 %v4161_v40, %v8051_v52 }
 0xa8d   : > { %10164 = vst [vmem:[#allocation98_spill] sm:$0xff] %v9411_v7  ;;  %v5874_v33 = vpop.eup %5873  ;;  %v4255_v10 = vadd.f32 1e-05, %v4223_v60  ;;  %4060 = vadd.xlane.f32.xlu1 %v9414_v59  ;;  %v4142_v11 = vmul.f32 %v9411_v7, %v9411_v7  ;;  %v4140_v60 = vmul.f32 %v9421_v16, %v9421_v16 }
 0xa8e   : > { %v4287_v39 = vmul.f32 %v5874_v33, %v4254_v50  ;;  %vm4293_vm4 = vweird.f32 %v5874_v33 }
 0xa8f   : > { %5875 = vrsqrt.f32 %v4255_v10  ;;  %4190 = vadd.xlane.f32.xlu0 %v4142_v11  ;;  %v10166_v11 = vld [vmem:[#allocation58_spill] sm:$0xff]  ;;  %vm4294_vm10 = vmor %vm4292_vm2, %vm4293_vm4  ;;  %vm4302_vm15 = vweird.f32 %v4255_v10 }
 0xa90   : > { %v4288_v43 = vmul.f32 %v5874_v33, %v4287_v39  ;;  %v4033_v30 = vpop.xlane.xlu2 %4032  ;;  %v9428_v39 = vperm.slane %v10166_v11, 0 }
 0xa91   : > { %v4079_v31 = vmul.f32 %v4033_v30, %v8051_v52 }
 0xa92   : > { %v4289_v46 = vmul.f32 0.5, %v4288_v43  ;;  %v4163_v25 = vpop.xlane.xlu1 %4162 }
 0xa93   : > { %v4224_v40 = vmul.f32 %v4163_v25, %v8051_v52  ;;  %v9431_v43 = vsub.f32 %v9278_v61, %v4079_v31 }
 0xa94   : > { %v4290_v4 = vsub.f32 1.5, %v4289_v46  ;;  %v9434_v46 = vperm.slane %v10166_v11, 1 }
 0xa95   : > { %v5876_v12 = vpop.eup %5875  ;;  %v4256_v7 = vadd.f32 1e-05, %v4224_v40  ;;  %4186 = vadd.xlane.f32.xlu1 %v4140_v60 }
 0xa96   : > { %v4291_v54 = vmul.f32 %v5874_v33, %v4290_v4  ;;  %v4297_v49 = vmul.f32 %v5876_v12, %v4255_v10  ;;  %vm4303_vm9 = vweird.f32 %v5876_v12 }
 0xa97   : > { %5877 = vrsqrt.f32 %v4256_v7  ;;  %vm4304_vm11 = vmor %vm4302_vm15, %vm4303_vm9  ;;  %vm4312_vm0 = vweird.f32 %v4256_v7 }
 0xa98   : > { %v4295_v30 = vsel %vm4294_vm10, %v5874_v33, %v4291_v54  ;;  %v4298_v25 = vmul.f32 %v5876_v12, %v4297_v49  ;;  %v4035_v27 = vpop.xlane.xlu0 %4034  ;;  %v4143_v33 = vmul.f32 %v9431_v43, %v9431_v43 }
 0xa99   : > { %v4606_v40 = vmul.f32 %v4295_v30, %v9255_v51  ;;  %v4080_v4 = vmul.f32 %v4035_v27, %v8051_v52 }
 0xa9a   : > { %v4299_v50 = vmul.f32 0.5, %v4298_v25  ;;  %v4165_v60 = vpop.xlane.xlu2 %4164 }
 0xa9b   : > { %v4639_v16 = vmul.f32 %v9428_v39, %v4606_v40  ;;  %v9440_v23 = vsub.f32 %v9288_v6, %v4080_v4  ;;  %v4225_v61 = vmul.f32 %v4165_v60, %v8051_v52 }
 0xa9c   : > { %v4300_v31 = vsub.f32 1.5, %v4299_v50 }
 0xa9d   : > { %v5878_v54 = vpop.eup %5877  ;;  %v4672_v49 = vadd.f32 %v9434_v46, %v4639_v16  ;;  %v4257_v51 = vadd.f32 1e-05, %v4225_v61  ;;  %4192 = vadd.xlane.f32.xlu1 %v4143_v33  ;;  %v4144_v27 = vmul.f32 %v9440_v23, %v9440_v23 }
 0xa9e   : > { %v4301_v11 = vmul.f32 %v5876_v12, %v4300_v31  ;;  %v4307_v30 = vmul.f32 %v5878_v54, %v4256_v7  ;;  %vm4313_vm14 = vweird.f32 %v5878_v54 }
 0xa9f   : > { %v4704_v6 = vadd.f32 %v4672_v49, %v10130_v62  ;;  %5879 = vrsqrt.f32 %v4257_v51  ;;  %4194 = vadd.xlane.f32.xlu2 %v4144_v27  ;;  %vm4314_vm1 = vmor %vm4312_vm0, %vm4313_vm14  ;;  %vm4322_vm7 = vweird.f32 %v4257_v51 }
 0xaa0   : > { %v4305_v25 = vsel %vm4304_vm11, %v5876_v12, %v4301_v11  ;;  %v4308_v40 = vmul.f32 %v5878_v54, %v4307_v30  ;;  %v4037_v4 = vpop.xlane.xlu1 %4036 }
 0xaa1   : > { %4736 = vst [vmem:[#allocation2] sm:$0xff] %v4704_v6  ;;  %v4607_v50 = vmul.f32 %v4305_v25, %v9265_v21  ;;  %v4081_v16 = vmul.f32 %v4037_v4, %v8051_v52 }
 0xaa2   : > { %v4309_v60 = vmul.f32 0.5, %v4308_v40  ;;  %v4167_v61 = vpop.xlane.xlu0 %4166 }
 0xaa3   : > { %v4640_v33 = vmul.f32 %v9428_v39, %v4607_v50  ;;  %v9453_v10 = vsub.f32 %v9298_v45, %v4081_v16  ;;  %v4226_v62 = vmul.f32 %v4167_v61, %v8051_v52 }
 0xaa4   : > { %v4310_v31 = vsub.f32 1.5, %v4309_v60 }
 0xaa5   : > { %v5880_v49 = vpop.eup %5879  ;;  %v4673_v12 = vadd.f32 %v9434_v46, %v4640_v33  ;;  %v4258_v27 = vadd.f32 1e-05, %v4226_v62  ;;  %v4145_v21 = vmul.f32 %v9453_v10, %v9453_v10 }
 0xaa6   : > { %v4311_v11 = vmul.f32 %v5878_v54, %v4310_v31  ;;  %v4317_v30 = vmul.f32 %v5880_v49, %v4257_v51  ;;  %vm4323_vm6 = vweird.f32 %v5880_v49 }
 0xaa7   : > { %v4705_v6 = vadd.f32 %v4673_v12, %v10131_v34  ;;  %5881 = vrsqrt.f32 %v4258_v27  ;;  %4196 = vadd.xlane.f32.xlu0 %v4145_v21  ;;  %vm4324_vm12 = vmor %vm4322_vm7, %vm4323_vm6  ;;  %vm4332_vm5 = vweird.f32 %v4258_v27 }
 0xaa8   : > { %v4315_v45 = vsel %vm4314_vm1, %v5878_v54, %v4311_v11  ;;  %v4318_v25 = vmul.f32 %v5880_v49, %v4317_v30  ;;  %v4039_v40 = vpop.xlane.xlu2 %4038 }
 0xaa9   : > { %4737 = vst [vmem:[#allocation2 + $0x8] sm:$0xff] %v4705_v6  ;;  %v4608_v4 = vmul.f32 %v4315_v45, %v9275_v35  ;;  %v4082_v50 = vmul.f32 %v4039_v40, %v8051_v52 }
 0xaaa   : > { %v4319_v16 = vmul.f32 0.5, %v4318_v25  ;;  %v4169_v60 = vpop.xlane.xlu1 %4168 }
 0xaab   : > { %v4641_v61 = vmul.f32 %v9428_v39, %v4608_v4  ;;  %v9464_v7 = vsub.f32 %v9308_v36, %v4082_v50  ;;  %v4227_v34 = vmul.f32 %v4169_v60, %v8051_v52 }
 0xaac   : > { %v4320_v33 = vsub.f32 1.5, %v4319_v16 }
 0xaad   : > { %v5882_v62 = vpop.eup %5881  ;;  %v4674_v54 = vadd.f32 %v9434_v46, %v4641_v61  ;;  %v4259_v31 = vadd.f32 1e-05, %v4227_v34  ;;  %v4146_v35 = vmul.f32 %v9464_v7, %v9464_v7 }
 0xaae   : > { %v4321_v12 = vmul.f32 %v5880_v49, %v4320_v33  ;;  %v4327_v21 = vmul.f32 %v5882_v62, %v4258_v27  ;;  %vm4333_vm13 = vweird.f32 %v5882_v62 }
 0xaaf   : > { %v4706_v11 = vadd.f32 %v4674_v54, %v10132_v9  ;;  %5883 = vrsqrt.f32 %v4259_v31  ;;  %4198 = vadd.xlane.f32.xlu1 %v4146_v35  ;;  %vm4334_vm8 = vmor %vm4332_vm5, %vm4333_vm13  ;;  %vm4342_vm4 = vweird.f32 %v4259_v31 }
 0xab0   : > { %v4325_v36 = vsel %vm4324_vm12, %v5880_v49, %v4321_v12  ;;  %v4328_v30 = vmul.f32 %v5882_v62, %v4327_v21  ;;  %v4041_v6 = vpop.xlane.xlu0 %4040 }
 0xab1   : > { %4738 = vst [vmem:[#allocation2 + $0x10] sm:$0xff] %v4706_v11  ;;  %v4609_v45 = vmul.f32 %v4325_v36, %v9285_v5  ;;  %v4083_v25 = vmul.f32 %v4041_v6, %v8051_v52 }
 0xab2   : > { %v4329_v40 = vmul.f32 0.5, %v4328_v30  ;;  %v4171_v4 = vpop.xlane.xlu2 %4170 }
 0xab3   : > { %v4642_v50 = vmul.f32 %v9428_v39, %v4609_v45  ;;  %v9475_v51 = vsub.f32 %v9318_v1, %v4083_v25  ;;  %v4228_v9 = vmul.f32 %v4171_v4, %v8051_v52 }
 0xab4   : > { %v4330_v16 = vsub.f32 1.5, %v4329_v40 }
 0xab5   : > { %v5884_v60 = vpop.eup %5883  ;;  %v4675_v49 = vadd.f32 %v9434_v46, %v4642_v50  ;;  %v4260_v61 = vadd.f32 1e-05, %v4228_v9  ;;  %v4147_v5 = vmul.f32 %v9475_v51, %v9475_v51 }
 0xab6   : > { %v4331_v34 = vmul.f32 %v5882_v62, %v4330_v16  ;;  %v4337_v33 = vmul.f32 %v5884_v60, %v4259_v31  ;;  %vm4343_vm3 = vweird.f32 %v5884_v60 }
 0xab7   : > { %v4707_v54 = vadd.f32 %v4675_v49, %v10133_v53  ;;  %5885 = vrsqrt.f32 %v4260_v61  ;;  %4200 = vadd.xlane.f32.xlu2 %v4147_v5  ;;  %vm4344_vm2 = vmor %vm4342_vm4, %vm4343_vm3  ;;  %vm4352_vm9 = vweird.f32 %v4260_v61 }
 0xab8   : > { %v4335_v1 = vsel %vm4334_vm8, %v5882_v62, %v4331_v34  ;;  %v4338_v35 = vmul.f32 %v5884_v60, %v4337_v33  ;;  %v4043_v12 = vpop.xlane.xlu1 %4042 }
 0xab9   : > { %4739 = vst [vmem:[#allocation2 + $0x18] sm:$0xff] %v4707_v54  ;;  %v4610_v21 = vmul.f32 %v4335_v1, %v9295_v58  ;;  %v4084_v11 = vmul.f32 %v4043_v12, %v8051_v52 }
 0xaba   : > { %v4339_v36 = vmul.f32 0.5, %v4338_v35  ;;  %v4173_v30 = vpop.xlane.xlu0 %4172 }
 0xabb   : > { %v4643_v6 = vmul.f32 %v9428_v39, %v4610_v21  ;;  %v9486_v27 = vsub.f32 %v9328_v0, %v4084_v11  ;;  %v4229_v53 = vmul.f32 %v4173_v30, %v8051_v52 }
 0xabc   : > { %v4340_v45 = vsub.f32 1.5, %v4339_v36 }
 0xabd   : > { %v5886_v25 = vpop.eup %5885  ;;  %v4676_v62 = vadd.f32 %v9434_v46, %v4643_v6  ;;  %v4261_v40 = vadd.f32 1e-05, %v4229_v53  ;;  %v4148_v58 = vmul.f32 %v9486_v27, %v9486_v27 }
 0xabe   : > { %v4341_v4 = vmul.f32 %v5884_v60, %v4340_v45  ;;  %v4347_v50 = vmul.f32 %v5886_v25, %v4260_v61  ;;  %vm4353_vm10 = vweird.f32 %v5886_v25 }
 0xabf   : > { %v4708_v9 = vadd.f32 %v4676_v62, %v10134_v47  ;;  %5887 = vrsqrt.f32 %v4261_v40  ;;  %4202 = vadd.xlane.f32.xlu0 %v4148_v58  ;;  %vm4354_vm15 = vmor %vm4352_vm9, %vm4353_vm10  ;;  %vm4362_vm14 = vweird.f32 %v4261_v40 }
 0xac0   : > { %v4345_v0 = vsel %vm4344_vm2, %v5884_v60, %v4341_v4  ;;  %v4348_v16 = vmul.f32 %v5886_v25, %v4347_v50  ;;  %v4045_v49 = vpop.xlane.xlu2 %4044 }
 0xac1   : > { %4740 = vst [vmem:[#allocation2 + $0x20] sm:$0xff] %v4708_v9  ;;  %v4611_v5 = vmul.f32 %v4345_v0, %v9305_v13  ;;  %v4085_v34 = vmul.f32 %v4045_v49, %v8051_v52 }
 0xac2   : > { %v4349_v33 = vmul.f32 0.5, %v4348_v16  ;;  %v4175_v54 = vpop.xlane.xlu1 %4174 }
 0xac3   : > { %v4644_v1 = vmul.f32 %v9428_v39, %v4611_v5  ;;  %v9497_v31 = vsub.f32 %v9338_v24, %v4085_v34  ;;  %v4230_v47 = vmul.f32 %v4175_v54, %v8051_v52 }
 0xac4   : > { %v4350_v35 = vsub.f32 1.5, %v4349_v33 }
 0xac5   : > { %v5888_v12 = vpop.eup %5887  ;;  %v4677_v60 = vadd.f32 %v9434_v46, %v4644_v1  ;;  %v4262_v21 = vadd.f32 1e-05, %v4230_v47  ;;  %v4149_v13 = vmul.f32 %v9497_v31, %v9497_v31 }
 0xac6   : > { %v4351_v11 = vmul.f32 %v5886_v25, %v4350_v35  ;;  %v4357_v36 = vmul.f32 %v5888_v12, %v4261_v40  ;;  %vm4363_vm11 = vweird.f32 %v5888_v12 }
 0xac7   : > { %v4709_v30 = vadd.f32 %v4677_v60, %v10135_v38  ;;  %5889 = vrsqrt.f32 %v4262_v21  ;;  %4204 = vadd.xlane.f32.xlu1 %v4149_v13  ;;  %vm4364_vm0 = vmor %vm4362_vm14, %vm4363_vm11  ;;  %vm4372_vm6 = vweird.f32 %v4262_v21 }
 0xac8   : > { %v4355_v24 = vsel %vm4354_vm15, %v5886_v25, %v4351_v11  ;;  %v4358_v6 = vmul.f32 %v5888_v12, %v4357_v36  ;;  %v4047_v53 = vpop.xlane.xlu0 %4046 }
 0xac9   : > { %4741 = vst [vmem:[#allocation2 + $0x28] sm:$0xff] %v4709_v30  ;;  %v4612_v45 = vmul.f32 %v4355_v24, %v9315_v63  ;;  %v4086_v62 = vmul.f32 %v4047_v53, %v8051_v52 }
 0xaca   : > { %v4359_v58 = vmul.f32 0.5, %v4358_v6  ;;  %v4177_v4 = vpop.xlane.xlu2 %4176 }
 0xacb   : > { %v4645_v50 = vmul.f32 %v9428_v39, %v4612_v45  ;;  %v9508_v61 = vsub.f32 %v9348_v15, %v4086_v62  ;;  %v4231_v38 = vmul.f32 %v4177_v4, %v8051_v52 }
 0xacc   : > { %v4360_v9 = vsub.f32 1.5, %v4359_v58 }
 0xacd   : > { %v5890_v0 = vpop.eup %5889  ;;  %v4678_v25 = vadd.f32 %v9434_v46, %v4645_v50  ;;  %v4263_v16 = vadd.f32 1e-05, %v4231_v38  ;;  %v4150_v63 = vmul.f32 %v9508_v61, %v9508_v61 }
 0xace   : > { %v4361_v49 = vmul.f32 %v5888_v12, %v4360_v9  ;;  %v4367_v5 = vmul.f32 %v5890_v0, %v4262_v21  ;;  %vm4373_vm1 = vweird.f32 %v5890_v0 }
 0xacf   : > { %v4710_v34 = vadd.f32 %v4678_v25, %v10136_v37  ;;  %5891 = vrsqrt.f32 %v4263_v16  ;;  %4206 = vadd.xlane.f32.xlu2 %v4150_v63  ;;  %vm4374_vm7 = vmor %vm4372_vm6, %vm4373_vm1  ;;  %vm4382_vm13 = vweird.f32 %v4263_v16 }
 0xad0   : > { %v4365_v15 = vsel %vm4364_vm0, %v5888_v12, %v4361_v49  ;;  %v4368_v33 = vmul.f32 %v5890_v0, %v4367_v5  ;;  %v4049_v54 = vpop.xlane.xlu1 %4048 }
 0xad1   : > { %4742 = vst [vmem:[#allocation2 + $0x30] sm:$0xff] %v4710_v34  ;;  %v4613_v1 = vmul.f32 %v4365_v15, %v9325_v32  ;;  %v4087_v47 = vmul.f32 %v4049_v54, %v8051_v52 }
 0xad2   : > { %v4369_v35 = vmul.f32 0.5, %v4368_v33  ;;  %v4179_v60 = vpop.xlane.xlu0 %4178 }
 0xad3   : > { %v4646_v13 = vmul.f32 %v9428_v39, %v4613_v1  ;;  %v9519_v40 = vsub.f32 %v9358_v17, %v4087_v47  ;;  %v4232_v37 = vmul.f32 %v4179_v60, %v8051_v52 }
 0xad4   : > { %v4370_v11 = vsub.f32 1.5, %v4369_v35 }
 0xad5   : > { %v5892_v36 = vpop.eup %5891  ;;  %v4679_v12 = vadd.f32 %v9434_v46, %v4646_v13  ;;  %v4264_v30 = vadd.f32 1e-05, %v4232_v37  ;;  %v4151_v32 = vmul.f32 %v9519_v40, %v9519_v40 }
 0xad6   : > { %v4371_v24 = vmul.f32 %v5890_v0, %v4370_v11  ;;  %v4377_v6 = vmul.f32 %v5892_v36, %v4263_v16  ;;  %vm4383_vm12 = vweird.f32 %v5892_v36 }
 0xad7   : > { %v4711_v53 = vadd.f32 %v4679_v12, %v10137_v44  ;;  %5893 = vrsqrt.f32 %v4264_v30  ;;  %4208 = vadd.xlane.f32.xlu0 %v4151_v32  ;;  %vm4384_vm5 = vmor %vm4382_vm13, %vm4383_vm12  ;;  %vm4392_vm3 = vweird.f32 %v4264_v30 }
 0xad8   : > { %v4375_v17 = vsel %vm4374_vm7, %v5890_v0, %v4371_v24  ;;  %v4378_v45 = vmul.f32 %v5892_v36, %v4377_v6  ;;  %v4051_v62 = vpop.xlane.xlu2 %4050 }
 0xad9   : > { %4743 = vst [vmem:[#allocation2 + $0x38] sm:$0xff] %v4711_v53  ;;  %v4614_v58 = vmul.f32 %v4375_v17, %v9335_v20  ;;  %v4088_v4 = vmul.f32 %v4051_v62, %v8051_v52 }
 0xada   : > { %v4379_v50 = vmul.f32 0.5, %v4378_v45  ;;  %v4181_v38 = vpop.xlane.xlu1 %4180 }
 0xadb   : > { %v4647_v9 = vmul.f32 %v9428_v39, %v4614_v58  ;;  %v9530_v21 = vsub.f32 %v9368_v57, %v4088_v4  ;;  %v4233_v44 = vmul.f32 %v4181_v38, %v8051_v52 }
 0xadc   : > { %v4380_v25 = vsub.f32 1.5, %v4379_v50 }
 0xadd   : > { %v5894_v63 = vpop.eup %5893  ;;  %v4680_v0 = vadd.f32 %v9434_v46, %v4647_v9  ;;  %v4265_v49 = vadd.f32 1e-05, %v4233_v44  ;;  %v4152_v20 = vmul.f32 %v9530_v21, %v9530_v21 }
 0xade   : > { %v4381_v5 = vmul.f32 %v5892_v36, %v4380_v25  ;;  %v4387_v34 = vmul.f32 %v5894_v63, %v4264_v30  ;;  %vm4393_vm8 = vweird.f32 %v5894_v63 }
 0xadf   : > { %v4712_v15 = vadd.f32 %v4680_v0, %v10138_v48  ;;  %5895 = vrsqrt.f32 %v4265_v49  ;;  %4210 = vadd.xlane.f32.xlu1 %v4152_v20  ;;  %vm4394_vm4 = vmor %vm4392_vm3, %vm4393_vm8  ;;  %vm4402_vm10 = vweird.f32 %v4265_v49 }
 0xae0   : > { %v4385_v57 = vsel %vm4384_vm5, %v5892_v36, %v4381_v5  ;;  %v4388_v33 = vmul.f32 %v5894_v63, %v4387_v34  ;;  %v4053_v54 = vpop.xlane.xlu0 %4052 }
 0xae1   : > { %4744 = vst [vmem:[#allocation2 + $0x40] sm:$0xff] %v4712_v15  ;;  %v4615_v1 = vmul.f32 %v4385_v57, %v9345_v22  ;;  %v4089_v47 = vmul.f32 %v4053_v54, %v8051_v52 }
 0xae2   : > { %v4389_v35 = vmul.f32 0.5, %v4388_v33  ;;  %v4183_v60 = vpop.xlane.xlu2 %4182 }
 0xae3   : > { %v4648_v13 = vmul.f32 %v9428_v39, %v4615_v1  ;;  %v9541_v16 = vsub.f32 %v9378_v19, %v4089_v47  ;;  %v4234_v48 = vmul.f32 %v4183_v60, %v8051_v52 }
 0xae4   : > { %v4390_v37 = vsub.f32 1.5, %v4389_v35 }
 0xae5   : > { %v5896_v11 = vpop.eup %5895  ;;  %v4681_v36 = vadd.f32 %v9434_v46, %v4648_v13  ;;  %v4266_v12 = vadd.f32 1e-05, %v4234_v48  ;;  %v4153_v22 = vmul.f32 %v9541_v16, %v9541_v16 }
 0xae6   : > { %v4391_v32 = vmul.f32 %v5894_v63, %v4390_v37  ;;  %v4397_v24 = vmul.f32 %v5896_v11, %v4265_v49  ;;  %vm4403_vm2 = vweird.f32 %v5896_v11 }
 0xae7   : > { %v4713_v6 = vadd.f32 %v4681_v36, %v10139_v56  ;;  %5897 = vrsqrt.f32 %v4266_v12  ;;  %4212 = vadd.xlane.f32.xlu2 %v4153_v22  ;;  %vm4404_vm9 = vmor %vm4402_vm10, %vm4403_vm2  ;;  %vm4412_vm11 = vweird.f32 %v4266_v12 }
 0xae8   : > { %v4395_v19 = vsel %vm4394_vm4, %v5894_v63, %v4391_v32  ;;  %v4398_v53 = vmul.f32 %v5896_v11, %v4397_v24  ;;  %v4055_v17 = vpop.xlane.xlu1 %4054 }
 0xae9   : > { %4745 = vst [vmem:[#allocation2 + $0x48] sm:$0xff] %v4713_v6  ;;  %v4616_v45 = vmul.f32 %v4395_v19, %v9355_v18  ;;  %v4090_v62 = vmul.f32 %v4055_v17, %v8051_v52 }
 0xaea   : > { %v4399_v58 = vmul.f32 0.5, %v4398_v53  ;;  %v4185_v4 = vpop.xlane.xlu0 %4184 }
 0xaeb   : > { %v4649_v50 = vmul.f32 %v9428_v39, %v4616_v45  ;;  %v9552_v30 = vsub.f32 %v9388_v8, %v4090_v62  ;;  %v4235_v56 = vmul.f32 %v4185_v4, %v8051_v52 }
 0xaec   : > { %v4400_v38 = vsub.f32 1.5, %v4399_v58 }
 0xaed   : > { %v5898_v9 = vpop.eup %5897  ;;  %v4682_v44 = vadd.f32 %v9434_v46, %v4649_v50  ;;  %v4267_v25 = vadd.f32 1e-05, %v4235_v56  ;;  %v4154_v18 = vmul.f32 %v9552_v30, %v9552_v30 }
 0xaee   : > { %v4401_v63 = vmul.f32 %v5896_v11, %v4400_v38  ;;  %v4407_v0 = vmul.f32 %v5898_v9, %v4266_v12  ;;  %vm4413_vm15 = vweird.f32 %v5898_v9 }
 0xaef   : > { %v4714_v20 = vadd.f32 %v4682_v44, %v10140_v2  ;;  %5899 = vrsqrt.f32 %v4267_v25  ;;  %4214 = vadd.xlane.f32.xlu0 %v4154_v18  ;;  %vm4414_vm14 = vmor %vm4412_vm11, %vm4413_vm15  ;;  %vm4422_vm1 = vweird.f32 %v4267_v25 }
 0xaf0   : > { %v4405_v8 = vsel %vm4404_vm9, %v5896_v11, %v4401_v63  ;;  %v4408_v5 = vmul.f32 %v5898_v9, %v4407_v0  ;;  %v4057_v34 = vpop.xlane.xlu2 %4056 }
 0xaf1   : > { %4746 = vst [vmem:[#allocation2 + $0x50] sm:$0xff] %v4714_v20  ;;  %v4617_v15 = vmul.f32 %v4405_v8, %v9365_v42  ;;  %v4091_v57 = vmul.f32 %v4057_v34, %v8051_v52 }
 0xaf2   : > { %v4409_v33 = vmul.f32 0.5, %v4408_v5 }
 0xaf3   : > { %v4650_v54 = vmul.f32 %v9428_v39, %v4617_v15  ;;  %v9563_v1 = vsub.f32 %v9394_v26, %v4091_v57 }
 0xaf4   : > { %v4410_v49 = vsub.f32 1.5, %v4409_v33 }
 0xaf5   : > { %v5900_v2 = vpop.eup %5899  ;;  %v4683_v47 = vadd.f32 %v9434_v46, %v4650_v54  ;;  %v4155_v35 = vmul.f32 %v9563_v1, %v9563_v1 }
 0xaf6   : > { %v4411_v60 = vmul.f32 %v5898_v9, %v4410_v49  ;;  %v4417_v13 = vmul.f32 %v5900_v2, %v4267_v25  ;;  %vm4423_vm0 = vweird.f32 %v5900_v2 }
 0xaf7   : > { %v4715_v42 = vadd.f32 %v4683_v47, %v10141_v29  ;;  %4216 = vadd.xlane.f32.xlu1 %v4155_v35  ;;  %vm4424_vm6 = vmor %vm4422_vm1, %vm4423_vm0 }
 0xaf8   : > { %v4415_v48 = vsel %vm4414_vm14, %v5898_v9, %v4411_v60  ;;  %v4418_v37 = vmul.f32 %v5900_v2, %v4417_v13  ;;  %v4059_v11 = vpop.xlane.xlu0 %4058 }
 0xaf9   : > { %4747 = vst [vmem:[#allocation2 + $0x58] sm:$0xff] %v4715_v42  ;;  %v4618_v26 = vmul.f32 %v4415_v48, %v9375_v14  ;;  %v4092_v36 = vmul.f32 %v4059_v11, %v8051_v52 }
 0xafa   : > { %v4419_v22 = vmul.f32 0.5, %v4418_v37  ;;  %v4189_v32 = vpop.xlane.xlu2 %4188 }
 0xafb   : > { %v4651_v24 = vmul.f32 %v9428_v39, %v4618_v26  ;;  %v9573_v6 = vsub.f32 %v9402_v3, %v4092_v36  ;;  %v4237_v12 = vmul.f32 %v4189_v32, %v8051_v52 }
 0xafc   : > { %v4420_v29 = vsub.f32 1.5, %v4419_v22 }
 0xafd   : > { %v4684_v19 = vadd.f32 %v9434_v46, %v4651_v24  ;;  %v4269_v53 = vadd.f32 1e-05, %v4237_v12  ;;  %v4156_v17 = vmul.f32 %v9573_v6, %v9573_v6 }
 0xafe   : > { %v4421_v14 = vmul.f32 %v5900_v2, %v4420_v29  ;;  %v10168_v29 = vld [vmem:[#allocation59_spill] sm:$0xff] }
 0xaff   : > { %v4716_v45 = vadd.f32 %v4684_v19, %v10142_v41  ;;  %5901 = vrsqrt.f32 %v4269_v53  ;;  %4218 = vadd.xlane.f32.xlu2 %v4156_v17  ;;  %vm4442_vm12 = vweird.f32 %v4269_v53 }
 0xb00   : > { %v4425_v62 = vsel %vm4424_vm6, %v5900_v2, %v4421_v14  ;;  %v4061_v3 = vpop.xlane.xlu1 %4060  ;;  %v10167_v2 = vld [vmem:[#allocation97_spill] sm:$0xff]  ;;  %v10169_v14 = vld [vmem:[#allocation98_spill] sm:$0xff] }
 0xb01   : > { %4748 = vst [vmem:[#allocation2 + $0x60] sm:$0xff] %v4716_v45  ;;  %v4619_v58 = vmul.f32 %v4425_v62, %v9385_v28  ;;  %v4093_v4 = vmul.f32 %v4061_v3, %v8051_v52 }
 0xb02   : > { %v4191_v50 = vpop.xlane.xlu0 %4190 }
 0xb03   : > { %v4652_v56 = vmul.f32 %v9428_v39, %v4619_v58  ;;  %v9584_v38 = vsub.f32 %v9414_v59, %v4093_v4  ;;  %v4238_v9 = vmul.f32 %v4191_v50, %v8051_v52 }
 0xb05   : > { %v5902_v44 = vpop.eup %5901  ;;  %v4685_v41 = vadd.f32 %v9434_v46, %v4652_v56  ;;  %v4270_v25 = vadd.f32 1e-05, %v4238_v9  ;;  %v4157_v18 = vmul.f32 %v9584_v38, %v9584_v38 }
 0xb06   : > { %v4437_v63 = vmul.f32 %v5902_v44, %v4269_v53  ;;  %vm4443_vm7 = vweird.f32 %v5902_v44 }
 0xb07   : > { %v4717_v28 = vadd.f32 %v4685_v41, %v10143_v55  ;;  %5903 = vrsqrt.f32 %v4270_v25  ;;  %4220 = vadd.xlane.f32.xlu0 %v4157_v18  ;;  %vm4444_vm13 = vmor %vm4442_vm12, %vm4443_vm7  ;;  %vm4452_vm8 = vweird.f32 %v4270_v25 }
 0xb08   : > { %v4438_v0 = vmul.f32 %v5902_v44, %v4437_v63  ;;  %v4187_v20 = vpop.xlane.xlu1 %4186 }
 0xb09   : > { %4749 = vst [vmem:[#allocation2 + $0x68] sm:$0xff] %v4717_v28  ;;  %v4236_v59 = vmul.f32 %v4187_v20, %v8051_v52 }
 0xb0a   : > { %v4439_v8 = vmul.f32 0.5, %v4438_v0  ;;  %v10170_v0 = vld [vmem:[#allocation94_spill] sm:$0xff] }
 0xb0b   : > { %v4268_v5 = vadd.f32 1e-05, %v4236_v59  ;;  %v10171_v59 = vld [vmem:[#allocation99_spill] sm:$0xff] }
 0xb0c   : > { %v4440_v34 = vsub.f32 1.5, %v4439_v8 }
 0xb0d   : > { %v5904_v15 = vpop.eup %5903  ;;  %5905 = vrsqrt.f32 %v4268_v5  ;;  %vm4432_vm2 = vweird.f32 %v4268_v5 }
 0xb0e   : > { %v4441_v57 = vmul.f32 %v5902_v44, %v4440_v34  ;;  %v4447_v33 = vmul.f32 %v5904_v15, %v4270_v25  ;;  %vm4453_vm5 = vweird.f32 %v5904_v15 }
 0xb0f   : > { %vm4454_vm3 = vmor %vm4452_vm8, %vm4453_vm5 }
 0xb10   : > { %v4445_v54 = vsel %vm4444_vm13, %v5902_v44, %v4441_v57  ;;  %v4448_v49 = vmul.f32 %v5904_v15, %v4447_v33  ;;  %v4193_v55 = vpop.xlane.xlu1 %4192 }
 0xb11   : > { %v4621_v47 = vmul.f32 %v4445_v54, %v10167_v2  ;;  %v4239_v35 = vmul.f32 %v4193_v55, %v8051_v52 }
 0xb12   : > { %v4449_v60 = vmul.f32 0.5, %v4448_v49  ;;  %v4195_v13 = vpop.xlane.xlu2 %4194 }
 0xb13   : > { %v5906_v42 = vpop.eup %5905  ;;  %v4654_v48 = vmul.f32 %v9428_v39, %v4621_v47  ;;  %v4271_v37 = vadd.f32 1e-05, %v4239_v35  ;;  %v4240_v11 = vmul.f32 %v4195_v13, %v8051_v52 }
 0xb14   : > { %v4450_v26 = vsub.f32 1.5, %v4449_v60  ;;  %v4427_v36 = vmul.f32 %v5906_v42, %v4268_v5  ;;  %vm4433_vm4 = vweird.f32 %v5906_v42  ;;  %v10172_v60 = vld [vmem:[#allocation61_spill] sm:$0xff] }
 0xb15   : > { %v4687_v22 = vadd.f32 %v9434_v46, %v4654_v48  ;;  %5907 = vrsqrt.f32 %v4271_v37  ;;  %v4272_v32 = vadd.f32 1e-05, %v4240_v11  ;;  %vm4434_vm10 = vmor %vm4432_vm2, %vm4433_vm4  ;;  %vm4462_vm15 = vweird.f32 %v4271_v37 }
 0xb16   : > { %v4451_v24 = vmul.f32 %v5904_v15, %v4450_v26  ;;  %v4428_v12 = vmul.f32 %v5906_v42, %v4427_v36 }
 0xb17   : > { %v4719_v19 = vadd.f32 %v4687_v22, %v10168_v29  ;;  %5909 = vrsqrt.f32 %v4272_v32  ;;  %vm4472_vm0 = vweird.f32 %v4272_v32 }
 0xb18   : > { %v4455_v53 = vsel %vm4454_vm3, %v5904_v15, %v4451_v24  ;;  %v4429_v17 = vmul.f32 0.5, %v4428_v12 }
 0xb19   : > { %4751 = vst [vmem:[#allocation2 + $0x78] sm:$0xff] %v4719_v19  ;;  %v4622_v45 = vmul.f32 %v4455_v53, %v10169_v14 }
 0xb1a   : > { %v4430_v62 = vsub.f32 1.5, %v4429_v17  ;;  %v4197_v3 = vpop.xlane.xlu0 %4196 }
 0xb1b   : > { %v5908_v58 = vpop.eup %5907  ;;  %v4655_v4 = vmul.f32 %v9428_v39, %v4622_v45  ;;  %v4241_v50 = vmul.f32 %v4197_v3, %v8051_v52 }
 0xb1c   : > { %v4431_v56 = vmul.f32 %v5906_v42, %v4430_v62  ;;  %v4457_v9 = vmul.f32 %v5908_v58, %v4271_v37  ;;  %vm4463_vm9 = vweird.f32 %v5908_v58 }
 0xb1d   : > { %v5910_v44 = vpop.eup %5909  ;;  %v4688_v41 = vadd.f32 %v9434_v46, %v4655_v4  ;;  %v4273_v25 = vadd.f32 1e-05, %v4241_v50  ;;  %vm4464_vm14 = vmor %vm4462_vm15, %vm4463_vm9 }
 0xb1e   : > { %v4435_v18 = vsel %vm4434_vm10, %v5906_v42, %v4431_v56  ;;  %v4458_v63 = vmul.f32 %v5908_v58, %v4457_v9  ;;  %v4467_v28 = vmul.f32 %v5910_v44, %v4272_v32  ;;  %vm4473_vm11 = vweird.f32 %v5910_v44 }
 0xb1f   : > { %v4720_v20 = vadd.f32 %v4688_v41, %v10170_v0  ;;  %v4620_v8 = vmul.f32 %v4435_v18, %v10171_v59  ;;  %5911 = vrsqrt.f32 %v4273_v25  ;;  %vm4474_vm1 = vmor %vm4472_vm0, %vm4473_vm11  ;;  %vm4482_vm7 = vweird.f32 %v4273_v25 }
 0xb20   : > { %v4459_v34 = vmul.f32 0.5, %v4458_v63  ;;  %v4468_v15 = vmul.f32 %v5910_v44, %v4467_v28 }
 0xb21   : > { %4752 = vst [vmem:[#allocation2 + $0x80] sm:$0xff] %v4720_v20  ;;  %v4653_v57 = vmul.f32 %v9428_v39, %v4620_v8 }
 0xb22   : > { %v4460_v5 = vsub.f32 1.5, %v4459_v34  ;;  %v4469_v33 = vmul.f32 0.5, %v4468_v15  ;;  %v4199_v54 = vpop.xlane.xlu1 %4198 }
 0xb23   : > { %v4686_v49 = vadd.f32 %v9434_v46, %v4653_v57  ;;  %v4242_v55 = vmul.f32 %v4199_v54, %v8051_v52  ;;  %v10175_v57 = vld [vmem:[#allocation88_spill] sm:$0xff] }
 0xb24   : > { %v4461_v2 = vmul.f32 %v5908_v58, %v4460_v5  ;;  %v4470_v47 = vsub.f32 1.5, %v4469_v33 }
 0xb25   : > { %v5912_v35 = vpop.eup %5911  ;;  %v4718_v13 = vadd.f32 %v4686_v49, %v10172_v60  ;;  %v4274_v42 = vadd.f32 1e-05, %v4242_v55 }
 0xb26   : > { %v4465_v48 = vsel %vm4464_vm14, %v5908_v58, %v4461_v2  ;;  %v4471_v11 = vmul.f32 %v5910_v44, %v4470_v47  ;;  %v4477_v26 = vmul.f32 %v5912_v35, %v4273_v25  ;;  %vm4483_vm6 = vweird.f32 %v5912_v35 }
 0xb27   : > { %4750 = vst [vmem:[#allocation2 + $0x70] sm:$0xff] %v4718_v13  ;;  %v4623_v36 = vmul.f32 %v4465_v48, %v9431_v43  ;;  %5913 = vrsqrt.f32 %v4274_v42  ;;  %v10173_v43 = vld [vmem:[#allocation92_spill] sm:$0xff]  ;;  %vm4484_vm12 = vmor %vm4482_vm7, %vm4483_vm6  ;;  %vm4492_vm5 = vweird.f32 %v4274_v42 }
 0xb28   : > { %v4475_v22 = vsel %vm4474_vm1, %v5910_v44, %v4471_v11  ;;  %v4478_v24 = vmul.f32 %v5912_v35, %v4477_v26  ;;  %v10176_v26 = vld [vmem:[#allocation86_spill] sm:$0xff] }
 0xb29   : > { %v4656_v37 = vmul.f32 %v9428_v39, %v4623_v36  ;;  %v4624_v12 = vmul.f32 %v4475_v22, %v9440_v23  ;;  %v10174_v23 = vld [vmem:[#allocation90_spill] sm:$0xff] }
 0xb2a   : > { %v4479_v29 = vmul.f32 0.5, %v4478_v24  ;;  %v4201_v19 = vpop.xlane.xlu2 %4200 }
 0xb2b   : > { %v4689_v53 = vadd.f32 %v9434_v46, %v4656_v37  ;;  %v4657_v17 = vmul.f32 %v9428_v39, %v4624_v12  ;;  %v4243_v32 = vmul.f32 %v4201_v19, %v8051_v52 }
 0xb2c   : > { %v4480_v14 = vsub.f32 1.5, %v4479_v29 }
 0xb2d   : > { %v5914_v45 = vpop.eup %5913  ;;  %v4721_v62 = vadd.f32 %v4689_v53, %v10173_v43  ;;  %v4690_v3 = vadd.f32 %v9434_v46, %v4657_v17  ;;  %v4275_v58 = vadd.f32 1e-05, %v4243_v32 }
 0xb2e   : > { %v4481_v4 = vmul.f32 %v5912_v35, %v4480_v14  ;;  %v4487_v50 = vmul.f32 %v5914_v45, %v4274_v42  ;;  %vm4493_vm13 = vweird.f32 %v5914_v45 }
 0xb2f   : > { %4753 = vst [vmem:[#allocation2 + $0x88] sm:$0xff] %v4721_v62  ;;  %v4722_v56 = vadd.f32 %v4690_v3, %v10174_v23  ;;  %5915 = vrsqrt.f32 %v4275_v58  ;;  %vm4494_vm8 = vmor %vm4492_vm5, %vm4493_vm13  ;;  %vm4502_vm4 = vweird.f32 %v4275_v58  ;;  %v10177_v62 = vld [vmem:[#allocation84_spill] sm:$0xff] }
 0xb30   : > { %v4485_v9 = vsel %vm4484_vm12, %v5912_v35, %v4481_v4  ;;  %v4488_v44 = vmul.f32 %v5914_v45, %v4487_v50 }
 0xb31   : > { %4754 = vst [vmem:[#allocation2 + $0x90] sm:$0xff] %v4722_v56  ;;  %v4625_v41 = vmul.f32 %v4485_v9, %v9453_v10 }
 0xb32   : > { %v4489_v18 = vmul.f32 0.5, %v4488_v44  ;;  %v4203_v63 = vpop.xlane.xlu0 %4202 }
 0xb33   : > { %v4658_v28 = vmul.f32 %v9428_v39, %v4625_v41  ;;  %v4244_v0 = vmul.f32 %v4203_v63, %v8051_v52 }
 0xb34   : > { %v4490_v20 = vsub.f32 1.5, %v4489_v18 }
 0xb35   : > { %v5916_v25 = vpop.eup %5915  ;;  %v4691_v59 = vadd.f32 %v9434_v46, %v4658_v28  ;;  %v4276_v8 = vadd.f32 1e-05, %v4244_v0 }
 0xb36   : > { %v4491_v34 = vmul.f32 %v5914_v45, %v4490_v20  ;;  %v4497_v15 = vmul.f32 %v5916_v25, %v4275_v58  ;;  %vm4503_vm3 = vweird.f32 %v5916_v25  ;;  %v10178_v20 = vld [vmem:[#allocation82_spill] sm:$0xff] }
 0xb37   : > { %v4723_v5 = vadd.f32 %v4691_v59, %v10175_v57  ;;  %5917 = vrsqrt.f32 %v4276_v8  ;;  %vm4504_vm2 = vmor %vm4502_vm4, %vm4503_vm3  ;;  %vm4512_vm9 = vweird.f32 %v4276_v8 }
 0xb38   : > { %v4495_v10 = vsel %vm4494_vm8, %v5914_v45, %v4491_v34  ;;  %v4498_v33 = vmul.f32 %v5916_v25, %v4497_v15 }
 0xb39   : > { %4755 = vst [vmem:[#allocation2 + $0x98] sm:$0xff] %v4723_v5  ;;  %v4626_v54 = vmul.f32 %v4495_v10, %v9464_v7 }
 0xb3a   : > { %v4499_v49 = vmul.f32 0.5, %v4498_v33  ;;  %v4205_v55 = vpop.xlane.xlu1 %4204 }
 0xb3b   : > { %v4659_v2 = vmul.f32 %v9428_v39, %v4626_v54  ;;  %v4245_v47 = vmul.f32 %v4205_v55, %v8051_v52 }
 0xb3c   : > { %v4500_v35 = vsub.f32 1.5, %v4499_v49 }
 0xb3d   : > { %v5918_v60 = vpop.eup %5917  ;;  %v4692_v13 = vadd.f32 %v9434_v46, %v4659_v2  ;;  %v4277_v42 = vadd.f32 1e-05, %v4245_v47  ;;  %v10179_v47 = vld [vmem:[#allocation78_spill] sm:$0xff] }
 0xb3e   : > { %v4501_v48 = vmul.f32 %v5916_v25, %v4500_v35  ;;  %v4507_v11 = vmul.f32 %v5918_v60, %v4276_v8  ;;  %vm4513_vm10 = vweird.f32 %v5918_v60 }
 0xb3f   : > { %v4724_v36 = vadd.f32 %v4692_v13, %v10176_v26  ;;  %5919 = vrsqrt.f32 %v4277_v42  ;;  %vm4514_vm15 = vmor %vm4512_vm9, %vm4513_vm10  ;;  %vm4522_vm14 = vweird.f32 %v4277_v42 }
 0xb40   : > { %v4505_v7 = vsel %vm4504_vm2, %v5916_v25, %v4501_v48  ;;  %v4508_v22 = vmul.f32 %v5918_v60, %v4507_v11 }
 0xb41   : > { %4756 = vst [vmem:[#allocation2 + $0xa0] sm:$0xff] %v4724_v36  ;;  %v4627_v24 = vmul.f32 %v4505_v7, %v9475_v51 }
 0xb42   : > { %v4509_v37 = vmul.f32 0.5, %v4508_v22  ;;  %v4207_v12 = vpop.xlane.xlu2 %4206 }
 0xb43   : > { %v4660_v29 = vmul.f32 %v9428_v39, %v4627_v24  ;;  %v4246_v19 = vmul.f32 %v4207_v12, %v8051_v52 }
 0xb44   : > { %v4510_v53 = vsub.f32 1.5, %v4509_v37 }
 0xb45   : > { %v5920_v17 = vpop.eup %5919  ;;  %v4693_v32 = vadd.f32 %v9434_v46, %v4660_v29  ;;  %v4278_v14 = vadd.f32 1e-05, %v4246_v19  ;;  %v10180_v29 = vld [vmem:[#allocation76_spill] sm:$0xff] }
 0xb46   : > { %v4511_v45 = vmul.f32 %v5918_v60, %v4510_v53  ;;  %v4517_v43 = vmul.f32 %v5920_v17, %v4277_v42  ;;  %vm4523_vm11 = vweird.f32 %v5920_v17 }
 0xb47   : > { %v4725_v3 = vadd.f32 %v4693_v32, %v10177_v62  ;;  %5921 = vrsqrt.f32 %v4278_v14  ;;  %vm4524_vm0 = vmor %vm4522_vm14, %vm4523_vm11  ;;  %vm4532_vm6 = vweird.f32 %v4278_v14 }
 0xb48   : > { %v4515_v51 = vsel %vm4514_vm15, %v5918_v60, %v4511_v45  ;;  %v4518_v58 = vmul.f32 %v5920_v17, %v4517_v43 }
 0xb49   : > { %4757 = vst [vmem:[#allocation2 + $0xa8] sm:$0xff] %v4725_v3  ;;  %v4628_v4 = vmul.f32 %v4515_v51, %v9486_v27 }
 0xb4a   : > { %v4519_v50 = vmul.f32 0.5, %v4518_v58  ;;  %v4209_v23 = vpop.xlane.xlu0 %4208 }
 0xb4b   : > { %v4661_v56 = vmul.f32 %v9428_v39, %v4628_v4  ;;  %v4247_v9 = vmul.f32 %v4209_v23, %v8051_v52  ;;  %v10181_v23 = vld [vmem:[#allocation74_spill] sm:$0xff] }
 0xb4c   : > { %v4520_v44 = vsub.f32 1.5, %v4519_v50 }
 0xb4d   : > { %v5922_v41 = vpop.eup %5921  ;;  %v4694_v18 = vadd.f32 %v9434_v46, %v4661_v56  ;;  %v4279_v63 = vadd.f32 1e-05, %v4247_v9 }
 0xb4e   : > { %v4521_v28 = vmul.f32 %v5920_v17, %v4520_v44  ;;  %v4527_v0 = vmul.f32 %v5922_v41, %v4278_v14  ;;  %vm4533_vm1 = vweird.f32 %v5922_v41 }
 0xb4f   : > { %v4726_v25 = vadd.f32 %v4694_v18, %v10178_v20  ;;  %5923 = vrsqrt.f32 %v4279_v63  ;;  %vm4534_vm7 = vmor %vm4532_vm6, %vm4533_vm1  ;;  %vm4542_vm13 = vweird.f32 %v4279_v63 }
 0xb50   : > { %v4525_v27 = vsel %vm4524_vm0, %v5920_v17, %v4521_v28  ;;  %v4528_v59 = vmul.f32 %v5922_v41, %v4527_v0 }
 0xb51   : > { %4758 = vst [vmem:[#allocation2 + $0xb0] sm:$0xff] %v4726_v25  ;;  %v4629_v8 = vmul.f32 %v4525_v27, %v9497_v31 }
 0xb52   : > { %v4529_v34 = vmul.f32 0.5, %v4528_v59  ;;  %v4211_v15 = vpop.xlane.xlu1 %4210 }
 0xb53   : > { %v4662_v57 = vmul.f32 %v9428_v39, %v4629_v8  ;;  %v4248_v5 = vmul.f32 %v4211_v15, %v8051_v52 }
 0xb54   : > { %v4530_v10 = vsub.f32 1.5, %v4529_v34  ;;  %v10182_v34 = vld [vmem:[#allocation72_spill] sm:$0xff] }
 0xb55   : > { %v5924_v33 = vpop.eup %5923  ;;  %v4695_v54 = vadd.f32 %v9434_v46, %v4662_v57  ;;  %v4280_v49 = vadd.f32 1e-05, %v4248_v5 }
 0xb56   : > { %v4531_v55 = vmul.f32 %v5922_v41, %v4530_v10  ;;  %v4537_v2 = vmul.f32 %v5924_v33, %v4279_v63  ;;  %vm4543_vm12 = vweird.f32 %v5924_v33 }
 0xb57   : > { %v4727_v35 = vadd.f32 %v4695_v54, %v10179_v47  ;;  %5925 = vrsqrt.f32 %v4280_v49  ;;  %vm4544_vm5 = vmor %vm4542_vm13, %vm4543_vm12  ;;  %vm4552_vm3 = vweird.f32 %v4280_v49 }
 0xb58   : > { %v4535_v31 = vsel %vm4534_vm7, %v5922_v41, %v4531_v55  ;;  %v4538_v60 = vmul.f32 %v5924_v33, %v4537_v2 }
 0xb59   : > { %4759 = vst [vmem:[#allocation2 + $0xb8] sm:$0xff] %v4727_v35  ;;  %v4630_v13 = vmul.f32 %v4535_v31, %v9508_v61 }
 0xb5a   : > { %v4539_v42 = vmul.f32 0.5, %v4538_v60  ;;  %v4213_v48 = vpop.xlane.xlu2 %4212 }
 0xb5b   : > { %v4663_v11 = vmul.f32 %v9428_v39, %v4630_v13  ;;  %v4249_v26 = vmul.f32 %v4213_v48, %v8051_v52  ;;  %v10183_v13 = vld [vmem:[#allocation68_spill] sm:$0xff] }
 0xb5c   : > { %v4540_v36 = vsub.f32 1.5, %v4539_v42 }
 0xb5d   : > { %v5926_v7 = vpop.eup %5925  ;;  %v4696_v22 = vadd.f32 %v9434_v46, %v4663_v11  ;;  %v4281_v24 = vadd.f32 1e-05, %v4249_v26 }
 0xb5e   : > { %v4541_v37 = vmul.f32 %v5924_v33, %v4540_v36  ;;  %v4547_v12 = vmul.f32 %v5926_v7, %v4280_v49  ;;  %vm4553_vm8 = vweird.f32 %v5926_v7 }
 0xb5f   : > { %v4728_v19 = vadd.f32 %v4696_v22, %v10180_v29  ;;  %5927 = vrsqrt.f32 %v4281_v24  ;;  %vm4554_vm4 = vmor %vm4552_vm3, %vm4553_vm8  ;;  %vm4562_vm10 = vweird.f32 %v4281_v24 }
 0xb60   : > { %v4545_v61 = vsel %vm4544_vm5, %v5924_v33, %v4541_v37  ;;  %v4548_v53 = vmul.f32 %v5926_v7, %v4547_v12 }
 0xb61   : > { %4760 = vst [vmem:[#allocation2 + $0xc0] sm:$0xff] %v4728_v19  ;;  %v4631_v17 = vmul.f32 %v4545_v61, %v9519_v40 }
 0xb62   : > { %v4549_v32 = vmul.f32 0.5, %v4548_v53  ;;  %v4215_v14 = vpop.xlane.xlu0 %4214  ;;  %v10184_v53 = vld [vmem:[#allocation66_spill] sm:$0xff] }
 0xb63   : > { %v4664_v45 = vmul.f32 %v9428_v39, %v4631_v17  ;;  %v4250_v43 = vmul.f32 %v4215_v14, %v8051_v52 }
 0xb64   : > { %v4550_v62 = vsub.f32 1.5, %v4549_v32 }
 0xb65   : > { %v5928_v3 = vpop.eup %5927  ;;  %v4697_v51 = vadd.f32 %v9434_v46, %v4664_v45  ;;  %v4282_v58 = vadd.f32 1e-05, %v4250_v43 }
 0xb66   : > { %v4551_v4 = vmul.f32 %v5926_v7, %v4550_v62  ;;  %v4557_v50 = vmul.f32 %v5928_v3, %v4281_v24  ;;  %vm4563_vm2 = vweird.f32 %v5928_v3 }
 0xb67   : > { %v4729_v56 = vadd.f32 %v4697_v51, %v10181_v23  ;;  %5929 = vrsqrt.f32 %v4282_v58  ;;  %vm4564_vm9 = vmor %vm4562_vm10, %vm4563_vm2  ;;  %vm4572_vm11 = vweird.f32 %v4282_v58 }
 0xb68   : > { %v4555_v40 = vsel %vm4554_vm4, %v5926_v7, %v4551_v4  ;;  %v4558_v9 = vmul.f32 %v5928_v3, %v4557_v50  ;;  %v10185_v4 = vld [vmem:[#allocation64_spill] sm:$0xff] }
 0xb69   : > { %4761 = vst [vmem:[#allocation2 + $0xc8] sm:$0xff] %v4729_v56  ;;  %v4632_v44 = vmul.f32 %v4555_v40, %v9530_v21 }
 0xb6a   : > { %v4559_v41 = vmul.f32 0.5, %v4558_v9  ;;  %v4217_v18 = vpop.xlane.xlu1 %4216 }
 0xb6b   : > { %v4665_v63 = vmul.f32 %v9428_v39, %v4632_v44  ;;  %v4251_v28 = vmul.f32 %v4217_v18, %v8051_v52 }
 0xb6c   : > { %v4560_v0 = vsub.f32 1.5, %v4559_v41 }
 0xb6d   : > { %v5930_v20 = vpop.eup %5929  ;;  %v4698_v25 = vadd.f32 %v9434_v46, %v4665_v63  ;;  %v4283_v27 = vadd.f32 1e-05, %v4251_v28  ;;  %v10186_v63 = vld [vmem:[#allocation62_spill] sm:$0xff] }
 0xb6e   : > { %v4561_v59 = vmul.f32 %v5928_v3, %v4560_v0  ;;  %v4567_v8 = vmul.f32 %v5930_v20, %v4282_v58  ;;  %vm4573_vm15 = vweird.f32 %v5930_v20 }
 0xb6f   : > { %v4730_v15 = vadd.f32 %v4698_v25, %v10182_v34  ;;  %5931 = vrsqrt.f32 %v4283_v27  ;;  %vm4574_vm14 = vmor %vm4572_vm11, %vm4573_vm15  ;;  %vm4582_vm1 = vweird.f32 %v4283_v27 }
 0xb70   : > { %v4565_v21 = vsel %vm4564_vm9, %v5928_v3, %v4561_v59  ;;  %v4568_v57 = vmul.f32 %v5930_v20, %v4567_v8 }
 0xb71   : > { %4762 = vst [vmem:[#allocation2 + $0xd0] sm:$0xff] %v4730_v15  ;;  %v4633_v5 = vmul.f32 %v4565_v21, %v9541_v16 }
 0xb72   : > { %v4569_v10 = vmul.f32 0.5, %v4568_v57  ;;  %v4219_v33 = vpop.xlane.xlu2 %4218 }
 0xb73   : > { %v4666_v54 = vmul.f32 %v9428_v39, %v4633_v5  ;;  %v4252_v49 = vmul.f32 %v4219_v33, %v8051_v52 }
 0xb74   : > { %v4570_v55 = vsub.f32 1.5, %v4569_v10 }
 0xb75   : > { %v5932_v2 = vpop.eup %5931  ;;  %v4699_v47 = vadd.f32 %v9434_v46, %v4666_v54  ;;  %v4284_v35 = vadd.f32 1e-05, %v4252_v49 }
 0xb76   : > { %v4571_v31 = vmul.f32 %v5930_v20, %v4570_v55  ;;  %v4577_v60 = vmul.f32 %v5932_v2, %v4283_v27  ;;  %vm4583_vm0 = vweird.f32 %v5932_v2  ;;  %v10187_v27 = vld [vmem:[#allocation60_spill] sm:$0xff] }
 0xb77   : > { %v4731_v42 = vadd.f32 %v4699_v47, %v10183_v13  ;;  %5933 = vrsqrt.f32 %v4284_v35  ;;  %vm4584_vm6 = vmor %vm4582_vm1, %vm4583_vm0  ;;  %vm4592_vm12 = vweird.f32 %v4284_v35 }
 0xb78   : > { %v4575_v16 = vsel %vm4574_vm14, %v5930_v20, %v4571_v31  ;;  %v4578_v48 = vmul.f32 %v5932_v2, %v4577_v60 }
 0xb79   : > { %4763 = vst [vmem:[#allocation2 + $0xd8] sm:$0xff] %v4731_v42  ;;  %v4634_v11 = vmul.f32 %v4575_v16, %v9552_v30 }
 0xb7a   : > { %v4579_v26 = vmul.f32 0.5, %v4578_v48  ;;  %v4221_v36 = vpop.xlane.xlu0 %4220 }
 0xb7b   : > { %v4667_v7 = vmul.f32 %v9428_v39, %v4634_v11  ;;  %v4253_v22 = vmul.f32 %v4221_v36, %v8051_v52 }
 0xb7c   : > { %v4580_v24 = vsub.f32 1.5, %v4579_v26 }
 0xb7d   : > { %v5934_v37 = vpop.eup %5933  ;;  %v4700_v12 = vadd.f32 %v9434_v46, %v4667_v7  ;;  %v4285_v29 = vadd.f32 1e-05, %v4253_v22 }
 0xb7e   : > { %v4581_v19 = vmul.f32 %v5932_v2, %v4580_v24  ;;  %v4587_v61 = vmul.f32 %v5934_v37, %v4284_v35  ;;  %vm4593_vm7 = vweird.f32 %v5934_v37 }
 0xb7f   : > { %v4732_v17 = vadd.f32 %v4700_v12, %v10184_v53  ;;  %5935 = vrsqrt.f32 %v4285_v29  ;;  %vm4594_vm13 = vmor %vm4592_vm12, %vm4593_vm7  ;;  %vm4602_vm8 = vweird.f32 %v4285_v29 }
 0xb80   : > { %v4585_v30 = vsel %vm4584_vm6, %v5932_v2, %v4581_v19  ;;  %v4588_v32 = vmul.f32 %v5934_v37, %v4587_v61 }
 0xb81   : > { %4764 = vst [vmem:[#allocation2 + $0xe0] sm:$0xff] %v4732_v17  ;;  %v4635_v14 = vmul.f32 %v4585_v30, %v9563_v1 }
 0xb82   : > { %v4589_v45 = vmul.f32 0.5, %v4588_v32 }
 0xb83   : > { %v4668_v52 = vmul.f32 %v9428_v39, %v4635_v14 }
 0xb84   : > { %v4590_v43 = vsub.f32 1.5, %v4589_v45 }
 0xb85   : > { %v5936_v62 = vpop.eup %5935  ;;  %v4701_v3 = vadd.f32 %v9434_v46, %v4668_v52 }
 0xb86   : > { %v4591_v51 = vmul.f32 %v5934_v37, %v4590_v43  ;;  %v4597_v58 = vmul.f32 %v5936_v62, %v4285_v29  ;;  %vm4603_vm5 = vweird.f32 %v5936_v62 }
 0xb87   : > { %v4733_v50 = vadd.f32 %v4701_v3, %v10185_v4  ;;  %vm4604_vm3 = vmor %vm4602_vm8, %vm4603_vm5 }
 0xb88   : > { %v4595_v23 = vsel %vm4594_vm13, %v5934_v37, %v4591_v51  ;;  %v4598_v56 = vmul.f32 %v5936_v62, %v4597_v58 }
 0xb89   : > { %4765 = vst [vmem:[#allocation2 + $0xe8] sm:$0xff] %v4733_v50  ;;  %v4636_v40 = vmul.f32 %v4595_v23, %v9573_v6 }
 0xb8a   : > { %v4599_v1 = vmul.f32 0.5, %v4598_v56 }
 0xb8b   : > { %v4669_v9 = vmul.f32 %v9428_v39, %v4636_v40 }
 0xb8c   : > { %v4600_v44 = vsub.f32 1.5, %v4599_v1 }
 0xb8d   : > { %v4702_v41 = vadd.f32 %v9434_v46, %v4669_v9 }
 0xb8e   : > { %v4601_v18 = vmul.f32 %v5936_v62, %v4600_v44 }
 0xb8f   : > { %v4734_v28 = vadd.f32 %v4702_v41, %v10186_v63 }
 0xb90   : > { %v4605_v0 = vsel %vm4604_vm3, %v5936_v62, %v4601_v18 }
 0xb91   : > { %4766 = vst [vmem:[#allocation2 + $0xf0] sm:$0xff] %v4734_v28  ;;  %v4637_v20 = vmul.f32 %v4605_v0, %v9584_v38 }
 0xb93   : > { %v4670_v25 = vmul.f32 %v9428_v39, %v4637_v20 }
 0xb95   : > { %v4703_v6 = vadd.f32 %v9434_v46, %v4670_v25 }
 0xb97   : > { %v4735_v59 = vadd.f32 %v4703_v6, %v10187_v27 }
 0xb99   : > { %4767 = vst [vmem:[#allocation2 + $0xf8] sm:$0xff] %v4735_v59 }
 0xb9a PF: > { %p4768_p9 = scmp.eq.s32.totalorder %s6219_s25, 2 }
 0xb9c   : > { %p4769_p10 = pnand %p4768_p9, %p3379_p7 }
 0xb9e   : > { %4772 = sbr.rel (%p4769_p10) target bundleno = 3012 (0xbc4), region = 76 }
 0xba3   : > { %v4773_v8 = vld [vmem:[#allocation2] sm:$0xff]  ;;  %v4774_v34 = vld [vmem:[#allocation2 + $0x8] sm:$0xff]  ;;  %v4775_v15 = vld [vmem:[#allocation2 + $0x10] sm:$0xff] }
 0xba4   : > { %4805 = vst [vmem:[#allocation13] sm:$0xff] %v4773_v8  ;;  %v4776_v21 = vld [vmem:[#allocation2 + $0x18] sm:$0xff]  ;;  %v4777_v38 = vld [vmem:[#allocation2 + $0x20] sm:$0xff]  ;;  %v4778_v39 = vld [vmem:[#allocation2 + $0x28] sm:$0xff] }
 0xba5   : > { %4806 = vst [vmem:[#allocation13 + $0x8] sm:$0xff] %v4774_v34  ;;  %v4779_v46 = vld [vmem:[#allocation2 + $0x30] sm:$0xff]  ;;  %v4780_v57 = vld [vmem:[#allocation2 + $0x38] sm:$0xff]  ;;  %v4781_v5 = vld [vmem:[#allocation2 + $0x40] sm:$0xff] }
 0xba6   : > { %4807 = vst [vmem:[#allocation13 + $0x10] sm:$0xff] %v4775_v15  ;;  %v4782_v10 = vld [vmem:[#allocation2 + $0x48] sm:$0xff]  ;;  %v4783_v33 = vld [vmem:[#allocation2 + $0x50] sm:$0xff]  ;;  %v4784_v54 = vld [vmem:[#allocation2 + $0x58] sm:$0xff] }
 0xba7   : > { %4808 = vst [vmem:[#allocation13 + $0x18] sm:$0xff] %v4776_v21  ;;  %v4785_v49 = vld [vmem:[#allocation2 + $0x60] sm:$0xff]  ;;  %v4786_v55 = vld [vmem:[#allocation2 + $0x68] sm:$0xff]  ;;  %v4787_v2 = vld [vmem:[#allocation2 + $0x70] sm:$0xff] }
 0xba8   : > { %4809 = vst [vmem:[#allocation13 + $0x20] sm:$0xff] %v4777_v38  ;;  %v4788_v47 = vld [vmem:[#allocation2 + $0x78] sm:$0xff]  ;;  %v4789_v35 = vld [vmem:[#allocation2 + $0x80] sm:$0xff]  ;;  %v4790_v31 = vld [vmem:[#allocation2 + $0x88] sm:$0xff] }
 0xba9   : > { %4810 = vst [vmem:[#allocation13 + $0x28] sm:$0xff] %v4778_v39  ;;  %v4791_v60 = vld [vmem:[#allocation2 + $0x90] sm:$0xff]  ;;  %v4792_v13 = vld [vmem:[#allocation2 + $0x98] sm:$0xff]  ;;  %v4793_v42 = vld [vmem:[#allocation2 + $0xa0] sm:$0xff] }
 0xbaa   : > { %4811 = vst [vmem:[#allocation13 + $0x30] sm:$0xff] %v4779_v46  ;;  %v4794_v16 = vld [vmem:[#allocation2 + $0xa8] sm:$0xff]  ;;  %v4795_v48 = vld [vmem:[#allocation2 + $0xb0] sm:$0xff]  ;;  %v4796_v11 = vld [vmem:[#allocation2 + $0xb8] sm:$0xff] }
 0xbab   : > { %4812 = vst [vmem:[#allocation13 + $0x38] sm:$0xff] %v4780_v57  ;;  %v4797_v26 = vld [vmem:[#allocation2 + $0xc0] sm:$0xff]  ;;  %v4798_v36 = vld [vmem:[#allocation2 + $0xc8] sm:$0xff]  ;;  %v4799_v7 = vld [vmem:[#allocation2 + $0xd0] sm:$0xff] }
 0xbac   : > { %4813 = vst [vmem:[#allocation13 + $0x40] sm:$0xff] %v4781_v5  ;;  %v4800_v22 = vld [vmem:[#allocation2 + $0xd8] sm:$0xff]  ;;  %v4801_v24 = vld [vmem:[#allocation2 + $0xe0] sm:$0xff]  ;;  %v4802_v37 = vld [vmem:[#allocation2 + $0xe8] sm:$0xff] }
 0xbad   : > { %4814 = vst [vmem:[#allocation13 + $0x48] sm:$0xff] %v4782_v10  ;;  %v4803_v12 = vld [vmem:[#allocation2 + $0xf0] sm:$0xff]  ;;  %v4804_v29 = vld [vmem:[#allocation2 + $0xf8] sm:$0xff] }
 0xbae   : > { %4815 = vst [vmem:[#allocation13 + $0x50] sm:$0xff] %v4783_v33 }
 0xbaf   : > { %4816 = vst [vmem:[#allocation13 + $0x58] sm:$0xff] %v4784_v54 }
 0xbb0   : > { %4817 = vst [vmem:[#allocation13 + $0x60] sm:$0xff] %v4785_v49 }
 0xbb1   : > { %4818 = vst [vmem:[#allocation13 + $0x68] sm:$0xff] %v4786_v55 }
 0xbb2   : > { %4819 = vst [vmem:[#allocation13 + $0x70] sm:$0xff] %v4787_v2 }
 0xbb3   : > { %4820 = vst [vmem:[#allocation13 + $0x78] sm:$0xff] %v4788_v47 }
 0xbb4   : > { %4821 = vst [vmem:[#allocation13 + $0x80] sm:$0xff] %v4789_v35 }
 0xbb5   : > { %4822 = vst [vmem:[#allocation13 + $0x88] sm:$0xff] %v4790_v31 }
 0xbb6   : > { %4823 = vst [vmem:[#allocation13 + $0x90] sm:$0xff] %v4791_v60 }
 0xbb7   : > { %4824 = vst [vmem:[#allocation13 + $0x98] sm:$0xff] %v4792_v13 }
 0xbb8   : > { %4825 = vst [vmem:[#allocation13 + $0xa0] sm:$0xff] %v4793_v42 }
 0xbb9   : > { %4826 = vst [vmem:[#allocation13 + $0xa8] sm:$0xff] %v4794_v16 }
 0xbba   : > { %4827 = vst [vmem:[#allocation13 + $0xb0] sm:$0xff] %v4795_v48 }
 0xbbb   : > { %4828 = vst [vmem:[#allocation13 + $0xb8] sm:$0xff] %v4796_v11 }
 0xbbc   : > { %4829 = vst [vmem:[#allocation13 + $0xc0] sm:$0xff] %v4797_v26 }
 0xbbd   : > { %4830 = vst [vmem:[#allocation13 + $0xc8] sm:$0xff] %v4798_v36 }
 0xbbe   : > { %4831 = vst [vmem:[#allocation13 + $0xd0] sm:$0xff] %v4799_v7 }
 0xbbf   : > { %4832 = vst [vmem:[#allocation13 + $0xd8] sm:$0xff] %v4800_v22 }
 0xbc0   : > { %4833 = vst [vmem:[#allocation13 + $0xe0] sm:$0xff] %v4801_v24 }
 0xbc1   : > { %4834 = vst [vmem:[#allocation13 + $0xe8] sm:$0xff] %v4802_v37 }
 0xbc2   : > { %4835 = vst [vmem:[#allocation13 + $0xf0] sm:$0xff] %v4803_v12 }
 0xbc3   : > { %4836 = vst [vmem:[#allocation13 + $0xf8] sm:$0xff] %v4804_v29 }
 0xbc4 PF: > { %p5343_p11 = scmp.eq.s32.totalorder %s6321_s29, 5  ;;  %s10188_s12 = sld [smem:[#allocation104_spill]] }
 0xbc5   : > { %s6243_s9 = smov [#allocation13]   ;;  %s6244_s21 = smov 128  }
 0xbc6   : > { %s4842_s7 = sshll.u32 %s6243_s9, 4  ;;  %s6245_s8 = smov 8   ;;  %s4843_s7 = int_to_ptr.vmem [resolvable:$true] %s4842_s7 }
 0xbca   : > { %s4844_s14 = sshll.u32 %s10188_s12, 4  ;;  %s4845_s14 = int_to_ptr.hbm [resolvable:$true] %s4844_s14 }
 0xbcb   : > { %5321 = dma.vmem_to_hbm [thread:$0]  (%p5343_p11), %s4843_s7, 4096, %s4845_s14, [#allocation8], %s6244_s21, %s6244_s21, %s6245_s8  }
 0xbcc   : > { %6198 = dma.done.wait (%p5343_p11), [#allocation8], 4096  }
 0xbcd   : > { %6200 = vsyncadd (%p5343_p11), [#allocation8], 4294963200 }
 0xbce PF: > { %s10189_s10 = sld [smem:[#allocation27_spill]]  ;;  %s10192_s21 = smov %s6207_s22 }
 0xbcf   : > { %s10190_s24 = sld [smem:[#allocation26_spill]]  ;;  %s10193_s22 = smov %s6211_s23 }
 0xbd0   : > { %s10191_s26 = sld [smem:[#allocation28_spill]]  ;;  %s10194_s23 = smov %s6386_s3 }
 0xbd1   : > { %s10195_s25 = smov %s6227_s27  ;;  %s10196_s27 = smov %s10202_s18 }
 0xbd4   : > { %s19_s28 = sadd.s32 1, %s10189_s10  }
 0xbd5   : > { %p16_p12 = scmp.ge.s32.totalorder %s19_s28, 8  }
 0xbd7   :  { %18 = sbr.rel (!%p16_p12) target bundleno = 12 (0xc), region = 120 }
 0xbdc   :  { %4861 = vsyncpa [#allocation7], 1 }
 0xbdd   :  { %4863 = vsyncpa [#allocation7 + $0x1], 1 }
 0xbde   :  { %4864 = vsyncpa [#allocation10], 1 }
 0xbdf   :  { %4865 = vsyncpa [#allocation8], 1 }
 0xbe0   :  { %4867 = vsyncpa [#allocation8 + $0x1], 1 }
 0xbe1   :  { %4868 = vsyncmov [#allocation5] }
 0xbe4   :  { %s4869_s29 = vpop.sfrf %4868 }
 0xbe5   :  { %p5184_p13 = scmp.ne.s32.totalorder %s4869_s29, 0 }
 0xbe7   :  { %4873 = shalt.err (%p5184_p13)  }
 0xbe8   :  { %4875 = vsyncmov [#allocation5 + $0x1] }
 0xbeb   :  { %s4876_s3 = vpop.sfrf %4875 }
 0xbec   :  { %p5185_p0 = scmp.ne.s32.totalorder %s4876_s3, 0 }
 0xbee   :  { %4880 = shalt.err (%p5185_p0)  }

</bundles_post_ra>
